<compile_context>
chip_gen: v6e
topology: v6e:2x2x1
jax: 0.10.0
libtpu: 0.0.40
codegen_flags: <defaults>
</compile_context>

<pallas_src>
import functools

import jax
import jax.numpy as jnp
from jax.experimental import pallas as pl
from jax.experimental.pallas import tpu as pltpu

# --- small config (real CLIP-L: S=77, D=768, H=12, FFN=3072, L=12) ----------
BATCH = 2
SEQ = 77            # max_length (what the module's forward implies)
SEQ_TILE = 128      # pad sequence to a lane/sublane friendly multiple of 128
DIM = 128           # hidden size (multiple of 128 lanes)
HEADS = 2
HEAD_DIM = DIM // HEADS    # 64, same per-head width as CLIP-L
FFN = 4 * DIM              # 512
LAYERS = 2
VOCAB = 1000
EPS = 1e-5
NEG_INF = -1e9


def _layernorm(x, w, b):
    # x: (S, D) f32; w, b: (1, D) f32 — single-pass statistics, kept in f32.
    mu = jnp.mean(x, axis=-1, keepdims=True)
    var = jnp.maximum(jnp.mean(x * x, axis=-1, keepdims=True) - mu * mu, 0.0)
    return (x - mu) * jax.lax.rsqrt(var + EPS) * w + b


def _clip_layers_kernel(x_ref, bias_ref,
                        ln1w_ref, ln1b_ref,
                        wqkv_ref, bqkv_ref, wo_ref, bo_ref,
                        ln2w_ref, ln2b_ref,
                        w1_ref, b1_ref, w2_ref, b2_ref,
                        lnfw_ref, lnfb_ref,
                        o_ref, res_ref, *, num_heads):
    """One grid step = one (batch, layer) pair.  Residual lives in res_ref."""
    l = pl.program_id(1)
    n_layers = pl.num_programs(1)

    # Initialize the VMEM-resident residual stream from the embedded input at
    # layer 0 of each batch element (L is the inner grid axis).
    @pl.when(l == 0)
    def _():
        res_ref[...] = x_ref[...]

    x = res_ref[...]                                   # (S, D) f32 residual
    S, D = x.shape
    dh = D // num_heads

    # ---- self attention (pre-LN, causal) ----
    h = _layernorm(x, ln1w_ref[...], ln1b_ref[...]).astype(jnp.bfloat16)
    # fused QKV: one (S,D)@(D,3D) MXU pass; 1/sqrt(dh) folded into Wq/bq.
    qkv = jnp.dot(h, wqkv_ref[...],
                  preferred_element_type=jnp.float32) + bqkv_ref[...]
    qkv = qkv.astype(jnp.bfloat16)

    def heads(t):                                      # (S, D) -> (H, S, dh)
        return pltpu.einshape('shd->hsd', t.reshape(S, num_heads, dh))

    qh = heads(qkv[:, 0 * D:1 * D])                    # lane-aligned slices
    kh = heads(qkv[:, 1 * D:2 * D])
    vh = heads(qkv[:, 2 * D:3 * D])

    # Batched attention (leading head batch dim on both operands).
    s = jnp.einsum('hqd,hkd->hqk', qh, kh,
                   preferred_element_type=jnp.float32)  # (H, S, S) f32
    s = s + bias_ref[...][None, :, :]                   # additive causal bias
    s = s - jnp.max(s, axis=-1, keepdims=True)
    p = jnp.exp(s)
    p = p * pl.reciprocal(jnp.sum(p, axis=-1, keepdims=True), approx=True)
    ctx = jnp.einsum('hqk,hkd->hqd', p.astype(jnp.bfloat16), vh,
                     preferred_element_type=jnp.float32)  # (H, S, dh)
    # back to a contiguous (S, D) context -> single K=D output projection.
    ctx = pltpu.einshape('hsd->shd', ctx.astype(jnp.bfloat16)).reshape(S, D)
    attn = jnp.dot(ctx, wo_ref[...],
                   preferred_element_type=jnp.float32) + bo_ref[...]
    x = x + attn

    # ---- MLP (pre-LN, quick_gelu) ----
    h2 = _layernorm(x, ln2w_ref[...], ln2b_ref[...]).astype(jnp.bfloat16)
    m = jnp.dot(h2, w1_ref[...],
                preferred_element_type=jnp.float32) + b1_ref[...]
    m = m.astype(jnp.bfloat16)
    m = m * jax.nn.sigmoid(1.702 * m)                   # quick_gelu (bf16)
    x = x + (jnp.dot(m, w2_ref[...],
                     preferred_element_type=jnp.float32) + b2_ref[...])

    # carry the residual to the next layer step
    res_ref[...] = x

    # ---- final LayerNorm fused into the last layer; single HBM write ----
    @pl.when(l == n_layers - 1)
    def _():
        o_ref[...] = _layernorm(x, lnfw_ref[...], lnfb_ref[...])


def clip_text_transformer(x, causal_bias, params):
    """Full CLIP text encoder stack in one pallas_call.

    x: (B, S, D) f32 with S a multiple of 128.  Per-layer weights in `params`
    carry a leading layer axis and are streamed layer-by-layer.
    """
    B, S, D = x.shape
    L = params["wqkv"].shape[0]

    def layer_spec(a):   # stacked (L, r, c) per-layer tensor -> per-layer block
        return pl.BlockSpec((None,) + a.shape[1:], lambda b, l: (l, 0, 0))

    def const_spec(a):   # grid-invariant 2D tensor (causal bias, final LN)
        return pl.BlockSpec(a.shape, lambda b, l: (0,) * a.ndim)

    args = [x, causal_bias,
            params["ln1_w"], params["ln1_b"],
            params["wqkv"], params["bqkv"], params["wo"], params["bo"],
            params["ln2_w"], params["ln2_b"],
            params["w1"], params["b1"], params["w2"], params["b2"],
            params["lnf_w"], params["lnf_b"]]

    in_specs = [pl.BlockSpec((None, S, D), lambda b, l: (b, 0, 0)),
                const_spec(causal_bias)]
    in_specs += [layer_spec(a) for a in args[2:14]]
    in_specs += [const_spec(params["lnf_w"]), const_spec(params["lnf_b"])]

    return pl.pallas_call(
        functools.partial(_clip_layers_kernel, num_heads=HEADS),
        out_shape=jax.ShapeDtypeStruct((B, S, D), jnp.float32),
        grid=(B, L),                       # L innermost: weights stream per b
        in_specs=in_specs,
        out_specs=pl.BlockSpec((None, S, D), lambda b, l: (b, 0, 0)),
        scratch_shapes=[pltpu.VMEM((S, D), jnp.float32)],   # resident residual
        compiler_params=pltpu.CompilerParams(
            # batches independent -> megacore-parallel on v7x; layer axis
            # carries the residual -> "arbitrary".
            dimension_semantics=("parallel", "arbitrary"),
            # 48 MiB: safe on v7x (64 MiB physical); raise toward 96 MiB on
            # v5e/v6e (128 MiB) when running real CLIP-L sized weights.
            vmem_limit_bytes=48 * 1024 * 1024),
    )(*args)


def frozen_clip_embedder(tokens, params):
    """(B, S) int32 token ids -> (B, S, D) f32 last_hidden_state."""
    B, S = tokens.shape
    # embedding gather + learned positional embedding (glue, plain JAX)
    x = (params["tok_emb"][tokens] + params["pos_emb"][None, :S, :]
         ).astype(jnp.float32)

    # Pad the sequence to a lane-dense multiple of 128.  The causal mask keeps
    # padded key columns from affecting real rows; padded rows are garbage and
    # are sliced off before returning.
    s_pad = ((S + SEQ_TILE - 1) // SEQ_TILE) * SEQ_TILE
    if s_pad != S:
        x = jnp.pad(x, ((0, 0), (0, s_pad - S), (0, 0)))

    # Additive causal bias built once here (hoisted out of the kernel / grid).
    row = jax.lax.broadcasted_iota(jnp.int32, (s_pad, s_pad), 0)
    col = jax.lax.broadcasted_iota(jnp.int32, (s_pad, s_pad), 1)
    causal_bias = jnp.where(col <= row, 0.0, NEG_INF).astype(jnp.float32)

    z = clip_text_transformer(x, causal_bias, params)
    return z[:, :S, :]


def init_params(key):
    def nrm(k, shape, scale=0.02):
        return (scale * jax.random.normal(k, shape)).astype(jnp.float32)

    attn_scale = 1.0 / (HEAD_DIM ** 0.5)
    keys = jax.random.split(key, 8)
    k_tok, k_pos, k_q, k_k, k_v, k_o, k_1, k_2 = keys

    # fold 1/sqrt(head_dim) into Wq (and bq — zero here, but a real checkpoint
    # must scale bq too), then fuse Q/K/V into a single (D, 3D) bf16 weight so
    # each layer does one QKV MXU pass.  Weights stacked with a leading layer
    # axis so the fused kernel streams them layer-by-layer.
    wq = nrm(k_q, (LAYERS, DIM, DIM)) * attn_scale
    wk = nrm(k_k, (LAYERS, DIM, DIM))
    wv = nrm(k_v, (LAYERS, DIM, DIM))

    return {
        "tok_emb": nrm(k_tok, (VOCAB, DIM)),
        "pos_emb": nrm(k_pos, (SEQ, DIM)),
        "ln1_w": jnp.ones((LAYERS, 1, DIM), jnp.float32),
        "ln1_b": jnp.zeros((LAYERS, 1, DIM), jnp.float32),
        "wqkv": jnp.concatenate([wq, wk, wv], axis=2).astype(jnp.bfloat16),
        "bqkv": jnp.zeros((LAYERS, 1, 3 * DIM), jnp.float32),
        "wo": nrm(k_o, (LAYERS, DIM, DIM)).astype(jnp.bfloat16),
        "bo": jnp.zeros((LAYERS, 1, DIM), jnp.float32),
        "ln2_w": jnp.ones((LAYERS, 1, DIM), jnp.float32),
        "ln2_b": jnp.zeros((LAYERS, 1, DIM), jnp.float32),
        "w1": nrm(k_1, (LAYERS, DIM, FFN)).astype(jnp.bfloat16),
        "b1": jnp.zeros((LAYERS, 1, FFN), jnp.float32),
        "w2": nrm(k_2, (LAYERS, FFN, DIM)).astype(jnp.bfloat16),
        "b2": jnp.zeros((LAYERS, 1, DIM), jnp.float32),
        "lnf_w": jnp.ones((1, DIM), jnp.float32),
        "lnf_b": jnp.zeros((1, DIM), jnp.float32),
    }


if __name__ == "__main__":
    key = jax.random.PRNGKey(0)
    k_tok, k_par = jax.random.split(key)
    tokens = jax.random.randint(k_tok, (BATCH, SEQ), 0, VOCAB, dtype=jnp.int32)
    params = init_params(k_par)

    z = jax.jit(frozen_clip_embedder)(tokens, params)
    z = jax.block_until_ready(z)
    assert z.shape == (BATCH, SEQ, DIM) and z.dtype == jnp.float32
    assert bool(jnp.all(jnp.isfinite(z)))
    print("KERNEL_OK")
</pallas_src>

<mosaic_0001>
module attributes {stable_mosaic.version = 11 : i64} {
  func.func @_clip_layers_kernel(%arg0: i32, %arg1: i32, %arg2: memref<1x128x128xf32, #tpu.memory_space<vmem>>, %arg3: memref<128x128xf32, #tpu.memory_space<vmem>>, %arg4: memref<1x1x128xf32, #tpu.memory_space<vmem>>, %arg5: memref<1x1x128xf32, #tpu.memory_space<vmem>>, %arg6: memref<1x128x384xbf16, #tpu.memory_space<vmem>>, %arg7: memref<1x1x384xf32, #tpu.memory_space<vmem>>, %arg8: memref<1x128x128xbf16, #tpu.memory_space<vmem>>, %arg9: memref<1x1x128xf32, #tpu.memory_space<vmem>>, %arg10: memref<1x1x128xf32, #tpu.memory_space<vmem>>, %arg11: memref<1x1x128xf32, #tpu.memory_space<vmem>>, %arg12: memref<1x128x512xbf16, #tpu.memory_space<vmem>>, %arg13: memref<1x1x512xf32, #tpu.memory_space<vmem>>, %arg14: memref<1x512x128xbf16, #tpu.memory_space<vmem>>, %arg15: memref<1x1x128xf32, #tpu.memory_space<vmem>>, %arg16: memref<1x128xf32, #tpu.memory_space<vmem>>, %arg17: memref<1x128xf32, #tpu.memory_space<vmem>>, %arg18: memref<1x128x128xf32, #tpu.memory_space<vmem>>, %arg19: memref<128x128xf32, #tpu.memory_space<vmem>>) attributes {dimension_semantics = [#tpu.dimension_semantics<parallel>, #tpu.dimension_semantics<arbitrary>], iteration_bounds = array<i64: 2, 2>, scalar_prefetch = 0 : i64, scratch_operands = 1 : i64, tpu.core_type = #tpu.core_type<tc>, window_params = [{transform_indices = @transform_0, window_bounds = array<i64: 1, 128, 128>}, {pipeline_mode = #tpu.pipeline_mode<synchronous>, transform_indices = @transform_1, window_bounds = array<i64: 128, 128>}, {transform_indices = @transform_2, window_bounds = array<i64: 1, 1, 128>}, {transform_indices = @transform_3, window_bounds = array<i64: 1, 1, 128>}, {transform_indices = @transform_4, window_bounds = array<i64: 1, 128, 384>}, {transform_indices = @transform_5, window_bounds = array<i64: 1, 1, 384>}, {transform_indices = @transform_6, window_bounds = array<i64: 1, 128, 128>}, {transform_indices = @transform_7, window_bounds = array<i64: 1, 1, 128>}, {transform_indices = @transform_8, window_bounds = array<i64: 1, 1, 128>}, {transform_indices = @transform_9, window_bounds = array<i64: 1, 1, 128>}, {transform_indices = @transform_10, window_bounds = array<i64: 1, 128, 512>}, {transform_indices = @transform_11, window_bounds = array<i64: 1, 1, 512>}, {transform_indices = @transform_12, window_bounds = array<i64: 1, 512, 128>}, {transform_indices = @transform_13, window_bounds = array<i64: 1, 1, 128>}, {pipeline_mode = #tpu.pipeline_mode<synchronous>, transform_indices = @transform_14, window_bounds = array<i64: 1, 128>}, {pipeline_mode = #tpu.pipeline_mode<synchronous>, transform_indices = @transform_15, window_bounds = array<i64: 1, 128>}, {transform_indices = @transform_16, window_bounds = array<i64: 1, 128, 128>}]} {
    %c0_i32 = arith.constant 0 : i32
    %0 = arith.cmpi eq, %arg1, %c0_i32 : i32
    %1 = arith.extui %0 : i1 to i32
    %c0_i32_0 = arith.constant 0 : i32
    %2 = arith.cmpi ne, %1, %c0_i32_0 : i32
    scf.if %2 {
      %c0_64 = arith.constant 0 : index
      %c0_65 = arith.constant 0 : index
      %c0_66 = arith.constant 0 : index
      %135 = vector.load %arg2[%c0_64, %c0_65, %c0_66] : memref<1x128x128xf32, #tpu.memory_space<vmem>>, vector<1x128x128xf32>
      %136 = vector.shape_cast %135 : vector<1x128x128xf32> to vector<128x128xf32>
      %c0_67 = arith.constant 0 : index
      %c0_68 = arith.constant 0 : index
      %137 = vector.load %arg19[%c0_67, %c0_68] : memref<128x128xf32, #tpu.memory_space<vmem>>, vector<128x128xf32>
      tpu.vector_store %arg19[%c0_67, %c0_68], %136 {strides = array<i32>} : memref<128x128xf32, #tpu.memory_space<vmem>>, vector<128x128xf32>,
    } else {
    }
    %c0 = arith.constant 0 : index
    %c0_1 = arith.constant 0 : index
    %3 = vector.load %arg19[%c0, %c0_1] : memref<128x128xf32, #tpu.memory_space<vmem>>, vector<128x128xf32>
    %c0_2 = arith.constant 0 : index
    %c0_3 = arith.constant 0 : index
    %c0_4 = arith.constant 0 : index
    %4 = vector.load %arg4[%c0_2, %c0_3, %c0_4] : memref<1x1x128xf32, #tpu.memory_space<vmem>>, vector<1x1x128xf32>
    %5 = vector.shape_cast %4 : vector<1x1x128xf32> to vector<1x128xf32>
    %c0_5 = arith.constant 0 : index
    %c0_6 = arith.constant 0 : index
    %c0_7 = arith.constant 0 : index
    %6 = vector.load %arg5[%c0_5, %c0_6, %c0_7] : memref<1x1x128xf32, #tpu.memory_space<vmem>>, vector<1x1x128xf32>
    %7 = vector.shape_cast %6 : vector<1x1x128xf32> to vector<1x128xf32>
    %cst = arith.constant dense<0.000000e+00> : vector<128xf32>
    %8 = vector.multi_reduction <add>, %3, %cst [1] : vector<128x128xf32> to vector<128xf32>
    %9 = vector.shape_cast %8 : vector<128xf32> to vector<128x1xf32>
    %cst_8 = arith.constant 1.280000e+02 : f32
    %10 = vector.broadcast %cst_8 : f32 to vector<128x1xf32>
    %11 = arith.divf %9, %10 : vector<128x1xf32>
    %12 = arith.mulf %3, %3 : vector<128x128xf32>
    %cst_9 = arith.constant dense<0.000000e+00> : vector<128xf32>
    %13 = vector.multi_reduction <add>, %12, %cst_9 [1] : vector<128x128xf32> to vector<128xf32>
    %14 = vector.shape_cast %13 : vector<128xf32> to vector<128x1xf32>
    %cst_10 = arith.constant 1.280000e+02 : f32
    %15 = vector.broadcast %cst_10 : f32 to vector<128x1xf32>
    %16 = arith.divf %14, %15 : vector<128x1xf32>
    %17 = arith.mulf %11, %11 : vector<128x1xf32>
    %18 = arith.subf %16, %17 : vector<128x1xf32>
    %cst_11 = arith.constant 0.000000e+00 : f32
    %19 = vector.broadcast %cst_11 : f32 to vector<128x1xf32>
    %20 = arith.maximumf %18, %19 : vector<128x1xf32>
    %21 = vector.broadcast %11 : vector<128x1xf32> to vector<128x128xf32>
    %22 = arith.subf %3, %21 : vector<128x128xf32>
    %cst_12 = arith.constant 9.99999974E-6 : f32
    %23 = vector.broadcast %cst_12 : f32 to vector<128x1xf32>
    %24 = arith.addf %20, %23 : vector<128x1xf32>
    %25 = math.rsqrt %24 : vector<128x1xf32>
    %26 = vector.broadcast %25 : vector<128x1xf32> to vector<128x128xf32>
    %27 = arith.mulf %22, %26 : vector<128x128xf32>
    %28 = vector.broadcast %5 : vector<1x128xf32> to vector<128x128xf32>
    %29 = arith.mulf %27, %28 : vector<128x128xf32>
    %30 = vector.broadcast %7 : vector<1x128xf32> to vector<128x128xf32>
    %31 = arith.addf %29, %30 : vector<128x128xf32>
    %32 = arith.truncf %31 : vector<128x128xf32> to vector<128x128xbf16>
    %c0_13 = arith.constant 0 : index
    %c0_14 = arith.constant 0 : index
    %c0_15 = arith.constant 0 : index
    %33 = vector.load %arg6[%c0_13, %c0_14, %c0_15] : memref<1x128x384xbf16, #tpu.memory_space<vmem>>, vector<1x128x384xbf16>
    %34 = vector.shape_cast %33 : vector<1x128x384xbf16> to vector<128x384xbf16>
    %cst_16 = arith.constant dense<0.000000e+00> : vector<128x384xf32>
    %35 = tpu.matmul %32, %34, %cst_16 {dimension_numbers = #tpu.dot_dimension_numbers<[1], [0], [0], [1], [0, 0, 1, 1], [], []>} : vector<128x128xbf16>, vector<128x384xbf16>, vector<128x384xf32> -> vector<128x384xf32>
    %c0_17 = arith.constant 0 : index
    %c0_18 = arith.constant 0 : index
    %c0_19 = arith.constant 0 : index
    %36 = vector.load %arg7[%c0_17, %c0_18, %c0_19] : memref<1x1x384xf32, #tpu.memory_space<vmem>>, vector<1x1x384xf32>
    %37 = vector.shape_cast %36 : vector<1x1x384xf32> to vector<1x384xf32>
    %38 = vector.broadcast %37 : vector<1x384xf32> to vector<128x384xf32>
    %39 = arith.addf %35, %38 : vector<128x384xf32>
    %40 = arith.truncf %39 : vector<128x384xf32> to vector<128x384xbf16>
    %41 = vector.extract_strided_slice %40 {offsets = [0, 0], sizes = [128, 128], strides = [1, 1]} : vector<128x384xbf16> to vector<128x128xbf16>
    %42 = vector.shape_cast %41 : vector<128x128xbf16> to vector<128x2x64xbf16>
    %43 = tpu.transpose %42, [1, 0, 2] : vector<128x2x64xbf16> -> vector<2x128x64xbf16>
    %44 = vector.extract_strided_slice %40 {offsets = [0, 128], sizes = [128, 128], strides = [1, 1]} : vector<128x384xbf16> to vector<128x128xbf16>
    %45 = vector.shape_cast %44 : vector<128x128xbf16> to vector<128x2x64xbf16>
    %46 = tpu.transpose %45, [1, 0, 2] : vector<128x2x64xbf16> -> vector<2x128x64xbf16>
    %47 = vector.extract_strided_slice %40 {offsets = [0, 256], sizes = [128, 128], strides = [1, 1]} : vector<128x384xbf16> to vector<128x128xbf16>
    %48 = vector.shape_cast %47 : vector<128x128xbf16> to vector<128x2x64xbf16>
    %49 = tpu.transpose %48, [1, 0, 2] : vector<128x2x64xbf16> -> vector<2x128x64xbf16>
    "tpu.trace_start"() <{level = 10 : i32, message = "hqd,hkd->hqk"}> : () -> ()
    %cst_20 = arith.constant dense<0.000000e+00> : vector<2x128x128xf32>
    %50 = tpu.matmul %43, %46, %cst_20 {dimension_numbers = #tpu.dot_dimension_numbers<[2], [2], [1], [1], [0, 0, 0, 1, 1, 1], [0], [0]>} : vector<2x128x64xbf16>, vector<2x128x64xbf16>, vector<2x128x128xf32> -> vector<2x128x128xf32>
    "tpu.trace_stop"() : () -> ()
    %c0_21 = arith.constant 0 : index
    %c0_22 = arith.constant 0 : index
    %51 = vector.load %arg3[%c0_21, %c0_22] : memref<128x128xf32, #tpu.memory_space<vmem>>, vector<128x128xf32>
    %52 = vector.shape_cast %51 : vector<128x128xf32> to vector<1x128x128xf32>
    %53 = vector.broadcast %52 : vector<1x128x128xf32> to vector<2x128x128xf32>
    %54 = arith.addf %50, %53 : vector<2x128x128xf32>
    %cst_23 = arith.constant dense<0xFF800000> : vector<2x128xf32>
    %55 = vector.multi_reduction <maximumf>, %54, %cst_23 [2] : vector<2x128x128xf32> to vector<2x128xf32>
    %56 = vector.shape_cast %55 : vector<2x128xf32> to vector<2x128x1xf32>
    %57 = vector.broadcast %56 : vector<2x128x1xf32> to vector<2x128x128xf32>
    %58 = arith.subf %54, %57 : vector<2x128x128xf32>
    %59 = math.exp %58 : vector<2x128x128xf32>
    %cst_24 = arith.constant dense<0.000000e+00> : vector<2x128xf32>
    %60 = vector.multi_reduction <add>, %59, %cst_24 [2] : vector<2x128x128xf32> to vector<2x128xf32>
    %61 = vector.shape_cast %60 : vector<2x128xf32> to vector<2x128x1xf32>
    %62 = tpu.reciprocal %61 {approx = true} : vector<2x128x1xf32> -> vector<2x128x1xf32>
    %63 = vector.broadcast %62 : vector<2x128x1xf32> to vector<2x128x128xf32>
    %64 = arith.mulf %59, %63 : vector<2x128x128xf32>
    %65 = arith.truncf %64 : vector<2x128x128xf32> to vector<2x128x128xbf16>
    "tpu.trace_start"() <{level = 10 : i32, message = "hqk,hkd->hqd"}> : () -> ()
    %cst_25 = arith.constant dense<0.000000e+00> : vector<2x128x64xf32>
    %66 = tpu.matmul %65, %49, %cst_25 {dimension_numbers = #tpu.dot_dimension_numbers<[2], [1], [1], [2], [0, 0, 0, 1, 1, 2], [0], [0]>} : vector<2x128x128xbf16>, vector<2x128x64xbf16>, vector<2x128x64xf32> -> vector<2x128x64xf32>
    "tpu.trace_stop"() : () -> ()
    %67 = arith.truncf %66 : vector<2x128x64xf32> to vector<2x128x64xbf16>
    %68 = tpu.transpose %67, [1, 0, 2] : vector<2x128x64xbf16> -> vector<128x2x64xbf16>
    %69 = vector.shape_cast %68 : vector<128x2x64xbf16> to vector<128x128xbf16>
    %c0_26 = arith.constant 0 : index
    %c0_27 = arith.constant 0 : index
    %c0_28 = arith.constant 0 : index
    %70 = vector.load %arg8[%c0_26, %c0_27, %c0_28] : memref<1x128x128xbf16, #tpu.memory_space<vmem>>, vector<1x128x128xbf16>
    %71 = vector.shape_cast %70 : vector<1x128x128xbf16> to vector<128x128xbf16>
    %cst_29 = arith.constant dense<0.000000e+00> : vector<128x128xf32>
    %72 = tpu.matmul %69, %71, %cst_29 {dimension_numbers = #tpu.dot_dimension_numbers<[1], [0], [0], [1], [0, 0, 1, 1], [], []>} : vector<128x128xbf16>, vector<128x128xbf16>, vector<128x128xf32> -> vector<128x128xf32>
    %c0_30 = arith.constant 0 : index
    %c0_31 = arith.constant 0 : index
    %c0_32 = arith.constant 0 : index
    %73 = vector.load %arg9[%c0_30, %c0_31, %c0_32] : memref<1x1x128xf32, #tpu.memory_space<vmem>>, vector<1x1x128xf32>
    %74 = vector.shape_cast %73 : vector<1x1x128xf32> to vector<1x128xf32>
    %75 = vector.broadcast %74 : vector<1x128xf32> to vector<128x128xf32>
    %76 = arith.addf %72, %75 : vector<128x128xf32>
    %77 = arith.addf %3, %76 : vector<128x128xf32>
    %c0_33 = arith.constant 0 : index
    %c0_34 = arith.constant 0 : index
    %c0_35 = arith.constant 0 : index
    %78 = vector.load %arg10[%c0_33, %c0_34, %c0_35] : memref<1x1x128xf32, #tpu.memory_space<vmem>>, vector<1x1x128xf32>
    %79 = vector.shape_cast %78 : vector<1x1x128xf32> to vector<1x128xf32>
    %c0_36 = arith.constant 0 : index
    %c0_37 = arith.constant 0 : index
    %c0_38 = arith.constant 0 : index
    %80 = vector.load %arg11[%c0_36, %c0_37, %c0_38] : memref<1x1x128xf32, #tpu.memory_space<vmem>>, vector<1x1x128xf32>
    %81 = vector.shape_cast %80 : vector<1x1x128xf32> to vector<1x128xf32>
    %cst_39 = arith.constant dense<0.000000e+00> : vector<128xf32>
    %82 = vector.multi_reduction <add>, %77, %cst_39 [1] : vector<128x128xf32> to vector<128xf32>
    %83 = vector.shape_cast %82 : vector<128xf32> to vector<128x1xf32>
    %cst_40 = arith.constant 1.280000e+02 : f32
    %84 = vector.broadcast %cst_40 : f32 to vector<128x1xf32>
    %85 = arith.divf %83, %84 : vector<128x1xf32>
    %86 = arith.mulf %77, %77 : vector<128x128xf32>
    %cst_41 = arith.constant dense<0.000000e+00> : vector<128xf32>
    %87 = vector.multi_reduction <add>, %86, %cst_41 [1] : vector<128x128xf32> to vector<128xf32>
    %88 = vector.shape_cast %87 : vector<128xf32> to vector<128x1xf32>
    %cst_42 = arith.constant 1.280000e+02 : f32
    %89 = vector.broadcast %cst_42 : f32 to vector<128x1xf32>
    %90 = arith.divf %88, %89 : vector<128x1xf32>
    %91 = arith.mulf %85, %85 : vector<128x1xf32>
    %92 = arith.subf %90, %91 : vector<128x1xf32>
    %cst_43 = arith.constant 0.000000e+00 : f32
    %93 = vector.broadcast %cst_43 : f32 to vector<128x1xf32>
    %94 = arith.maximumf %92, %93 : vector<128x1xf32>
    %95 = vector.broadcast %85 : vector<128x1xf32> to vector<128x128xf32>
    %96 = arith.subf %77, %95 : vector<128x128xf32>
    %cst_44 = arith.constant 9.99999974E-6 : f32
    %97 = vector.broadcast %cst_44 : f32 to vector<128x1xf32>
    %98 = arith.addf %94, %97 : vector<128x1xf32>
    %99 = math.rsqrt %98 : vector<128x1xf32>
    %100 = vector.broadcast %99 : vector<128x1xf32> to vector<128x128xf32>
    %101 = arith.mulf %96, %100 : vector<128x128xf32>
    %102 = vector.broadcast %79 : vector<1x128xf32> to vector<128x128xf32>
    %103 = arith.mulf %101, %102 : vector<128x128xf32>
    %104 = vector.broadcast %81 : vector<1x128xf32> to vector<128x128xf32>
    %105 = arith.addf %103, %104 : vector<128x128xf32>
    %106 = arith.truncf %105 : vector<128x128xf32> to vector<128x128xbf16>
    %c0_45 = arith.constant 0 : index
    %c0_46 = arith.constant 0 : index
    %c0_47 = arith.constant 0 : index
    %107 = vector.load %arg12[%c0_45, %c0_46, %c0_47] : memref<1x128x512xbf16, #tpu.memory_space<vmem>>, vector<1x128x512xbf16>
    %108 = vector.shape_cast %107 : vector<1x128x512xbf16> to vector<128x512xbf16>
    %cst_48 = arith.constant dense<0.000000e+00> : vector<128x512xf32>
    %109 = tpu.matmul %106, %108, %cst_48 {dimension_numbers = #tpu.dot_dimension_numbers<[1], [0], [0], [1], [0, 0, 1, 1], [], []>} : vector<128x128xbf16>, vector<128x512xbf16>, vector<128x512xf32> -> vector<128x512xf32>
    %c0_49 = arith.constant 0 : index
    %c0_50 = arith.constant 0 : index
    %c0_51 = arith.constant 0 : index
    %110 = vector.load %arg13[%c0_49, %c0_50, %c0_51] : memref<1x1x512xf32, #tpu.memory_space<vmem>>, vector<1x1x512xf32>
    %111 = vector.shape_cast %110 : vector<1x1x512xf32> to vector<1x512xf32>
    %112 = vector.broadcast %111 : vector<1x512xf32> to vector<128x512xf32>
    %113 = arith.addf %109, %112 : vector<128x512xf32>
    %114 = arith.truncf %113 : vector<128x512xf32> to vector<128x512xbf16>
    %cst_52 = arith.constant 1.703130e+00 : bf16
    %115 = vector.broadcast %cst_52 : bf16 to vector<128x512xbf16>
    %116 = arith.mulf %115, %114 : vector<128x512xbf16>
    %117 = arith.negf %116 : vector<128x512xbf16>
    %118 = math.exp %117 : vector<128x512xbf16>
    %cst_53 = arith.constant 1.000000e+00 : bf16
    %119 = vector.broadcast %cst_53 : bf16 to vector<128x512xbf16>
    %120 = arith.addf %119, %118 : vector<128x512xbf16>
    %121 = arith.divf %119, %120 : vector<128x512xbf16>
    %122 = arith.mulf %114, %121 : vector<128x512xbf16>
    %c0_54 = arith.constant 0 : index
    %c0_55 = arith.constant 0 : index
    %c0_56 = arith.constant 0 : index
    %123 = vector.load %arg14[%c0_54, %c0_55, %c0_56] : memref<1x512x128xbf16, #tpu.memory_space<vmem>>, vector<1x512x128xbf16>
    %124 = vector.shape_cast %123 : vector<1x512x128xbf16> to vector<512x128xbf16>
    %cst_57 = arith.constant dense<0.000000e+00> : vector<128x128xf32>
    %125 = tpu.matmul %122, %124, %cst_57 {dimension_numbers = #tpu.dot_dimension_numbers<[1], [0], [0], [1], [0, 0, 1, 1], [], []>} : vector<128x512xbf16>, vector<512x128xbf16>, vector<128x128xf32> -> vector<128x128xf32>
    %c0_58 = arith.constant 0 : index
    %c0_59 = arith.constant 0 : index
    %c0_60 = arith.constant 0 : index
    %126 = vector.load %arg15[%c0_58, %c0_59, %c0_60] : memref<1x1x128xf32, #tpu.memory_space<vmem>>, vector<1x1x128xf32>
    %127 = vector.shape_cast %126 : vector<1x1x128xf32> to vector<1x128xf32>
    %128 = vector.broadcast %127 : vector<1x128xf32> to vector<128x128xf32>
    %129 = arith.addf %125, %128 : vector<128x128xf32>
    %130 = arith.addf %77, %129 : vector<128x128xf32>
    %c0_61 = arith.constant 0 : index
    %c0_62 = arith.constant 0 : index
    %131 = vector.load %arg19[%c0_61, %c0_62] : memref<128x128xf32, #tpu.memory_space<vmem>>, vector<128x128xf32>
    tpu.vector_store %arg19[%c0_61, %c0_62], %130 {strides = array<i32>} : memref<128x128xf32, #tpu.memory_space<vmem>>, vector<128x128xf32>,
    %c1_i32 = arith.constant 1 : i32
    %132 = arith.cmpi eq, %arg1, %c1_i32 : i32
    %133 = arith.extui %132 : i1 to i32
    %c0_i32_63 = arith.constant 0 : i32
    %134 = arith.cmpi ne, %133, %c0_i32_63 : i32
    scf.if %134 {
      %c0_64 = arith.constant 0 : index
      %c0_65 = arith.constant 0 : index
      %135 = vector.load %arg16[%c0_64, %c0_65] : memref<1x128xf32, #tpu.memory_space<vmem>>, vector<1x128xf32>
      %c0_66 = arith.constant 0 : index
      %c0_67 = arith.constant 0 : index
      %136 = vector.load %arg17[%c0_66, %c0_67] : memref<1x128xf32, #tpu.memory_space<vmem>>, vector<1x128xf32>
      %cst_68 = arith.constant dense<0.000000e+00> : vector<128xf32>
      %137 = vector.multi_reduction <add>, %130, %cst_68 [1] : vector<128x128xf32> to vector<128xf32>
      %138 = vector.shape_cast %137 : vector<128xf32> to vector<128x1xf32>
      %cst_69 = arith.constant 1.280000e+02 : f32
      %139 = vector.broadcast %cst_69 : f32 to vector<128x1xf32>
      %140 = arith.divf %138, %139 : vector<128x1xf32>
      %141 = arith.mulf %130, %130 : vector<128x128xf32>
      %cst_70 = arith.constant dense<0.000000e+00> : vector<128xf32>
      %142 = vector.multi_reduction <add>, %141, %cst_70 [1] : vector<128x128xf32> to vector<128xf32>
      %143 = vector.shape_cast %142 : vector<128xf32> to vector<128x1xf32>
      %cst_71 = arith.constant 1.280000e+02 : f32
      %144 = vector.broadcast %cst_71 : f32 to vector<128x1xf32>
      %145 = arith.divf %143, %144 : vector<128x1xf32>
      %146 = arith.mulf %140, %140 : vector<128x1xf32>
      %147 = arith.subf %145, %146 : vector<128x1xf32>
      %cst_72 = arith.constant 0.000000e+00 : f32
      %148 = vector.broadcast %cst_72 : f32 to vector<128x1xf32>
      %149 = arith.maximumf %147, %148 : vector<128x1xf32>
      %150 = vector.broadcast %140 : vector<128x1xf32> to vector<128x128xf32>
      %151 = arith.subf %130, %150 : vector<128x128xf32>
      %cst_73 = arith.constant 9.99999974E-6 : f32
      %152 = vector.broadcast %cst_73 : f32 to vector<128x1xf32>
      %153 = arith.addf %149, %152 : vector<128x1xf32>
      %154 = math.rsqrt %153 : vector<128x1xf32>
      %155 = vector.broadcast %154 : vector<128x1xf32> to vector<128x128xf32>
      %156 = arith.mulf %151, %155 : vector<128x128xf32>
      %157 = vector.broadcast %135 : vector<1x128xf32> to vector<128x128xf32>
      %158 = arith.mulf %156, %157 : vector<128x128xf32>
      %159 = vector.broadcast %136 : vector<1x128xf32> to vector<128x128xf32>
      %160 = arith.addf %158, %159 : vector<128x128xf32>
      %c0_74 = arith.constant 0 : index
      %c0_75 = arith.constant 0 : index
      %c0_76 = arith.constant 0 : index
      %161 = vector.load %arg18[%c0_74, %c0_75, %c0_76] : memref<1x128x128xf32, #tpu.memory_space<vmem>>, vector<1x128x128xf32>
      %162 = vector.shape_cast %161 : vector<1x128x128xf32> to vector<128x128xf32>
      %163 = vector.shape_cast %160 : vector<128x128xf32> to vector<1x128x128xf32>
      tpu.vector_store %arg18[%c0_74, %c0_75, %c0_76], %163 {strides = array<i32>} : memref<1x128x128xf32, #tpu.memory_space<vmem>>, vector<1x128x128xf32>,
    } else {
    }
    return
  }
  func.func @transform_0(%arg0: i32, %arg1: i32) -> (i32, i32, i32) {
    %c0_i32 = arith.constant 0 : i32
    %c0_i32_0 = arith.constant 0 : i32
    %c0_i32_1 = arith.constant 0 : i32
    return %arg0, %c0_i32, %c0_i32_0 : i32, i32, i32
  }
  func.func @transform_1(%arg0: i32, %arg1: i32) -> (i32, i32) {
    %c0_i32 = arith.constant 0 : i32
    %c0_i32_0 = arith.constant 0 : i32
    %c0_i32_1 = arith.constant 0 : i32
    return %c0_i32, %c0_i32_0 : i32, i32
  }
  func.func @transform_2(%arg0: i32, %arg1: i32) -> (i32, i32, i32) {
    %c0_i32 = arith.constant 0 : i32
    %c0_i32_0 = arith.constant 0 : i32
    %c0_i32_1 = arith.constant 0 : i32
    return %arg1, %c0_i32, %c0_i32_0 : i32, i32, i32
  }
  func.func @transform_3(%arg0: i32, %arg1: i32) -> (i32, i32, i32) {
    %c0_i32 = arith.constant 0 : i32
    %c0_i32_0 = arith.constant 0 : i32
    %c0_i32_1 = arith.constant 0 : i32
    return %arg1, %c0_i32, %c0_i32_0 : i32, i32, i32
  }
  func.func @transform_4(%arg0: i32, %arg1: i32) -> (i32, i32, i32) {
    %c0_i32 = arith.constant 0 : i32
    %c0_i32_0 = arith.constant 0 : i32
    %c0_i32_1 = arith.constant 0 : i32
    return %arg1, %c0_i32, %c0_i32_0 : i32, i32, i32
  }
  func.func @transform_5(%arg0: i32, %arg1: i32) -> (i32, i32, i32) {
    %c0_i32 = arith.constant 0 : i32
    %c0_i32_0 = arith.constant 0 : i32
    %c0_i32_1 = arith.constant 0 : i32
    return %arg1, %c0_i32, %c0_i32_0 : i32, i32, i32
  }
  func.func @transform_6(%arg0: i32, %arg1: i32) -> (i32, i32, i32) {
    %c0_i32 = arith.constant 0 : i32
    %c0_i32_0 = arith.constant 0 : i32
    %c0_i32_1 = arith.constant 0 : i32
    return %arg1, %c0_i32, %c0_i32_0 : i32, i32, i32
  }
  func.func @transform_7(%arg0: i32, %arg1: i32) -> (i32, i32, i32) {
    %c0_i32 = arith.constant 0 : i32
    %c0_i32_0 = arith.constant 0 : i32
    %c0_i32_1 = arith.constant 0 : i32
    return %arg1, %c0_i32, %c0_i32_0 : i32, i32, i32
  }
  func.func @transform_8(%arg0: i32, %arg1: i32) -> (i32, i32, i32) {
    %c0_i32 = arith.constant 0 : i32
    %c0_i32_0 = arith.constant 0 : i32
    %c0_i32_1 = arith.constant 0 : i32
    return %arg1, %c0_i32, %c0_i32_0 : i32, i32, i32
  }
  func.func @transform_9(%arg0: i32, %arg1: i32) -> (i32, i32, i32) {
    %c0_i32 = arith.constant 0 : i32
    %c0_i32_0 = arith.constant 0 : i32
    %c0_i32_1 = arith.constant 0 : i32
    return %arg1, %c0_i32, %c0_i32_0 : i32, i32, i32
  }
  func.func @transform_10(%arg0: i32, %arg1: i32) -> (i32, i32, i32) {
    %c0_i32 = arith.constant 0 : i32
    %c0_i32_0 = arith.constant 0 : i32
    %c0_i32_1 = arith.constant 0 : i32
    return %arg1, %c0_i32, %c0_i32_0 : i32, i32, i32
  }
  func.func @transform_11(%arg0: i32, %arg1: i32) -> (i32, i32, i32) {
    %c0_i32 = arith.constant 0 : i32
    %c0_i32_0 = arith.constant 0 : i32
    %c0_i32_1 = arith.constant 0 : i32
    return %arg1, %c0_i32, %c0_i32_0 : i32, i32, i32
  }
  func.func @transform_12(%arg0: i32, %arg1: i32) -> (i32, i32, i32) {
    %c0_i32 = arith.constant 0 : i32
    %c0_i32_0 = arith.constant 0 : i32
    %c0_i32_1 = arith.constant 0 : i32
    return %arg1, %c0_i32, %c0_i32_0 : i32, i32, i32
  }
  func.func @transform_13(%arg0: i32, %arg1: i32) -> (i32, i32, i32) {
    %c0_i32 = arith.constant 0 : i32
    %c0_i32_0 = arith.constant 0 : i32
    %c0_i32_1 = arith.constant 0 : i32
    return %arg1, %c0_i32, %c0_i32_0 : i32, i32, i32
  }
  func.func @transform_14(%arg0: i32, %arg1: i32) -> (i32, i32) {
    %c0_i32 = arith.constant 0 : i32
    %c0_i32_0 = arith.constant 0 : i32
    %c0_i32_1 = arith.constant 0 : i32
    return %c0_i32, %c0_i32_0 : i32, i32
  }
  func.func @transform_15(%arg0: i32, %arg1: i32) -> (i32, i32) {
    %c0_i32 = arith.constant 0 : i32
    %c0_i32_0 = arith.constant 0 : i32
    %c0_i32_1 = arith.constant 0 : i32
    return %c0_i32, %c0_i32_0 : i32, i32
  }
  func.func @transform_16(%arg0: i32, %arg1: i32) -> (i32, i32, i32) {
    %c0_i32 = arith.constant 0 : i32
    %c0_i32_0 = arith.constant 0 : i32
    %c0_i32_1 = arith.constant 0 : i32
    return %arg0, %c0_i32, %c0_i32_0 : i32, i32, i32
  }
}

</mosaic_0001>

<bundles_post_ra>
// kernel: frozen_clip_embedder.1
= control target key start
LH: loop header
LB: loop body
LE: loop exit
PB: predicated region body
PF: predicated region fallthrough
CT: control target
= control target key end

     0   :  { %s12770_s21 = smov 0   ;;  %s12772_s22 = smov 0   ;;  %s16700_s0 = inlined_call_operand.vmem [shape: f32[2,128,128], index: 0, kind: input, shape index: {}]   ;;  %s16701_s1 = inlined_call_operand.vmem [shape: f32[128,128], index: 1, kind: input, shape index: {}]   ;;  %s16702_s2 = inlined_call_operand.vmem [shape: f32[2,1,128], index: 2, kind: input, shape index: {}]   ;;  %s16703_s3 = inlined_call_operand.vmem [shape: f32[2,1,128], index: 3, kind: input, shape index: {}]   ;;  %s16704_s4 = inlined_call_operand.vmem [shape: bf16[2,128,384], index: 4, kind: input, shape index: {}]   ;;  %s16705_s5 = inlined_call_operand.vmem [shape: f32[2,1,384], index: 5, kind: input, shape index: {}]   ;;  %s16706_s6 = inlined_call_operand.vmem [shape: bf16[2,128,128], index: 6, kind: input, shape index: {}]   ;;  %s16707_s7 = inlined_call_operand.vmem [shape: f32[2,1,128], index: 7, kind: input, shape index: {}]   ;;  %s16708_s8 = inlined_call_operand.vmem [shape: f32[2,1,128], index: 8, kind: input, shape index: {}]   ;;  %s16709_s9 = inlined_call_operand.vmem [shape: f32[2,1,128], index: 9, kind: input, shape index: {}]   ;;  %s16710_s10 = inlined_call_operand.vmem [shape: bf16[2,128,512], index: 10, kind: input, shape index: {}]   ;;  %s16711_s11 = inlined_call_operand.vmem [shape: f32[2,1,512], index: 11, kind: input, shape index: {}]   ;;  %s16712_s12 = inlined_call_operand.vmem [shape: bf16[2,512,128], index: 12, kind: input, shape index: {}]   ;;  %s16713_s13 = inlined_call_operand.vmem [shape: f32[2,1,128], index: 13, kind: input, shape index: {}]   ;;  %s16714_s14 = inlined_call_operand.vmem [shape: f32[1,128], index: 14, kind: input, shape index: {}]   ;;  %s16715_s15 = inlined_call_operand.vmem [shape: f32[1,128], index: 15, kind: input, shape index: {}]   ;;  %s16716_s16 = inlined_call_operand.vmem [shape: f32[2,128,128], index: 16, kind: output, shape index: {}]  }
   0x1   :  { %16822 = sst [smem:[#allocation120_spill]] %s16700_s0  ;;  %s12774_s23 = smov 0  }
   0x2   :  { %16823 = sst [smem:[#allocation121_spill]] %s16701_s1  ;;  %s12776_s24 = smov 0  }
   0x3   :  { %16824 = sst [smem:[#allocation122_spill]] %s16702_s2  ;;  %s12778_s25 = smov 0  }
   0x4   :  { %16825 = sst [smem:[#allocation123_spill]] %s16703_s3 }
   0x5   :  { %16826 = sst [smem:[#allocation124_spill]] %s16704_s4 }
   0x6   :  { %16827 = sst [smem:[#allocation125_spill]] %s16706_s6 }
   0x7   :  { %16828 = sst [smem:[#allocation126_spill]] %s16714_s14 }
   0x8   :  { %16829 = sst [smem:[#allocation127_spill]] %s16715_s15 }
   0x9 LB: > { %16830 = sst [smem:[#allocation3_spill]] %s12663_s21  ;;  %s35_s26 = sadd.s32 1, %s12671_s23  ;;  %s12679_s25 = sphi %s12778_s25, %s26_s25   ;;  %s12675_s24 = sphi %s12776_s24, %s17194_s24   ;;  %s12671_s23 = sphi %s12774_s23, %s17193_s23   ;;  %s12667_s22 = sphi %s12772_s22, %s17192_s22   ;;  %s12663_s21 = sphi %s12770_s21, %s17191_s21  }
   0xa   : > { %16831 = sst [smem:[#allocation4_spill]] %s12671_s23  ;;  %s38_s27 = sadd.s32 1, %s12675_s24 }
   0xb   : > { %16832 = sst [smem:[#allocation5_spill]] %s12675_s24  ;;  %p36_p0 = scmp.ge.s32.totalorder %s35_s26, 2 }
   0xc   : > { %16833 = sst [smem:[#allocation6_spill]] %s12679_s25  ;;  %p11357_p1 = scmp.ge.s32.totalorder %s12679_s25, 1 }
   0xd   : > { %p580_p2 = scmp.lt.s32.totalorder %s12679_s25, 5  ;;  %s17196_s26 = smov (%p36_p0, %s35_s26), 0 }
   0xe   : > { %16834 = sst [smem:[#allocation7_spill]] %s17196_s26  ;;  %s17198_s27 = smov (!%p36_p0, %s38_s27), %s12675_s24 }
   0xf   : > { %p581_p3 = pnand %p11357_p1, %p580_p2  ;;  %p40_p4 = scmp.ge.s32.totalorder %s17198_s27, 2 }
  0x11   : > { %s17200_s27 = smov (%p40_p4, %s17198_s27), 0  ;;  %584 = sbr.rel (%p581_p3) target bundleno = 2932 (0xb74), region = 84 }
  0x12   : > { %16835 = sst [smem:[#allocation8_spill]] %s17200_s27 }
  0x16   : > { %p676_p5 = scmp.lt.s32.totalorder %s12667_s22, 1  ;;  %p681_p6 = scmp.lt.s32.totalorder %s12663_s21, 1 }
  0x17   : > { %s16836_s17 = sld [smem:[#allocation120_spill]] }
  0x18   : > { %s17202_s22 = smov (!%p676_p5, %s12667_s22), 1  ;;  %s16839_s4 = sld [smem:[#allocation124_spill]] }
  0x19   : > { %s12804_s28 = scalar_select %p681_p6, %s12663_s21, 1 }
  0x1a   : > { %s11654_s29 = sshll.u32 %s17202_s22, 7  ;;  %s16840_s6 = sld [smem:[#allocation125_spill]] }
  0x1b   : > { %s12107_s25 = smul.u32 192, %s12804_s28  ;;  %s11655_s14 = sshll.u32 %s12804_s28, 6 }
  0x1c   : > { %s12108_s15 = smul.u32 3, %s12804_s28  ;;  %s11656_s30 = sshll.u32 %s12804_s28, 8 }
  0x1d   : > { %s12809_s18 = scalar_lea.vmem %s16836_s17, %s11654_s29  ;;  %s12854_s19 = scalar_lea.vmem %s16710_s10, %s11656_s30 }
  0x1e   : > { %s12825_s22 = scalar_lea.vmem %s16839_s4, %s12107_s25  ;;  %s12835_s27 = scalar_lea.vmem %s16705_s5, %s12108_s15 }
  0x1f   : > { %s12864_s2 = scalar_lea.vmem %s16712_s12, %s11656_s30  ;;  %s726_s25 = scalar_lea.vmem %s16713_s13, %s12804_s28 }
  0x20   : > { %s12830_s17 = scalar_lea.vmem %s16840_s6, %s11655_s14  ;;  %s11365_s14 = sshll.u32 %s12804_s28, 2 }
  0x21   : > { %s12859_s24 = scalar_lea.vmem %s16711_s11, %s11365_s14  ;;  %s12873_s6 = scalar_lea.vmem %s16716_s16, %s11654_s29 }
  0x22   : > { %s16841_s0 = sld [smem:[#allocation3_spill]] }
  0x28   : > { %p11370_p7 = scmp.ne.s32.totalorder %s16841_s0, 0 }
  0x2a   : > { %738 = sbr.rel (%p11370_p7) target bundleno = 56 (0x38), region = 88 }
  0x2f   : > { %v739_v0 = vld [vmem:[%s12809_s18] sm:$0xff]  ;;  %v740_v1 = vld [vmem:[%s12809_s18 + $0x8] sm:$0xff]  ;;  %v741_v2 = vld [vmem:[%s12809_s18 + $0x10] sm:$0xff] }
  0x30   : > { %755 = vst [vmem:[#allocation2 + $0x30] sm:$0xff] %v739_v0  ;;  %756 = vst [vmem:[#allocation2] sm:$0xff] %v740_v1  ;;  %v742_v3 = vld [vmem:[%s12809_s18 + $0x18] sm:$0xff]  ;;  %v743_v4 = vld [vmem:[%s12809_s18 + $0x20] sm:$0xff] }
  0x31   : > { %757 = vst [vmem:[#allocation2 + $0x58] sm:$0xff] %v741_v2  ;;  %v744_v5 = vld [vmem:[%s12809_s18 + $0x28] sm:$0xff]  ;;  %758 = vst [vmem:[#allocation2 + $0x18] sm:$0xff] %v742_v3  ;;  %v745_v6 = vld [vmem:[%s12809_s18 + $0x30] sm:$0xff] }
  0x32   : > { %759 = vst [vmem:[#allocation2 + $0x50] sm:$0xff] %v743_v4  ;;  %760 = vst [vmem:[#allocation2 + $0x68] sm:$0xff] %v744_v5  ;;  %v746_v7 = vld [vmem:[%s12809_s18 + $0x38] sm:$0xff]  ;;  %v747_v8 = vld [vmem:[%s12809_s18 + $0x40] sm:$0xff] }
  0x33   : > { %761 = vst [vmem:[#allocation2 + $0x8] sm:$0xff] %v745_v6  ;;  %762 = vst [vmem:[#allocation2 + $0x48] sm:$0xff] %v746_v7  ;;  %v748_v9 = vld [vmem:[%s12809_s18 + $0x48] sm:$0xff]  ;;  %v749_v10 = vld [vmem:[%s12809_s18 + $0x50] sm:$0xff] }
  0x34   : > { %763 = vst [vmem:[#allocation2 + $0x40] sm:$0xff] %v747_v8  ;;  %v750_v11 = vld [vmem:[%s12809_s18 + $0x58] sm:$0xff]  ;;  %764 = vst [vmem:[#allocation2 + $0x20] sm:$0xff] %v748_v9  ;;  %v751_v12 = vld [vmem:[%s12809_s18 + $0x60] sm:$0xff] }
  0x35   : > { %765 = vst [vmem:[#allocation2 + $0x10] sm:$0xff] %v749_v10  ;;  %766 = vst [vmem:[#allocation2 + $0x38] sm:$0xff] %v750_v11  ;;  %v752_v13 = vld [vmem:[%s12809_s18 + $0x68] sm:$0xff]  ;;  %v753_v14 = vld [vmem:[%s12809_s18 + $0x70] sm:$0xff] }
  0x36   : > { %767 = vst [vmem:[#allocation2 + $0x60] sm:$0xff] %v751_v12  ;;  %768 = vst [vmem:[#allocation2 + $0x70] sm:$0xff] %v752_v13  ;;  %v754_v15 = vld [vmem:[%s12809_s18 + $0x78] sm:$0xff] }
  0x37   : > { %769 = vst [vmem:[#allocation2 + $0x78] sm:$0xff] %v753_v14  ;;  %770 = vst [vmem:[#allocation2 + $0x28] sm:$0xff] %v754_v15 }
  0x38 PF: > { %v12892_v16 = vld [vmem:[#allocation2 + $0x30] sm:$0xff]  ;;  %v12894_v17 = vld [vmem:[#allocation2] sm:$0xff]  ;;  %v12902_v20 = vld [vmem:[#allocation2 + $0x58] sm:$0xff]  ;;  %v16740_v1 = vmov 0   ;;  %s16842_s29 = sld [smem:[#allocation122_spill]]  ;;  %vm6627_vm0 = vcmask 523264   ;;  %s17176_s23 = scalar_lea.vmem %s16707_s7, %s12804_s28 }
  0x39   : > { %789 = vadd.xlane.f32.xlu0 %v12892_v16  ;;  %v838_v18 = vmul.f32 %v12892_v16, %v12892_v16  ;;  %v839_v19 = vmul.f32 %v12894_v17, %v12894_v17  ;;  %v12904_v21 = vld [vmem:[#allocation2 + $0x18] sm:$0xff]  ;;  %v840_v22 = vmul.f32 %v12902_v20, %v12902_v20  ;;  %v12912_v24 = vld [vmem:[#allocation2 + $0x50] sm:$0xff]  ;;  %v12915_v26 = vld [vmem:[#allocation2 + $0x68] sm:$0xff]  ;;  %1275 = vmatprep.mubr.bf16.mxu0 %v16740_v1  ;;  %s16844_s30 = sld [smem:[#allocation123_spill]] }
  0x3a   : > { %v841_v23 = vmul.f32 %v12904_v21, %v12904_v21  ;;  %v12153_v25 = vld [vmem:[%s12825_s22 + $0xac] ss:$12 sps:$4 sm:$0xff]   ;;  %v12155_v27 = vld [vmem:[%s12825_s22 + $0xa8] ss:$12 sps:$4 sm:$0xff]   ;;  %v842_v28 = vmul.f32 %v12912_v24, %v12912_v24  ;;  %v12158_v30 = vld [vmem:[%s12825_s22 + $0x90] ss:$12 sps:$4 sm:$0xff]   ;;  %v843_v31 = vmul.f32 %v12915_v26, %v12915_v26 }
  0x3b   : > { %854 = vadd.xlane.f32.xlu1 %v838_v18  ;;  %1243 = vmatprep.subr.bf16.mxu0 %v12153_v25  ;;  %v12156_v29 = vld [vmem:[%s12825_s22 + $0x94] ss:$12 sps:$4 sm:$0xff]   ;;  %v12159_v34 = vld [vmem:[%s12825_s22 + $0x7c] ss:$12 sps:$4 sm:$0xff]   ;;  %v12162_v36 = vld [vmem:[%s12825_s22 + $0x78] ss:$12 sps:$4 sm:$0xff]  }
  0x3c   : > { %1244 = vmatpush1.bf16.msra.mxu0 %v12155_v27  ;;  %v12926_v32 = vld [vmem:[#allocation2 + $0x8] sm:$0xff]  ;;  %v12165_v39 = vld [vmem:[%s12825_s22 + $0x98] ss:$12 sps:$4 sm:$0xff]   ;;  %v12166_v41 = vld [vmem:[%s12825_s22 + $0x60] ss:$12 sps:$4 sm:$0xff]   ;;  %s17172_s26 = sld [smem:[#allocation121_spill]] }
  0x3d   : > { %791 = vadd.xlane.f32.xlu0 %v12894_v17  ;;  %1245 = vmatprep.subr.bf16.mxu0 %v12156_v29  ;;  %v12928_v33 = vld [vmem:[#allocation2 + $0x48] sm:$0xff]  ;;  %v844_v37 = vmul.f32 %v12926_v32, %v12926_v32  ;;  %v12942_v42 = vld [vmem:[#allocation2 + $0x40] sm:$0xff]  ;;  %v12958_v52 = vld [vmem:[#allocation2 + $0x10] sm:$0xff] }
  0x3e   : > { %v12161_v35 = vld [vmem:[%s12825_s22 + $0xb0] ss:$12 sps:$4 sm:$0xff]   ;;  %v845_v40 = vmul.f32 %v12928_v33, %v12928_v33  ;;  %v12944_v43 = vld [vmem:[#allocation2 + $0x20] sm:$0xff]  ;;  %v846_v47 = vmul.f32 %v12942_v42, %v12942_v42  ;;  %v12171_v48 = vld [vmem:[%s12825_s22 + $0x34] ss:$12 sps:$4 sm:$0xff]   ;;  %v848_v57 = vmul.f32 %v12958_v52, %v12958_v52  ;;  %s16843_s18 = scalar_lea.vmem %s16842_s29, %s12804_s28 }
  0x3f   : > { %856 = vadd.xlane.f32.xlu1 %v839_v19  ;;  %11883 = vmatprep.subr.bf16.mxu1 %v12161_v35  ;;  %v12163_v38 = vld [vmem:[%s12825_s22 + $0x64] ss:$12 sps:$4 sm:$0xff]   ;;  %v12167_v44 = vld [vmem:[%s12825_s22 + $0x4c] ss:$12 sps:$4 sm:$0xff]   ;;  %v12170_v46 = vld [vmem:[%s12825_s22 + $0x48] ss:$12 sps:$4 sm:$0xff]   ;;  %v847_v50 = vmul.f32 %v12944_v43, %v12944_v43  ;;  %s16845_s14 = scalar_lea.vmem %s16844_s30, %s12804_s28  ;;  %s17180_s30 = scalar_lea.vmem %s16709_s9, %s12804_s28 }
  0x40   : > { %1246 = vmatpush1.bf16.msra.mxu0 %v12158_v30  ;;  %11884 = vmatpush3.bf16.msra.mxu1 %v12161_v35  ;;  %v12169_v45 = vld [vmem:[%s12825_s22 + $0x80] ss:$12 sps:$4 sm:$0xff]   ;;  %v12173_v49 = vld [vmem:[%s12825_s22 + $0x68] ss:$12 sps:$4 sm:$0xff]   ;;  %v12174_v51 = vld [vmem:[%s12825_s22 + $0x30] ss:$12 sps:$4 sm:$0xff]  }
  0x41   : > { %793 = vadd.xlane.f32.xlu0 %v12902_v20  ;;  %1247 = vmatprep.subr.bf16.mxu0 %v12159_v34  ;;  %v12175_v53 = vld [vmem:[%s12825_s22 + $0x1c] ss:$12 sps:$4 sm:$0xff]   ;;  %v12962_v55 = vld [vmem:[#allocation2 + $0x38] sm:$0xff]  ;;  %v12989_v6 = vld [vmem:[#allocation2 + $0x28] sm:$0xff] }
  0x42   : > { %11885 = vmatprep.subr.bf16.mxu1 %v12165_v39  ;;  %v12177_v54 = vld [vmem:[%s12825_s22 + $0x50] ss:$12 sps:$4 sm:$0xff]   ;;  %v12178_v56 = vld [vmem:[%s12825_s22 + $0x18] ss:$12 sps:$4 sm:$0xff]   ;;  %v849_v60 = vmul.f32 %v12962_v55, %v12962_v55  ;;  %v12182_v61 = vld [vmem:[%s12825_s22] ss:$12 sps:$4 sm:$0xff]   ;;  %v853_v8 = vmul.f32 %v12989_v6, %v12989_v6 }
  0x43   : > { %795 = vadd.xlane.f32.xlu1 %v12904_v21  ;;  %v12179_v58 = vld [vmem:[%s12825_s22 + $0x4] ss:$12 sps:$4 sm:$0xff]   ;;  %v12974_v62 = vld [vmem:[#allocation2 + $0x60] sm:$0xff]  ;;  %v12976_v63 = vld [vmem:[#allocation2 + $0x70] sm:$0xff] }
  0x44   : > { %1248 = vmatpush1.bf16.msra.mxu0 %v12162_v36  ;;  %11886 = vmatpush3.bf16.msra.mxu1 %v12165_v39  ;;  %v12181_v59 = vld [vmem:[%s12825_s22 + $0x38] ss:$12 sps:$4 sm:$0xff]   ;;  %v12183_v0 = vld [vmem:[%s12825_s22 + $0x20] ss:$12 sps:$4 sm:$0xff]   ;;  %v850_v2 = vmul.f32 %v12974_v62, %v12974_v62  ;;  %v12184_v3 = vld [vmem:[%s12825_s22 + $0x8] ss:$12 sps:$4 sm:$0xff]   ;;  %v851_v4 = vmul.f32 %v12976_v63, %v12976_v63 }
  0x45   : > { %858 = vadd.xlane.f32.xlu0 %v840_v22  ;;  %1249 = vmatprep.subr.bf16.mxu0 %v12163_v38  ;;  %v12987_v5 = vld [vmem:[#allocation2 + $0x78] sm:$0xff] }
  0x46   : > { %11887 = vmatprep.subr.bf16.mxu1 %v12169_v45  ;;  %v852_v7 = vmul.f32 %v12987_v5, %v12987_v5 }
  0x47   : > { %860 = vadd.xlane.f32.xlu1 %v841_v23 }
  0x48   : > { %1250 = vmatpush1.bf16.msra.mxu0 %v12166_v41  ;;  %11888 = vmatpush3.bf16.msra.mxu1 %v12169_v45 }
  0x49   : > { %797 = vadd.xlane.f32.xlu0 %v12912_v24  ;;  %1251 = vmatprep.subr.bf16.mxu0 %v12167_v44 }
  0x4a   : > { %11889 = vmatprep.subr.bf16.mxu1 %v12173_v49 }
  0x4b   : > { %799 = vadd.xlane.f32.xlu1 %v12915_v26 }
  0x4c   : > { %1252 = vmatpush1.bf16.msra.mxu0 %v12170_v46  ;;  %11890 = vmatpush3.bf16.msra.mxu1 %v12173_v49 }
  0x4d   : > { %862 = vadd.xlane.f32.xlu0 %v842_v28  ;;  %1253 = vmatprep.subr.bf16.mxu0 %v12171_v48 }
  0x4e   : > { %11891 = vmatprep.subr.bf16.mxu1 %v12177_v54 }
  0x4f   : > { %864 = vadd.xlane.f32.xlu1 %v843_v31 }
  0x50   : > { %1254 = vmatpush1.bf16.msra.mxu0 %v12174_v51  ;;  %11892 = vmatpush3.bf16.msra.mxu1 %v12177_v54 }
  0x51   : > { %801 = vadd.xlane.f32.xlu0 %v12926_v32  ;;  %1255 = vmatprep.subr.bf16.mxu0 %v12175_v53 }
  0x52   : > { %11893 = vmatprep.subr.bf16.mxu1 %v12181_v59 }
  0x53   : > { %803 = vadd.xlane.f32.xlu1 %v12928_v33 }
  0x54   : > { %1256 = vmatpush1.bf16.msra.mxu0 %v12178_v56  ;;  %11894 = vmatpush3.bf16.msra.mxu1 %v12181_v59 }
  0x55   : > { %866 = vadd.xlane.f32.xlu0 %v844_v37  ;;  %1257 = vmatprep.subr.bf16.mxu0 %v12179_v58 }
  0x56   : > { %11895 = vmatprep.subr.bf16.mxu1 %v12183_v0 }
  0x57   : > { %868 = vadd.xlane.f32.xlu1 %v845_v40 }
  0x58   : > { %1258 = vmatpush1.bf16.msra.mxu0 %v12182_v61  ;;  %11896 = vmatpush3.bf16.msra.mxu1 %v12183_v0 }
  0x59   : > { %805 = vadd.xlane.f32.xlu0 %v12942_v42  ;;  %11897 = vmatprep.subr.bf16.mxu1 %v12184_v3 }
  0x5b   : > { %807 = vadd.xlane.f32.xlu1 %v12944_v43 }
  0x5c   : > { %11898 = vmatpush3.bf16.msra.mxu1 %v12184_v3 }
  0x5d   : > { %870 = vadd.xlane.f32.xlu0 %v846_v47 }
  0x5f   : > { %872 = vadd.xlane.f32.xlu1 %v847_v50 }
  0x61   : > { %809 = vadd.xlane.f32.xlu0 %v12958_v52 }
  0x63   : > { %811 = vadd.xlane.f32.xlu1 %v12962_v55 }
  0x65   : > { %874 = vadd.xlane.f32.xlu0 %v848_v57 }
  0x67   : > { %876 = vadd.xlane.f32.xlu1 %v849_v60 }
  0x69   : > { %813 = vadd.xlane.f32.xlu0 %v12974_v62 }
  0x6b   : > { %815 = vadd.xlane.f32.xlu1 %v12976_v63 }
  0x6d   : > { %878 = vadd.xlane.f32.xlu0 %v850_v2 }
  0x6f   : > { %880 = vadd.xlane.f32.xlu1 %v851_v4 }
  0x71   : > { %817 = vadd.xlane.f32.xlu0 %v12987_v5 }
  0x73   : > { %819 = vadd.xlane.f32.xlu1 %v12989_v6 }
  0x75   : > { %882 = vadd.xlane.f32.xlu0 %v852_v7 }
  0x77   : > { %884 = vadd.xlane.f32.xlu1 %v853_v8 }
  0xc2   : > { %v790_v9 = vpop.xlane.xlu0 %789 }
  0xc3   : > { %v822_v10 = vmul.f32 0.0078125, %v790_v9 }
  0xc4   : > { %v855_v11 = vpop.xlane.xlu1 %854 }
  0xc5   : > { %v902_v12 = vmul.f32 %v822_v10, %v822_v10  ;;  %v886_v13 = vmul.f32 0.0078125, %v855_v11  ;;  %v950_v4 = vsub.f32 %v12892_v16, %v822_v10  ;;  %v13024_v16 = vld [vmem:[%s16843_s18] ss:$0 sm:$0xff]  ;;  %s17179_s18 = scalar_lea.vmem %s16708_s8, %s12804_s28  ;;  %s17187_s28 = sld [smem:[#allocation3_spill]] }
  0xc6   : > { %v792_v14 = vpop.xlane.xlu0 %791 }
  0xc7   : > { %v918_v15 = vsub.f32 %v886_v13, %v902_v12  ;;  %v823_v18 = vmul.f32 0.0078125, %v792_v14 }
  0xc8   : > { %v857_v19 = vpop.xlane.xlu1 %856 }
  0xc9   : > { %v934_v22 = vmax.f32 %v918_v15, 0.0  ;;  %v903_v23 = vmul.f32 %v823_v18, %v823_v18  ;;  %v887_v25 = vmul.f32 0.0078125, %v857_v19  ;;  %v951_v14 = vsub.f32 %v12894_v17, %v823_v18 }
  0xca   : > { %v794_v27 = vpop.xlane.xlu0 %793 }
  0xcb   : > { %v966_v28 = vadd.f32 1e-05, %v934_v22  ;;  %v919_v29 = vsub.f32 %v887_v25, %v903_v23  ;;  %v12997_v30 = vmul.f32 0.0078125, %v794_v27  ;;  %p11649_p8 = scmp.ne.s32.totalorder %s17187_s28, 1 }
  0xcc   : > { %v796_v31 = vpop.xlane.xlu1 %795  ;;  %s17188_s15 = sld [smem:[#allocation126_spill]] (!%p11649_p8) }
  0xcd   : > { %12273 = vrsqrt.f32 %v966_v28  ;;  %v935_v34 = vmax.f32 %v919_v29, 0.0  ;;  %v904_v35 = vmul.f32 %v12997_v30, %v12997_v30  ;;  %v13001_v36 = vmul.f32 0.0078125, %v796_v31  ;;  %s17189_s21 = sld [smem:[#allocation127_spill]] (!%p11649_p8) }
  0xce   : > { %v859_v37 = vpop.xlane.xlu0 %858 }
  0xcf   : > { %v967_v38 = vadd.f32 1e-05, %v935_v34  ;;  %v888_v39 = vmul.f32 0.0078125, %v859_v37  ;;  %v905_v41 = vmul.f32 %v13001_v36, %v13001_v36  ;;  %v13036_v37 = vld [vmem:[%s16845_s14] ss:$0 sm:$0xff] }
  0xd0   : > { %v861_v40 = vpop.xlane.xlu1 %860 }
  0xd1   : > { %12275 = vrsqrt.f32 %v967_v38  ;;  %v920_v44 = vsub.f32 %v888_v39, %v904_v35  ;;  %v889_v45 = vmul.f32 0.0078125, %v861_v40 }
  0xd2   : > { %v798_v46 = vpop.xlane.xlu0 %797 }
  0xd3   : > { %v936_v47 = vmax.f32 %v920_v44, 0.0  ;;  %v921_v48 = vsub.f32 %v889_v45, %v905_v41  ;;  %v13005_v49 = vmul.f32 0.0078125, %v798_v46 }
  0xd4   : > { %v800_v50 = vpop.xlane.xlu1 %799 }
  0xd5   : > { %v968_v51 = vadd.f32 1e-05, %v936_v47  ;;  %v937_v53 = vmax.f32 %v921_v48, 0.0  ;;  %v906_v54 = vmul.f32 %v13005_v49, %v13005_v49  ;;  %v13009_v56 = vmul.f32 0.0078125, %v800_v50 }
  0xd6   : > { %v863_v57 = vpop.xlane.xlu0 %862  ;;  %v952_v47 = vsub.f32 %v12902_v20, %v12997_v30 }
  0xd7   : > { %12277 = vrsqrt.f32 %v968_v51  ;;  %v969_v58 = vadd.f32 1e-05, %v937_v53  ;;  %v890_v59 = vmul.f32 0.0078125, %v863_v57  ;;  %v907_v61 = vmul.f32 %v13009_v56, %v13009_v56 }
  0xd8   : > { %v865_v60 = vpop.xlane.xlu1 %864  ;;  %v953_v51 = vsub.f32 %v12904_v21, %v13001_v36 }
  0xd9   : > { %12279 = vrsqrt.f32 %v969_v58  ;;  %v922_v0 = vsub.f32 %v890_v59, %v906_v54  ;;  %v891_v2 = vmul.f32 0.0078125, %v865_v60 }
  0xda   : > { %v12274_v3 = vpop.eup %12273  ;;  %v802_v7 = vpop.xlane.xlu0 %801 }
  0xdb   : > { %v938_v8 = vmax.f32 %v922_v0, 0.0  ;;  %v923_v9 = vsub.f32 %v891_v2, %v907_v61  ;;  %v13014_v11 = vmul.f32 0.0078125, %v802_v7  ;;  %v998_v13 = vmul.f32 %v12274_v3, %v950_v4 }
  0xdc   : > { %v804_v12 = vpop.xlane.xlu1 %803 }
  0xdd   : > { %v970_v15 = vadd.f32 1e-05, %v938_v8  ;;  %v939_v19 = vmax.f32 %v923_v9, 0.0  ;;  %v908_v22 = vmul.f32 %v13014_v11, %v13014_v11  ;;  %v13026_v23 = vmul.f32 0.0078125, %v804_v12 }
  0xde   : > { %v12276_v10 = vpop.eup %12275  ;;  %v867_v25 = vpop.xlane.xlu0 %866  ;;  %v1020_v31 = vmul.f32 %v13024_v16, %v998_v13 }
  0xdf   : > { %12281 = vrsqrt.f32 %v970_v15  ;;  %v971_v27 = vadd.f32 1e-05, %v939_v19  ;;  %v892_v28 = vmul.f32 0.0078125, %v867_v25  ;;  %v999_v17 = vmul.f32 %v12276_v10, %v951_v14 }
  0xe0   : > { %v909_v18 = vmul.f32 %v13026_v23, %v13026_v23  ;;  %v869_v29 = vpop.xlane.xlu1 %868  ;;  %v1042_v50 = vadd.f32 %v13036_v37, %v1020_v31 }
  0xe1   : > { %12283 = vrsqrt.f32 %v971_v27  ;;  %v924_v34 = vsub.f32 %v892_v28, %v908_v22  ;;  %v893_v35 = vmul.f32 0.0078125, %v869_v29  ;;  %v1021_v38 = vmul.f32 %v13024_v16, %v999_v17 }
  0xe2   : > { %v806_v39 = vpop.xlane.xlu0 %805  ;;  %v954_v22 = vsub.f32 %v12912_v24, %v13005_v49  ;;  %v955_v27 = vsub.f32 %v12915_v26, %v13009_v56 }
  0xe3   : > { %v940_v40 = vmax.f32 %v924_v34, 0.0  ;;  %v925_v41 = vsub.f32 %v893_v35, %v909_v18  ;;  %v13039_v44 = vmul.f32 0.0078125, %v806_v39  ;;  %v1043_v45 = vadd.f32 %v13036_v37, %v1021_v38 }
  0xe4   : > { %v12278_v46 = vpop.eup %12277  ;;  %v808_v48 = vpop.xlane.xlu1 %807 }
  0xe5   : > { %v972_v53 = vadd.f32 1e-05, %v940_v40  ;;  %v941_v54 = vmax.f32 %v925_v41, 0.0  ;;  %v910_v57 = vmul.f32 %v13039_v44, %v13039_v44  ;;  %v13049_v59 = vmul.f32 0.0078125, %v808_v48 }
  0xe6   : > { %v12280_v58 = vpop.eup %12279  ;;  %v871_v60 = vpop.xlane.xlu0 %870  ;;  %v1058_v61 = vpack.c.bf16 %v1043_v45, %v1042_v50  ;;  %v1000_v0 = vmul.f32 %v12278_v46, %v952_v47 }
  0xe7   : > { %12285 = vrsqrt.f32 %v972_v53  ;;  %v973_v2 = vadd.f32 1e-05, %v941_v54  ;;  %v894_v20 = vmul.f32 0.0078125, %v871_v60  ;;  %v1001_v30 = vmul.f32 %v12280_v58, %v953_v51 }
  0xe8   : > { %v911_v3 = vmul.f32 %v13049_v59, %v13049_v59  ;;  %1276 = vmatmul.mubr.bf16.vlgmr.msra.gmra.mxu0 %v1058_v61  ;;  %11899 = vmatprep.mubr.bf16.mxu1 %v1058_v61  ;;  %v873_v21 = vpop.xlane.xlu1 %872  ;;  %v1022_v36 = vmul.f32 %v13024_v16, %v1000_v0  ;;  %v957_v61 = vsub.f32 %v12928_v33, %v13026_v23 }
  0xe9   : > { %12287 = vrsqrt.f32 %v973_v2  ;;  %v926_v4 = vsub.f32 %v894_v20, %v910_v57  ;;  %v895_v7 = vmul.f32 0.0078125, %v873_v21  ;;  %1285 = vmatprep.mubr.bf16.mxu0 %v16740_v1  ;;  %v1023_v8 = vmul.f32 %v13024_v16, %v1001_v30 }
  0xea   : > { %v810_v9 = vpop.xlane.xlu0 %809  ;;  %v1044_v25 = vadd.f32 %v13036_v37, %v1022_v36  ;;  %v956_v57 = vsub.f32 %v12926_v32, %v13014_v11 }
  0xeb   : > { %v942_v12 = vmax.f32 %v926_v4, 0.0  ;;  %v927_v13 = vsub.f32 %v895_v7, %v911_v3  ;;  %v13056_v14 = vmul.f32 0.0078125, %v810_v9  ;;  %v1045_v15 = vadd.f32 %v13036_v37, %v1023_v8 }
  0xec   : > { %v12282_v19 = vpop.eup %12281  ;;  %v812_v10 = vpop.xlane.xlu1 %811 }
  0xed   : > { %v974_v28 = vadd.f32 1e-05, %v942_v12  ;;  %v943_v17 = vmax.f32 %v927_v13, 0.0  ;;  %v912_v18 = vmul.f32 %v13056_v14, %v13056_v14  ;;  %v13066_v31 = vmul.f32 0.0078125, %v812_v10 }
  0xee   : > { %v12284_v29 = vpop.eup %12283  ;;  %v875_v34 = vpop.xlane.xlu0 %874  ;;  %v1059_v35 = vpack.c.bf16 %v1045_v15, %v1044_v25  ;;  %v1002_v38 = vmul.f32 %v12282_v19, %v954_v22 }
  0xef   : > { %12289 = vrsqrt.f32 %v974_v28  ;;  %v975_v39 = vadd.f32 1e-05, %v943_v17  ;;  %v896_v24 = vmul.f32 0.0078125, %v875_v34  ;;  %v1003_v49 = vmul.f32 %v12284_v29, %v955_v27 }
  0xf0   : > { %v913_v40 = vmul.f32 %v13066_v31, %v13066_v31  ;;  %1286 = vmatmul.mubr.bf16.gmra.mxu0 %v1059_v35  ;;  %11900 = vmatmul.mubr.bf16.vlgmr.msra.gmra.mxu1 %v1059_v35  ;;  %v877_v26 = vpop.xlane.xlu1 %876  ;;  %v1024_v56 = vmul.f32 %v13024_v16, %v1002_v38  ;;  %v958_v28 = vsub.f32 %v12942_v42, %v13039_v44 }
  0xf1   : > { %12291 = vrsqrt.f32 %v975_v39  ;;  %v928_v41 = vsub.f32 %v896_v24, %v912_v18  ;;  %v897_v45 = vmul.f32 0.0078125, %v877_v26  ;;  %1295 = vmatprep.mubr.bf16.mxu0 %v16740_v1  ;;  %v1025_v46 = vmul.f32 %v13024_v16, %v1003_v49 }
  0xf2   : > { %v814_v47 = vpop.xlane.xlu0 %813  ;;  %v1046_v60 = vadd.f32 %v13036_v37, %v1024_v56  ;;  %v959_v29 = vsub.f32 %v12944_v43, %v13049_v59 }
  0xf3   : > { %v944_v48 = vmax.f32 %v928_v41, 0.0  ;;  %v929_v50 = vsub.f32 %v897_v45, %v913_v40  ;;  %v13073_v51 = vmul.f32 0.0078125, %v814_v47  ;;  %v1047_v53 = vadd.f32 %v13036_v37, %v1025_v46 }
  0xf4   : > { %v12286_v54 = vpop.eup %12285  ;;  %v816_v58 = vpop.xlane.xlu1 %815 }
  0xf5   : > { %v976_v0 = vadd.f32 1e-05, %v944_v48  ;;  %v945_v2 = vmax.f32 %v929_v50, 0.0  ;;  %v914_v20 = vmul.f32 %v13073_v51, %v13073_v51  ;;  %v13083_v3 = vmul.f32 0.0078125, %v816_v58 }
  0xf6   : > { %v12288_v30 = vpop.eup %12287  ;;  %v879_v21 = vpop.xlane.xlu0 %878  ;;  %v1060_v36 = vpack.c.bf16 %v1047_v53, %v1046_v60  ;;  %v1004_v4 = vmul.f32 %v12286_v54, %v956_v57  ;;  %v960_v48 = vsub.f32 %v12958_v52, %v13056_v14  ;;  %v961_v60 = vsub.f32 %v12962_v55, %v13066_v31 }
  0xf7   : > { %12293 = vrsqrt.f32 %v976_v0  ;;  %v977_v7 = vadd.f32 1e-05, %v945_v2  ;;  %v898_v32 = vmul.f32 0.0078125, %v879_v21  ;;  %v1005_v11 = vmul.f32 %v12288_v30, %v957_v61 }
  0xf8   : > { %v915_v8 = vmul.f32 %v13083_v3, %v13083_v3  ;;  %1296 = vmatmul.mubr.bf16.gmra.mxu0 %v1060_v36  ;;  %11903 = vmatprep.mubr.bf16.mxu1 %v1060_v36  ;;  %v881_v33 = vpop.xlane.xlu1 %880  ;;  %v1026_v23 = vmul.f32 %v13024_v16, %v1004_v4  ;;  %v962_v55 = vsub.f32 %v12974_v62, %v13073_v51 }
  0xf9   : > { %12295 = vrsqrt.f32 %v977_v7  ;;  %v930_v9 = vsub.f32 %v898_v32, %v914_v20  ;;  %v899_v12 = vmul.f32 0.0078125, %v881_v33  ;;  %1305 = vmatprep.mubr.bf16.mxu0 %v16740_v1  ;;  %v1027_v13 = vmul.f32 %v13024_v16, %v1005_v11 }
  0xfa   : > { %v818_v15 = vpop.xlane.xlu0 %817  ;;  %v1048_v18 = vadd.f32 %v13036_v37, %v1026_v23  ;;  %v963_v32 = vsub.f32 %v12976_v63, %v13083_v3 }
  0xfb   : > { %v946_v19 = vmax.f32 %v930_v9, 0.0  ;;  %v931_v22 = vsub.f32 %v899_v12, %v915_v8  ;;  %v13090_v10 = vmul.f32 0.0078125, %v818_v15  ;;  %v1049_v25 = vadd.f32 %v13036_v37, %v1027_v13 }
  0xfc   : > { %v12290_v27 = vpop.eup %12289  ;;  %v820_v17 = vpop.xlane.xlu1 %819 }
  0xfd   : > { %v978_v34 = vadd.f32 1e-05, %v946_v19  ;;  %v947_v35 = vmax.f32 %v931_v22, 0.0  ;;  %v916_v38 = vmul.f32 %v13090_v10, %v13090_v10  ;;  %v13100_v24 = vmul.f32 0.0078125, %v820_v17 }
  0xfe   : > { %v12292_v39 = vpop.eup %12291  ;;  %v883_v49 = vpop.xlane.xlu0 %882  ;;  %v1061_v40 = vpack.c.bf16 %v1049_v25, %v1048_v18  ;;  %v1006_v26 = vmul.f32 %v12290_v27, %v958_v28  ;;  %v964_v51 = vsub.f32 %v12987_v5, %v13090_v10 }
  0xff   : > { %12297 = vrsqrt.f32 %v978_v34  ;;  %v979_v56 = vadd.f32 1e-05, %v947_v35  ;;  %v900_v42 = vmul.f32 0.0078125, %v883_v49  ;;  %v1007_v44 = vmul.f32 %v12292_v39, %v959_v29  ;;  %v1098_v34 = vld [vmem:[%s12835_s27] sm:$0x7]  ;;  %s12682_s27 = smov 64  }
 0x100   : > { %v917_v41 = vmul.f32 %v13100_v24, %v13100_v24  ;;  %1306 = vmatmul.mubr.bf16.gmra.mxu0 %v1061_v40  ;;  %11904 = vmatmul.mubr.bf16.gmra.mxu1 %v1061_v40  ;;  %v885_v43 = vpop.xlane.xlu1 %884  ;;  %v1028_v59 = vmul.f32 %v13024_v16, %v1006_v26  ;;  %v965_v3 = vsub.f32 %v12989_v6, %v13100_v24  ;;  %v1100_v6 = vlaneseq }
 0x101   : > { %12299 = vrsqrt.f32 %v979_v56  ;;  %v932_v45 = vsub.f32 %v900_v42, %v916_v38  ;;  %v901_v46 = vmul.f32 0.0078125, %v885_v43  ;;  %1315 = vmatprep.mubr.bf16.mxu0 %v16740_v1  ;;  %v1029_v47 = vmul.f32 %v13024_v16, %v1007_v44 }
 0x102   : > { %v1050_v54 = vadd.f32 %v13036_v37, %v1028_v59  ;;  %v13136_v18 = vshrl.u32 %v1100_v6, 7 }
 0x103   : > { %v948_v50 = vmax.f32 %v932_v45, 0.0  ;;  %v933_v53 = vsub.f32 %v901_v46, %v917_v41  ;;  %v1051_v57 = vadd.f32 %v13036_v37, %v1029_v47 }
 0x104   : > { %v12294_v58 = vpop.eup %12293  ;;  %16846 = vst [vmem:[#allocation9_spill] sm:$0xff] %v13136_v18  ;;  %v16724_v29 = vsub.s32 0, %v13136_v18  ;;  %v16723_v49 = vsub.s32 2, %v13136_v18 }
 0x105   : > { %v980_v61 = vadd.f32 1e-05, %v948_v50  ;;  %v949_v0 = vmax.f32 %v933_v53, 0.0  ;;  %v1062_v2 = vpack.c.bf16 %v1051_v57, %v1050_v54  ;;  %v1008_v20 = vmul.f32 %v12294_v58, %v960_v48 }
 0x106   : > { %v12296_v30 = vpop.eup %12295  ;;  %v13142_v38 = vrot.slane %v1098_v34, %v16724_v29  ;;  %v13159_v44 = vrot.slane %v1098_v34, %v16723_v49 }
 0x107   : > { %12301 = vrsqrt.f32 %v980_v61  ;;  %v981_v21 = vadd.f32 1e-05, %v949_v0  ;;  %11907 = vmatprep.mubr.bf16.mxu1 %v1062_v2  ;;  %v1009_v36 = vmul.f32 %v12296_v30, %v961_v60  ;;  %v1030_v52 = vmul.f32 %v13024_v16, %v1008_v20 }
 0x108   : > { %1316 = vmatmul.mubr.bf16.gmra.mxu0 %v1062_v2 }
 0x109   : > { %12303 = vrsqrt.f32 %v981_v21  ;;  %1325 = vmatprep.mubr.bf16.mxu0 %v16740_v1  ;;  %v1031_v14 = vmul.f32 %v13024_v16, %v1009_v36  ;;  %v1052_v31 = vadd.f32 %v13036_v37, %v1030_v52 }
 0x10b   : > { %v1053_v4 = vadd.f32 %v13036_v37, %v1031_v14 }
 0x10c   : > { %v12298_v7 = vpop.eup %12297 }
 0x10d   : > { %v1063_v11 = vpack.c.bf16 %v1053_v4, %v1052_v31  ;;  %v1010_v8 = vmul.f32 %v12298_v7, %v962_v55 }
 0x10e   : > { %v12300_v33 = vpop.eup %12299 }
 0x10f   : > { %11908 = vmatmul.mubr.bf16.gmra.mxu1 %v1063_v11  ;;  %v1011_v23 = vmul.f32 %v12300_v33, %v963_v32  ;;  %v1032_v9 = vmul.f32 %v13024_v16, %v1010_v8 }
 0x110   : > { %1326 = vmatmul.mubr.bf16.gmra.mxu0 %v1063_v11  ;;  %v16722_v11 = vsub.s32 1, %v13136_v18 }
 0x111   : > { %1335 = vmatprep.mubr.bf16.mxu0 %v16740_v1  ;;  %v1033_v62 = vmul.f32 %v13024_v16, %v1011_v23  ;;  %v1054_v12 = vadd.f32 %v13036_v37, %v1032_v9 }
 0x112   : > { %v1107_v9 = vrot.slane %v1098_v34, %v16722_v11 }
 0x113   : > { %v1055_v13 = vadd.f32 %v13036_v37, %v1033_v62 }
 0x114   : > { %v12302_v63 = vpop.eup %12301 }
 0x115   : > { %v1064_v15 = vpack.c.bf16 %v1055_v13, %v1054_v12  ;;  %v1012_v19 = vmul.f32 %v12302_v63, %v964_v51 }
 0x116   : > { %v12304_v22 = vpop.eup %12303 }
 0x117   : > { %11911 = vmatprep.mubr.bf16.mxu1 %v1064_v15  ;;  %v1013_v25 = vmul.f32 %v12304_v22, %v965_v3  ;;  %v1034_v27 = vmul.f32 %v13024_v16, %v1012_v19 }
 0x118   : > { %1336 = vmatmul.mubr.bf16.gmra.mxu0 %v1064_v15 }
 0x119   : > { %1345 = vmatprep.mubr.bf16.mxu0 %v16740_v1  ;;  %v1035_v5 = vmul.f32 %v13024_v16, %v1013_v25  ;;  %v1056_v10 = vadd.f32 %v13036_v37, %v1034_v27 }
 0x11b   : > { %v1057_v28 = vadd.f32 %v13036_v37, %v1035_v5 }
 0x11d   : > { %v1065_v17 = vpack.c.bf16 %v1057_v28, %v1056_v10 }
 0x11f   : > { %11912 = vmatmul.mubr.bf16.gmra.mxu1 %v1065_v17 }
 0x120   : > { %1346 = vmatmul.mubr.bf16.gmra.mxu0 %v1065_v17 }
 0x1a8   : > { %v1277_v35 = vpop.f32.mrf.mxu0 }
 0x1a9   : > { %v1278_v24 = vadd.f32 %v1277_v35, %v13142_v38 }
 0x1aa   : > { %v13144_v39 = vpop.f32.mrf.mxu0 }
 0x1ac   : > { %v1281_v16 = vpop.f32.mrf.mxu0 }
 0x1ad   : > { %v1282_v37 = vadd.f32 %v1281_v16, %v13142_v38 }
 0x1ae   : > { %v13149_v40 = vpop.f32.mrf.mxu0 }
 0x1af   : > { %v13151_v26 = vpack.c.bf16 %v1282_v37, %v1278_v24 }
 0x1b0   : > { %v13153_v56 = vpop.f32.mrf.mxu0  ;;  %v13155_v42 = vpop.f32.mrf.mxu1 }
 0x1b2   : > { %v13161_v41 = vpop.f32.mrf.mxu0  ;;  %v1390_v43 = vpop.f32.mrf.mxu1 }
 0x1b3   : > { %v1391_v59 = vadd.f32 %v1390_v43, %v13159_v44 }
 0x1b4   : > { %v13164_v45 = vpop.f32.mrf.mxu0  ;;  %v13166_v46 = vpop.f32.mrf.mxu1 }
 0x1b6   : > { %v1293_v47 = vpop.f32.mrf.mxu0  ;;  %v1393_v48 = vpop.f32.mrf.mxu1 }
 0x1b7   : > { %v1394_v50 = vadd.f32 %v1393_v48, %v13159_v44 }
 0x1b8   : > { %v13169_v53 = vpop.f32.mrf.mxu0 }
 0x1b9   : > { %v13171_v54 = vpack.c.bf16 %v1394_v50, %v1391_v59 }
 0x1ba   : > { %v1299_v57 = vpop.f32.mrf.mxu0 }
 0x1bb   : > { %16847 = vst [vmem:[#allocation10_spill] sm:$0xff] %v13171_v54  ;;  %v1300_v48 = vadd.f32 %v1299_v57, %v1107_v9 }
 0x1bc   : > { %v13173_v58 = vpop.f32.mrf.mxu0 }
 0x1be   : > { %v1303_v60 = vpop.f32.mrf.mxu0 }
 0x1bf   : > { %v1304_v24 = vadd.f32 %v1303_v60, %v1107_v9 }
 0x1c0   : > { %v13175_v61 = vpop.f32.mrf.mxu0  ;;  %v13187_v4 = vpop.f32.mrf.mxu1 }
 0x1c2   : > { %v1309_v0 = vpop.f32.mrf.mxu0  ;;  %v13192_v8 = vpop.f32.mrf.mxu1 }
 0x1c3   : > { %v1310_v50 = vadd.f32 %v1309_v0, %v1107_v9 }
 0x1c4   : > { %v13177_v2 = vpop.f32.mrf.mxu0  ;;  %v13198_v62 = vpop.f32.mrf.mxu1 }
 0x1c6   : > { %v1313_v20 = vpop.f32.mrf.mxu0  ;;  %v13204_v19 = vpop.f32.mrf.mxu1 }
 0x1c7   : > { %v1314_v37 = vadd.f32 %v1313_v20, %v1107_v9  ;;  %v1280_v20 = vadd.f32 %v13144_v39, %v1107_v9  ;;  %v1288_v39 = vadd.f32 %v13153_v56, %v13142_v38  ;;  %v1308_v56 = vadd.f32 %v13175_v61, %v13142_v38 }
 0x1c8   : > { %v13179_v30 = vpop.f32.mrf.mxu0 }
 0x1c9   : > { %v13227_v60 = vpack.c.bf16 %v1314_v37, %v1310_v50  ;;  %v1318_v61 = vadd.f32 %v13179_v30, %v13142_v38  ;;  %v1415_v50 = vadd.f32 %v13187_v4, %v13159_v44  ;;  %v1399_v4 = vadd.f32 %v13155_v42, %v13159_v44 }
 0x1ca   : > { %v1319_v21 = vpop.f32.mrf.mxu0 }
 0x1cb   : > { %v1320_v6 = vadd.f32 %v1319_v21, %v1107_v9 }
 0x1cc   : > { %v13181_v36 = vpop.f32.mrf.mxu0 }
 0x1ce   : > { %v1323_v52 = vpop.f32.mrf.mxu0 }
 0x1cf   : > { %v13208_v27 = vpop.f32.mrf.mxu1  ;;  %v1324_v10 = vadd.f32 %v1323_v52, %v1107_v9  ;;  %v1284_v52 = vadd.f32 %v13149_v40, %v1107_v9  ;;  %v1292_v40 = vadd.f32 %v13164_v45, %v13142_v38  ;;  %v1312_v45 = vadd.f32 %v13177_v2, %v13142_v38 }
 0x1d0   : > { %v13183_v14 = vpop.f32.mrf.mxu0 }
 0x1d1   : > { %v13214_v16 = vpop.f32.mrf.mxu1  ;;  %v13216_v43 = vpack.c.bf16 %v1324_v10, %v1320_v6  ;;  %v13235_v0 = vpack.c.bf16 %v1284_v52, %v1280_v20  ;;  %v1431_v52 = vadd.f32 %v13208_v27, %v13159_v44 }
 0x1d2   : > { %v1329_v55 = vpop.f32.mrf.mxu0  ;;  %v1423_v27 = vadd.f32 %v13214_v16, %v13159_v44  ;;  %v12683_v16 = vmov 1983009808  }
 0x1d3   : > { %v1330_v25 = vadd.f32 %v1329_v55, %v1107_v9  ;;  %v11910_v21 = vpop.f32.mrf.mxu1  ;;  %v1294_v55 = vadd.f32 %v1293_v47, %v1107_v9 }
 0x1d4   : > { %v13185_v31 = vpop.f32.mrf.mxu0 }
 0x1d5   : > { %v1425_v57 = vpop.f32.mrf.mxu1  ;;  %v1332_v2 = vadd.f32 %v13185_v31, %v13142_v38 }
 0x1d6   : > { %v1333_v7 = vpop.f32.mrf.mxu0  ;;  %v1426_v20 = vadd.f32 %v1425_v57, %v13159_v44  ;;  %v1407_v57 = vadd.f32 %v13192_v8, %v13159_v44 }
 0x1d7   : > { %v1334_v3 = vadd.f32 %v1333_v7, %v1107_v9  ;;  %v13225_v7 = vpack.c.bf16 %v1304_v24, %v1300_v48 }
 0x1d8   : > { %v13189_v32 = vpop.f32.mrf.mxu0 }
 0x1d9   : > { %v13210_v28 = vpack.c.bf16 %v1334_v3, %v1330_v25  ;;  %v1328_v25 = vadd.f32 %v13183_v14, %v13142_v38  ;;  %v1338_v30 = vadd.f32 %v13189_v32, %v13142_v38 }
 0x1da   : > { %v1339_v33 = vpop.f32.mrf.mxu0 }
 0x1db   : > { %v1340_v12 = vadd.f32 %v1339_v33, %v1107_v9  ;;  %v1290_v33 = vadd.f32 %v13161_v41, %v1107_v9  ;;  %v13247_v41 = vpack.c.bf16 %v1292_v40, %v1288_v39  ;;  %v13338_v40 = vpack.c.bf16 %v1426_v20, %v1423_v27 }
 0x1dc   : > { %v13194_v23 = vpop.f32.mrf.mxu0  ;;  %v12684_v39 = vmov 1934713408  }
 0x1dd   : > { %v13239_v47 = vpack.c.bf16 %v1294_v55, %v1290_v33  ;;  %16849 = vst [vmem:[#allocation12_spill] sm:$0xff] %v13338_v40 }
 0x1de   : > { %v1343_v51 = vpop.f32.mrf.mxu0 }
 0x1df   : > { %v1344_v13 = vadd.f32 %v1343_v51, %v1107_v9  ;;  %v11913_v51 = vpop.f32.mrf.mxu1 }
 0x1e0   : > { %v13200_v63 = vpop.f32.mrf.mxu0  ;;  %v1447_v24 = vadd.f32 %v11913_v51, %v13159_v44  ;;  %v1573_v51 = vunpack.c.l.s4 %v12683_v16 }
 0x1e1   : > { %v13202_v15 = vpack.c.bf16 %v1344_v13, %v1340_v12  ;;  %v1438_v12 = vpop.f32.mrf.mxu1  ;;  %v1298_v13 = vadd.f32 %v13169_v53, %v13142_v38  ;;  %v1348_v14 = vadd.f32 %v13200_v63, %v13142_v38  ;;  %v1434_v63 = vadd.f32 %v11910_v21, %v13159_v44 }
 0x1e2   : > { %v1349_v22 = vpop.f32.mrf.mxu0  ;;  %v1439_v32 = vadd.f32 %v1438_v12, %v13159_v44 }
 0x1e3   : > { %3207 = vrot.lane.b32.xlu1 %v13202_v15, %s12682_s27  ;;  %v1350_v34 = vadd.f32 %v1349_v22, %v1107_v9  ;;  %v13263_v22 = vpack.c.bf16 %v1312_v45, %v1308_v56  ;;  %v11914_v53 = vpop.f32.mrf.mxu1  ;;  %v13323_v55 = vpack.c.bf16 %v1434_v63, %v1431_v52  ;;  %v3247_v63 = vshrl.u32 %v13216_v43, 16 }
 0x1e4   : > { %v1351_v5 = vpop.f32.mrf.mxu0 }
 0x1e5   : > { %v1352_v31 = vadd.f32 %v1351_v5, %v13142_v38  ;;  %v1441_v6 = vpop.f32.mrf.mxu1 }
 0x1e6   : > { %v1353_v17 = vpop.f32.mrf.mxu0  ;;  %v1442_v5 = vadd.f32 %v1441_v6, %v13159_v44 }
 0x1e7   : > { %v1354_v35 = vadd.f32 %v1353_v17, %v1107_v9  ;;  %3205 = vrot.lane.b32.xlu1 %v13210_v28, %s12682_s27  ;;  %v1302_v9 = vadd.f32 %v13173_v58, %v13142_v38  ;;  %v1322_v58 = vadd.f32 %v13181_v36, %v13142_v38  ;;  %v13279_v17 = vpack.c.bf16 %v1332_v2, %v1328_v25 }
 0x1e8   : > { %v1342_v36 = vadd.f32 %v13194_v23, %v13142_v38  ;;  %v1450_v23 = vadd.f32 %v11914_v53, %v13159_v44  ;;  %v1418_v38 = vadd.f32 %v13198_v62, %v13159_v44  ;;  %v13309_v48 = vpack.c.bf16 %v1442_v5, %v1439_v32 }
 0x1e9   : > { %v13218_v59 = vpack.c.bf16 %v1354_v35, %v1350_v34  ;;  %v13261_v3 = vpack.c.bf16 %v1302_v9, %v1298_v13  ;;  %v13277_v10 = vpack.c.bf16 %v1322_v58, %v1318_v61  ;;  %v13294_v35 = vpack.c.bf16 %v1352_v31, %v1348_v14 }
 0x1ea   : > { %v13292_v34 = vpack.c.bf16 %v1342_v36, %v1338_v30  ;;  %v13307_v37 = vpack.c.bf16 %v1450_v23, %v1447_v24  ;;  %v1402_v62 = vadd.f32 %v13166_v46, %v13159_v44  ;;  %v13321_v21 = vpack.c.bf16 %v1418_v38, %v1415_v50 }
 0x1eb   : > { %3203 = vrot.lane.b32.xlu1 %v13216_v43, %s12682_s27  ;;  %3209 = vrot.lane.b32.xlu0 %v13218_v59, %s12682_s27  ;;  %v1410_v46 = vadd.f32 %v13204_v19, %v13159_v44  ;;  %v1588_v19 = vunpack.c.l.s4 %v12684_v39  ;;  %v1574_v9 = vunpack.c.0.s8 %v1573_v51  ;;  %v13353_v44 = vpack.i.b16 %v16740_v1, %v16740_v1 }
 0x1ec   : > { %v13334_v33 = vpack.c.bf16 %v1402_v62, %v1399_v4  ;;  %v3263_v30 = vshrl.u32 %v13202_v15, 16  ;;  %v3255_v38 = vshrl.u32 %v13210_v28, 16  ;;  %v3271_v27 = vshrl.u32 %v13218_v59, 16 }
 0x1ed   : > { %v13346_v42 = vpack.c.bf16 %v1410_v46, %v1407_v57  ;;  %v1589_v45 = vunpack.c.0.s8 %v1588_v19  ;;  %16851 = vst [vmem:[#allocation14_spill] sm:$0xff] %v13353_v44  ;;  %v13356_v8 = vsub.s32 %v1574_v9, %v13136_v18 }
 0x1ee   : > { %16848 = vst [vmem:[#allocation11_spill] sm:$0xff] %v13334_v33 }
 0x1ef   : > { %3199 = vrot.lane.b32.xlu1 %v13225_v7, %s12682_s27  ;;  %3201 = vrot.lane.b32.xlu0 %v13227_v60, %s12682_s27  ;;  %16850 = vst [vmem:[#allocation13_spill] sm:$0xff] %v13346_v42  ;;  %v13359_v13 = vsub.s32 %v1589_v45, %v13136_v18 }
 0x1f3   : > { %3195 = vrot.lane.b32.xlu1 %v13235_v0, %s12682_s27  ;;  %3197 = vrot.lane.b32.xlu0 %v13239_v47, %s12682_s27 }
 0x1f7   : > { %1487 = vrot.lane.b32.xlu1 %v13247_v41, %s12682_s27  ;;  %1485 = vrot.lane.b32.xlu0 %v13151_v26, %s12682_s27 }
 0x1fb   : > { %1491 = vrot.lane.b32.xlu1 %v13263_v22, %s12682_s27  ;;  %1489 = vrot.lane.b32.xlu0 %v13261_v3, %s12682_s27 }
 0x1ff   : > { %1495 = vrot.lane.b32.xlu1 %v13279_v17, %s12682_s27  ;;  %1493 = vrot.lane.b32.xlu0 %v13277_v10, %s12682_s27 }
 0x203   : > { %1497 = vrot.lane.b32.xlu0 %v13292_v34, %s12682_s27  ;;  %1499 = vrot.lane.b32.xlu1 %v13294_v35, %s12682_s27 }
 0x207   : > { %4913 = vrot.lane.b32.xlu0 %v13307_v37, %s12682_s27  ;;  %4911 = vrot.lane.b32.xlu1 %v13309_v48, %s12682_s27 }
 0x20b   : > { %4905 = vrot.lane.b32.xlu0 %v13321_v21, %s12682_s27  ;;  %4909 = vrot.lane.b32.xlu1 %v13323_v55, %s12682_s27 }
 0x20f   : > { %4901 = vrot.lane.b32.xlu0 %v13334_v33, %s12682_s27  ;;  %4907 = vrot.lane.b32.xlu1 %v13338_v40, %s12682_s27 }
 0x213   : > { %4903 = vrot.lane.b32.xlu1 %v13346_v42, %s12682_s27 }
 0x255   : > { %v3208_v31 = vpop.permute.xlu1 %3207 }
 0x256   : > { %v3261_v14 = vpack.i.b16 %v3208_v31, %v13202_v15  ;;  %v3264_v23 = vshrl.u32 %v3208_v31, 16 }
 0x258   : > { %v3265_v52 = vpack.i.b16 %v3264_v23, %v3263_v30  ;;  %v3863_v62 = vcombine.high %v3261_v14, %v13353_v44  ;;  %v3870_v20 = vrot.slane %v3261_v14, %v13356_v8 }
 0x259   : > { %v3206_v46 = vpop.permute.xlu1 %3205 }
 0x25a   : > { %v3877_v16 = vrot.slane %v3863_v62, %v13356_v8  ;;  %v3878_v51 = vcombine.high %v3870_v20, %v16740_v1  ;;  %v3912_v39 = vcombine.high %v3265_v52, %v13353_v44  ;;  %v3919_v9 = vrot.slane %v3265_v52, %v13356_v8 }
 0x25b   : > { %v3253_v45 = vpack.i.b16 %v3206_v46, %v13210_v28  ;;  %v3256_v31 = vshrl.u32 %v3206_v46, 16  ;;  %v3885_v14 = vrot.slane %v3870_v20, %v13359_v13 }
 0x25c   : > { %v3892_v23 = vrot.slane %v3878_v51, %v13359_v13  ;;  %v3893_v11 = vcombine.high %v3877_v16, %v16740_v1  ;;  %v3926_v62 = vrot.slane %v3912_v39, %v13356_v8  ;;  %v3900_v49 = vrot.slane %v3877_v16, %v13359_v13 }
 0x25d   : > { %v3927_v29 = vcombine.high %v3919_v9, %v16740_v1  ;;  %v3765_v58 = vcombine.high %v3253_v45, %v13353_v44  ;;  %v3934_v46 = vrot.slane %v3919_v9, %v13359_v13  ;;  %v3257_v36 = vpack.i.b16 %v3256_v31, %v3255_v38 }
 0x25e   : > { %v3907_v28 = vrot.slane %v3893_v11, %v13359_v13  ;;  %v3942_v20 = vcombine.high %v3926_v62, %v16740_v1  ;;  %v4647_v30 = vcombine.low %v3885_v14, %v3892_v23  ;;  %v11453_v57 = vcombine.high %v3885_v14, %v3892_v23 }
 0x25f   : > { %v3941_v51 = vrot.slane %v3927_v29, %v13359_v13  ;;  %v3772_v39 = vrot.slane %v3253_v45, %v13356_v8  ;;  %v3779_v52 = vrot.slane %v3765_v58, %v13356_v8  ;;  %v13408_v11 = vrot.slane %v3926_v62, %v13359_v13  ;;  %v3210_v58 = vpop.permute.xlu0 %3209 }
 0x260   : > { %v13404_v16 = vrot.slane %v3942_v20, %v13359_v13  ;;  %v4663_v19 = vcombine.low %v3900_v49, %v3907_v28  ;;  %v11454_v4 = vcombine.high %v3900_v49, %v3907_v28  ;;  %v13411_v9 = vrot.slane %v4647_v30, %v13356_v8 }
 0x261   : > { %v4696_v15 = vcombine.low %v3934_v46, %v3941_v51  ;;  %v3780_v29 = vcombine.high %v3772_v39, %v16740_v1  ;;  %v13415_v38 = vrot.slane %v11453_v57, %v13356_v8  ;;  %v11455_v49 = vcombine.high %v3934_v46, %v3941_v51 }
 0x262   : > { %v13418_v45 = vrot.slane %v4663_v19, %v13356_v8  ;;  %v13421_v31 = vrot.slane %v11454_v4, %v13356_v8  ;;  %v3787_v23 = vrot.slane %v3772_v39, %v13359_v13  ;;  %v3795_v19 = vcombine.high %v3779_v52, %v16740_v1 }
 0x263   : > { %v3794_v62 = vrot.slane %v3780_v29, %v13359_v13  ;;  %v13430_v57 = vrot.slane %v4696_v15, %v13356_v8  ;;  %v3814_v4 = vcombine.high %v3257_v36, %v13353_v44  ;;  %v3821_v28 = vrot.slane %v3257_v36, %v13356_v8  ;;  %v3202_v56 = vpop.permute.xlu0 %3201 }
 0x264   : > { %v3269_v51 = vpack.i.b16 %v3210_v58, %v13218_v59  ;;  %v3272_v14 = vshrl.u32 %v3210_v58, 16  ;;  %v3802_v30 = vrot.slane %v3779_v52, %v13359_v13  ;;  %v3809_v39 = vrot.slane %v3795_v19, %v13359_v13 }
 0x265   : > { %v4549_v46 = vcombine.low %v3787_v23, %v3794_v62  ;;  %v11449_v20 = vcombine.high %v3787_v23, %v3794_v62  ;;  %v3828_v29 = vrot.slane %v3814_v4, %v13356_v8  ;;  %v3829_v15 = vcombine.high %v3821_v28, %v16740_v1 }
 0x266   : > { %v13441_v50 = vrot.slane %v11455_v49, %v13356_v8  ;;  %v3836_v32 = vrot.slane %v3821_v28, %v13359_v13  ;;  %v3273_v24 = vpack.i.b16 %v3272_v14, %v3271_v27  ;;  %v3961_v36 = vcombine.high %v3269_v51, %v13353_v44 }
 0x267   : > { %v3843_v23 = vrot.slane %v3829_v15, %v13359_v13  ;;  %v3844_v59 = vcombine.high %v3828_v29, %v16740_v1  ;;  %v13448_v52 = vrot.slane %v4549_v46, %v13356_v8  ;;  %v4565_v58 = vcombine.low %v3802_v30, %v3809_v39 }
 0x268   : > { %v13451_v62 = vrot.slane %v11449_v20, %v13356_v8  ;;  %v11450_v19 = vcombine.high %v3802_v30, %v3809_v39  ;;  %v3968_v49 = vrot.slane %v3269_v51, %v13356_v8  ;;  %v3975_v4 = vrot.slane %v3961_v36, %v13356_v8  ;;  %v3204_v51 = vpop.permute.xlu1 %3203 }
 0x269   : > { %v13456_v27 = vrot.slane %v3844_v59, %v13359_v13  ;;  %v4598_v14 = vcombine.low %v3836_v32, %v3843_v23  ;;  %v11451_v28 = vcombine.high %v3836_v32, %v3843_v23  ;;  %v4010_v15 = vcombine.high %v3273_v24, %v13353_v44 }
 0x26a   : > { %v13460_v25 = vrot.slane %v3828_v29, %v13359_v13  ;;  %v13463_v46 = vrot.slane %v4565_v58, %v13356_v8  ;;  %v3976_v20 = vcombine.high %v3968_v49, %v16740_v1  ;;  %v3991_v30 = vcombine.high %v3975_v4, %v16740_v1 }
 0x26b   : > { %16852 = vst [vmem:[#allocation15_spill] sm:$0xff] %v13456_v27  ;;  %v13468_v39 = vrot.slane %v11450_v19, %v13356_v8  ;;  %v13471_v36 = vrot.slane %v4598_v14, %v13356_v8  ;;  %v13474_v32 = vrot.slane %v11451_v28, %v13356_v8  ;;  %v3983_v29 = vrot.slane %v3968_v49, %v13359_v13 }
 0x26c   : > { %v3990_v59 = vrot.slane %v3976_v20, %v13359_v13  ;;  %v4005_v58 = vrot.slane %v3991_v30, %v13359_v13  ;;  %v4017_v61 = vrot.slane %v3273_v24, %v13356_v8  ;;  %v3998_v19 = vrot.slane %v3975_v4, %v13359_v13 }
 0x26d   : > { %16853 = vst [vmem:[#allocation16_spill] sm:$0xff] %v13471_v36  ;;  %16854 = vst [vmem:[#allocation17_spill] sm:$0xff] %v13474_v32  ;;  %v4024_v14 = vrot.slane %v4010_v15, %v13356_v8  ;;  %v3245_v12 = vpack.i.b16 %v3204_v51, %v13216_v43  ;;  %v3248_v28 = vshrl.u32 %v3204_v51, 16  ;;  %v3237_v24 = vpack.i.b16 %v3202_v56, %v13227_v60 }
 0x26e   : > { %v4025_v53 = vcombine.high %v4017_v61, %v16740_v1  ;;  %v4745_v23 = vcombine.low %v3983_v29, %v3990_v59  ;;  %v11457_v2 = vcombine.high %v3983_v29, %v3990_v59  ;;  %v4761_v30 = vcombine.low %v3998_v19, %v4005_v58 }
 0x26f   : > { %v4040_v20 = vcombine.high %v4024_v14, %v16740_v1  ;;  %v11458_v6 = vcombine.high %v3998_v19, %v4005_v58  ;;  %v4032_v4 = vrot.slane %v4017_v61, %v13359_v13  ;;  %v13493_v5 = vrot.slane %v4024_v14, %v13359_v13 }
 0x270   : > { %v4039_v15 = vrot.slane %v4025_v53, %v13359_v13  ;;  %v3249_v51 = vpack.i.b16 %v3248_v28, %v3247_v63  ;;  %v13501_v29 = vrot.slane %v4745_v23, %v13356_v8  ;;  %v13504_v59 = vrot.slane %v11457_v2, %v13356_v8 }
 0x271   : > { %v13498_v49 = vrot.slane %v4040_v20, %v13359_v13  ;;  %v3667_v58 = vcombine.high %v3245_v12, %v13353_v44  ;;  %v13508_v61 = vrot.slane %v4761_v30, %v13356_v8  ;;  %v3674_v19 = vrot.slane %v3245_v12, %v13356_v8 }
 0x272   : > { %v4794_v53 = vcombine.low %v4032_v4, %v4039_v15  ;;  %v3716_v43 = vcombine.high %v3249_v51, %v13353_v44  ;;  %v13513_v63 = vrot.slane %v11458_v6, %v13356_v8  ;;  %v11459_v14 = vcombine.high %v4032_v4, %v4039_v15 }
 0x273   : > { %v3681_v23 = vrot.slane %v3667_v58, %v13356_v8  ;;  %v3723_v28 = vrot.slane %v3249_v51, %v13356_v8  ;;  %v3682_v12 = vcombine.high %v3674_v19, %v16740_v1  ;;  %v3689_v18 = vrot.slane %v3674_v19, %v13359_v13 }
 0x274   : > { %v13518_v2 = vrot.slane %v4794_v53, %v13356_v8  ;;  %v3730_v4 = vrot.slane %v3716_v43, %v13356_v8  ;;  %v3240_v53 = vshrl.u32 %v3202_v56, 16  ;;  %v3569_v20 = vcombine.high %v3237_v24, %v13353_v44 }
 0x275   : > { %v3697_v6 = vcombine.high %v3681_v23, %v16740_v1  ;;  %v3731_v15 = vcombine.high %v3723_v28, %v16740_v1  ;;  %v3696_v51 = vrot.slane %v3682_v12, %v13359_v13  ;;  %v3704_v58 = vrot.slane %v3681_v23, %v13359_v13 }
 0x276   : > { %v3738_v30 = vrot.slane %v3723_v28, %v13359_v13  ;;  %v3746_v19 = vcombine.high %v3730_v4, %v16740_v1  ;;  %v16855_v43 = vshrl.u32 %v13227_v60, 16  ;;  %v3576_v12 = vrot.slane %v3237_v24, %v13356_v8 }
 0x277   : > { %v3711_v54 = vrot.slane %v3697_v6, %v13359_v13  ;;  %v3745_v42 = vrot.slane %v3731_v15, %v13359_v13  ;;  %v4451_v40 = vcombine.low %v3689_v18, %v3696_v51  ;;  %v11445_v33 = vcombine.high %v3689_v18, %v3696_v51 }
 0x278   : > { %v3241_v36 = vpack.i.b16 %v3240_v53, %v16855_v43  ;;  %v13540_v23 = vrot.slane %v3746_v19, %v13359_v13  ;;  %v13543_v6 = vrot.slane %v11459_v14, %v13356_v8  ;;  %v13546_v28 = vrot.slane %v3730_v4, %v13359_v13  ;;  %v3200_v14 = vpop.permute.xlu1 %3199  ;;  %v3198_v53 = vpop.permute.xlu0 %3197 }
 0x279   : > { %v4467_v56 = vcombine.low %v3704_v58, %v3711_v54  ;;  %v11446_v32 = vcombine.high %v3704_v58, %v3711_v54  ;;  %v4500_v27 = vcombine.low %v3738_v30, %v3745_v42  ;;  %v11447_v15 = vcombine.high %v3738_v30, %v3745_v42 }
 0x27a   : > { %16856 = vst [vmem:[#allocation18_spill] sm:$0xff] %v13540_v23  ;;  %16857 = vst [vmem:[#allocation19_spill] sm:$0xff] %v13546_v28  ;;  %v3583_v18 = vrot.slane %v3569_v20, %v13356_v8  ;;  %v13550_v60 = vrot.slane %v4451_v40, %v13356_v8  ;;  %v13553_v24 = vrot.slane %v11445_v33, %v13356_v8 }
 0x27b   : > { %v13556_v51 = vrot.slane %v4467_v56, %v13356_v8  ;;  %v13559_v54 = vrot.slane %v11446_v32, %v13356_v8  ;;  %v13562_v58 = vrot.slane %v4500_v27, %v13356_v8  ;;  %v13565_v42 = vrot.slane %v11447_v15, %v13356_v8 }
 0x27c   : > { %16858 = vst [vmem:[#allocation20_spill] sm:$0xff] %v13550_v60  ;;  %16859 = vst [vmem:[#allocation21_spill] sm:$0xff] %v13553_v24  ;;  %v3584_v20 = vcombine.high %v3576_v12, %v16740_v1  ;;  %v3599_v30 = vcombine.high %v3583_v18, %v16740_v1  ;;  %v3618_v32 = vcombine.high %v3241_v36, %v13353_v44  ;;  %v3232_v56 = vshrl.u32 %v3200_v14, 16 }
 0x27d   : > { %16860 = vst [vmem:[#allocation22_spill] sm:$0xff] %v13556_v51  ;;  %16861 = vst [vmem:[#allocation23_spill] sm:$0xff] %v13559_v54  ;;  %v3625_v4 = vrot.slane %v3241_v36, %v13356_v8  ;;  %v3591_v27 = vrot.slane %v3576_v12, %v13359_v13  ;;  %v3229_v43 = vpack.i.b16 %v3200_v14, %v13225_v7 }
 0x27e   : > { %16862 = vst [vmem:[#allocation24_spill] sm:$0xff] %v13562_v58  ;;  %16863 = vst [vmem:[#allocation25_spill] sm:$0xff] %v13565_v42  ;;  %v3598_v19 = vrot.slane %v3584_v20, %v13359_v13  ;;  %v3606_v15 = vrot.slane %v3583_v18, %v13359_v13  ;;  %v3613_v40 = vrot.slane %v3599_v30, %v13359_v13 }
 0x27f   : > { %v3632_v33 = vrot.slane %v3618_v32, %v13356_v8  ;;  %v3633_v58 = vcombine.high %v3625_v4, %v16740_v1  ;;  %v3471_v36 = vcombine.high %v3229_v43, %v13353_v44  ;;  %v3221_v28 = vpack.i.b16 %v3198_v53, %v13239_v47 }
 0x280   : > { %v4353_v42 = vcombine.low %v3591_v27, %v3598_v19  ;;  %v11441_v23 = vcombine.high %v3591_v27, %v3598_v19  ;;  %v3640_v12 = vrot.slane %v3625_v4, %v13359_v13  ;;  %v4369_v51 = vcombine.low %v3606_v15, %v3613_v40 }
 0x281   : > { %v3647_v20 = vrot.slane %v3633_v58, %v13359_v13  ;;  %v3648_v14 = vcombine.high %v3632_v33, %v16740_v1  ;;  %v13588_v18 = vrot.slane %v3632_v33, %v13359_v13  ;;  %v11442_v30 = vcombine.high %v3606_v15, %v3613_v40 }
 0x282   : > { %v16865_v32 = vshrl.u32 %v13225_v7, 16  ;;  %v3478_v27 = vrot.slane %v3229_v43, %v13356_v8  ;;  %v13597_v60 = vrot.slane %v4353_v42, %v13356_v8  ;;  %v13600_v1 = vrot.slane %v11441_v23, %v13356_v8 }
 0x283   : > { %16864 = vst [vmem:[#allocation26_spill] sm:$0xff] %v13588_v18  ;;  %v13594_v19 = vrot.slane %v3648_v14, %v13359_v13  ;;  %v4402_v4 = vcombine.low %v3640_v12, %v3647_v20  ;;  %v11443_v58 = vcombine.high %v3640_v12, %v3647_v20  ;;  %v13603_v33 = vrot.slane %v4369_v51, %v13356_v8 }
 0x284   : > { %v3233_v54 = vpack.i.b16 %v3232_v56, %v16865_v32  ;;  %16867 = vst [vmem:[#allocation28_spill] sm:$0xff] %v13597_v60  ;;  %16868 = vst [vmem:[#allocation29_spill] sm:$0xff] %v13600_v1  ;;  %v3485_v40 = vrot.slane %v3471_v36, %v13356_v8  ;;  %v16870_v7 = vmov 0   ;;  %v13608_v43 = vrot.slane %v11442_v30, %v13356_v8 }
 0x285   : > { %16866 = vst [vmem:[#allocation27_spill] sm:$0xff] %v13594_v19  ;;  %16869 = vst [vmem:[#allocation30_spill] sm:$0xff] %v13603_v33  ;;  %v3486_v56 = vcombine.high %v3478_v27, %v16870_v7  ;;  %v13611_v15 = vrot.slane %v4402_v4, %v13356_v8  ;;  %v13614_v42 = vrot.slane %v11443_v58, %v13356_v8  ;;  %v3224_v30 = vshrl.u32 %v3198_v53, 16 }
 0x286   : > { %16871 = vst [vmem:[#allocation31_spill] sm:$0xff] %v13608_v43  ;;  %v3493_v12 = vrot.slane %v3478_v27, %v13359_v13  ;;  %v3501_v36 = vcombine.high %v3485_v40, %v16870_v7  ;;  %v3520_v20 = vcombine.high %v3233_v54, %v13353_v44  ;;  %v3527_v14 = vrot.slane %v3233_v54, %v13356_v8 }
 0x287   : > { %16872 = vst [vmem:[#allocation32_spill] sm:$0xff] %v13611_v15  ;;  %16873 = vst [vmem:[#allocation33_spill] sm:$0xff] %v13614_v42  ;;  %v3500_v51 = vrot.slane %v3486_v56, %v13359_v13  ;;  %v3373_v32 = vcombine.high %v3221_v28, %v13353_v44  ;;  %v3380_v4 = vrot.slane %v3221_v28, %v13356_v8 }
 0x288   : > { %v3515_v58 = vrot.slane %v3501_v36, %v13359_v13  ;;  %v3534_v27 = vrot.slane %v3520_v20, %v13356_v8  ;;  %v3508_v23 = vrot.slane %v3485_v40, %v13359_v13  ;;  %v3535_v33 = vcombine.high %v3527_v14, %v16870_v7 }
 0x289   : > { %v4255_v15 = vcombine.low %v3493_v12, %v3500_v51  ;;  %v11437_v42 = vcombine.high %v3493_v12, %v3500_v51  ;;  %v3387_v54 = vrot.slane %v3373_v32, %v13356_v8  ;;  %v3542_v53 = vrot.slane %v3527_v14, %v13359_v13 }
 0x28a   : > { %v3550_v43 = vcombine.high %v3534_v27, %v16870_v7  ;;  %v13635_v28 = vrot.slane %v3534_v27, %v13359_v13  ;;  %v16875_v36 = vshrl.u32 %v13239_v47, 16  ;;  %v3549_v12 = vrot.slane %v3535_v33, %v13359_v13 }
 0x28b   : > { %v4271_v51 = vcombine.low %v3508_v23, %v3515_v58  ;;  %v11438_v56 = vcombine.high %v3508_v23, %v3515_v58  ;;  %v3388_v40 = vcombine.high %v3380_v4, %v16870_v7  ;;  %v13645_v32 = vrot.slane %v4255_v15, %v13356_v8 }
 0x28c   : > { %16874 = vst [vmem:[#allocation34_spill] sm:$0xff] %v13635_v28  ;;  %v3225_v20 = vpack.i.b16 %v3224_v30, %v16875_v36  ;;  %v13642_v19 = vrot.slane %v3550_v43, %v13359_v13  ;;  %v13648_v14 = vrot.slane %v11437_v42, %v13356_v8  ;;  %v3403_v27 = vcombine.high %v3387_v54, %v16870_v7  ;;  %v3196_v42 = vpop.permute.xlu1 %3195 }
 0x28d   : > { %16877 = vst [vmem:[#allocation36_spill] sm:$0xff] %v13645_v32  ;;  %v4304_v18 = vcombine.low %v3542_v53, %v3549_v12  ;;  %v11439_v47 = vcombine.high %v3542_v53, %v3549_v12  ;;  %v3395_v30 = vrot.slane %v3380_v4, %v13359_v13  ;;  %v3410_v33 = vrot.slane %v3387_v54, %v13359_v13  ;;  %v1486_v53 = vpop.permute.xlu0 %1485 }
 0x28e   : > { %16876 = vst [vmem:[#allocation35_spill] sm:$0xff] %v13642_v19  ;;  %16878 = vst [vmem:[#allocation37_spill] sm:$0xff] %v13648_v14  ;;  %v13654_v23 = vrot.slane %v4271_v51, %v13356_v8  ;;  %v13657_v43 = vrot.slane %v11438_v56, %v13356_v8  ;;  %v3402_v15 = vrot.slane %v3388_v40, %v13359_v13 }
 0x28f   : > { %v3417_v58 = vrot.slane %v3403_v27, %v13359_v13  ;;  %v3422_v4 = vcombine.high %v3225_v20, %v13353_v44  ;;  %v3429_v54 = vrot.slane %v3225_v20, %v13356_v8  ;;  %v13668_v12 = vrot.slane %v4304_v18, %v13356_v8 }
 0x290   : > { %16879 = vst [vmem:[#allocation38_spill] sm:$0xff] %v13654_v23  ;;  %16880 = vst [vmem:[#allocation39_spill] sm:$0xff] %v13657_v43  ;;  %v4157_v56 = vcombine.low %v3395_v30, %v3402_v15  ;;  %v11433_v51 = vcombine.high %v3395_v30, %v3402_v15  ;;  %v13671_v40 = vrot.slane %v11439_v47, %v13356_v8 }
 0x291   : > { %16881 = vst [vmem:[#allocation40_spill] sm:$0xff] %v13668_v12  ;;  %v4173_v23 = vcombine.low %v3410_v33, %v3417_v58  ;;  %v3436_v27 = vrot.slane %v3422_v4, %v13356_v8  ;;  %v3437_v36 = vcombine.high %v3429_v54, %v16870_v7  ;;  %v3213_v43 = vpack.i.b16 %v3196_v42, %v13235_v0 }
 0x292   : > { %16882 = vst [vmem:[#allocation41_spill] sm:$0xff] %v13671_v40  ;;  %v3444_v19 = vrot.slane %v3429_v54, %v13359_v13  ;;  %v13678_v20 = vrot.slane %v4157_v56, %v13356_v8  ;;  %v13681_v18 = vrot.slane %v11433_v51, %v13356_v8  ;;  %v11434_v30 = vcombine.high %v3410_v33, %v3417_v58 }
 0x293   : > { %v3451_v15 = vrot.slane %v3437_v36, %v13359_v13  ;;  %v3452_v47 = vcombine.high %v3436_v27, %v16870_v7  ;;  %v13686_v4 = vrot.slane %v4173_v23, %v13356_v8  ;;  %v3216_v12 = vshrl.u32 %v3196_v42, 16 }
 0x294   : > { %16883 = vst [vmem:[#allocation42_spill] sm:$0xff] %v13678_v20  ;;  %16884 = vst [vmem:[#allocation43_spill] sm:$0xff] %v13681_v18  ;;  %v3275_v40 = vcombine.high %v3213_v43, %v13353_v44  ;;  %v3282_v28 = vrot.slane %v3213_v43, %v13356_v8  ;;  %v1503_v54 = vpack.i.b16 %v1486_v53, %v13151_v26  ;;  %v1506_v56 = vshrl.u32 %v1486_v53, 16 }
 0x295   : > { %16885 = vst [vmem:[#allocation44_spill] sm:$0xff] %v13686_v4  ;;  %v13692_v20 = vrot.slane %v3452_v47, %v13359_v13  ;;  %v4206_v51 = vcombine.low %v3444_v19, %v3451_v15  ;;  %v11435_v33 = vcombine.high %v3444_v19, %v3451_v15  ;;  %v16887_v58 = vshrl.u32 %v13235_v0, 16 }
 0x296   : > { %v13697_v18 = vrot.slane %v3436_v27, %v13359_v13  ;;  %v13700_v23 = vrot.slane %v11434_v30, %v13356_v8  ;;  %v3289_v42 = vrot.slane %v3275_v40, %v13356_v8  ;;  %v3290_v43 = vcombine.high %v3282_v28, %v16870_v7 }
 0x297   : > { %16886 = vst [vmem:[#allocation45_spill] sm:$0xff] %v13692_v20  ;;  %v3217_v36 = vpack.i.b16 %v3216_v12, %v16887_v58  ;;  %v13705_v53 = vrot.slane %v4206_v51, %v13356_v8  ;;  %v13708_v47 = vrot.slane %v11435_v33, %v13356_v8  ;;  %v3297_v19 = vrot.slane %v3282_v28, %v13359_v13 }
 0x298   : > { %16888 = vst [vmem:[#allocation46_spill] sm:$0xff] %v13697_v18  ;;  %16889 = vst [vmem:[#allocation47_spill] sm:$0xff] %v13700_v23  ;;  %v16892_v0 = vshrl.u32 %v13151_v26, 16  ;;  %v3304_v30 = vrot.slane %v3290_v43, %v13359_v13  ;;  %v3305_v40 = vcombine.high %v3289_v42, %v16870_v7  ;;  %v1571_v58 = vcombine.high %v1503_v54, %v13353_v44 }
 0x299   : > { %16890 = vst [vmem:[#allocation48_spill] sm:$0xff] %v13705_v53  ;;  %16891 = vst [vmem:[#allocation49_spill] sm:$0xff] %v13708_v47  ;;  %v3324_v15 = vcombine.high %v3217_v36, %v13353_v44  ;;  %v3331_v33 = vrot.slane %v3217_v36, %v13356_v8  ;;  %v1578_v28 = vrot.slane %v1503_v54, %v13356_v8 }
 0x29a   : > { %v1507_v12 = vpack.i.b16 %v1506_v56, %v16892_v0  ;;  %v3319_v26 = vrot.slane %v3305_v40, %v13359_v13  ;;  %v4059_v0 = vcombine.low %v3297_v19, %v3304_v30  ;;  %v11429_v27 = vcombine.high %v3297_v19, %v3304_v30 }
 0x29b   : > { %v3338_v56 = vrot.slane %v3324_v15, %v13356_v8  ;;  %v3312_v43 = vrot.slane %v3289_v42, %v13359_v13  ;;  %v3339_v53 = vcombine.high %v3331_v33, %v16870_v7  ;;  %v1585_v47 = vrot.slane %v1571_v58, %v13356_v8 }
 0x29c   : > { %v1586_v51 = vcombine.high %v1578_v28, %v16870_v7  ;;  %v3346_v36 = vrot.slane %v3331_v33, %v13359_v13  ;;  %v1620_v40 = vcombine.high %v1507_v12, %v13353_v44  ;;  %v13737_v19 = vrot.slane %v4059_v0, %v13356_v8 }
 0x29d   : > { %v3354_v20 = vcombine.high %v3338_v56, %v16870_v7  ;;  %v13732_v54 = vrot.slane %v3338_v56, %v13359_v13  ;;  %v3353_v15 = vrot.slane %v3339_v53, %v13359_v13  ;;  %v4075_v42 = vcombine.low %v3312_v43, %v3319_v26 }
 0x29e   : > { %16894 = vst [vmem:[#allocation51_spill] sm:$0xff] %v13737_v19  ;;  %v11430_v30 = vcombine.high %v3312_v43, %v3319_v26  ;;  %v13743_v18 = vrot.slane %v11429_v27, %v13356_v8  ;;  %v1600_v33 = vrot.slane %v1586_v51, %v13359_v13  ;;  %v1601_v56 = vcombine.high %v1585_v47, %v16870_v7 }
 0x29f   : > { %16893 = vst [vmem:[#allocation50_spill] sm:$0xff] %v13732_v54  ;;  %v13740_v58 = vrot.slane %v3354_v20, %v13359_v13  ;;  %v4108_v4 = vcombine.low %v3346_v36, %v3353_v15  ;;  %v11431_v23 = vcombine.high %v3346_v36, %v3353_v15  ;;  %v1593_v32 = vrot.slane %v1578_v28, %v13359_v13 }
 0x2a0   : > { %16896 = vst [vmem:[#allocation53_spill] sm:$0xff] %v13743_v18  ;;  %v1608_v53 = vrot.slane %v1585_v47, %v13359_v13  ;;  %v13750_v0 = vrot.slane %v4075_v42, %v13356_v8  ;;  %v13753_v26 = vrot.slane %v11430_v30, %v13356_v8  ;;  %v1615_v20 = vrot.slane %v1601_v56, %v13359_v13  ;;  %v1488_v47 = vpop.permute.xlu1 %1487 }
 0x2a1   : > { %16895 = vst [vmem:[#allocation52_spill] sm:$0xff] %v13740_v58  ;;  %v1627_v27 = vrot.slane %v1507_v12, %v13356_v8  ;;  %v1634_v28 = vrot.slane %v1620_v40, %v13356_v8  ;;  %v2355_v36 = vcombine.low %v1593_v32, %v1600_v33  ;;  %v13763_v15 = vrot.slane %v4108_v4, %v13356_v8  ;;  %v1490_v58 = vpop.permute.xlu0 %1489 }
 0x2a2   : > { %16897 = vst [vmem:[#allocation54_spill] sm:$0xff] %v13750_v0  ;;  %16898 = vst [vmem:[#allocation55_spill] sm:$0xff] %v13753_v26  ;;  %v11397_v30 = vcombine.high %v1593_v32, %v1600_v33  ;;  %v2371_v0 = vcombine.low %v1608_v53, %v1615_v20  ;;  %v13767_v56 = vrot.slane %v11431_v23, %v13356_v8  ;;  %v1528_v54 = vshrl.u32 %v1490_v58, 16 }
 0x2a3   : > { %16899 = vst [vmem:[#allocation56_spill] sm:$0xff] %v13763_v15  ;;  %v1635_v42 = vcombine.high %v1627_v27, %v16870_v7  ;;  %v13770_v12 = vrot.slane %v1627_v27, %v13359_v13  ;;  %v1650_v51 = vcombine.high %v1634_v28, %v16870_v7  ;;  %v11398_v43 = vcombine.high %v1608_v53, %v1615_v20 }
 0x2a4   : > { %16900 = vst [vmem:[#allocation57_spill] sm:$0xff] %v13767_v56  ;;  %v13777_v4 = vrot.slane %v1634_v28, %v13359_v13  ;;  %v13780_v15 = vrot.slane %v2355_v36, %v13356_v8  ;;  %v1517_v32 = vpack.i.b16 %v1488_v47, %v13247_v41  ;;  %v13787_v33 = vrot.slane %v11397_v30, %v13356_v8 }
 0x2a5   : > { %v13774_v40 = vrot.slane %v1635_v42, %v13359_v13  ;;  %v13784_v23 = vrot.slane %v1650_v51, %v13359_v13  ;;  %v13790_v53 = vrot.slane %v2371_v0, %v13356_v8  ;;  %v1520_v20 = vshrl.u32 %v1488_v47, 16 }
 0x2a6   : > { %16901 = vst [vmem:[#allocation58_spill] sm:$0xff] %v13777_v4  ;;  %v1669_v28 = vcombine.high %v1517_v32, %v13353_v44  ;;  %v1676_v36 = vrot.slane %v1517_v32, %v13356_v8  ;;  %v1525_v42 = vpack.i.b16 %v1490_v58, %v13261_v3  ;;  %v13798_v56 = vrot.slane %v11398_v43, %v13356_v8 }
 0x2a7   : > { %16902 = vst [vmem:[#allocation59_spill] sm:$0xff] %v13784_v23  ;;  %16903 = vst [vmem:[#allocation60_spill] sm:$0xff] %v13790_v53  ;;  %v2404_v27 = vcombine.low %v13770_v12, %v13774_v40  ;;  %v11399_v51 = vcombine.high %v13770_v12, %v13774_v40  ;;  %v16904_v30 = vshrl.u32 %v13247_v41, 16 }
 0x2a8   : > { %v1683_v32 = vrot.slane %v1669_v28, %v13356_v8  ;;  %v1684_v19 = vcombine.high %v1676_v36, %v16870_v7  ;;  %v1691_v18 = vrot.slane %v1676_v36, %v13359_v13  ;;  %v1767_v28 = vcombine.high %v1525_v42, %v13353_v44 }
 0x2a9   : > { %v1521_v0 = vpack.i.b16 %v1520_v20, %v16904_v30  ;;  %v13811_v43 = vrot.slane %v2404_v27, %v13356_v8  ;;  %v16906_v20 = vshrl.u32 %v13261_v3, 16  ;;  %v1774_v36 = vrot.slane %v1525_v42, %v13356_v8 }
 0x2aa   : > { %v1698_v58 = vrot.slane %v1684_v19, %v13359_v13  ;;  %v1699_v40 = vcombine.high %v1683_v32, %v16870_v7  ;;  %v1706_v26 = vrot.slane %v1683_v32, %v13359_v13 }
 0x2ab   : > { %16905 = vst [vmem:[#allocation61_spill] sm:$0xff] %v13811_v43  ;;  %v1718_v12 = vcombine.high %v1521_v0, %v13353_v44  ;;  %v1725_v41 = vrot.slane %v1521_v0, %v13356_v8  ;;  %v1529_v30 = vpack.i.b16 %v1528_v54, %v16906_v20  ;;  %v1781_v54 = vrot.slane %v1767_v28, %v13356_v8 }
 0x2ac   : > { %v1713_v14 = vrot.slane %v1699_v40, %v13359_v13  ;;  %v2453_v19 = vcombine.low %v1691_v18, %v1698_v58  ;;  %v11401_v60 = vcombine.high %v1691_v18, %v1698_v58  ;;  %v1782_v32 = vcombine.high %v1774_v36, %v16870_v7 }
 0x2ad   : > { %v1732_v27 = vrot.slane %v1718_v12, %v13356_v8  ;;  %v1733_v47 = vcombine.high %v1725_v41, %v16870_v7  ;;  %v1740_v0 = vrot.slane %v1725_v41, %v13359_v13 }
 0x2ae   : > { %v2460_v12 = vrot.slane %v2453_v19, %v13356_v8  ;;  %v2468_v20 = vrot.slane %v11401_v60, %v13356_v8  ;;  %v2469_v24 = vcombine.low %v1706_v26, %v1713_v14  ;;  %v11402_v42 = vcombine.high %v1706_v26, %v1713_v14 }
 0x2af   : > { %v1747_v1 = vrot.slane %v1733_v47, %v13359_v13  ;;  %v1748_v3 = vcombine.high %v1732_v27, %v16870_v7  ;;  %v1755_v40 = vrot.slane %v1732_v27, %v13359_v13  ;;  %v1796_v28 = vrot.slane %v1782_v32, %v13359_v13 }
 0x2b0   : > { %v2476_v47 = vrot.slane %v2469_v24, %v13356_v8  ;;  %v2484_v58 = vrot.slane %v11402_v42, %v13356_v8  ;;  %v2485_v23 = vcombine.low %v2460_v12, %v2468_v20  ;;  %v1789_v27 = vrot.slane %v1774_v36, %v13359_v13 }
 0x2b1   : > { %v1762_v41 = vrot.slane %v1748_v3, %v13359_v13  ;;  %v2502_v43 = vcombine.low %v1740_v0, %v1747_v1  ;;  %v11403_v18 = vcombine.high %v1740_v0, %v1747_v1  ;;  %v1797_v1 = vcombine.high %v1781_v54, %v16870_v7 }
 0x2b2   : > { %v2492_v14 = vrot.slane %v2485_v23, %v13359_v13  ;;  %v2493_v26 = vcombine.low %v2476_v47, %v2484_v58  ;;  %v1816_v32 = vcombine.high %v1529_v30, %v13353_v44  ;;  %v1823_v20 = vrot.slane %v1529_v30, %v13356_v8 }
 0x2b3   : > { %v2509_v4 = vrot.slane %v2502_v43, %v13356_v8  ;;  %v2517_v19 = vrot.slane %v11403_v18, %v13356_v8  ;;  %v2518_v60 = vcombine.low %v1755_v40, %v1762_v41  ;;  %v11404_v53 = vcombine.high %v1755_v40, %v1762_v41  ;;  %v1492_v18 = vpop.permute.xlu1 %1491 }
 0x2b4   : > { %v2500_v43 = vrot.slane %v2493_v26, %v13359_v13  ;;  %v1811_v12 = vrot.slane %v1797_v1, %v13359_v13  ;;  %v2551_v42 = vcombine.low %v1789_v27, %v1796_v28  ;;  %v13850_v23 = vrot.slane %v11399_v51, %v13356_v8 }
 0x2b5   : > { %v2525_v24 = vrot.slane %v2518_v60, %v13356_v8  ;;  %v2533_v0 = vrot.slane %v11404_v53, %v13356_v8  ;;  %v2534_v3 = vcombine.low %v2509_v4, %v2517_v19  ;;  %v1804_v40 = vrot.slane %v1781_v54, %v13359_v13  ;;  %v1494_v19 = vpop.permute.xlu0 %1493 }
 0x2b6   : > { %v1830_v41 = vrot.slane %v1816_v32, %v13356_v8  ;;  %v13854_v53 = vcombine.low %v2492_v14, %v2500_v43  ;;  %v1831_v47 = vcombine.high %v1823_v20, %v16870_v7  ;;  %v11405_v58 = vcombine.high %v1789_v27, %v1796_v28 }
 0x2b7   : > { %v2542_v36 = vcombine.low %v2525_v24, %v2533_v0  ;;  %v13857_v4 = vrot.slane %v2534_v3, %v13359_v13  ;;  %v1838_v51 = vrot.slane %v1823_v20, %v13359_v13  ;;  %v13866_v54 = vrot.slane %v2551_v42, %v13356_v8 }
 0x2b8   : > { %16907 = vst [vmem:[#allocation62_spill] sm:$0xff] %v13854_v53  ;;  %v1846_v60 = vcombine.high %v1830_v41, %v16870_v7  ;;  %v1845_v14 = vrot.slane %v1831_v47, %v13359_v13  ;;  %v2567_v26 = vcombine.low %v1804_v40, %v1811_v12  ;;  %v11406_v1 = vcombine.high %v1804_v40, %v1811_v12 }
 0x2b9   : > { %v13861_v30 = vrot.slane %v2542_v36, %v13359_v13  ;;  %v1533_v24 = vpack.i.b16 %v1492_v18, %v13263_v22  ;;  %v13871_v0 = vrot.slane %v1830_v41, %v13359_v13  ;;  %v1536_v27 = vshrl.u32 %v1492_v18, 16 }
 0x2ba   : > { %v13874_v28 = vrot.slane %v1846_v60, %v13359_v13  ;;  %v1541_v3 = vpack.i.b16 %v1494_v19, %v13277_v10  ;;  %v13878_v32 = vrot.slane %v11405_v58, %v13356_v8  ;;  %v2600_v43 = vcombine.low %v1838_v51, %v1845_v14 }
 0x2bb   : > { %16908 = vst [vmem:[#allocation63_spill] sm:$0xff] %v13871_v0  ;;  %v11407_v20 = vcombine.high %v1838_v51, %v1845_v14  ;;  %v1544_v42 = vshrl.u32 %v1494_v19, 16  ;;  %v13881_v36 = vrot.slane %v2567_v26, %v13356_v8  ;;  %v13884_v12 = vrot.slane %v11406_v1, %v13356_v8 }
 0x2bc   : > { %16909 = vst [vmem:[#allocation64_spill] sm:$0xff] %v13874_v28  ;;  %v16912_v40 = vshrl.u32 %v13263_v22, 16  ;;  %v1865_v47 = vcombine.high %v1533_v24, %v13353_v44  ;;  %v13890_v18 = vrot.slane %v2600_v43, %v13356_v8  ;;  %v1872_v51 = vrot.slane %v1533_v24, %v13356_v8 }
 0x2bd   : > { %16910 = vst [vmem:[#allocation65_spill] sm:$0xff] %v13881_v36  ;;  %16911 = vst [vmem:[#allocation66_spill] sm:$0xff] %v13884_v12  ;;  %v1963_v26 = vcombine.high %v1541_v3, %v13353_v44  ;;  %v13902_v1 = vrot.slane %v11407_v20, %v13356_v8  ;;  %v16915_v43 = vshrl.u32 %v13277_v10, 16  ;;  %v1970_v19 = vrot.slane %v1541_v3, %v13356_v8 }
 0x2be   : > { %v1537_v41 = vpack.i.b16 %v1536_v27, %v16912_v40  ;;  %16913 = vst [vmem:[#allocation67_spill] sm:$0xff] %v13890_v18  ;;  %v1879_v60 = vrot.slane %v1865_v47, %v13356_v8  ;;  %v1880_v27 = vcombine.high %v1872_v51, %v16870_v7  ;;  %v1887_v24 = vrot.slane %v1872_v51, %v13359_v13 }
 0x2bf   : > { %16914 = vst [vmem:[#allocation68_spill] sm:$0xff] %v13902_v1  ;;  %v1545_v40 = vpack.i.b16 %v1544_v42, %v16915_v43  ;;  %v1977_v1 = vrot.slane %v1963_v26, %v13356_v8  ;;  %v1978_v28 = vcombine.high %v1970_v19, %v16870_v7 }
 0x2c0   : > { %v1914_v14 = vcombine.high %v1537_v41, %v13353_v44  ;;  %v1921_v22 = vrot.slane %v1537_v41, %v13356_v8  ;;  %v1895_v47 = vcombine.high %v1879_v60, %v16870_v7  ;;  %v1894_v18 = vrot.slane %v1880_v27, %v13359_v13 }
 0x2c1   : > { %v1902_v20 = vrot.slane %v1879_v60, %v13359_v13  ;;  %v1992_v0 = vrot.slane %v1978_v28, %v13359_v13  ;;  %v2012_v27 = vcombine.high %v1545_v40, %v13353_v44 }
 0x2c2   : > { %v1928_v58 = vrot.slane %v1914_v14, %v13356_v8  ;;  %v1929_v41 = vcombine.high %v1921_v22, %v16870_v7  ;;  %v1909_v10 = vrot.slane %v1895_v47, %v13359_v13  ;;  %v1936_v3 = vrot.slane %v1921_v22, %v13359_v13 }
 0x2c3   : > { %v2649_v43 = vcombine.low %v1887_v24, %v1894_v18  ;;  %v11409_v14 = vcombine.high %v1887_v24, %v1894_v18  ;;  %v1993_v18 = vcombine.high %v1977_v1, %v16870_v7  ;;  %v1496_v24 = vpop.permute.xlu1 %1495 }
 0x2c4   : > { %v1943_v42 = vrot.slane %v1929_v41, %v13359_v13  ;;  %v1944_v51 = vcombine.high %v1928_v58, %v16870_v7  ;;  %v2665_v26 = vcombine.low %v1902_v20, %v1909_v10  ;;  %v11410_v36 = vcombine.high %v1902_v20, %v1909_v10 }
 0x2c5   : > { %v13926_v47 = vrot.slane %v1928_v58, %v13359_v13  ;;  %v13929_v22 = vrot.slane %v2649_v43, %v13356_v8  ;;  %v1985_v41 = vrot.slane %v1970_v19, %v13359_v13  ;;  %v13934_v28 = vrot.slane %v11409_v14, %v13356_v8 }
 0x2c6   : > { %v13923_v60 = vrot.slane %v1944_v51, %v13359_v13  ;;  %v2698_v12 = vcombine.low %v1936_v3, %v1943_v42  ;;  %v13937_v51 = vrot.slane %v2665_v26, %v13356_v8  ;;  %v13940_v20 = vrot.slane %v11410_v36, %v13356_v8 }
 0x2c7   : > { %16917 = vst [vmem:[#allocation70_spill] sm:$0xff] %v13926_v47  ;;  %16918 = vst [vmem:[#allocation71_spill] sm:$0xff] %v13929_v22  ;;  %v11411_v10 = vcombine.high %v1936_v3, %v1943_v42  ;;  %v2000_v19 = vrot.slane %v1977_v1, %v13359_v13  ;;  %v2007_v22 = vrot.slane %v1993_v18, %v13359_v13  ;;  %v1552_v42 = vshrl.u32 %v1496_v24, 16 }
 0x2c8   : > { %16916 = vst [vmem:[#allocation69_spill] sm:$0xff] %v13923_v60  ;;  %16919 = vst [vmem:[#allocation72_spill] sm:$0xff] %v13934_v28  ;;  %v13943_v58 = vrot.slane %v2698_v12, %v13356_v8  ;;  %v2019_v14 = vrot.slane %v1545_v40, %v13356_v8  ;;  %v2026_v28 = vrot.slane %v2012_v27, %v13356_v8  ;;  %v1498_v40 = vpop.permute.xlu0 %1497  ;;  %v16928_v43 = vshrl.u32 %v13279_v17, 16 }
 0x2c9   : > { %16920 = vst [vmem:[#allocation73_spill] sm:$0xff] %v13937_v51  ;;  %16921 = vst [vmem:[#allocation74_spill] sm:$0xff] %v13940_v20  ;;  %v2747_v26 = vcombine.low %v1985_v41, %v1992_v0  ;;  %v11413_v51 = vcombine.high %v1985_v41, %v1992_v0  ;;  %v2763_v53 = vcombine.low %v2000_v19, %v2007_v22 }
 0x2ca   : > { %16922 = vst [vmem:[#allocation75_spill] sm:$0xff] %v13943_v58  ;;  %v11414_v36 = vcombine.high %v2000_v19, %v2007_v22  ;;  %v1549_v3 = vpack.i.b16 %v1496_v24, %v13279_v17  ;;  %v13953_v12 = vrot.slane %v11411_v10, %v13356_v8  ;;  %v2027_v1 = vcombine.high %v2019_v14, %v16870_v7  ;;  %v13969_v24 = vpop.permute.xlu1 %1499 }
 0x2cb   : > { %v2042_v18 = vcombine.high %v2026_v28, %v16870_v7  ;;  %v2034_v27 = vrot.slane %v2019_v14, %v13359_v13  ;;  %v13961_v0 = vrot.slane %v2026_v28, %v13359_v13  ;;  %v13964_v22 = vrot.slane %v2747_v26, %v13356_v8 }
 0x2cc   : > { %16923 = vst [vmem:[#allocation76_spill] sm:$0xff] %v13953_v12  ;;  %v13967_v41 = vrot.slane %v11413_v51, %v13356_v8  ;;  %v2041_v10 = vrot.slane %v2027_v1, %v13359_v13  ;;  %v1553_v58 = vpack.i.b16 %v1552_v42, %v16928_v43  ;;  %v2061_v14 = vcombine.high %v1549_v3, %v13353_v44 }
 0x2cd   : > { %16924 = vst [vmem:[#allocation77_spill] sm:$0xff] %v13961_v0  ;;  %16925 = vst [vmem:[#allocation78_spill] sm:$0xff] %v13964_v22  ;;  %v13973_v19 = vrot.slane %v2042_v18, %v13359_v13  ;;  %v13979_v28 = vrot.slane %v2763_v53, %v13356_v8  ;;  %v13982_v26 = vrot.slane %v11414_v36, %v13356_v8  ;;  %v1560_v12 = vshrl.u32 %v1498_v40, 16 }
 0x2ce   : > { %16926 = vst [vmem:[#allocation79_spill] sm:$0xff] %v13967_v41  ;;  %v2068_v51 = vrot.slane %v1549_v3, %v13356_v8  ;;  %v1557_v22 = vpack.i.b16 %v1498_v40, %v13292_v34  ;;  %v2796_v41 = vcombine.low %v2034_v27, %v2041_v10  ;;  %v11415_v1 = vcombine.high %v2034_v27, %v2041_v10 }
 0x2cf   : > { %16927 = vst [vmem:[#allocation80_spill] sm:$0xff] %v13973_v19  ;;  %16929 = vst [vmem:[#allocation81_spill] sm:$0xff] %v13979_v28  ;;  %v13988_v18 = vpack.i.b16 %v13969_v24, %v13294_v35  ;;  %v2075_v53 = vrot.slane %v2061_v14, %v13356_v8  ;;  %v2110_v36 = vcombine.high %v1553_v58, %v13353_v44 }
 0x2d0   : > { %16930 = vst [vmem:[#allocation82_spill] sm:$0xff] %v13982_v26  ;;  %v2076_v43 = vcombine.high %v2068_v51, %v16870_v7  ;;  %v13996_v3 = vrot.slane %v2796_v41, %v13356_v8  ;;  %v2083_v40 = vrot.slane %v2068_v51, %v13359_v13  ;;  %v2117_v27 = vrot.slane %v1553_v58, %v13356_v8 }
 0x2d1   : > { %v14003_v10 = vrot.slane %v11415_v1, %v13356_v8  ;;  %v2091_v14 = vcombine.high %v2075_v53, %v16870_v7  ;;  %v2124_v28 = vrot.slane %v2110_v36, %v13356_v8  ;;  %v2098_v26 = vrot.slane %v2075_v53, %v13359_v13 }
 0x2d2   : > { %16931 = vst [vmem:[#allocation83_spill] sm:$0xff] %v13996_v3  ;;  %v2090_v17 = vrot.slane %v2076_v43, %v13359_v13  ;;  %v2125_v41 = vcombine.high %v2117_v27, %v16870_v7  ;;  %v2159_v3 = vcombine.high %v1557_v22, %v13353_v44  ;;  %v2166_v42 = vrot.slane %v1557_v22, %v13356_v8 }
 0x2d3   : > { %16932 = vst [vmem:[#allocation84_spill] sm:$0xff] %v14003_v10  ;;  %v2105_v51 = vrot.slane %v2091_v14, %v13359_v13  ;;  %v2132_v58 = vrot.slane %v2117_v27, %v13359_v13  ;;  %v2140_v1 = vcombine.high %v2124_v28, %v16870_v7  ;;  %v16934_v22 = vshrl.u32 %v13292_v34, 16 }
 0x2d4   : > { %v2845_v10 = vcombine.low %v2083_v40, %v2090_v17  ;;  %v2139_v43 = vrot.slane %v2125_v41, %v13359_v13  ;;  %v11417_v19 = vcombine.high %v2083_v40, %v2090_v17  ;;  %v2173_v36 = vrot.slane %v2159_v3, %v13356_v8 }
 0x2d5   : > { %v2174_v53 = vcombine.high %v2166_v42, %v16870_v7  ;;  %v14019_v0 = vrot.slane %v2140_v1, %v13359_v13  ;;  %v2861_v60 = vcombine.low %v2098_v26, %v2105_v51  ;;  %v11418_v47 = vcombine.high %v2098_v26, %v2105_v51 }
 0x2d6   : > { %v1561_v14 = vpack.i.b16 %v1560_v12, %v16934_v22  ;;  %v14024_v27 = vrot.slane %v2124_v28, %v13359_v13  ;;  %v14027_v20 = vrot.slane %v2845_v10, %v13356_v8  ;;  %v14030_v17 = vrot.slane %v11417_v19, %v13356_v8 }
 0x2d7   : > { %16933 = vst [vmem:[#allocation85_spill] sm:$0xff] %v14019_v0  ;;  %v2894_v3 = vcombine.low %v2132_v58, %v2139_v43  ;;  %v14033_v40 = vrot.slane %v2861_v60, %v13356_v8  ;;  %v14036_v41 = vrot.slane %v11418_v47, %v13356_v8  ;;  %v11419_v26 = vcombine.high %v2132_v58, %v2139_v43 }
 0x2d8   : > { %16935 = vst [vmem:[#allocation86_spill] sm:$0xff] %v14024_v27  ;;  %16936 = vst [vmem:[#allocation87_spill] sm:$0xff] %v14027_v20  ;;  %v2181_v34 = vrot.slane %v2166_v42, %v13359_v13  ;;  %v2188_v10 = vrot.slane %v2174_v53, %v13359_v13  ;;  %v2189_v19 = vcombine.high %v2173_v36, %v16870_v7  ;;  %v1568_v58 = vshrl.u32 %v13969_v24, 16 }
 0x2d9   : > { %16937 = vst [vmem:[#allocation88_spill] sm:$0xff] %v14030_v17  ;;  %16938 = vst [vmem:[#allocation89_spill] sm:$0xff] %v14033_v40  ;;  %v2196_v51 = vrot.slane %v2173_v36, %v13359_v13  ;;  %v2208_v60 = vcombine.high %v1561_v14, %v13353_v44  ;;  %v2215_v47 = vrot.slane %v1561_v14, %v13356_v8  ;;  %v16941_v12 = vshrl.u32 %v13294_v35, 16 }
 0x2da   : > { %16939 = vst [vmem:[#allocation90_spill] sm:$0xff] %v14036_v41  ;;  %v2203_v42 = vrot.slane %v2189_v19, %v13359_v13  ;;  %v2943_v1 = vcombine.low %v2181_v34, %v2188_v10  ;;  %v11421_v43 = vcombine.high %v2181_v34, %v2188_v10  ;;  %v2257_v22 = vcombine.high %v13988_v18, %v13353_v44 }
 0x2db   : > { %v14053_v28 = vrot.slane %v2894_v3, %v13356_v8  ;;  %v2222_v53 = vrot.slane %v2208_v60, %v13356_v8  ;;  %v2223_v36 = vcombine.high %v2215_v47, %v16870_v7  ;;  %v1569_v0 = vpack.i.b16 %v1568_v58, %v16941_v12 }
 0x2dc   : > { %v14060_v14 = vrot.slane %v11419_v26, %v13356_v8  ;;  %v2230_v24 = vrot.slane %v2215_v47, %v13359_v13  ;;  %v2959_v19 = vcombine.low %v2196_v51, %v2203_v42  ;;  %v11422_v34 = vcombine.high %v2196_v51, %v2203_v42 }
 0x2dd   : > { %16940 = vst [vmem:[#allocation91_spill] sm:$0xff] %v14053_v28  ;;  %v2237_v10 = vrot.slane %v2223_v36, %v13359_v13  ;;  %v2238_v27 = vcombine.high %v2222_v53, %v16870_v7  ;;  %v14066_v3 = vrot.slane %v2943_v1, %v13356_v8  ;;  %v2264_v60 = vrot.slane %v13988_v18, %v13356_v8 }
 0x2de   : > { %16942 = vst [vmem:[#allocation92_spill] sm:$0xff] %v14060_v14  ;;  %v14071_v35 = vrot.slane %v2222_v53, %v13359_v13  ;;  %v14074_v26 = vrot.slane %v11421_v43, %v13356_v8  ;;  %v2271_v12 = vrot.slane %v2257_v22, %v13356_v8  ;;  %v2306_v51 = vcombine.high %v1569_v0, %v13353_v44  ;;  %v16980_v14 = vld [vmem:[#allocation11_spill] sm:$0xff] }
 0x2df   : > { %16943 = vst [vmem:[#allocation93_spill] sm:$0xff] %v14066_v3  ;;  %v14079_v47 = vrot.slane %v2238_v27, %v13359_v13  ;;  %v2992_v58 = vcombine.low %v2230_v24, %v2237_v10  ;;  %v11423_v42 = vcombine.high %v2230_v24, %v2237_v10  ;;  %v2272_v1 = vcombine.high %v2264_v60, %v16870_v7 }
 0x2e0   : > { %16944 = vst [vmem:[#allocation94_spill] sm:$0xff] %v14071_v35  ;;  %16945 = vst [vmem:[#allocation95_spill] sm:$0xff] %v14074_v26  ;;  %v14083_v36 = vrot.slane %v2959_v19, %v13356_v8  ;;  %v14086_v18 = vrot.slane %v11422_v34, %v13356_v8  ;;  %v2287_v43 = vcombine.high %v2271_v12, %v16870_v7 }
 0x2e1   : > { %16946 = vst [vmem:[#allocation96_spill] sm:$0xff] %v14079_v47  ;;  %v2313_v53 = vrot.slane %v1569_v0, %v13356_v8  ;;  %v14091_v22 = vrot.slane %v2992_v58, %v13356_v8  ;;  %v14094_v27 = vrot.slane %v11423_v42, %v13356_v8  ;;  %v2279_v24 = vrot.slane %v2264_v60, %v13359_v13 }
 0x2e2   : > { %16947 = vst [vmem:[#allocation97_spill] sm:$0xff] %v14083_v36  ;;  %16948 = vst [vmem:[#allocation98_spill] sm:$0xff] %v14086_v18  ;;  %v2294_v10 = vrot.slane %v2271_v12, %v13359_v13  ;;  %v2286_v19 = vrot.slane %v2272_v1, %v13359_v13  ;;  %v2301_v36 = vrot.slane %v2287_v43, %v13359_v13 }
 0x2e3   : > { %16949 = vst [vmem:[#allocation99_spill] sm:$0xff] %v14091_v22  ;;  %16950 = vst [vmem:[#allocation100_spill] sm:$0xff] %v14094_v27  ;;  %v2320_v34 = vrot.slane %v2306_v51, %v13356_v8  ;;  %v2321_v18 = vcombine.high %v2313_v53, %v16870_v7  ;;  %v4777_v42 = vcombine.low %v13501_v29, %v13504_v59 }
 0x2e4   : > { %v4785_v60 = vcombine.low %v13508_v61, %v13513_v63  ;;  %v2328_v12 = vrot.slane %v2313_v53, %v13359_v13  ;;  %v3041_v43 = vcombine.low %v2279_v24, %v2286_v19  ;;  %v11425_v22 = vcombine.high %v2279_v24, %v2286_v19 }
 0x2e5   : > { %v2335_v1 = vrot.slane %v2321_v18, %v13359_v13  ;;  %v2336_v51 = vcombine.high %v2320_v34, %v16870_v7  ;;  %v3057_v27 = vcombine.low %v2294_v10, %v2301_v36  ;;  %v11426_v3 = vcombine.high %v2294_v10, %v2301_v36 }
 0x2e6   : > { %v16951_v58 = vcombine.low %v13493_v5, %v13498_v49  ;;  %v14118_v29 = vrot.slane %v2320_v34, %v13359_v13  ;;  %v14124_v18 = vrot.slane %v3041_v43, %v13356_v8  ;;  %v14127_v53 = vrot.slane %v11425_v22, %v13356_v8 }
 0x2e7   : > { %v14121_v59 = vrot.slane %v2336_v51, %v13359_v13  ;;  %v3090_v61 = vcombine.low %v2328_v12, %v2335_v1  ;;  %v11427_v63 = vcombine.high %v2328_v12, %v2335_v1  ;;  %v4784_v36 = vrot.slane %v4777_v42, %v13359_v13 }
 0x2e8   : > { %v4817_v0 = vrot.slane %v16951_v58, %v13356_v8  ;;  %16952 = vst [vmem:[#allocation101_spill] sm:$0xff] %v14118_v29  ;;  %16954 = vst [vmem:[#allocation103_spill] sm:$0xff] %v14124_v18  ;;  %v4792_v24 = vrot.slane %v4785_v60, %v13359_v13  ;;  %v14132_v10 = vrot.slane %v3057_v27, %v13356_v8 }
 0x2e9   : > { %16953 = vst [vmem:[#allocation102_spill] sm:$0xff] %v14121_v59  ;;  %16955 = vst [vmem:[#allocation104_spill] sm:$0xff] %v14127_v53  ;;  %v14135_v19 = vrot.slane %v11426_v3, %v13356_v8  ;;  %v14138_v34 = vrot.slane %v3090_v61, %v13356_v8  ;;  %v14141_v58 = vrot.slane %v11427_v63, %v13356_v8  ;;  %v4914_v3 = vpop.permute.xlu0 %4913 }
 0x2ea   : > { %16956 = vst [vmem:[#allocation105_spill] sm:$0xff] %v14132_v10  ;;  %v4793_v12 = vcombine.low %v4784_v36, %v4792_v24  ;;  %v16960_v42 = vcombine.high %v13493_v5, %v13498_v49  ;;  %v4826_v27 = vcombine.low %v13518_v2, %v13543_v6  ;;  %v4679_v1 = vcombine.low %v13411_v9, %v13415_v38  ;;  %v4912_v36 = vpop.permute.xlu1 %4911 }
 0x2eb   : > { %16957 = vst [vmem:[#allocation106_spill] sm:$0xff] %v14135_v19  ;;  %16958 = vst [vmem:[#allocation107_spill] sm:$0xff] %v14138_v34  ;;  %v4687_v51 = vcombine.low %v13418_v45, %v13421_v31  ;;  %v16961_v43 = vcombine.low %v13408_v11, %v13404_v16  ;;  %v16962_v5 = vcombine.high %v13408_v11, %v13404_v16 }
 0x2ec   : > { %16959 = vst [vmem:[#allocation108_spill] sm:$0xff] %v14141_v58  ;;  %v4825_v60 = vrot.slane %v16960_v42, %v13356_v8  ;;  %v4728_v9 = vcombine.low %v13430_v57, %v13441_v50  ;;  %v4833_v38 = vrot.slane %v4826_v27, %v13359_v13  ;;  %v4973_v63 = vpack.i.b16 %v4914_v3, %v13307_v37 }
 0x2ed   : > { %v4719_v61 = vrot.slane %v16961_v43, %v13356_v8  ;;  %v4727_v49 = vrot.slane %v16962_v5, %v13356_v8  ;;  %v4694_v45 = vrot.slane %v4687_v51, %v13359_v13  ;;  %v4686_v16 = vrot.slane %v4679_v1, %v13359_v13 }
 0x2ee   : > { %v4834_v6 = vcombine.low %v4817_v0, %v4825_v60  ;;  %v4888_v11 = vshrl.u32 %v4793_v12, 16  ;;  %v4976_v42 = vshrl.u32 %v4914_v3, 16  ;;  %v4735_v0 = vrot.slane %v4728_v9, %v13359_v13 }
 0x2ef   : > { %v4736_v31 = vcombine.low %v4719_v61, %v4727_v49  ;;  %v5665_v50 = vcombine.high %v4973_v63, %v13353_v44  ;;  %v5672_v57 = vrot.slane %v4973_v63, %v13356_v8  ;;  %v4695_v51 = vcombine.low %v4686_v16, %v4694_v45 }
 0x2f0   : > { %v4841_v24 = vrot.slane %v4834_v6, %v13359_v13  ;;  %v16963_v43 = vshrl.u32 %v13307_v37, 16  ;;  %v4965_v5 = vpack.i.b16 %v4912_v36, %v13309_v48  ;;  %v4968_v6 = vshrl.u32 %v4912_v36, 16 }
 0x2f1   : > { %v4743_v60 = vrot.slane %v4736_v31, %v13359_v13  ;;  %v5679_v1 = vrot.slane %v5665_v50, %v13356_v8  ;;  %v5680_v3 = vcombine.high %v5672_v57, %v16870_v7 }
 0x2f2   : > { %v4842_v27 = vcombine.low %v4833_v38, %v4841_v24  ;;  %v4977_v61 = vpack.i.b16 %v4976_v42, %v16963_v43  ;;  %v5687_v38 = vrot.slane %v5672_v57, %v13359_v13  ;;  %v5567_v50 = vcombine.high %v4965_v5, %v13353_v44 }
 0x2f3   : > { %v4744_v49 = vcombine.low %v4735_v0, %v4743_v60  ;;  %v5694_v37 = vrot.slane %v5680_v3, %v13359_v13  ;;  %v5695_v45 = vcombine.high %v5679_v1, %v16870_v7  ;;  %v14200_v57 = vrot.slane %v5679_v1, %v13359_v13 }
 0x2f4   : > { %v4887_v9 = vpack.i.b16 %v4842_v27, %v4793_v12  ;;  %v4889_v2 = vshrl.u32 %v4842_v27, 16  ;;  %v5714_v31 = vcombine.high %v4977_v61, %v13353_v44  ;;  %v5721_v22 = vrot.slane %v4977_v61, %v13356_v8 }
 0x2f5   : > { %v14183_v63 = vpack.i.b16 %v4744_v49, %v4695_v51  ;;  %v14193_v42 = vrot.slane %v5695_v45, %v13359_v13  ;;  %v6449_v0 = vcombine.low %v5687_v38, %v5694_v37  ;;  %v11489_v60 = vcombine.high %v5687_v38, %v5694_v37 }
 0x2f6   : > { %12091 = vmatprep.subr.msk.bf16.mxu0 %vm6627_vm0, %v4887_v9  ;;  %v6674_v24 = vsel %vm6627_vm0, %v4887_v9, 0  ;;  %v4890_v16 = vpack.i.b16 %v4889_v2, %v4888_v11  ;;  %v5728_v12 = vrot.slane %v5714_v31, %v13356_v8  ;;  %v5729_v36 = vcombine.high %v5721_v22, %v16870_v7 }
 0x2f7   : > { %11916 = vmatpush3.bf16.xpose.msra.mxu0 %v6674_v24  ;;  %v14208_v43 = vrot.slane %v5721_v22, %v13359_v13  ;;  %v14214_v3 = vrot.slane %v6449_v0, %v13356_v8  ;;  %v14217_v9 = vrot.slane %v11489_v60, %v13356_v8  ;;  %v16964_v38 = vshrl.u32 %v13309_v48, 16 }
 0x2f8   : > { %12092 = vmatprep.subr.msk.bf16.mxu0 %vm6627_vm0, %v14183_v63  ;;  %12099 = vmatprep.subr.msk.bf16.mxu1 %vm6627_vm0, %v4890_v16  ;;  %v14203_v2 = vrot.slane %v5729_v36, %v13359_v13  ;;  %v5744_v11 = vcombine.high %v5728_v12, %v16870_v7  ;;  %v6819_v27 = vsel %vm6627_vm0, %v4890_v16, 0  ;;  %v14211_v61 = vrot.slane %v5728_v12, %v13359_v13 }
 0x2f9   : > { %11948 = vmatpush3.bf16.xpose.msra.mxu1 %v6819_v27  ;;  %v4969_v37 = vpack.i.b16 %v4968_v6, %v16964_v38  ;;  %v5574_v24 = vrot.slane %v4965_v5, %v13356_v8  ;;  %v5581_v16 = vrot.slane %v5567_v50, %v13356_v8  ;;  %v4883_v12 = vshrl.u32 %v4744_v49, 16  ;;  %v4906_v27 = vpop.permute.xlu0 %4905  ;;  %v4910_v6 = vpop.permute.xlu1 %4909 }
 0x2fa   : > { %v14220_v1 = vrot.slane %v5744_v11, %v13359_v13  ;;  %v4882_v11 = vshrl.u32 %v4695_v51, 16  ;;  %v4944_v22 = vshrl.u32 %v4906_v27, 16 }
 0x2fb   : > { %v5616_v0 = vcombine.high %v4969_v37, %v13353_v44  ;;  %v5623_v60 = vrot.slane %v4969_v37, %v13356_v8  ;;  %v5582_v5 = vcombine.high %v5574_v24, %v16870_v7  ;;  %v5597_v50 = vcombine.high %v5581_v16, %v16870_v7 }
 0x2fc   : > { %v5589_v49 = vrot.slane %v5574_v24, %v13359_v13  ;;  %v14245_v45 = vpack.i.b16 %v4883_v12, %v4882_v11  ;;  %v5604_v37 = vrot.slane %v5581_v16, %v13359_v13  ;;  %v4941_v12 = vpack.i.b16 %v4906_v27, %v13321_v21 }
 0x2fd   : > { %v5630_v38 = vrot.slane %v5616_v0, %v13356_v8  ;;  %v5631_v36 = vcombine.high %v5623_v60, %v16870_v7  ;;  %v5596_v51 = vrot.slane %v5582_v5, %v13359_v13  ;;  %v5611_v48 = vrot.slane %v5597_v50, %v13359_v13  ;;  %v4902_v28 = vpop.permute.xlu0 %4901 }
 0x2fe   : > { %v5638_v31 = vrot.slane %v5623_v60, %v13359_v13  ;;  %12100 = vmatprep.subr.msk.bf16.mxu1 %vm6627_vm0, %v14245_v45  ;;  %v16965_v50 = vshrl.u32 %v13321_v21, 16  ;;  %v4957_v60 = vpack.i.b16 %v4910_v6, %v13323_v55  ;;  %v4925_v40 = vpack.i.b16 %v4902_v28, %v16980_v14 }
 0x2ff   : > { %v5645_v34 = vrot.slane %v5631_v36, %v13359_v13  ;;  %v5646_v24 = vcombine.high %v5630_v38, %v16870_v7  ;;  %v6351_v0 = vcombine.low %v5589_v49, %v5596_v51  ;;  %v11485_v11 = vcombine.high %v5589_v49, %v5596_v51 }
 0x300   : > { %v6367_v5 = vcombine.low %v5604_v37, %v5611_v48  ;;  %v11486_v58 = vcombine.high %v5604_v37, %v5611_v48  ;;  %v4945_v29 = vpack.i.b16 %v4944_v22, %v16965_v50  ;;  %v14260_v36 = vrot.slane %v5630_v38, %v13359_v13 }
 0x301   : > { %v6400_v16 = vcombine.low %v5638_v31, %v5645_v34  ;;  %v11487_v59 = vcombine.high %v5638_v31, %v5645_v34  ;;  %v14263_v10 = vrot.slane %v5646_v24, %v13359_v13  ;;  %v14266_v19 = vrot.slane %v6351_v0, %v13356_v8 }
 0x302   : > { %v14269_v27 = vrot.slane %v11485_v11, %v13356_v8  ;;  %v14272_v48 = vrot.slane %v6367_v5, %v13356_v8  ;;  %v14275_v21 = vrot.slane %v11486_v58, %v13356_v8  ;;  %v5273_v22 = vcombine.high %v4941_v12, %v13353_v44 }
 0x303   : > { %v14278_v34 = vrot.slane %v6400_v16, %v13356_v8  ;;  %v14281_v31 = vrot.slane %v11487_v59, %v13356_v8  ;;  %v5280_v49 = vrot.slane %v4941_v12, %v13356_v8  ;;  %v5322_v38 = vcombine.high %v4945_v29, %v13353_v44 }
 0x304   : > { %v5329_v51 = vrot.slane %v4945_v29, %v13356_v8  ;;  %v4960_v37 = vshrl.u32 %v4910_v6, 16  ;;  %v5469_v24 = vcombine.high %v4957_v60, %v13353_v44  ;;  %v5476_v58 = vrot.slane %v4957_v60, %v13356_v8 }
 0x305   : > { %v6671_v0 = vsel %vm6627_vm0, %v14183_v63, 0  ;;  %v5287_v11 = vrot.slane %v5273_v22, %v13356_v8  ;;  %v5288_v5 = vcombine.high %v5280_v49, %v16870_v7  ;;  %v5336_v12 = vrot.slane %v5322_v38, %v13356_v8 }
 0x306   : > { %11918 = vmatpush3.bf16.xpose.msra.mxu0 %v6671_v0  ;;  %v5295_v6 = vrot.slane %v5280_v49, %v13359_v13  ;;  %v5337_v16 = vcombine.high %v5329_v51, %v16870_v7  ;;  %v5483_v50 = vrot.slane %v5469_v24, %v13356_v8  ;;  %v14304_v22 = vrot.slane %v5329_v51, %v13359_v13 }
 0x307   : > { %v5302_v63 = vrot.slane %v5288_v5, %v13359_v13  ;;  %v5303_v60 = vcombine.high %v5287_v11, %v16870_v7  ;;  %v5352_v59 = vcombine.high %v5336_v12, %v16870_v7  ;;  %v14308_v38 = vrot.slane %v5287_v11, %v13359_v13 }
 0x308   : > { %16966 = vst [vmem:[#allocation109_spill] sm:$0xff] %v14304_v22  ;;  %v14311_v0 = vrot.slane %v5337_v16, %v13359_v13  ;;  %v16969_v49 = vshrl.u32 %v13323_v55, 16  ;;  %v5484_v24 = vcombine.high %v5476_v58, %v16870_v7  ;;  %v14320_v18 = vrot.slane %v5336_v12, %v13359_v13  ;;  %v16979_v12 = vld [vmem:[#allocation16_spill] sm:$0xff] }
 0x309   : > { %16967 = vst [vmem:[#allocation110_spill] sm:$0xff] %v14308_v38  ;;  %v14317_v5 = vrot.slane %v5303_v60, %v13359_v13  ;;  %v6057_v51 = vcombine.low %v5295_v6, %v5302_v63  ;;  %v11473_v53 = vcombine.high %v5295_v6, %v5302_v63  ;;  %v14323_v47 = vrot.slane %v5352_v59, %v13359_v13 }
 0x30a   : > { %16968 = vst [vmem:[#allocation111_spill] sm:$0xff] %v14311_v0  ;;  %v4961_v29 = vpack.i.b16 %v4960_v37, %v16969_v49  ;;  %16971 = vst [vmem:[#allocation113_spill] sm:$0xff] %v14320_v18  ;;  %v5491_v11 = vrot.slane %v5476_v58, %v13359_v13  ;;  %v5498_v16 = vrot.slane %v5484_v24, %v13359_v13  ;;  %v16978_v58 = vld [vmem:[#allocation17_spill] sm:$0xff] }
 0x30b   : > { %16970 = vst [vmem:[#allocation112_spill] sm:$0xff] %v14317_v5  ;;  %16972 = vst [vmem:[#allocation114_spill] sm:$0xff] %v14323_v47  ;;  %v5499_v55 = vcombine.high %v5483_v50, %v16870_v7  ;;  %v14329_v37 = vrot.slane %v6057_v51, %v13356_v8  ;;  %v14332_v60 = vrot.slane %v11473_v53, %v13356_v8  ;;  %v4928_v47 = vshrl.u32 %v4902_v28, 16 }
 0x30c   : > { %v5506_v63 = vrot.slane %v5483_v50, %v13359_v13  ;;  %v5518_v24 = vcombine.high %v4961_v29, %v13353_v44  ;;  %v5525_v53 = vrot.slane %v4961_v29, %v13356_v8  ;;  %v6253_v51 = vcombine.low %v5491_v11, %v5498_v16 }
 0x30d   : > { %16973 = vst [vmem:[#allocation115_spill] sm:$0xff] %v14329_v37  ;;  %16974 = vst [vmem:[#allocation116_spill] sm:$0xff] %v14332_v60  ;;  %v5513_v49 = vrot.slane %v5499_v55, %v13359_v13  ;;  %v11481_v35 = vcombine.high %v5491_v11, %v5498_v16  ;;  %v4589_v59 = vcombine.low %v13463_v46, %v13468_v39  ;;  %v17003_v37 = vld [vmem:[#allocation20_spill] sm:$0xff]  ;;  %v17004_v60 = vld [vmem:[#allocation23_spill] sm:$0xff] }
 0x30e   : > { %v5532_v50 = vrot.slane %v5518_v24, %v13356_v8  ;;  %v5533_v55 = vcombine.high %v5525_v53, %v16870_v7  ;;  %v4581_v29 = vcombine.low %v13448_v52, %v13451_v62  ;;  %v5540_v11 = vrot.slane %v5525_v53, %v13359_v13  ;;  %v16975_v62 = vld [vmem:[#allocation15_spill] sm:$0xff] }
 0x30f   : > { %v6269_v6 = vcombine.low %v5506_v63, %v5513_v49  ;;  %v11482_v26 = vcombine.high %v5506_v63, %v5513_v49  ;;  %v14358_v16 = vrot.slane %v6253_v51, %v13356_v8  ;;  %v14361_v63 = vrot.slane %v11481_v35, %v13356_v8 }
 0x310   : > { %v5547_v39 = vrot.slane %v5533_v55, %v13359_v13  ;;  %v5548_v49 = vcombine.high %v5532_v50, %v16870_v7  ;;  %v4596_v52 = vrot.slane %v4589_v59, %v13359_v13  ;;  %v16976_v53 = vcombine.low %v13460_v25, %v16975_v62 }
 0x311   : > { %v14364_v46 = vrot.slane %v6269_v6, %v13356_v8  ;;  %v14369_v24 = vrot.slane %v11482_v26, %v13356_v8  ;;  %v16977_v35 = vcombine.high %v13460_v25, %v16975_v62  ;;  %v4630_v55 = vcombine.low %v16979_v12, %v16978_v58  ;;  %v4908_v62 = vpop.permute.xlu1 %4907 }
 0x312   : > { %v4621_v51 = vrot.slane %v16976_v53, %v13356_v8  ;;  %v14384_v26 = vrot.slane %v5548_v49, %v13359_v13  ;;  %v6302_v41 = vcombine.low %v5540_v11, %v5547_v39  ;;  %v11483_v59 = vcombine.high %v5540_v11, %v5547_v39 }
 0x313   : > { %v4629_v6 = vrot.slane %v16977_v35, %v13356_v8  ;;  %v4588_v20 = vrot.slane %v4581_v29, %v13359_v13  ;;  %v14388_v17 = vrot.slane %v5532_v50, %v13359_v13  ;;  %v5077_v25 = vcombine.high %v4925_v40, %v13353_v44 }
 0x314   : > { %v14392_v35 = vrot.slane %v6302_v41, %v13356_v8  ;;  %v14395_v12 = vrot.slane %v11483_v59, %v13356_v8  ;;  %v4637_v11 = vrot.slane %v4630_v55, %v13359_v13  ;;  %v16981_v50 = vshrl.u32 %v16980_v14, 16 }
 0x315   : > { %v4638_v53 = vcombine.low %v4621_v51, %v4629_v6  ;;  %v14397_v58 = vcombine.low %v4588_v20, %v4596_v52  ;;  %v5084_v28 = vrot.slane %v4925_v40, %v13356_v8  ;;  %v5091_v49 = vrot.slane %v5077_v25, %v13356_v8  ;;  %v16982_v52 = vld [vmem:[#allocation12_spill] sm:$0xff] }
 0x316   : > { %v4929_v39 = vpack.i.b16 %v4928_v47, %v16981_v50  ;;  %v6816_v20 = vsel %vm6627_vm0, %v14245_v45, 0  ;;  %v4949_v6 = vpack.i.b16 %v4908_v62, %v16982_v52  ;;  %v4952_v40 = vshrl.u32 %v4908_v62, 16 }
 0x317   : > { %v4645_v29 = vrot.slane %v4638_v53, %v13359_v13  ;;  %v5092_v14 = vcombine.high %v5084_v28, %v16870_v7  ;;  %v5107_v47 = vcombine.high %v5091_v49, %v16870_v7  ;;  %11950 = vmatpush3.bf16.xpose.msra.mxu1 %v6816_v20  ;;  %v5099_v59 = vrot.slane %v5084_v28, %v13359_v13 }
 0x318   : > { %v5126_v53 = vcombine.high %v4929_v39, %v13353_v44  ;;  %v5133_v25 = vrot.slane %v4929_v39, %v13356_v8  ;;  %v2387_v50 = vcombine.low %v13780_v15, %v13787_v33  ;;  %v5371_v62 = vcombine.high %v4949_v6, %v13353_v44 }
 0x319   : > { %v14412_v55 = vcombine.low %v4637_v11, %v4645_v29  ;;  %v5106_v11 = vrot.slane %v5092_v14, %v13359_v13  ;;  %v14427_v29 = vrot.slane %v5107_v47, %v13359_v13  ;;  %v14431_v28 = vrot.slane %v5091_v49, %v13359_v13 }
 0x31a   : > { %v5140_v20 = vrot.slane %v5126_v53, %v13356_v8  ;;  %v5141_v39 = vcombine.high %v5133_v25, %v16870_v7  ;;  %v5378_v15 = vrot.slane %v4949_v6, %v13356_v8  ;;  %v14439_v33 = vrot.slane %v5133_v25, %v13359_v13 }
 0x31b   : > { %v14423_v45 = vpack.i.b16 %v14412_v55, %v14397_v58  ;;  %16983 = vst [vmem:[#allocation15_spill] sm:$0xff] %v14427_v29  ;;  %16984 = vst [vmem:[#allocation17_spill] sm:$0xff] %v14431_v28  ;;  %v5861_v14 = vcombine.low %v5099_v59, %v5106_v11  ;;  %v11465_v47 = vcombine.high %v5099_v59, %v5106_v11  ;;  %v16986_v51 = vshrl.u32 %v16982_v52, 16 }
 0x31c   : > { %16985 = vst [vmem:[#allocation16_spill] sm:$0xff] %v14439_v33  ;;  %v14444_v49 = vrot.slane %v5141_v39, %v13359_v13  ;;  %v5156_v53 = vcombine.high %v5140_v20, %v16870_v7  ;;  %v5385_v6 = vrot.slane %v5371_v62, %v13356_v8  ;;  %v14451_v0 = vrot.slane %v5140_v20, %v13359_v13 }
 0x31d   : > { %12093 = vmatprep.subr.msk.bf16.mxu0 %vm6627_vm0, %v14423_v45  ;;  %v4953_v41 = vpack.i.b16 %v4952_v40, %v16986_v51  ;;  %v14454_v25 = vrot.slane %v5861_v14, %v13356_v8  ;;  %v5386_v51 = vcombine.high %v5378_v15, %v16870_v7  ;;  %v14463_v59 = vrot.slane %v11465_v47, %v13356_v8 }
 0x31e   : > { %16987 = vst [vmem:[#allocation11_spill] sm:$0xff] %v14444_v49  ;;  %16988 = vst [vmem:[#allocation12_spill] sm:$0xff] %v14451_v0  ;;  %v14460_v40 = vrot.slane %v5156_v53, %v13359_v13  ;;  %v5393_v11 = vrot.slane %v5378_v15, %v13359_v13  ;;  %v5401_v62 = vcombine.high %v5385_v6, %v16870_v7  ;;  %v16992_v53 = vld [vmem:[#allocation60_spill] sm:$0xff]  ;;  %v4876_v0 = vshrl.u32 %v14397_v58, 16 }
 0x31f   : > { %16989 = vst [vmem:[#allocation117_spill] sm:$0xff] %v14454_v25  ;;  %16991 = vst [vmem:[#allocation119_spill] sm:$0xff] %v14463_v59  ;;  %v5400_v39 = vrot.slane %v5386_v51, %v13359_v13  ;;  %v5420_v14 = vcombine.high %v4953_v41, %v13353_v44  ;;  %v5427_v52 = vrot.slane %v4953_v41, %v13356_v8 }
 0x320   : > { %16990 = vst [vmem:[#allocation118_spill] sm:$0xff] %v14460_v40  ;;  %v5408_v18 = vrot.slane %v5385_v6, %v13359_v13  ;;  %v5415_v15 = vrot.slane %v5401_v62, %v13359_v13  ;;  %v2395_v49 = vcombine.low %v16992_v53, %v13798_v56  ;;  %v2394_v33 = vrot.slane %v2387_v50, %v13359_v13  ;;  %v16994_v53 = vld [vmem:[#allocation58_spill] sm:$0xff] }
 0x321   : > { %v5434_v20 = vrot.slane %v5420_v14, %v13356_v8  ;;  %v5435_v51 = vcombine.high %v5427_v52, %v16870_v7  ;;  %v6155_v59 = vcombine.low %v5393_v11, %v5400_v39  ;;  %v11477_v29 = vcombine.high %v5393_v11, %v5400_v39 }
 0x322   : > { %v6171_v41 = vcombine.low %v5408_v18, %v5415_v15  ;;  %v11478_v28 = vcombine.high %v5408_v18, %v5415_v15  ;;  %v5442_v47 = vrot.slane %v5427_v52, %v13359_v13  ;;  %v2402_v18 = vrot.slane %v2395_v49, %v13359_v13  ;;  %v16995_v15 = vld [vmem:[#allocation59_spill] sm:$0xff] }
 0x323   : > { %v5449_v6 = vrot.slane %v5435_v51, %v13359_v13  ;;  %v5450_v62 = vcombine.high %v5434_v20, %v16870_v7  ;;  %v14489_v25 = vrot.slane %v5434_v20, %v13359_v13  ;;  %v14492_v14 = vrot.slane %v6155_v59, %v13356_v8 }
 0x324   : > { %v14495_v11 = vrot.slane %v11477_v29, %v13356_v8  ;;  %v16996_v50 = vcombine.low %v16994_v53, %v16995_v15  ;;  %v14506_v20 = vrot.slane %v6171_v41, %v13356_v8  ;;  %v14509_v59 = vrot.slane %v11478_v28, %v13356_v8 }
 0x325   : > { %v14499_v56 = vrot.slane %v5450_v62, %v13359_v13  ;;  %v6204_v52 = vcombine.low %v5442_v47, %v5449_v6  ;;  %v11479_v39 = vcombine.high %v5442_v47, %v5449_v6  ;;  %v16997_v29 = vcombine.high %v16994_v53, %v16995_v15  ;;  %v16998_v62 = vld [vmem:[#allocation61_spill] sm:$0xff]  ;;  %v4904_v47 = vpop.permute.xlu1 %4903  ;;  %v17005_v53 = vld [vmem:[#allocation22_spill] sm:$0xff] }
 0x326   : > { %v2427_v51 = vrot.slane %v16996_v50, %v13356_v8  ;;  %v2436_v40 = vcombine.low %v16998_v62, %v13850_v23  ;;  %v2403_v41 = vcombine.low %v2394_v33, %v2402_v18  ;;  %v17001_v23 = vld [vmem:[#allocation13_spill] sm:$0xff]  ;;  %v4936_v22 = vshrl.u32 %v4904_v47, 16 }
 0x327   : > { %16993 = vst [vmem:[#allocation60_spill] sm:$0xff] %v14499_v56  ;;  %v2435_v49 = vrot.slane %v16997_v29, %v13356_v8  ;;  %v14518_v6 = vrot.slane %v6204_v52, %v13356_v8  ;;  %v14521_v50 = vrot.slane %v11479_v39, %v13356_v8  ;;  %v4877_v29 = vshrl.u32 %v14412_v55, 16  ;;  %v17002_v39 = vld [vmem:[#allocation21_spill] sm:$0xff] }
 0x328   : > { %v4933_v62 = vpack.i.b16 %v4904_v47, %v17001_v23  ;;  %v6668_v52 = vsel %vm6627_vm0, %v14423_v45, 0  ;;  %v4483_v33 = vcombine.low %v17003_v37, %v17002_v39  ;;  %v2443_v58 = vrot.slane %v2436_v40, %v13359_v13 }
 0x329   : > { %16999 = vst [vmem:[#allocation58_spill] sm:$0xff] %v14518_v6  ;;  %17000 = vst [vmem:[#allocation59_spill] sm:$0xff] %v14521_v50  ;;  %v2444_v15 = vcombine.low %v2427_v51, %v2435_v49  ;;  %v4878_v28 = vpack.i.b16 %v4877_v29, %v4876_v0  ;;  %11920 = vmatpush3.bf16.xpose.msra.mxu0 %v6668_v52  ;;  %v4491_v51 = vcombine.low %v17005_v53, %v17004_v60  ;;  %v17007_v0 = vld [vmem:[#allocation19_spill] sm:$0xff] }
 0x32a   : > { %v3142_v49 = vshrl.u32 %v2403_v41, 16  ;;  %v17006_v55 = vshrl.u32 %v17001_v23, 16  ;;  %v5175_v47 = vcombine.high %v4933_v62, %v13353_v44  ;;  %v5182_v45 = vrot.slane %v4933_v62, %v13356_v8 }
 0x32b   : > { %v2451_v18 = vrot.slane %v2444_v15, %v13359_v13  ;;  %12101 = vmatprep.subr.msk.bf16.mxu1 %vm6627_vm0, %v4878_v28  ;;  %v4490_v37 = vrot.slane %v4483_v33, %v13359_v13  ;;  %v4498_v40 = vrot.slane %v4491_v51, %v13359_v13  ;;  %v17008_v15 = vld [vmem:[#allocation18_spill] sm:$0xff]  ;;  %v17012_v51 = vld [vmem:[#allocation24_spill] sm:$0xff] }
 0x32c   : > { %v4937_v5 = vpack.i.b16 %v4936_v22, %v17006_v55  ;;  %v17009_v29 = vcombine.low %v17007_v0, %v17008_v15  ;;  %v5189_v53 = vrot.slane %v5175_v47, %v13356_v8  ;;  %v5190_v22 = vcombine.high %v5182_v45, %v16870_v7 }
 0x32d   : > { %v2452_v38 = vcombine.low %v2443_v58, %v2451_v18  ;;  %v17010_v62 = vcombine.high %v17007_v0, %v17008_v15  ;;  %v17011_v18 = vld [vmem:[#allocation25_spill] sm:$0xff] }
 0x32e   : > { %v4523_v60 = vrot.slane %v17009_v29, %v13356_v8  ;;  %v5224_v23 = vcombine.high %v4937_v5, %v13353_v44  ;;  %v5231_v58 = vrot.slane %v4937_v5, %v13356_v8  ;;  %v4532_v55 = vcombine.low %v17012_v51, %v17011_v18 }
 0x32f   : > { %v4531_v52 = vrot.slane %v17010_v62, %v13356_v8  ;;  %v3141_v39 = vpack.i.b16 %v2452_v38, %v2403_v41  ;;  %v3143_v33 = vshrl.u32 %v2452_v38, 16  ;;  %v5197_v29 = vrot.slane %v5182_v45, %v13359_v13 }
 0x330   : > { %v5204_v47 = vrot.slane %v5190_v22, %v13359_v13  ;;  %v5205_v6 = vcombine.high %v5189_v53, %v16870_v7  ;;  %v5238_v44 = vrot.slane %v5224_v23, %v13356_v8  ;;  %v5212_v0 = vrot.slane %v5189_v53, %v13359_v13 }
 0x331   : > { %11931 = vmatprep.mubr.msk.bf16.mxu0 %vm6627_vm0, %v3141_v39  ;;  %v3144_v50 = vpack.i.b16 %v3143_v33, %v3142_v49  ;;  %v5239_v38 = vcombine.high %v5231_v58, %v16870_v7  ;;  %v4499_v41 = vcombine.low %v4490_v37, %v4498_v40  ;;  %v14568_v15 = vrot.slane %v5231_v58, %v13359_v13 }
 0x332   : > { %v5219_v5 = vrot.slane %v5205_v6, %v13359_v13  ;;  %v5254_v45 = vcombine.high %v5238_v44, %v16870_v7  ;;  %v5959_v22 = vcombine.low %v5197_v29, %v5204_v47  ;;  %v11469_v62 = vcombine.high %v5197_v29, %v5204_v47 }
 0x333   : > { %11963 = vmatprep.mubr.msk.bf16.mxu1 %vm6627_vm0, %v3144_v50  ;;  %v14573_v23 = vrot.slane %v5239_v38, %v13359_v13  ;;  %v4540_v49 = vcombine.low %v4523_v60, %v4531_v52  ;;  %v6813_v53 = vsel %vm6627_vm0, %v4878_v28, 0  ;;  %v4539_v40 = vrot.slane %v4532_v55, %v13359_v13  ;;  %v17020_v38 = vld [vmem:[#allocation28_spill] sm:$0xff] }
 0x334   : > { %v14577_v39 = vrot.slane %v5254_v45, %v13359_v13  ;;  %v5975_v37 = vcombine.low %v5212_v0, %v5219_v5  ;;  %v11470_v6 = vcombine.high %v5212_v0, %v5219_v5  ;;  %11952 = vmatpush3.bf16.xpose.msra.mxu1 %v6813_v53  ;;  %v14581_v33 = vrot.slane %v5238_v44, %v13359_v13  ;;  %v17019_v0 = vld [vmem:[#allocation29_spill] sm:$0xff]  ;;  %v17021_v45 = vld [vmem:[#allocation31_spill] sm:$0xff] }
 0x335   : > { %v14584_v50 = vrot.slane %v5959_v22, %v13356_v8  ;;  %v14587_v58 = vrot.slane %v11469_v62, %v13356_v8  ;;  %v4547_v60 = vrot.slane %v4540_v49, %v13359_v13  ;;  %v6008_v18 = vcombine.low %v14568_v15, %v14573_v23  ;;  %v17022_v22 = vld [vmem:[#allocation30_spill] sm:$0xff]  ;;  %v17024_v53 = vld [vmem:[#allocation27_spill] sm:$0xff] }
 0x336   : > { %17013 = vst [vmem:[#allocation61_spill] sm:$0xff] %v14577_v39  ;;  %17014 = vst [vmem:[#allocation13_spill] sm:$0xff] %v14581_v33  ;;  %v14591_v28 = vrot.slane %v5975_v37, %v13356_v8  ;;  %v14594_v52 = vrot.slane %v11470_v6, %v13356_v8  ;;  %v4870_v47 = vshrl.u32 %v4499_v41, 16  ;;  %v4385_v5 = vcombine.low %v17020_v38, %v17019_v0  ;;  %v17023_v49 = vld [vmem:[#allocation26_spill] sm:$0xff]  ;;  %v17029_v33 = vld [vmem:[#allocation37_spill] sm:$0xff] }
 0x337   : > { %17015 = vst [vmem:[#allocation21_spill] sm:$0xff] %v14584_v50  ;;  %17016 = vst [vmem:[#allocation20_spill] sm:$0xff] %v14587_v58  ;;  %v4548_v29 = vcombine.low %v4539_v40, %v4547_v60  ;;  %v4393_v62 = vcombine.low %v17022_v22, %v17021_v45  ;;  %v17025_v37 = vcombine.low %v17023_v49, %v17024_v53  ;;  %v17027_v40 = vld [vmem:[#allocation33_spill] sm:$0xff]  ;;  %v17028_v60 = vld [vmem:[#allocation32_spill] sm:$0xff] }
 0x338   : > { %17017 = vst [vmem:[#allocation23_spill] sm:$0xff] %v14591_v28  ;;  %17018 = vst [vmem:[#allocation22_spill] sm:$0xff] %v14594_v52  ;;  %v17026_v51 = vcombine.high %v17023_v49, %v17024_v53  ;;  %v4434_v39 = vcombine.low %v17028_v60, %v17027_v40  ;;  %v17030_v0 = vld [vmem:[#allocation36_spill] sm:$0xff]  ;;  %v4392_v45 = vrot.slane %v4385_v5, %v13359_v13  ;;  %v17031_v52 = vld [vmem:[#allocation39_spill] sm:$0xff] }
 0x339   : > { %v4425_v6 = vrot.slane %v17025_v37, %v13356_v8  ;;  %v4869_v7 = vpack.i.b16 %v4548_v29, %v4499_v41  ;;  %v4871_v55 = vshrl.u32 %v4548_v29, 16  ;;  %v4287_v38 = vcombine.low %v17030_v0, %v17029_v33  ;;  %v17032_v37 = vld [vmem:[#allocation38_spill] sm:$0xff]  ;;  %v17038_v40 = vld [vmem:[#allocation40_spill] sm:$0xff] }
 0x33a   : > { %v4433_v44 = vrot.slane %v17026_v51, %v13356_v8  ;;  %v4400_v22 = vrot.slane %v4393_v62, %v13359_v13  ;;  %v4295_v50 = vcombine.low %v17032_v37, %v17031_v52  ;;  %v4441_v51 = vrot.slane %v4434_v39, %v13359_v13  ;;  %v17034_v62 = vld [vmem:[#allocation35_spill] sm:$0xff]  ;;  %v17040_v0 = vld [vmem:[#allocation42_spill] sm:$0xff] }
 0x33b   : > { %12094 = vmatprep.subr.msk.bf16.mxu0 %vm6627_vm0, %v4869_v7  ;;  %v4872_v49 = vpack.i.b16 %v4871_v55, %v4870_v47  ;;  %v6665_v41 = vsel %vm6627_vm0, %v4869_v7, 0  ;;  %v4294_v29 = vrot.slane %v4287_v38, %v13359_v13  ;;  %v17037_v47 = vld [vmem:[#allocation41_spill] sm:$0xff]  ;;  %v14645_v38 = vrot.slane %v6008_v18, %v13356_v8  ;;  %v17042_v37 = vld [vmem:[#allocation47_spill] sm:$0xff] }
 0x33c   : > { %v4442_v28 = vcombine.low %v4425_v6, %v4433_v44  ;;  %11922 = vmatpush3.bf16.xpose.msra.mxu0 %v6665_v41  ;;  %v4401_v53 = vcombine.low %v4392_v45, %v4400_v22  ;;  %v4302_v5 = vrot.slane %v4295_v50, %v13359_v13  ;;  %v17033_v44 = vld [vmem:[#allocation34_spill] sm:$0xff]  ;;  %v4336_v60 = vcombine.low %v17038_v40, %v17037_v47  ;;  %v17043_v41 = vld [vmem:[#allocation44_spill] sm:$0xff] }
 0x33d   : > { %v17035_v6 = vcombine.low %v17033_v44, %v17034_v62  ;;  %12102 = vmatprep.subr.msk.bf16.mxu1 %vm6627_vm0, %v4872_v49  ;;  %v6810_v55 = vsel %vm6627_vm0, %v4872_v49, 0  ;;  %v17036_v7 = vcombine.high %v17033_v44, %v17034_v62  ;;  %17041 = vst [vmem:[#allocation19_spill] sm:$0xff] %v14645_v38  ;;  %v4197_v49 = vcombine.low %v17043_v41, %v17042_v37  ;;  %v17044_v62 = vld [vmem:[#allocation46_spill] sm:$0xff]  ;;  %v17052_v41 = vld [vmem:[#allocation55_spill] sm:$0xff] }
 0x33e   : > { %v4449_v33 = vrot.slane %v4442_v28, %v13359_v13  ;;  %v17039_v28 = vld [vmem:[#allocation43_spill] sm:$0xff]  ;;  %11954 = vmatpush3.bf16.xpose.msra.mxu1 %v6810_v55  ;;  %v4303_v22 = vcombine.low %v4294_v29, %v4302_v5  ;;  %v4343_v58 = vrot.slane %v4336_v60, %v13359_v13  ;;  %v17048_v55 = vld [vmem:[#allocation49_spill] sm:$0xff] }
 0x33f   : > { %v4327_v52 = vrot.slane %v17035_v6, %v13356_v8  ;;  %v4335_v39 = vrot.slane %v17036_v7, %v13356_v8  ;;  %v4189_v50 = vcombine.low %v17040_v0, %v17039_v28  ;;  %v4864_v6 = vshrl.u32 %v4401_v53, 16  ;;  %v17045_v7 = vld [vmem:[#allocation45_spill] sm:$0xff]  ;;  %v17051_v0 = vld [vmem:[#allocation51_spill] sm:$0xff] }
 0x340   : > { %v4450_v45 = vcombine.low %v4441_v51, %v4449_v33  ;;  %v17046_v47 = vcombine.low %v17044_v62, %v17045_v7  ;;  %v4204_v51 = vrot.slane %v4197_v49, %v13359_v13  ;;  %v17047_v33 = vcombine.high %v17044_v62, %v17045_v7  ;;  %v17050_v60 = vld [vmem:[#allocation53_spill] sm:$0xff]  ;;  %v17053_v49 = vld [vmem:[#allocation54_spill] sm:$0xff] }
 0x341   : > { %v4344_v44 = vcombine.low %v4327_v52, %v4335_v39  ;;  %v4196_v18 = vrot.slane %v4189_v50, %v13359_v13  ;;  %v17049_v52 = vld [vmem:[#allocation48_spill] sm:$0xff]  ;;  %v4091_v37 = vcombine.low %v17051_v0, %v17050_v60 }
 0x342   : > { %v4229_v40 = vrot.slane %v17046_v47, %v13356_v8  ;;  %v4863_v56 = vpack.i.b16 %v4450_v45, %v4401_v53  ;;  %v4865_v28 = vshrl.u32 %v4450_v45, 16  ;;  %v4237_v5 = vrot.slane %v17047_v33, %v13356_v8 }
 0x343   : > { %v4351_v29 = vrot.slane %v4344_v44, %v13359_v13  ;;  %v4238_v39 = vcombine.low %v17049_v52, %v17048_v55  ;;  %v4858_v45 = vshrl.u32 %v4303_v22, 16  ;;  %v4099_v44 = vcombine.low %v17053_v49, %v17052_v41 }
 0x344   : > { %12095 = vmatprep.subr.msk.bf16.mxu0 %vm6627_vm0, %v4863_v56  ;;  %v4866_v53 = vpack.i.b16 %v4865_v28, %v4864_v6  ;;  %v6662_v50 = vsel %vm6627_vm0, %v4863_v56, 0  ;;  %v4205_v38 = vcombine.low %v4196_v18, %v4204_v51  ;;  %v4246_v7 = vcombine.low %v4229_v40, %v4237_v5  ;;  %v17054_v56 = vld [vmem:[#allocation50_spill] sm:$0xff]  ;;  %v17055_v28 = vld [vmem:[#allocation52_spill] sm:$0xff] }
 0x345   : > { %v4352_v47 = vcombine.low %v4343_v58, %v4351_v29  ;;  %v4245_v62 = vrot.slane %v4238_v39, %v13359_v13  ;;  %11924 = vmatpush3.bf16.xpose.msra.mxu0 %v6662_v50  ;;  %v4098_v55 = vrot.slane %v4091_v37, %v13359_v13  ;;  %v4106_v6 = vrot.slane %v4099_v44, %v13359_v13  ;;  %v17059_v39 = vld [vmem:[#allocation57_spill] sm:$0xff]  ;;  %v17060_v37 = vld [vmem:[#allocation56_spill] sm:$0xff] }
 0x346   : > { %12103 = vmatprep.subr.msk.bf16.mxu1 %vm6627_vm0, %v4866_v53  ;;  %v6807_v33 = vsel %vm6627_vm0, %v4866_v53, 0  ;;  %v17056_v52 = vcombine.low %v17054_v56, %v17055_v28  ;;  %v4253_v18 = vrot.slane %v4246_v7, %v13359_v13  ;;  %v17057_v40 = vcombine.high %v17054_v56, %v17055_v28 }
 0x347   : > { %v4857_v0 = vpack.i.b16 %v4352_v47, %v4303_v22  ;;  %v4859_v58 = vshrl.u32 %v4352_v47, 16  ;;  %v17058_v29 = vcombine.high %v14568_v15, %v14573_v23  ;;  %11956 = vmatpush3.bf16.xpose.msra.mxu1 %v6807_v33  ;;  %v4140_v53 = vcombine.low %v17060_v37, %v17059_v39 }
 0x348   : > { %v4131_v60 = vrot.slane %v17056_v52, %v13356_v8  ;;  %v4139_v51 = vrot.slane %v17057_v40, %v13356_v8  ;;  %v17061_v22 = vcombine.low %v14200_v57, %v14193_v42  ;;  %v17062_v41 = vcombine.high %v14200_v57, %v14193_v42 }
 0x349   : > { %v14687_v5 = vrot.slane %v17058_v29, %v13356_v8  ;;  %12096 = vmatprep.subr.msk.bf16.mxu0 %vm6627_vm0, %v4857_v0  ;;  %v4860_v44 = vpack.i.b16 %v4859_v58, %v4858_v45  ;;  %v4254_v15 = vcombine.low %v4245_v62, %v4253_v18  ;;  %v4107_v23 = vcombine.low %v4098_v55, %v4106_v6 }
 0x34a   : > { %v6472_v50 = vrot.slane %v17061_v22, %v13356_v8  ;;  %v6480_v49 = vrot.slane %v17062_v41, %v13356_v8  ;;  %v4148_v47 = vcombine.low %v4131_v60, %v4139_v51  ;;  %v6659_v7 = vsel %vm6627_vm0, %v4857_v0, 0 }
 0x34b   : > { %v4852_v33 = vshrl.u32 %v4205_v38, 16  ;;  %v6481_v56 = vcombine.low %v14214_v3, %v14217_v9  ;;  %12104 = vmatprep.subr.msk.bf16.mxu1 %vm6627_vm0, %v4860_v44  ;;  %v4851_v52 = vpack.i.b16 %v4254_v15, %v4205_v38  ;;  %v4853_v40 = vshrl.u32 %v4254_v15, 16  ;;  %v17067_v15 = vld [vmem:[#allocation62_spill] sm:$0xff] }
 0x34c   : > { %v6489_v28 = vcombine.low %v6472_v50, %v6480_v49  ;;  %v4147_v42 = vrot.slane %v4140_v53, %v13359_v13  ;;  %v4155_v57 = vrot.slane %v4148_v47, %v13359_v13  ;;  %v17063_v55 = vcombine.low %v14208_v43, %v14203_v2  ;;  %v17069_v47 = vld [vmem:[#allocation65_spill] sm:$0xff] }
 0x34d   : > { %v6488_v45 = vrot.slane %v6481_v56, %v13359_v13  ;;  %v17064_v3 = vcombine.high %v14208_v43, %v14203_v2  ;;  %v4854_v38 = vpack.i.b16 %v4853_v40, %v4852_v33  ;;  %v4846_v0 = vshrl.u32 %v4107_v23, 16  ;;  %11926 = vmatpush3.bf16.xpose.msra.mxu0 %v6659_v7  ;;  %v17071_v33 = vld [vmem:[#allocation64_spill] sm:$0xff] }
 0x34e   : > { %v6496_v62 = vrot.slane %v6489_v28, %v13359_v13  ;;  %v6505_v6 = vrot.slane %v17063_v55, %v13356_v8  ;;  %v4156_v60 = vcombine.low %v4147_v42, %v4155_v57  ;;  %v17065_v58 = vcombine.low %v14211_v61, %v14220_v1  ;;  %12097 = vmatprep.subr.msk.bf16.mxu0 %vm6627_vm0, %v4851_v52  ;;  %v17074_v42 = vld [vmem:[#allocation68_spill] sm:$0xff]  ;;  %v17075_v57 = vld [vmem:[#allocation67_spill] sm:$0xff] }
 0x34f   : > { %v6513_v9 = vrot.slane %v17064_v3, %v13356_v8  ;;  %v17066_v29 = vcombine.high %v14211_v61, %v14220_v1  ;;  %v14726_v2 = vcombine.low %v13857_v4, %v13861_v30  ;;  %v6804_v43 = vsel %vm6627_vm0, %v4860_v44, 0 }
 0x350   : > { %v6521_v18 = vrot.slane %v17065_v58, %v13356_v8  ;;  %v6497_v51 = vcombine.low %v6488_v45, %v6496_v62  ;;  %v4845_v53 = vpack.i.b16 %v4156_v60, %v4107_v23  ;;  %v4847_v22 = vshrl.u32 %v4156_v60, 16  ;;  %11958 = vmatpush3.bf16.xpose.msra.mxu1 %v6804_v43  ;;  %v17068_v23 = vld [vmem:[#allocation66_spill] sm:$0xff] }
 0x351   : > { %v6529_v39 = vrot.slane %v17066_v29, %v13356_v8  ;;  %v6530_v37 = vcombine.low %v6505_v6, %v6513_v9  ;;  %v2583_v50 = vcombine.low %v13866_v54, %v13878_v32  ;;  %v6656_v41 = vsel %vm6627_vm0, %v4851_v52, 0  ;;  %12105 = vmatprep.subr.msk.bf16.mxu1 %vm6627_vm0, %v4854_v38  ;;  %v17070_v32 = vld [vmem:[#allocation63_spill] sm:$0xff] }
 0x352   : > { %v6801_v61 = vsel %vm6627_vm0, %v4854_v38, 0  ;;  %v4848_v4 = vpack.i.b16 %v4847_v22, %v4846_v0  ;;  %v6607_v30 = vshrl.u32 %v6497_v51, 16  ;;  %v3147_v44 = vpack.i.b16 %v14726_v2, %v17067_v15 }
 0x353   : > { %v6537_v1 = vrot.slane %v6530_v37, %v13359_v13  ;;  %v6538_v49 = vcombine.low %v6521_v18, %v6529_v39  ;;  %v2591_v7 = vcombine.low %v17069_v47, %v17068_v23  ;;  %v17072_v56 = vcombine.low %v17070_v32, %v17071_v33 }
 0x354   : > { %v17073_v52 = vcombine.high %v17070_v32, %v17071_v33  ;;  %v2632_v45 = vcombine.low %v17075_v57, %v17074_v42  ;;  %v6653_v62 = vsel %vm6627_vm0, %v4845_v53, 0  ;;  %v2590_v55 = vrot.slane %v2583_v50, %v13359_v13  ;;  %v17083_v42 = vld [vmem:[#allocation73_spill] sm:$0xff] }
 0x355   : > { %v6545_v54 = vrot.slane %v6538_v49, %v13359_v13  ;;  %v2623_v28 = vrot.slane %v17072_v56, %v13356_v8  ;;  %v2598_v6 = vrot.slane %v2591_v7, %v13359_v13  ;;  %v3149_v3 = vshrl.u32 %v14726_v2, 16  ;;  %11928 = vmatpush3.bf16.xpose.msra.mxu0 %v6656_v41  ;;  %v17080_v56 = vld [vmem:[#allocation72_spill] sm:$0xff] }
 0x356   : > { %v2631_v40 = vrot.slane %v17073_v52, %v13356_v8  ;;  %v3148_v60 = vshrl.u32 %v17067_v15, 16  ;;  %v6383_v0 = vcombine.low %v14266_v19, %v14269_v27  ;;  %v6798_v58 = vsel %vm6627_vm0, %v4848_v4, 0  ;;  %12098 = vmatprep.subr.msk.bf16.mxu0 %vm6627_vm0, %v4845_v53 }
 0x357   : > { %v6546_v9 = vcombine.low %v6537_v1, %v6545_v54  ;;  %v14759_v18 = vcombine.low %v2590_v55, %v2598_v6  ;;  %v6391_v29 = vcombine.low %v14272_v48, %v14275_v21  ;;  %v17076_v39 = vcombine.low %v14260_v36, %v14263_v10 }
 0x358   : > { %v2640_v38 = vcombine.low %v2623_v28, %v2631_v40  ;;  %v2639_v22 = vrot.slane %v2632_v45, %v13359_v13  ;;  %v14769_v1 = vpack.i.b16 %v3149_v3, %v3148_v60  ;;  %v6390_v19 = vrot.slane %v6383_v0, %v13359_v13  ;;  %11960 = vmatpush3.bf16.xpose.msra.mxu1 %v6801_v61  ;;  %v17081_v28 = vld [vmem:[#allocation71_spill] sm:$0xff]  ;;  %v17082_v40 = vld [vmem:[#allocation74_spill] sm:$0xff]  ;;  %v17088_v0 = vld [vmem:[#allocation76_spill] sm:$0xff] }
 0x359   : > { %v6423_v37 = vrot.slane %v17076_v39, %v13356_v8  ;;  %v6608_v43 = vshrl.u32 %v6546_v9, 16  ;;  %v6398_v27 = vrot.slane %v6391_v29, %v13359_v13  ;;  %v17077_v48 = vcombine.high %v14260_v36, %v14263_v10  ;;  %12106 = vmatprep.subr.msk.bf16.mxu1 %vm6627_vm0, %v4848_v4  ;;  %v17084_v3 = vld [vmem:[#allocation70_spill] sm:$0xff] }
 0x35a   : > { %v2647_v50 = vrot.slane %v2640_v38, %v13359_v13  ;;  %v6432_v41 = vcombine.low %v14278_v34, %v14281_v31  ;;  %v14780_v49 = vpack.i.b16 %v6546_v9, %v6497_v51  ;;  %v6285_v47 = vcombine.low %v14358_v16, %v14361_v63  ;;  %v17085_v9 = vld [vmem:[#allocation69_spill] sm:$0xff] }
 0x35b   : > { %v6431_v21 = vrot.slane %v17077_v48, %v13356_v8  ;;  %v6293_v53 = vcombine.low %v14364_v46, %v14369_v24  ;;  %v6399_v7 = vcombine.low %v6390_v19, %v6398_v27  ;;  %v3154_v10 = vshrl.u32 %v14759_v18, 16  ;;  %v17090_v27 = vld [vmem:[#allocation79_spill] sm:$0xff]  ;;  %v17091_v48 = vld [vmem:[#allocation78_spill] sm:$0xff] }
 0x35c   : > { %v2648_v23 = vcombine.low %v2639_v22, %v2647_v50  ;;  %v17078_v36 = vcombine.low %v14388_v17, %v14384_v26  ;;  %v14792_v31 = vpack.i.b16 %v6608_v43, %v6607_v30  ;;  %v6292_v61 = vrot.slane %v6285_v47, %v13359_v13  ;;  %v17092_v47 = vld [vmem:[#allocation82_spill] sm:$0xff] }
 0x35d   : > { %v6440_v54 = vcombine.low %v6423_v37, %v6431_v21  ;;  %v6300_v16 = vrot.slane %v6293_v53, %v13359_v13  ;;  %v6439_v63 = vrot.slane %v6432_v41, %v13359_v13  ;;  %v17079_v24 = vcombine.high %v14388_v17, %v14384_v26  ;;  %11930 = vmatpush3.bf16.xpose.msra.mxu0 %v6653_v62  ;;  %v17093_v53 = vld [vmem:[#allocation81_spill] sm:$0xff] }
 0x35e   : > { %v6325_v34 = vrot.slane %v17078_v36, %v13356_v8  ;;  %v3155_v51 = vshrl.u32 %v2648_v23, 16  ;;  %v6334_v32 = vcombine.low %v14392_v35, %v14395_v12  ;;  %v3153_v30 = vpack.i.b16 %v2648_v23, %v14759_v18  ;;  %v17089_v18 = vld [vmem:[#allocation75_spill] sm:$0xff]  ;;  %11979 = vmatprep.subr.bf16.mxu0 %v14780_v49  ;;  %v17095_v36 = vld [vmem:[#allocation80_spill] sm:$0xff] }
 0x35f   : > { %v6447_v46 = vrot.slane %v6440_v54, %v13359_v13  ;;  %v6333_v4 = vrot.slane %v17079_v24, %v13356_v8  ;;  %v6301_v33 = vcombine.low %v6292_v61, %v6300_v16  ;;  %v2681_v52 = vcombine.low %v17081_v28, %v17080_v56 }
 0x360   : > { %v2689_v57 = vcombine.low %v17083_v42, %v17082_v40  ;;  %v6599_v55 = vshrl.u32 %v6399_v7, 16  ;;  %v17086_v17 = vcombine.low %v17084_v3, %v17085_v9  ;;  %v3156_v38 = vpack.i.b16 %v3155_v51, %v3154_v10  ;;  %11962 = vmatpush3.bf16.xpose.msra.mxu1 %v6798_v58  ;;  %v17094_v10 = vld [vmem:[#allocation77_spill] sm:$0xff] }
 0x361   : > { %v6448_v45 = vcombine.low %v6439_v63, %v6447_v46  ;;  %v6342_v6 = vcombine.low %v6325_v34, %v6333_v4  ;;  %v17087_v12 = vcombine.high %v17084_v3, %v17085_v9  ;;  %v2730_v29 = vcombine.low %v17089_v18, %v17088_v0  ;;  %12011 = vmatprep.subr.bf16.mxu1 %v14792_v31  ;;  %v17098_v63 = vld [vmem:[#allocation84_spill] sm:$0xff]  ;;  %v17099_v46 = vld [vmem:[#allocation83_spill] sm:$0xff] }
 0x362   : > { %v2721_v26 = vrot.slane %v17086_v17, %v13356_v8  ;;  %v2696_v35 = vrot.slane %v2689_v57, %v13359_v13  ;;  %v6341_v37 = vrot.slane %v6334_v32, %v13359_v13  ;;  %v2688_v62 = vrot.slane %v2681_v52, %v13359_v13  ;;  %v17100_v3 = vld [vmem:[#allocation60_spill] sm:$0xff]  ;;  %v17103_v17 = vld [vmem:[#allocation59_spill] sm:$0xff] }
 0x363   : > { %v2729_v60 = vrot.slane %v17087_v12, %v13356_v8  ;;  %v6600_v39 = vshrl.u32 %v6448_v45, 16  ;;  %v6349_v43 = vrot.slane %v6342_v6, %v13359_v13  ;;  %v6597_v22 = vpack.i.b16 %v6448_v45, %v6399_v7  ;;  %v17106_v0 = vld [vmem:[#allocation112_spill] sm:$0xff] }
 0x364   : > { %v6591_v19 = vshrl.u32 %v6301_v33, 16  ;;  %v2779_v21 = vcombine.low %v17091_v48, %v17090_v27  ;;  %v2697_v23 = vcombine.low %v2688_v62, %v2696_v35  ;;  %v2787_v54 = vcombine.low %v17093_v53, %v17092_v47  ;;  %11932 = vmatmul.mubr.msk.bf16.vlgmr.msra.gmra.mxu0 %vm6627_vm0, %v3147_v44  ;;  %v17111_v48 = vld [vmem:[#allocation109_spill] sm:$0xff] }
 0x365   : > { %v2738_v50 = vcombine.low %v2721_v26, %v2729_v60  ;;  %v6350_v41 = vcombine.low %v6341_v37, %v6349_v43  ;;  %v17096_v34 = vcombine.low %v17094_v10, %v17095_v36  ;;  %v2737_v58 = vrot.slane %v2730_v29, %v13359_v13  ;;  %11935 = vmatprep.mubr.msk.bf16.mxu0 %vm6627_vm0, %v3153_v30 }
 0x366   : > { %v17097_v61 = vcombine.high %v17094_v10, %v17095_v36  ;;  %v2828_v24 = vcombine.low %v17099_v46, %v17098_v63  ;;  %v6601_v4 = vpack.i.b16 %v6600_v39, %v6599_v55  ;;  %v2786_v56 = vrot.slane %v2779_v21, %v13359_v13  ;;  %11980 = vmatpush3.bf16.msra.mxu0 %v14780_v49  ;;  %v17104_v49 = vld [vmem:[#allocation58_spill] sm:$0xff]  ;;  %v17112_v21 = vld [vmem:[#allocation111_spill] sm:$0xff] }
 0x367   : > { %v2819_v51 = vrot.slane %v17096_v34, %v13356_v8  ;;  %v2745_v7 = vrot.slane %v2738_v50, %v13359_v13  ;;  %v6592_v32 = vshrl.u32 %v6350_v41, 16  ;;  %v2794_v28 = vrot.slane %v2787_v54, %v13359_v13  ;;  %11964 = vmatmul.mubr.msk.bf16.vlgmr.msra.gmra.mxu1 %vm6627_vm0, %v14769_v1  ;;  %11981 = vmatprep.subr.bf16.mxu0 %v6597_v22  ;;  %v17105_v1 = vld [vmem:[#allocation110_spill] sm:$0xff]  ;;  %v17109_v50 = vld [vmem:[#allocation116_spill] sm:$0xff] }
 0x368   : > { %v2827_v16 = vrot.slane %v17097_v61, %v13356_v8  ;;  %v6589_v52 = vpack.i.b16 %v6350_v41, %v6301_v33  ;;  %v6187_v57 = vcombine.low %v14492_v14, %v14495_v11  ;;  %v2835_v6 = vrot.slane %v2828_v24, %v13359_v13  ;;  %11967 = vmatprep.mubr.msk.bf16.mxu1 %vm6627_vm0, %v3156_v38 }
 0x369   : > { %v2746_v40 = vcombine.low %v2737_v58, %v2745_v7  ;;  %v2795_v45 = vcombine.low %v2786_v56, %v2794_v28  ;;  %v6195_v55 = vcombine.low %v14506_v20, %v14509_v59  ;;  %v17101_v33 = vcombine.low %v14489_v25, %v17100_v3  ;;  %12012 = vmatpush3.bf16.msra.mxu1 %v14792_v31  ;;  %v17116_v58 = vld [vmem:[#allocation114_spill] sm:$0xff]  ;;  %v17119_v28 = vld [vmem:[#allocation88_spill] sm:$0xff] }
 0x36a   : > { %v2836_v42 = vcombine.low %v2819_v51, %v2827_v16  ;;  %v6593_v14 = vpack.i.b16 %v6592_v32, %v6591_v19  ;;  %v6194_v15 = vrot.slane %v6187_v57, %v13359_v13  ;;  %v3160_v20 = vshrl.u32 %v2697_v23, 16  ;;  %12013 = vmatprep.subr.bf16.mxu1 %v6601_v4  ;;  %11982 = vmatpush3.bf16.msra.mxu0 %v6597_v22  ;;  %v17110_v19 = vld [vmem:[#allocation115_spill] sm:$0xff]  ;;  %v17115_v51 = vld [vmem:[#allocation113_spill] sm:$0xff]  ;;  %v17121_v57 = vld [vmem:[#allocation90_spill] sm:$0xff] }
 0x36b   : > { %v6227_v9 = vrot.slane %v17101_v33, %v13356_v8  ;;  %v3161_v2 = vshrl.u32 %v2746_v40, 16  ;;  %v6202_v59 = vrot.slane %v6195_v55, %v13359_v13  ;;  %v17102_v44 = vcombine.high %v14489_v25, %v17100_v3  ;;  %11983 = vmatprep.subr.bf16.mxu0 %v6589_v52 }
 0x36c   : > { %v2843_v11 = vrot.slane %v2836_v42, %v13359_v13  ;;  %v6236_v26 = vcombine.low %v17104_v49, %v17103_v17  ;;  %v3159_v35 = vpack.i.b16 %v2746_v40, %v2697_v23  ;;  %v3166_v60 = vshrl.u32 %v2795_v45, 16  ;;  %v17120_v40 = vld [vmem:[#allocation87_spill] sm:$0xff] }
 0x36d   : > { %v6235_v30 = vrot.slane %v17102_v44, %v13356_v8  ;;  %v17107_v18 = vcombine.low %v17105_v1, %v17106_v0  ;;  %v3162_v39 = vpack.i.b16 %v3161_v2, %v3160_v20  ;;  %v6203_v37 = vcombine.low %v6194_v15, %v6202_v59  ;;  %12014 = vmatpush3.bf16.msra.mxu1 %v6601_v4  ;;  %v17123_v20 = vld [vmem:[#allocation86_spill] sm:$0xff]  ;;  %v17124_v59 = vld [vmem:[#allocation85_spill] sm:$0xff] }
 0x36e   : > { %v2844_v12 = vcombine.low %v2835_v6, %v2843_v11  ;;  %v17108_v43 = vcombine.high %v17105_v1, %v17106_v0  ;;  %v6243_v31 = vrot.slane %v6236_v26, %v13359_v13  ;;  %v6089_v27 = vcombine.low %v17110_v19, %v17109_v50  ;;  %11936 = vmatmul.mubr.msk.bf16.gmra.mxu0 %vm6627_vm0, %v3159_v35  ;;  %v17127_v26 = vld [vmem:[#allocation92_spill] sm:$0xff]  ;;  %v17129_v0 = vld [vmem:[#allocation95_spill] sm:$0xff] }
 0x36f   : > { %v6080_v29 = vrot.slane %v17107_v18, %v13356_v8  ;;  %v6244_v25 = vcombine.low %v6227_v9, %v6235_v30  ;;  %v17113_v41 = vcombine.low %v17111_v48, %v17112_v21  ;;  %v17114_v22 = vcombine.high %v17111_v48, %v17112_v21  ;;  %12015 = vmatprep.subr.bf16.mxu1 %v6593_v14  ;;  %v17130_v18 = vld [vmem:[#allocation93_spill] sm:$0xff] }
 0x370   : > { %v6088_v62 = vrot.slane %v17108_v43, %v13356_v8  ;;  %v3167_v38 = vshrl.u32 %v2844_v12, 16  ;;  %v3165_v47 = vpack.i.b16 %v2844_v12, %v2795_v45  ;;  %v6096_v34 = vrot.slane %v6089_v27, %v13359_v13  ;;  %11984 = vmatpush3.bf16.msra.mxu0 %v6589_v52  ;;  %v17122_v45 = vld [vmem:[#allocation89_spill] sm:$0xff]  ;;  %11968 = vmatmul.mubr.msk.bf16.gmra.mxu1 %vm6627_vm0, %v3162_v39 }
 0x371   : > { %v6113_v23 = vrot.slane %v17113_v41, %v13356_v8  ;;  %v6251_v53 = vrot.slane %v6244_v25, %v13359_v13  ;;  %v6121_v10 = vrot.slane %v17114_v22, %v13356_v8  ;;  %v17117_v7 = vcombine.low %v17115_v51, %v17116_v58  ;;  %12016 = vmatpush3.bf16.msra.mxu1 %v6593_v14  ;;  %v17128_v14 = vld [vmem:[#allocation91_spill] sm:$0xff]  ;;  %v17131_v25 = vld [vmem:[#allocation98_spill] sm:$0xff]  ;;  %v17132_v43 = vld [vmem:[#allocation97_spill] sm:$0xff] }
 0x372   : > { %v6097_v54 = vcombine.low %v6080_v29, %v6088_v62  ;;  %v3168_v36 = vpack.i.b16 %v3167_v38, %v3166_v60  ;;  %v17118_v16 = vcombine.high %v17115_v51, %v17116_v58  ;;  %11939 = vmatprep.mubr.msk.bf16.mxu0 %vm6627_vm0, %v3165_v47  ;;  %v6583_v32 = vshrl.u32 %v6203_v37, 16  ;;  %v17134_v38 = vld [vmem:[#allocation96_spill] sm:$0xff]  ;;  %v17138_v22 = vld [vmem:[#allocation99_spill] sm:$0xff] }
 0x373   : > { %v6129_v61 = vrot.slane %v17117_v7, %v13356_v8  ;;  %v6252_v46 = vcombine.low %v6243_v31, %v6251_v53  ;;  %v6138_v4 = vcombine.low %v6113_v23, %v6121_v10  ;;  %v2877_v42 = vcombine.low %v17120_v40, %v17119_v28  ;;  %v17133_v31 = vld [vmem:[#allocation94_spill] sm:$0xff]  ;;  %v17139_v58 = vld [vmem:[#allocation20_spill] sm:$0xff]  ;;  %v17140_v7 = vld [vmem:[#allocation21_spill] sm:$0xff] }
 0x374   : > { %v6137_v63 = vrot.slane %v17118_v16, %v13356_v8  ;;  %v6104_v24 = vrot.slane %v6097_v54, %v13359_v13  ;;  %v2885_v6 = vcombine.low %v17122_v45, %v17121_v57  ;;  %11971 = vmatprep.mubr.msk.bf16.mxu1 %vm6627_vm0, %v3168_v36  ;;  %v17125_v44 = vcombine.low %v17123_v20, %v17124_v59  ;;  %v17137_v54 = vld [vmem:[#allocation100_spill] sm:$0xff]  ;;  %v17141_v16 = vld [vmem:[#allocation22_spill] sm:$0xff]  ;;  %v17144_v28 = vld [vmem:[#allocation61_spill] sm:$0xff] }
 0x375   : > { %v6581_v55 = vpack.i.b16 %v6252_v46, %v6203_v37  ;;  %v6584_v3 = vshrl.u32 %v6252_v46, 16  ;;  %v6145_v9 = vrot.slane %v6138_v4, %v13359_v13  ;;  %v2884_v11 = vrot.slane %v2877_v42, %v13359_v13 }
 0x376   : > { %v6146_v56 = vcombine.low %v6129_v61, %v6137_v63  ;;  %v6105_v33 = vcombine.low %v6096_v34, %v6104_v24  ;;  %v2892_v2 = vrot.slane %v2885_v6, %v13359_v13  ;;  %v2917_v30 = vrot.slane %v17125_v44, %v13356_v8  ;;  %v17142_v63 = vld [vmem:[#allocation23_spill] sm:$0xff]  ;;  %v17148_v44 = vld [vmem:[#allocation17_spill] sm:$0xff] }
 0x377   : > { %11985 = vmatprep.subr.bf16.mxu0 %v6581_v55  ;;  %v6585_v15 = vpack.i.b16 %v6584_v3, %v6583_v32  ;;  %v17126_v17 = vcombine.high %v17123_v20, %v17124_v59  ;;  %v2926_v35 = vcombine.low %v17128_v14, %v17127_v26  ;;  %v2975_v29 = vcombine.low %v17130_v18, %v17129_v0 }
 0x378   : > { %v6153_v52 = vrot.slane %v6146_v56, %v13359_v13  ;;  %11986 = vmatpush3.bf16.msra.mxu0 %v6581_v55  ;;  %v2893_v60 = vcombine.low %v2884_v11, %v2892_v2  ;;  %v6575_v1 = vshrl.u32 %v6105_v33, 16  ;;  %v2983_v62 = vcombine.low %v17132_v43, %v17131_v25  ;;  %v17143_v56 = vld [vmem:[#allocation13_spill] sm:$0xff]  ;;  %v17154_v43 = vld [vmem:[#allocation16_spill] sm:$0xff] }
 0x379   : > { %v2925_v49 = vrot.slane %v17126_v17, %v13356_v8  ;;  %12017 = vmatprep.subr.bf16.mxu1 %v6585_v15  ;;  %v2933_v39 = vrot.slane %v2926_v35, %v13359_v13  ;;  %v17135_v50 = vcombine.low %v17133_v31, %v17134_v38  ;;  %v2982_v21 = vrot.slane %v2975_v29, %v13359_v13 }
 0x37a   : > { %v6154_v12 = vcombine.low %v6145_v9, %v6153_v52  ;;  %12018 = vmatpush3.bf16.msra.mxu1 %v6585_v15  ;;  %v17136_v41 = vcombine.high %v17133_v31, %v17134_v38  ;;  %v2990_v53 = vrot.slane %v2983_v62, %v13359_v13  ;;  %v3024_v10 = vcombine.low %v17138_v22, %v17137_v54  ;;  %v17147_v52 = vld [vmem:[#allocation19_spill] sm:$0xff] }
 0x37b   : > { %v2934_v37 = vcombine.low %v2917_v30, %v2925_v49  ;;  %v3015_v19 = vrot.slane %v17135_v50, %v13356_v8  ;;  %v3172_v36 = vshrl.u32 %v2893_v60, 16  ;;  %v5991_v61 = vcombine.low %v17140_v7, %v17139_v58  ;;  %v17149_v30 = vld [vmem:[#allocation15_spill] sm:$0xff]  ;;  %v17164_v58 = vld [vmem:[#allocation106_spill] sm:$0xff]  ;;  %v17165_v7 = vld [vmem:[#allocation105_spill] sm:$0xff] }
 0x37c   : > { %v6573_v27 = vpack.i.b16 %v6154_v12, %v6105_v33  ;;  %v6576_v48 = vshrl.u32 %v6154_v12, 16  ;;  %v3023_v23 = vrot.slane %v17136_v41, %v13356_v8  ;;  %v5999_v46 = vcombine.low %v17142_v63, %v17141_v16  ;;  %v17152_v12 = vld [vmem:[#allocation119_spill] sm:$0xff]  ;;  %v17159_v41 = vld [vmem:[#allocation118_spill] sm:$0xff] }
 0x37d   : > { %v2941_v47 = vrot.slane %v2934_v37, %v13359_v13  ;;  %v2991_v4 = vcombine.low %v2982_v21, %v2990_v53  ;;  %v3031_v32 = vrot.slane %v3024_v10, %v13359_v13  ;;  %v17145_v40 = vcombine.low %v17143_v56, %v17144_v28  ;;  %v17155_v62 = vld [vmem:[#allocation11_spill] sm:$0xff]  ;;  %v17158_v21 = vld [vmem:[#allocation12_spill] sm:$0xff] }
 0x37e   : > { %11987 = vmatprep.subr.bf16.mxu0 %v6573_v27  ;;  %v6577_v34 = vpack.i.b16 %v6576_v48, %v6575_v1  ;;  %v3032_v51 = vcombine.low %v3015_v19, %v3023_v23  ;;  %v5998_v45 = vrot.slane %v5991_v61, %v13359_v13  ;;  %v6006_v6 = vrot.slane %v5999_v46, %v13359_v13 }
 0x37f   : > { %v2942_v24 = vcombine.low %v2933_v39, %v2941_v47  ;;  %11988 = vmatpush3.bf16.msra.mxu0 %v6573_v27  ;;  %v6031_v42 = vrot.slane %v17145_v40, %v13356_v8  ;;  %v17146_v55 = vcombine.high %v17143_v56, %v17144_v28  ;;  %v6040_v11 = vcombine.low %v17147_v52, %v14687_v5 }
 0x380   : > { %12019 = vmatprep.subr.bf16.mxu1 %v6577_v34  ;;  %v3039_v57 = vrot.slane %v3032_v51, %v13359_v13  ;;  %v3178_v2 = vshrl.u32 %v2991_v4, 16  ;;  %v6007_v20 = vcombine.low %v5998_v45, %v6006_v6  ;;  %v17150_v17 = vcombine.low %v17148_v44, %v17149_v30 }
 0x381   : > { %v6039_v3 = vrot.slane %v17146_v55, %v13356_v8  ;;  %v3171_v33 = vpack.i.b16 %v2942_v24, %v2893_v60  ;;  %v3173_v9 = vshrl.u32 %v2942_v24, 16  ;;  %12020 = vmatpush3.bf16.msra.mxu1 %v6577_v34  ;;  %v6047_v14 = vrot.slane %v6040_v11, %v13359_v13  ;;  %v17153_v60 = vld [vmem:[#allocation117_spill] sm:$0xff]  ;;  %v17163_v34 = vld [vmem:[#allocation103_spill] sm:$0xff] }
 0x382   : > { %v3040_v15 = vcombine.low %v3031_v32, %v3039_v57  ;;  %v5884_v49 = vrot.slane %v17150_v17, %v13356_v8  ;;  %v17151_v35 = vcombine.high %v17148_v44, %v17149_v30  ;;  %v5893_v1 = vcombine.low %v17153_v60, %v17152_v12  ;;  %v17166_v24 = vld [vmem:[#allocation101_spill] sm:$0xff]  ;;  %v6613_v60 = vld [vmem:[%s17172_s26 + $0x10] sm:$0xff] }
 0x383   : > { %v6048_v59 = vcombine.low %v6031_v42, %v6039_v3  ;;  %11940 = vmatmul.mubr.msk.bf16.gmra.mxu0 %vm6627_vm0, %v3171_v33  ;;  %v3174_v26 = vpack.i.b16 %v3173_v9, %v3172_v36  ;;  %v6567_v39 = vshrl.u32 %v6007_v20, 16  ;;  %v17156_v31 = vcombine.low %v17154_v43, %v17155_v62  ;;  %v17162_v36 = vld [vmem:[#allocation104_spill] sm:$0xff]  ;;  %v17171_v33 = vld [vmem:[#allocation107_spill] sm:$0xff] }
 0x384   : > { %v5892_v5 = vrot.slane %v17151_v35, %v13356_v8  ;;  %v3177_v0 = vpack.i.b16 %v3040_v15, %v2991_v4  ;;  %v3179_v29 = vshrl.u32 %v3040_v15, 16  ;;  %v5900_v37 = vrot.slane %v5893_v1, %v13359_v13  ;;  %v17167_v4 = vld [vmem:[#allocation102_spill] sm:$0xff]  ;;  %v17170_v3 = vld [vmem:[#allocation108_spill] sm:$0xff] }
 0x385   : > { %v6055_v18 = vrot.slane %v6048_v59, %v13359_v13  ;;  %11972 = vmatmul.mubr.msk.bf16.gmra.mxu1 %vm6627_vm0, %v3174_v26  ;;  %v5917_v38 = vrot.slane %v17156_v31, %v13356_v8  ;;  %v17157_v50 = vcombine.high %v17154_v43, %v17155_v62  ;;  %v17160_v23 = vcombine.low %v17158_v21, %v17159_v41 }
 0x386   : > { %v5901_v25 = vcombine.low %v5884_v49, %v5892_v5  ;;  %11943 = vmatprep.mubr.msk.bf16.mxu0 %vm6627_vm0, %v3177_v0  ;;  %v3180_v48 = vpack.i.b16 %v3179_v29, %v3178_v2  ;;  %v17161_v53 = vcombine.high %v17158_v21, %v17159_v41  ;;  %v3073_v51 = vcombine.low %v17163_v34, %v17162_v36  ;;  %v6611_v29 = vld [vmem:[%s17172_s26] sm:$0xff] }
 0x387   : > { %v5925_v19 = vrot.slane %v17157_v50, %v13356_v8  ;;  %v6056_v27 = vcombine.low %v6047_v14, %v6055_v18  ;;  %v5933_v47 = vrot.slane %v17160_v23, %v13356_v8  ;;  %v3081_v61 = vcombine.low %v17165_v7, %v17164_v58  ;;  %v6612_v50 = vld [vmem:[%s17172_s26 + $0x8] sm:$0xff] }
 0x388   : > { %v5941_v54 = vrot.slane %v17161_v53, %v13356_v8  ;;  %v5908_v22 = vrot.slane %v5901_v25, %v13359_v13  ;;  %11975 = vmatprep.mubr.msk.bf16.mxu1 %vm6627_vm0, %v3180_v48  ;;  %v17168_v32 = vcombine.low %v17166_v24, %v17167_v4  ;;  %v17169_v6 = vcombine.high %v17166_v24, %v17167_v4 }
 0x389   : > { %v5942_v10 = vcombine.low %v5917_v38, %v5925_v19  ;;  %v6565_v16 = vpack.i.b16 %v6056_v27, %v6007_v20  ;;  %v6568_v63 = vshrl.u32 %v6056_v27, 16  ;;  %v3088_v42 = vrot.slane %v3081_v61, %v13359_v13  ;;  %v6616_v61 = vld [vmem:[%s17172_s26 + $0x28] sm:$0xff] }
 0x38a   : > { %v5950_v46 = vcombine.low %v5933_v47, %v5941_v54  ;;  %v3113_v56 = vrot.slane %v17168_v32, %v13356_v8  ;;  %v5909_v28 = vcombine.low %v5900_v37, %v5908_v22  ;;  %v3121_v55 = vrot.slane %v17169_v6, %v13356_v8  ;;  %v6614_v37 = vld [vmem:[%s17172_s26 + $0x18] sm:$0xff] }
 0x38b   : > { %v5949_v40 = vrot.slane %v5942_v10, %v13359_v13  ;;  %11989 = vmatprep.subr.bf16.mxu0 %v6565_v16  ;;  %v6569_v57 = vpack.i.b16 %v6568_v63, %v6567_v39  ;;  %v3122_v9 = vcombine.low %v17171_v33, %v17170_v3  ;;  %v3080_v52 = vrot.slane %v3073_v51, %v13359_v13  ;;  %v6618_v22 = vld [vmem:[%s17172_s26 + $0x38] sm:$0xff]  ;;  %v6617_v51 = vld [vmem:[%s17172_s26 + $0x30] sm:$0xff] }
 0x38c   : > { %v5957_v45 = vrot.slane %v5950_v46, %v13359_v13  ;;  %11990 = vmatpush3.bf16.msra.mxu0 %v6565_v16  ;;  %v3130_v2 = vcombine.low %v3113_v56, %v3121_v55  ;;  %v6559_v20 = vshrl.u32 %v5909_v28, 16  ;;  %v6615_v46 = vld [vmem:[%s17172_s26 + $0x20] sm:$0xff]  ;;  %v6622_v6 = vld [vmem:[%s17172_s26 + $0x58] sm:$0xff] }
 0x38d   : > { %12021 = vmatprep.subr.bf16.mxu1 %v6569_v57  ;;  %v3089_v15 = vcombine.low %v3080_v52, %v3088_v42  ;;  %v3129_v44 = vrot.slane %v3122_v9, %v13359_v13  ;;  %v6621_v9 = vld [vmem:[%s17172_s26 + $0x50] sm:$0xff] }
 0x38e   : > { %v5958_v11 = vcombine.low %v5949_v40, %v5957_v45  ;;  %12022 = vmatpush3.bf16.msra.mxu1 %v6569_v57  ;;  %v3137_v30 = vrot.slane %v3130_v2, %v13359_v13  ;;  %v6620_v2 = vld [vmem:[%s17172_s26 + $0x48] sm:$0xff] }
 0x38f   : > { %v3184_v35 = vshrl.u32 %v3089_v15, 16 }
 0x390   : > { %v6557_v59 = vpack.i.b16 %v5958_v11, %v5909_v28  ;;  %v6560_v17 = vshrl.u32 %v5958_v11, 16  ;;  %v3138_v49 = vcombine.low %v3129_v44, %v3137_v30 }
 0x392   : > { %11991 = vmatprep.subr.bf16.mxu0 %v6557_v59  ;;  %v6561_v26 = vpack.i.b16 %v6560_v17, %v6559_v20  ;;  %v3183_v14 = vpack.i.b16 %v3138_v49, %v3089_v15  ;;  %v3185_v5 = vshrl.u32 %v3138_v49, 16 }
 0x393   : > { %11992 = vmatpush3.bf16.msra.mxu0 %v6557_v59  ;;  %v6619_v59 = vld [vmem:[%s17172_s26 + $0x40] sm:$0xff] }
 0x394   : > { %12023 = vmatprep.subr.bf16.mxu1 %v6561_v26  ;;  %11944 = vmatmul.mubr.msk.bf16.gmra.mxu0 %vm6627_vm0, %v3183_v14  ;;  %v3186_v12 = vpack.i.b16 %v3185_v5, %v3184_v35 }
 0x395   : > { %12024 = vmatpush3.bf16.msra.mxu1 %v6561_v26 }
 0x396   : > { %11976 = vmatmul.mubr.msk.bf16.gmra.mxu1 %vm6627_vm0, %v3186_v12 }
 0x424   : > { %v11933_v1 = vpop.f32.mrf.mxu0 }
 0x425   : > { %v15018_v0 = vadd.f32 %v11933_v1, %v6613_v60 }
 0x426   : > { %v6710_v18 = vpop.f32.mrf.mxu0 }
 0x427   : > { %v11965_v39 = vpop.f32.mrf.mxu1  ;;  %6922 = vmax.xlane.f32.xlu0 %v15018_v0  ;;  %v15027_v62 = vadd.f32 %v6710_v18, %v6611_v29 }
 0x428   : > { %v11934_v25 = vpop.f32.mrf.mxu0  ;;  %v15036_v48 = vadd.f32 %v11965_v39, %v6613_v60  ;;  %v6626_v60 = vld [vmem:[%s17172_s26 + $0x78] sm:$0xff]  ;;  %v6625_v39 = vld [vmem:[%s17172_s26 + $0x70] sm:$0xff] }
 0x429   : > { %v6855_v43 = vpop.f32.mrf.mxu1  ;;  %v15029_v31 = vadd.f32 %v11934_v25, %v6614_v37 }
 0x42a   : > { %v6713_v38 = vpop.f32.mrf.mxu0  ;;  %v15042_v47 = vadd.f32 %v6855_v43, %v6611_v29  ;;  %v6624_v43 = vld [vmem:[%s17172_s26 + $0x68] sm:$0xff] }
 0x42b   : > { %v11966_v19 = vpop.f32.mrf.mxu1  ;;  %6924 = vmax.xlane.f32.xlu1 %v15029_v31  ;;  %6918 = vmax.xlane.f32.xlu0 %v15027_v62  ;;  %v15038_v21 = vadd.f32 %v6713_v38, %v6612_v50 }
 0x42c   : > { %v15044_v53 = vadd.f32 %v11966_v19, %v6614_v37  ;;  %v6623_v19 = vld [vmem:[%s17172_s26 + $0x60] sm:$0xff] }
 0x42d   : > { %v6858_v41 = vpop.f32.mrf.mxu1 }
 0x42e   : > { %v11937_v27 = vpop.f32.mrf.mxu0  ;;  %v15051_v36 = vadd.f32 %v6858_v41, %v6612_v50 }
 0x42f   : > { %6920 = vmax.xlane.f32.xlu1 %v15038_v21  ;;  %6954 = vmax.xlane.f32.xlu0 %v15036_v48  ;;  %v15063_v16 = vadd.f32 %v11937_v27, %v6617_v51 }
 0x430   : > { %v6726_v23 = vpop.f32.mrf.mxu0  ;;  %v11969_v54 = vpop.f32.mrf.mxu1 }
 0x431   : > { %v15072_v32 = vadd.f32 %v6726_v23, %v6615_v46  ;;  %v15078_v42 = vadd.f32 %v11969_v54, %v6617_v51 }
 0x432   : > { %v11938_v10 = vpop.f32.mrf.mxu0  ;;  %v6871_v58 = vpop.f32.mrf.mxu1 }
 0x433   : > { %6956 = vmax.xlane.f32.xlu1 %v15044_v53  ;;  %6950 = vmax.xlane.f32.xlu0 %v15042_v47  ;;  %v15053_v34 = vadd.f32 %v11938_v10, %v6618_v22  ;;  %v15087_v3 = vadd.f32 %v6871_v58, %v6615_v46 }
 0x434   : > { %v6729_v7 = vpop.f32.mrf.mxu0  ;;  %v11970_v24 = vpop.f32.mrf.mxu1 }
 0x435   : > { %v15065_v63 = vadd.f32 %v6729_v7, %v6616_v61  ;;  %v15074_v56 = vadd.f32 %v11970_v24, %v6618_v22 }
 0x436   : > { %v6874_v28 = vpop.f32.mrf.mxu1 }
 0x437   : > { %6952 = vmax.xlane.f32.xlu0 %v15051_v36  ;;  %6932 = vmax.xlane.f32.xlu1 %v15053_v34  ;;  %v15080_v57 = vadd.f32 %v6874_v28, %v6616_v61 }
 0x43b   : > { %6930 = vmax.xlane.f32.xlu0 %v15063_v16  ;;  %6928 = vmax.xlane.f32.xlu1 %v15065_v63 }
 0x43f   : > { %6964 = vmax.xlane.f32.xlu1 %v15074_v56  ;;  %6926 = vmax.xlane.f32.xlu0 %v15072_v32 }
 0x443   : > { %v11941_v4 = vpop.f32.mrf.mxu0  ;;  %6960 = vmax.xlane.f32.xlu1 %v15080_v57  ;;  %6962 = vmax.xlane.f32.xlu0 %v15078_v42 }
 0x444   : > { %v15099_v15 = vadd.f32 %v11941_v4, %v6621_v9 }
 0x445   : > { %v6742_v40 = vpop.f32.mrf.mxu0  ;;  %v11973_v45 = vpop.f32.mrf.mxu1 }
 0x446   : > { %v15108_v17 = vadd.f32 %v6742_v40, %v6619_v59  ;;  %v15114_v35 = vadd.f32 %v11973_v45, %v6621_v9 }
 0x447   : > { %v11942_v55 = vpop.f32.mrf.mxu0  ;;  %v6887_v52 = vpop.f32.mrf.mxu1  ;;  %6958 = vmax.xlane.f32.xlu0 %v15087_v3 }
 0x448   : > { %v15089_v33 = vadd.f32 %v11942_v55, %v6622_v6  ;;  %v15123_v18 = vadd.f32 %v6887_v52, %v6619_v59 }
 0x449   : > { %v6745_v11 = vpop.f32.mrf.mxu0  ;;  %v11974_v44 = vpop.f32.mrf.mxu1 }
 0x44a   : > { %6940 = vmax.xlane.f32.xlu1 %v15089_v33  ;;  %v15101_v20 = vadd.f32 %v6745_v11, %v6620_v2  ;;  %v15110_v49 = vadd.f32 %v11974_v44, %v6622_v6 }
 0x44b   : > { %6938 = vmax.xlane.f32.xlu0 %v15099_v15  ;;  %v6890_v26 = vpop.f32.mrf.mxu1 }
 0x44c   : > { %v15116_v5 = vadd.f32 %v6890_v26, %v6620_v2 }
 0x44e   : > { %6936 = vmax.xlane.f32.xlu1 %v15101_v20 }
 0x44f   : > { %6934 = vmax.xlane.f32.xlu0 %v15108_v17 }
 0x452   : > { %6972 = vmax.xlane.f32.xlu1 %v15110_v49 }
 0x453   : > { %6970 = vmax.xlane.f32.xlu0 %v15114_v35 }
 0x454   : > { %v11945_v30 = vpop.f32.mrf.mxu0 }
 0x455   : > { %v15135_v38 = vadd.f32 %v11945_v30, %v6625_v39 }
 0x456   : > { %v6758_v14 = vpop.f32.mrf.mxu0  ;;  %v11977_v12 = vpop.f32.mrf.mxu1  ;;  %6968 = vmax.xlane.f32.xlu1 %v15116_v5 }
 0x457   : > { %6966 = vmax.xlane.f32.xlu0 %v15123_v18  ;;  %v15144_v41 = vadd.f32 %v6758_v14, %v6623_v19  ;;  %v15150_v22 = vadd.f32 %v11977_v12, %v6625_v39 }
 0x458   : > { %v11946_v1 = vpop.f32.mrf.mxu0  ;;  %v6903_v37 = vpop.f32.mrf.mxu1 }
 0x459   : > { %v15125_v29 = vadd.f32 %v11946_v1, %v6626_v60  ;;  %v15156_v51 = vadd.f32 %v6903_v37, %v6623_v19 }
 0x45a   : > { %v6761_v25 = vpop.f32.mrf.mxu0  ;;  %v11978_v27 = vpop.f32.mrf.mxu1 }
 0x45b   : > { %6948 = vmax.xlane.f32.xlu1 %v15125_v29  ;;  %v15137_v50 = vadd.f32 %v6761_v25, %v6624_v43  ;;  %6946 = vmax.xlane.f32.xlu0 %v15135_v38  ;;  %v15146_v23 = vadd.f32 %v11978_v27, %v6626_v60 }
 0x45c   : > { %v6906_v54 = vpop.f32.mrf.mxu1 }
 0x45d   : > { %v15152_v10 = vadd.f32 %v6906_v54, %v6624_v43 }
 0x45f   : > { %6944 = vmax.xlane.f32.xlu1 %v15137_v50  ;;  %6942 = vmax.xlane.f32.xlu0 %v15144_v41 }
 0x463   : > { %6980 = vmax.xlane.f32.xlu1 %v15146_v23  ;;  %6978 = vmax.xlane.f32.xlu0 %v15150_v22 }
 0x467   : > { %6976 = vmax.xlane.f32.xlu1 %v15152_v10  ;;  %6974 = vmax.xlane.f32.xlu0 %v15156_v51 }
 0x4b0   : > { %v6923_v58 = vpop.xlane.xlu0 %6922 }
 0x4b1   : > { %v6984_v7 = vsub.f32 %v15018_v0, %v6923_v58 }
 0x4b3   : > { %v7018_v61 = vmul.f32 1.442695, %v6984_v7 }
 0x4b4   : > { %v6919_v46 = vpop.xlane.xlu0 %6918  ;;  %v6925_v24 = vpop.xlane.xlu1 %6924 }
 0x4b5   : > { %12305 = vpow2.f32 %v7018_v61  ;;  %v6982_v4 = vsub.f32 %v15027_v62, %v6919_v46  ;;  %v6985_v11 = vsub.f32 %v15029_v31, %v6925_v24 }
 0x4b7   : > { %v7014_v28 = vmul.f32 1.442695, %v6982_v4  ;;  %v7020_v30 = vmul.f32 1.442695, %v6985_v11 }
 0x4b8   : > { %v6955_v40 = vpop.xlane.xlu0 %6954  ;;  %v6921_v45 = vpop.xlane.xlu1 %6920 }
 0x4b9   : > { %12307 = vpow2.f32 %v7014_v28  ;;  %v7000_v6 = vsub.f32 %v15036_v48, %v6955_v40  ;;  %v6983_v62 = vsub.f32 %v15038_v21, %v6921_v45  ;;  %v17173_v40 = vld [vmem:[#allocation10_spill] sm:$0xff] }
 0x4bb   : > { %v7050_v55 = vmul.f32 1.442695, %v7000_v6  ;;  %v7016_v14 = vmul.f32 1.442695, %v6983_v62 }
 0x4bc   : > { %v6951_v9 = vpop.xlane.xlu0 %6950  ;;  %v6957_v52 = vpop.xlane.xlu1 %6956 }
 0x4bd   : > { %12309 = vpow2.f32 %v7050_v55  ;;  %v6998_v0 = vsub.f32 %v15042_v47, %v6951_v9  ;;  %v7001_v12 = vsub.f32 %v15044_v53, %v6957_v52 }
 0x4bf   : > { %v7046_v2 = vmul.f32 1.442695, %v6998_v0  ;;  %v7052_v1 = vmul.f32 1.442695, %v7001_v12 }
 0x4c0   : > { %v6953_v59 = vpop.xlane.xlu0 %6952  ;;  %v6933_v44 = vpop.xlane.xlu1 %6932 }
 0x4c1   : > { %12311 = vpow2.f32 %v7046_v2  ;;  %v6999_v21 = vsub.f32 %v15051_v36, %v6953_v59 }
 0x4c2   : > { %v15165_v26 = vpop.eup %12305  ;;  %12313 = vpow2.f32 %v7020_v30 }
 0x4c3   : > { %7082 = vadd.xlane.f32.xlu0 %v15165_v26  ;;  %12315 = vpow2.f32 %v7016_v14  ;;  %v7048_v43 = vmul.f32 1.442695, %v6999_v21 }
 0x4c4   : > { %v6931_v48 = vpop.xlane.xlu0 %6930  ;;  %v6929_v60 = vpop.xlane.xlu1 %6928  ;;  %12317 = vpow2.f32 %v7052_v1 }
 0x4c5   : > { %v6988_v53 = vsub.f32 %v15063_v16, %v6931_v48  ;;  %12319 = vpow2.f32 %v7048_v43 }
 0x4c6   : > { %v15169_v31 = vpop.eup %12307 }
 0x4c7   : > { %7078 = vadd.xlane.f32.xlu1 %v15169_v31  ;;  %v7026_v54 = vmul.f32 1.442695, %v6988_v53 }
 0x4c8   : > { %v6927_v47 = vpop.xlane.xlu0 %6926  ;;  %v6965_v37 = vpop.xlane.xlu1 %6964 }
 0x4c9   : > { %12321 = vpow2.f32 %v7026_v54  ;;  %v6986_v48 = vsub.f32 %v15072_v32, %v6927_v47 }
 0x4ca   : > { %v15173_v39 = vpop.eup %12309 }
 0x4cb   : > { %7114 = vadd.xlane.f32.xlu0 %v15173_v39  ;;  %v7022_v1 = vmul.f32 1.442695, %v6986_v48 }
 0x4cc   : > { %v6963_v25 = vpop.xlane.xlu0 %6962  ;;  %v6961_v7 = vpop.xlane.xlu1 %6960 }
 0x4cd   : > { %v7004_v58 = vsub.f32 %v15078_v42, %v6963_v25  ;;  %v6989_v42 = vsub.f32 %v15053_v34, %v6933_v44  ;;  %v7005_v34 = vsub.f32 %v15074_v56, %v6965_v37 }
 0x4ce   : > { %v15177_v19 = vpop.eup %12311 }
 0x4cf   : > { %7110 = vadd.xlane.f32.xlu0 %v15177_v19  ;;  %v15181_v36 = vpop.eup %12313  ;;  %v7058_v46 = vmul.f32 1.442695, %v7004_v58  ;;  %v7028_v55 = vmul.f32 1.442695, %v6989_v42  ;;  %v7060_v30 = vmul.f32 1.442695, %v7005_v34 }
 0x4d0   : > { %v6959_v27 = vpop.xlane.xlu0 %6958  ;;  %v15185_v16 = vpop.eup %12315 }
 0x4d1   : > { %v7002_v24 = vsub.f32 %v15087_v3, %v6959_v27  ;;  %12323 = vpow2.f32 %v7058_v46  ;;  %v15191_v6 = vpop.eup %12317  ;;  %v6987_v3 = vsub.f32 %v15065_v63, %v6929_v60  ;;  %v7003_v63 = vsub.f32 %v15080_v57, %v6961_v7 }
 0x4d2   : > { %v15195_v52 = vpop.eup %12319 }
 0x4d3   : > { %7084 = vadd.xlane.f32.xlu0 %v15181_v36  ;;  %v6941_v4 = vpop.xlane.xlu1 %6940  ;;  %v7054_v45 = vmul.f32 1.442695, %v7002_v24  ;;  %v7024_v0 = vmul.f32 1.442695, %v6987_v3  ;;  %v7056_v14 = vmul.f32 1.442695, %v7003_v63 }
 0x4d4   : > { %v6939_v61 = vpop.xlane.xlu0 %6938  ;;  %v6993_v57 = vsub.f32 %v15089_v33, %v6941_v4 }
 0x4d5   : > { %12325 = vpow2.f32 %v7054_v45  ;;  %v6992_v21 = vsub.f32 %v15099_v15, %v6939_v61 }
 0x4d6   : > { %12327 = vpow2.f32 %v7028_v55  ;;  %v15199_v2 = vpop.eup %12321  ;;  %v7036_v27 = vmul.f32 1.442695, %v6993_v57 }
 0x4d7   : > { %7080 = vadd.xlane.f32.xlu0 %v15185_v16  ;;  %v6937_v11 = vpop.xlane.xlu1 %6936  ;;  %12329 = vpow2.f32 %v7024_v0  ;;  %v7034_v47 = vmul.f32 1.442695, %v6992_v21 }
 0x4d8   : > { %v6935_v28 = vpop.xlane.xlu0 %6934  ;;  %4899 = vrot.lane.b32.xlu1 %v17173_v40, %s12682_s27  ;;  %12331 = vpow2.f32 %v7060_v30  ;;  %v6991_v15 = vsub.f32 %v15101_v20, %v6937_v11 }
 0x4d9   : > { %v6990_v56 = vsub.f32 %v15108_v17, %v6935_v28  ;;  %12333 = vpow2.f32 %v7056_v14 }
 0x4da   : > { %12335 = vpow2.f32 %v7022_v1  ;;  %v7032_v7 = vmul.f32 1.442695, %v6991_v15 }
 0x4db   : > { %7116 = vadd.xlane.f32.xlu0 %v15191_v6  ;;  %v6973_v44 = vpop.xlane.xlu1 %6972  ;;  %v7030_v25 = vmul.f32 1.442695, %v6990_v56 }
 0x4dc   : > { %v6971_v9 = vpop.xlane.xlu0 %6970 }
 0x4dd   : > { %12337 = vpow2.f32 %v7030_v25  ;;  %v7008_v33 = vsub.f32 %v15114_v35, %v6971_v9  ;;  %v7009_v35 = vsub.f32 %v15110_v49, %v6973_v44 }
 0x4de   : > { %v15203_v62 = vpop.eup %12323  ;;  %12339 = vpow2.f32 %v7034_v47 }
 0x4df   : > { %7112 = vadd.xlane.f32.xlu0 %v15195_v52  ;;  %v6969_v37 = vpop.xlane.xlu1 %6968  ;;  %12341 = vpow2.f32 %v7036_v27  ;;  %v7066_v24 = vmul.f32 1.442695, %v7008_v33 }
 0x4e0   : > { %v6967_v59 = vpop.xlane.xlu0 %6966 }
 0x4e1   : > { %v7006_v43 = vsub.f32 %v15123_v18, %v6967_v59  ;;  %v7007_v18 = vsub.f32 %v15116_v5, %v6969_v37 }
 0x4e2   : > { %v15208_v60 = vpop.eup %12325 }
 0x4e3   : > { %7090 = vadd.xlane.f32.xlu0 %v15199_v2  ;;  %v15213_v32 = vpop.eup %12327  ;;  %v7062_v58 = vmul.f32 1.442695, %v7006_v43  ;;  %v7064_v28 = vmul.f32 1.442695, %v7007_v18 }
 0x4e4   : > { %v6947_v12 = vpop.xlane.xlu0 %6946  ;;  %v6949_v53 = vpop.xlane.xlu1 %6948 }
 0x4e5   : > { %v15218_v54 = vpop.eup %12329  ;;  %12343 = vpow2.f32 %v7062_v58  ;;  %v6996_v20 = vsub.f32 %v15135_v38, %v6947_v12  ;;  %v7068_v38 = vmul.f32 1.442695, %v7009_v35  ;;  %v6997_v11 = vsub.f32 %v15125_v29, %v6949_v53  ;;  %v17174_v35 = vld [vmem:[#allocation14_spill] sm:$0xff] }
 0x4e6   : > { %v15223_v46 = vpop.eup %12331  ;;  %12345 = vpow2.f32 %v7032_v7 }
 0x4e7   : > { %7122 = vadd.xlane.f32.xlu0 %v15203_v62  ;;  %v15228_v42 = vpop.eup %12333  ;;  %12347 = vpow2.f32 %v7066_v24  ;;  %v7042_v45 = vmul.f32 1.442695, %v6996_v20 }
 0x4e8   : > { %v6943_v17 = vpop.xlane.xlu0 %6942  ;;  %v6945_v4 = vpop.xlane.xlu1 %6944  ;;  %12349 = vpow2.f32 %v7064_v28 }
 0x4e9   : > { %v6994_v5 = vsub.f32 %v15144_v41, %v6943_v17  ;;  %v15231_v55 = vpop.eup %12335  ;;  %12351 = vpow2.f32 %v7042_v45  ;;  %v7044_v41 = vmul.f32 1.442695, %v6997_v11  ;;  %v6995_v44 = vsub.f32 %v15137_v50, %v6945_v4 }
 0x4ea   : > { %v15236_v49 = vpop.eup %12337  ;;  %12353 = vpow2.f32 %v7068_v38 }
 0x4eb   : > { %7118 = vadd.xlane.f32.xlu0 %v15208_v60  ;;  %v7038_v0 = vmul.f32 1.442695, %v6994_v5  ;;  %v15239_v59 = vpop.eup %12339 }
 0x4ec   : > { %v6979_v61 = vpop.xlane.xlu0 %6978  ;;  %v6981_v9 = vpop.xlane.xlu1 %6980 }
 0x4ed   : > { %v15244_v30 = vpop.eup %12341  ;;  %12355 = vpow2.f32 %v7038_v0  ;;  %v7012_v29 = vsub.f32 %v15150_v22, %v6979_v61  ;;  %v7013_v22 = vsub.f32 %v15146_v23, %v6981_v9  ;;  %v4919_v61 = vshrl.u32 %v17173_v40, 16 }
 0x4ee   : > { %12357 = vpow2.f32 %v7044_v41  ;;  %v17175_v9 = vmov 0  }
 0x4ef   : > { %7092 = vadd.xlane.f32.xlu0 %v15213_v32  ;;  %v7074_v50 = vmul.f32 1.442695, %v7012_v29 }
 0x4f0   : > { %v6975_v3 = vpop.xlane.xlu0 %6974  ;;  %v6977_v63 = vpop.xlane.xlu1 %6976 }
 0x4f1   : > { %v7010_v34 = vsub.f32 %v15156_v51, %v6975_v3  ;;  %v7040_v51 = vmul.f32 1.442695, %v6995_v44  ;;  %v7011_v56 = vsub.f32 %v15152_v10, %v6977_v63  ;;  %v7076_v10 = vmul.f32 1.442695, %v7013_v22 }
 0x4f2   : > { %v15247_v14 = vpop.eup %12343 }
 0x4f3   : > { %7088 = vadd.xlane.f32.xlu0 %v15218_v54  ;;  %v7070_v48 = vmul.f32 1.442695, %v7010_v34  ;;  %v15252_v12 = vpop.eup %12345  ;;  %v7072_v21 = vmul.f32 1.442695, %v7011_v56 }
 0x4f4   : > { %v15254_v1 = vpop.eup %12347 }
 0x4f5   : > { %12359 = vpow2.f32 %v7070_v48  ;;  %v15259_v37 = vpop.eup %12349 }
 0x4f6   : > { %12361 = vpow2.f32 %v7040_v51  ;;  %v15261_v57 = vpop.eup %12351 }
 0x4f7   : > { %7124 = vadd.xlane.f32.xlu0 %v15223_v46  ;;  %12363 = vpow2.f32 %v7074_v50  ;;  %v15265_v25 = vpop.eup %12353 }
 0x4f8   : > { %12365 = vpow2.f32 %v7072_v21 }
 0x4f9   : > { %12367 = vpow2.f32 %v7076_v10 }
 0x4fa   : > { %v15267_v47 = vpop.eup %12355 }
 0x4fb   : > { %7120 = vadd.xlane.f32.xlu0 %v15228_v42  ;;  %v15271_v23 = vpop.eup %12357 }
 0x4fc   : > { %7086 = vadd.xlane.f32.xlu1 %v15231_v55 }
 0x4ff   : > { %7094 = vadd.xlane.f32.xlu0 %v15236_v49 }
 0x500   : > { %7098 = vadd.xlane.f32.xlu1 %v15239_v59 }
 0x502   : > { %v15273_v43 = vpop.eup %12359 }
 0x503   : > { %7100 = vadd.xlane.f32.xlu0 %v15244_v30  ;;  %v15277_v17 = vpop.eup %12361 }
 0x504   : > { %7126 = vadd.xlane.f32.xlu1 %v15247_v14  ;;  %v15279_v53 = vpop.eup %12363 }
 0x505   : > { %v15283_v27 = vpop.eup %12365 }
 0x506   : > { %v15286_v15 = vpop.eup %12367 }
 0x507   : > { %7096 = vadd.xlane.f32.xlu0 %v15252_v12 }
 0x508   : > { %7130 = vadd.xlane.f32.xlu1 %v15254_v1 }
 0x50b   : > { %7128 = vadd.xlane.f32.xlu0 %v15259_v37 }
 0x50c   : > { %7106 = vadd.xlane.f32.xlu1 %v15261_v57 }
 0x50f   : > { %7132 = vadd.xlane.f32.xlu0 %v15265_v25 }
 0x510   : > { %7102 = vadd.xlane.f32.xlu1 %v15267_v47 }
 0x513   : > { %7108 = vadd.xlane.f32.xlu0 %v15271_v23 }
 0x514   : > { %7134 = vadd.xlane.f32.xlu1 %v15273_v43 }
 0x517   : > { %7104 = vadd.xlane.f32.xlu0 %v15277_v17 }
 0x518   : > { %7138 = vadd.xlane.f32.xlu1 %v15279_v53 }
 0x51b   : > { %7136 = vadd.xlane.f32.xlu0 %v15283_v27 }
 0x51f   : > { %7140 = vadd.xlane.f32.xlu0 %v15286_v15 }
 0x54c   : > { %v7083_v33 = vpop.xlane.xlu0 %7082 }
 0x54d   : > { %12369 = vrcp.f32 %v7083_v33 }
 0x550   : > { %v7079_v58 = vpop.xlane.xlu1 %7078 }
 0x554   : > { %v7115_v7 = vpop.xlane.xlu0 %7114  ;;  %v4900_v18 = vpop.permute.xlu1 %4899 }
 0x555   : > { %v4917_v24 = vpack.i.b16 %v4900_v18, %v17173_v40  ;;  %v4920_v20 = vshrl.u32 %v4900_v18, 16 }
 0x557   : > { %v4921_v4 = vpack.i.b16 %v4920_v20, %v4919_v61  ;;  %v4979_v28 = vcombine.high %v4917_v24, %v17174_v35  ;;  %v4986_v45 = vrot.slane %v4917_v24, %v13356_v8 }
 0x558   : > { %v7111_v5 = vpop.xlane.xlu0 %7110 }
 0x559   : > { %v4993_v3 = vrot.slane %v4979_v28, %v13356_v8  ;;  %v4994_v38 = vcombine.high %v4986_v45, %v17175_v9  ;;  %v5028_v11 = vcombine.high %v4921_v4, %v17174_v35  ;;  %v5035_v0 = vrot.slane %v4921_v4, %v13356_v8 }
 0x55a   : > { %v5001_v34 = vrot.slane %v4986_v45, %v13359_v13 }
 0x55b   : > { %v5008_v41 = vrot.slane %v4994_v38, %v13359_v13  ;;  %v5009_v40 = vcombine.high %v4993_v3, %v17175_v9  ;;  %v5042_v44 = vrot.slane %v5028_v11, %v13356_v8  ;;  %v5016_v29 = vrot.slane %v4993_v3, %v13359_v13 }
 0x55c   : > { %v5043_v63 = vcombine.high %v5035_v0, %v17175_v9  ;;  %v7085_v48 = vpop.xlane.xlu0 %7084  ;;  %v5050_v56 = vrot.slane %v5035_v0, %v13359_v13 }
 0x55d   : > { %v5023_v51 = vrot.slane %v5009_v40, %v13359_v13  ;;  %v5058_v50 = vcombine.high %v5042_v44, %v17175_v9  ;;  %v5763_v22 = vcombine.low %v5001_v34, %v5008_v41  ;;  %v5065_v10 = vrot.slane %v5042_v44, %v13359_v13 }
 0x55e   : > { %v5057_v21 = vrot.slane %v5043_v63, %v13359_v13  ;;  %v11461_v18 = vcombine.high %v5001_v34, %v5008_v41  ;;  %12371 = vrcp.f32 %v7085_v48 }
 0x55f   : > { %v5072_v33 = vrot.slane %v5058_v50, %v13359_v13  ;;  %v5770_v61 = vrot.slane %v5763_v22, %v13356_v8  ;;  %v5779_v24 = vcombine.low %v5016_v29, %v5023_v51  ;;  %v11462_v20 = vcombine.high %v5016_v29, %v5023_v51 }
 0x560   : > { %12373 = vrcp.f32 %v7079_v58  ;;  %v5778_v4 = vrot.slane %v11461_v18, %v13356_v8  ;;  %v5812_v28 = vcombine.low %v5050_v56, %v5057_v21  ;;  %v11463_v45 = vcombine.high %v5050_v56, %v5057_v21  ;;  %v7081_v3 = vpop.xlane.xlu0 %7080 }
 0x561   : > { %v5786_v38 = vrot.slane %v5779_v24, %v13356_v8  ;;  %v5794_v11 = vrot.slane %v11462_v20, %v13356_v8  ;;  %v5828_v0 = vcombine.low %v5065_v10, %v5072_v33  ;;  %v11464_v40 = vcombine.high %v5065_v10, %v5072_v33 }
 0x562   : > { %v5819_v34 = vrot.slane %v5812_v28, %v13356_v8  ;;  %v5827_v41 = vrot.slane %v11463_v45, %v13356_v8  ;;  %12375 = vrcp.f32 %v7081_v3  ;;  %v5795_v44 = vcombine.low %v5770_v61, %v5778_v4  ;;  %v12370_v61 = vpop.eup %12369 }
 0x563   : > { %v5803_v63 = vcombine.low %v5786_v38, %v5794_v11  ;;  %v5835_v58 = vrot.slane %v5828_v0, %v13356_v8  ;;  %v5843_v29 = vrot.slane %v11464_v40, %v13356_v8 }
 0x564   : > { %v7117_v48 = vpop.xlane.xlu0 %7116  ;;  %v5844_v51 = vcombine.low %v5819_v34, %v5827_v41  ;;  %v5802_v56 = vrot.slane %v5795_v44, %v13359_v13  ;;  %v7176_v41 = vmul.f32 %v12370_v61, %v15165_v26 }
 0x565   : > { %v5810_v50 = vrot.slane %v5803_v63, %v13359_v13  ;;  %v5852_v22 = vcombine.low %v5835_v58, %v5843_v29  ;;  %12377 = vrcp.f32 %v7117_v48 }
 0x566   : > { %12379 = vrcp.f32 %v7111_v5  ;;  %v5851_v10 = vrot.slane %v5844_v51, %v13359_v13 }
 0x567   : > { %v5811_v21 = vcombine.low %v5802_v56, %v5810_v50  ;;  %v5859_v18 = vrot.slane %v5852_v22, %v13359_v13  ;;  %12381 = vrcp.f32 %v7115_v7 }
 0x568   : > { %v7113_v33 = vpop.xlane.xlu0 %7112 }
 0x569   : > { %12383 = vrcp.f32 %v7113_v33  ;;  %v5860_v24 = vcombine.low %v5851_v10, %v5859_v18  ;;  %v6551_v28 = vshrl.u32 %v5811_v21, 16 }
 0x56b   : > { %v12372_v20 = vpop.eup %12371  ;;  %v6549_v4 = vpack.i.b16 %v5860_v24, %v5811_v21  ;;  %v6552_v45 = vshrl.u32 %v5860_v24, 16 }
 0x56c   : > { %v7091_v3 = vpop.xlane.xlu0 %7090  ;;  %v7177_v0 = vmul.f32 %v12372_v20, %v15181_v36 }
 0x56d   : > { %v12374_v38 = vpop.eup %12373  ;;  %11993 = vmatprep.subr.bf16.mxu0 %v6549_v4  ;;  %v6553_v11 = vpack.i.b16 %v6552_v45, %v6551_v28  ;;  %12385 = vrcp.f32 %v7091_v3 }
 0x56e   : > { %11994 = vmatpush3.bf16.msra.mxu0 %v6549_v4  ;;  %v7174_v7 = vmul.f32 %v12374_v38, %v15169_v31  ;;  %v7207_v58 = vpack.c.bf16 %v7177_v0, %v7176_v41 }
 0x56f   : > { %v12376_v5 = vpop.eup %12375  ;;  %12025 = vmatprep.subr.bf16.mxu1 %v6553_v11 }
 0x570   : > { %v7123_v40 = vpop.xlane.xlu0 %7122  ;;  %12026 = vmatpush3.bf16.msra.mxu1 %v6553_v11  ;;  %v7175_v34 = vmul.f32 %v12376_v5, %v15185_v16 }
 0x571   : > { %12387 = vrcp.f32 %v7123_v40 }
 0x572   : > { %v7206_v44 = vpack.c.bf16 %v7175_v34, %v7174_v7  ;;  %v12378_v63 = vpop.eup %12377 }
 0x573   : > { %v12380_v29 = vpop.eup %12379  ;;  %v7193_v50 = vmul.f32 %v12378_v63, %v15191_v6 }
 0x574   : > { %11995 = vmatprep.mubr.bf16.mxu0 %v7206_v44  ;;  %v7119_v48 = vpop.xlane.xlu0 %7118  ;;  %v12382_v51 = vpop.eup %12381  ;;  %v7190_v36 = vmul.f32 %v12380_v29, %v15177_v19 }
 0x575   : > { %11996 = vmatmul.mubr.bf16.vlgmr.msra.gmra.mxu0 %v7207_v58  ;;  %v7192_v16 = vmul.f32 %v12382_v51, %v15173_v39  ;;  %12389 = vrcp.f32 %v7119_v48 }
 0x576   : > { %v12384_v56 = vpop.eup %12383 }
 0x577   : > { %v7191_v22 = vmul.f32 %v12384_v56, %v15195_v52  ;;  %v7215_v26 = vpack.c.bf16 %v7193_v50, %v7192_v16 }
 0x578   : > { %v7093_v31 = vpop.xlane.xlu0 %7092 }
 0x579   : > { %v7214_v21 = vpack.c.bf16 %v7191_v22, %v7190_v36 }
 0x57a   : > { %v12386_v61 = vpop.eup %12385 }
 0x57b   : > { %12027 = vmatprep.mubr.bf16.mxu1 %v7214_v21 }
 0x57c   : > { %v7089_v10 = vpop.xlane.xlu0 %7088  ;;  %12028 = vmatmul.mubr.bf16.vlgmr.msra.gmra.mxu1 %v7215_v26 }
 0x57e   : > { %v12388_v24 = vpop.eup %12387 }
 0x57f   : > { %v7196_v29 = vmul.f32 %v12388_v24, %v15203_v62 }
 0x580   : > { %v7125_v18 = vpop.xlane.xlu0 %7124 }
 0x581   : > { %12391 = vrcp.f32 %v7125_v18 }
 0x582   : > { %12393 = vrcp.f32 %v7093_v31  ;;  %v12390_v4 = vpop.eup %12389 }
 0x583   : > { %12395 = vrcp.f32 %v7089_v10  ;;  %v7194_v7 = vmul.f32 %v12390_v4, %v15208_v60 }
 0x584   : > { %v7121_v6 = vpop.xlane.xlu0 %7120 }
 0x585   : > { %12397 = vrcp.f32 %v7121_v6  ;;  %v7087_v19 = vpop.xlane.xlu1 %7086 }
 0x586   : > { %12399 = vrcp.f32 %v7087_v19 }
 0x588   : > { %v7095_v52 = vpop.xlane.xlu0 %7094 }
 0x589   : > { %v7099_v33 = vpop.xlane.xlu1 %7098 }
 0x58c   : > { %v7101_v39 = vpop.xlane.xlu0 %7100 }
 0x58d   : > { %v7127_v20 = vpop.xlane.xlu1 %7126  ;;  %12401 = vrcp.f32 %v7101_v39 }
 0x58e   : > { %v12392_v28 = vpop.eup %12391  ;;  %12403 = vrcp.f32 %v7095_v52 }
 0x58f   : > { %v12394_v45 = vpop.eup %12393  ;;  %12405 = vrcp.f32 %v7099_v33  ;;  %v7197_v0 = vmul.f32 %v12392_v28, %v15223_v46  ;;  %v7180_v46 = vmul.f32 %v12386_v61, %v15199_v2 }
 0x590   : > { %v7097_v3 = vpop.xlane.xlu0 %7096  ;;  %v12396_v38 = vpop.eup %12395  ;;  %v7181_v41 = vmul.f32 %v12394_v45, %v15213_v32 }
 0x591   : > { %12407 = vrcp.f32 %v7097_v3  ;;  %v7131_v11 = vpop.xlane.xlu1 %7130  ;;  %v7179_v58 = vmul.f32 %v12396_v38, %v15218_v54  ;;  %v7217_v50 = vpack.c.bf16 %v7197_v0, %v7196_v29 }
 0x592   : > { %v12398_v5 = vpop.eup %12397  ;;  %12409 = vrcp.f32 %v7127_v20  ;;  %v7209_v60 = vpack.c.bf16 %v7181_v41, %v7180_v46 }
 0x593   : > { %v12400_v40 = vpop.eup %12399  ;;  %v7195_v34 = vmul.f32 %v12398_v5, %v15228_v42 }
 0x594   : > { %v7129_v44 = vpop.xlane.xlu0 %7128  ;;  %v7178_v63 = vmul.f32 %v12400_v40, %v15231_v55 }
 0x595   : > { %12411 = vrcp.f32 %v7129_v44  ;;  %v7107_v48 = vpop.xlane.xlu1 %7106  ;;  %v7216_v51 = vpack.c.bf16 %v7195_v34, %v7194_v7 }
 0x596   : > { %v7208_v56 = vpack.c.bf16 %v7179_v58, %v7178_v63  ;;  %12413 = vrcp.f32 %v7131_v11 }
 0x597   : > { %12031 = vmatprep.mubr.bf16.mxu1 %v7216_v51  ;;  %v12187_v51 = vld [vmem:[%s12830_s17 + $0x28] sm:$0xff]  }
 0x598   : > { %v7133_v42 = vpop.xlane.xlu0 %7132  ;;  %11999 = vmatprep.mubr.bf16.mxu0 %v7208_v56  ;;  %12032 = vmatmul.mubr.bf16.gmra.mxu1 %v7217_v50 }
 0x599   : > { %12415 = vrcp.f32 %v7133_v42  ;;  %12000 = vmatmul.mubr.bf16.gmra.mxu0 %v7209_v60  ;;  %v7103_v32 = vpop.xlane.xlu1 %7102 }
 0x59a   : > { %v12402_v55 = vpop.eup %12401 }
 0x59b   : > { %v12404_v54 = vpop.eup %12403  ;;  %v7185_v2 = vmul.f32 %v12402_v55, %v15244_v30 }
 0x59c   : > { %v7109_v36 = vpop.xlane.xlu0 %7108  ;;  %v12406_v62 = vpop.eup %12405  ;;  %v7182_v16 = vmul.f32 %v12404_v54, %v15236_v49 }
 0x59d   : > { %12417 = vrcp.f32 %v7109_v36  ;;  %v7135_v31 = vpop.xlane.xlu1 %7134  ;;  %v7184_v18 = vmul.f32 %v12406_v62, %v15239_v59 }
 0x59e   : > { %v12408_v22 = vpop.eup %12407  ;;  %12419 = vrcp.f32 %v7103_v32 }
 0x59f   : > { %v7183_v21 = vmul.f32 %v12408_v22, %v15252_v12  ;;  %v12410_v26 = vpop.eup %12409  ;;  %12421 = vrcp.f32 %v7107_v48  ;;  %v7211_v52 = vpack.c.bf16 %v7185_v2, %v7184_v18  ;;  %v12186_v48 = vld [vmem:[%s12830_s17 + $0x30] sm:$0xff]  }
 0x5a0   : > { %v7105_v10 = vpop.xlane.xlu0 %7104  ;;  %v7198_v33 = vmul.f32 %v12410_v26, %v15247_v14 }
 0x5a1   : > { %12423 = vrcp.f32 %v7105_v10  ;;  %v7210_v6 = vpack.c.bf16 %v7183_v21, %v7182_v16  ;;  %v7139_v39 = vpop.xlane.xlu1 %7138 }
 0x5a2   : > { %v12412_v19 = vpop.eup %12411  ;;  %12425 = vrcp.f32 %v7135_v31  ;;  %v12189_v31 = vld [vmem:[%s12830_s17 + $0x18] sm:$0xff]  }
 0x5a3   : > { %12003 = vmatprep.mubr.bf16.mxu0 %v7210_v6  ;;  %v7199_v30 = vmul.f32 %v12412_v19, %v15259_v37  ;;  %v12414_v61 = vpop.eup %12413 }
 0x5a4   : > { %v7137_v49 = vpop.xlane.xlu0 %7136  ;;  %12004 = vmatmul.mubr.bf16.gmra.mxu0 %v7211_v52  ;;  %v7200_v59 = vmul.f32 %v12414_v61, %v15254_v1 }
 0x5a5   : > { %12427 = vrcp.f32 %v7137_v49  ;;  %v7218_v12 = vpack.c.bf16 %v7199_v30, %v7198_v33  ;;  %v12190_v33 = vld [vmem:[%s12830_s17 + $0x10] sm:$0xff]  }
 0x5a6   : > { %v12416_v24 = vpop.eup %12415  ;;  %12429 = vrcp.f32 %v7139_v39 }
 0x5a7   : > { %12035 = vmatprep.mubr.bf16.mxu1 %v7218_v12  ;;  %v7201_v20 = vmul.f32 %v12416_v24, %v15265_v25 }
 0x5a8   : > { %v7141_v4 = vpop.xlane.xlu0 %7140 }
 0x5a9   : > { %12431 = vrcp.f32 %v7141_v4  ;;  %v7219_v28 = vpack.c.bf16 %v7201_v20, %v7200_v59 }
 0x5aa   : > { %v12418_v45 = vpop.eup %12417 }
 0x5ab   : > { %12036 = vmatmul.mubr.bf16.gmra.mxu1 %v7219_v28  ;;  %v12420_v14 = vpop.eup %12419  ;;  %v7189_v38 = vmul.f32 %v12418_v45, %v15271_v23 }
 0x5ac   : > { %v12422_v37 = vpop.eup %12421  ;;  %v7186_v11 = vmul.f32 %v12420_v14, %v15267_v47 }
 0x5ad   : > { %v7188_v40 = vmul.f32 %v12422_v37, %v15261_v57 }
 0x5ae   : > { %v12424_v3 = vpop.eup %12423 }
 0x5af   : > { %v7187_v5 = vmul.f32 %v12424_v3, %v15277_v17  ;;  %v12426_v0 = vpop.eup %12425  ;;  %v7213_v25 = vpack.c.bf16 %v7189_v38, %v7188_v40 }
 0x5b0   : > { %v7202_v34 = vmul.f32 %v12426_v0, %v15273_v43  ;;  %v12185_v43 = vld [vmem:[%s12830_s17 + $0x38] sm:$0xff]  }
 0x5b1   : > { %v7212_v1 = vpack.c.bf16 %v7187_v5, %v7186_v11  ;;  %12043 = vmatprep.subr.bf16.mxu0 %v12185_v43  ;;  %v12191_v5 = vld [vmem:[%s12830_s17 + $0x8] sm:$0xff]  }
 0x5b2   : > { %v12428_v7 = vpop.eup %12427  ;;  %12044 = vmatpush3.bf16.msra.mxu0 %v12185_v43 }
 0x5b3   : > { %12007 = vmatprep.mubr.bf16.mxu0 %v7212_v1  ;;  %v7203_v41 = vmul.f32 %v12428_v7, %v15283_v27  ;;  %v12430_v44 = vpop.eup %12429  ;;  %12045 = vmatprep.subr.bf16.mxu0 %v12186_v48 }
 0x5b4   : > { %12008 = vmatmul.mubr.bf16.gmra.mxu0 %v7213_v25  ;;  %v7204_v17 = vmul.f32 %v12430_v44, %v15279_v53 }
 0x5b5   : > { %v7220_v23 = vpack.c.bf16 %v7203_v41, %v7202_v34 }
 0x5b6   : > { %v12432_v47 = vpop.eup %12431  ;;  %12046 = vmatpush3.bf16.msra.mxu0 %v12186_v48 }
 0x5b7   : > { %12039 = vmatprep.mubr.bf16.mxu1 %v7220_v23  ;;  %v7205_v57 = vmul.f32 %v12432_v47, %v15286_v15  ;;  %12047 = vmatprep.subr.bf16.mxu0 %v12187_v51  ;;  %v12188_v15 = vld [vmem:[%s12830_s17 + $0x20] sm:$0xff]  }
 0x5b9   : > { %v7221_v63 = vpack.c.bf16 %v7205_v57, %v7204_v17 }
 0x5ba   : > { %12048 = vmatpush3.bf16.msra.mxu0 %v12187_v51 }
 0x5bb   : > { %12040 = vmatmul.mubr.bf16.gmra.mxu1 %v7221_v63  ;;  %12049 = vmatprep.subr.bf16.mxu0 %v12188_v15 }
 0x5bc   : > { %9868 = vmatprep.mubr.bf16.mxu1 %v17175_v9 }
 0x5be   : > { %12050 = vmatpush3.bf16.msra.mxu0 %v12188_v15 }
 0x5bf   : > { %12051 = vmatprep.subr.bf16.mxu0 %v12189_v31 }
 0x5c2   : > { %12052 = vmatpush3.bf16.msra.mxu0 %v12189_v31 }
 0x5c3   : > { %12053 = vmatprep.subr.bf16.mxu0 %v12190_v33 }
 0x5c6   : > { %12054 = vmatpush3.bf16.msra.mxu0 %v12190_v33 }
 0x5c7   : > { %12055 = vmatprep.subr.bf16.mxu0 %v12191_v5 }
 0x5ca   : > { %12056 = vmatpush3.bf16.msra.mxu0 %v12191_v5 }
 0x635   : > { %v11997_v58 = vpop.f32.mrf.mxu0 }
 0x637   : > { %v7256_v29 = vpop.f32.mrf.mxu0 }
 0x639   : > { %v11998_v27 = vpop.f32.mrf.mxu0 }
 0x63a   : > { %v7417_v56 = vpack.c.bf16 %v11998_v27, %v11997_v58 }
 0x63b   : > { %v7259_v50 = vpop.f32.mrf.mxu0 }
 0x63c   : > { %v12029_v46 = vpop.f32.mrf.mxu1  ;;  %v7444_v32 = vshrl.u32 %v7417_v56, 16  ;;  %v7416_v54 = vpack.c.bf16 %v7259_v50, %v7256_v29 }
 0x63e   : > { %v7353_v53 = vpop.f32.mrf.mxu1  ;;  %v7436_v18 = vshrl.u32 %v7416_v54, 16 }
 0x640   : > { %v12030_v60 = vpop.f32.mrf.mxu1 }
 0x641   : > { %v7425_v42 = vpack.c.bf16 %v12030_v60, %v12029_v46 }
 0x642   : > { %v7356_v55 = vpop.f32.mrf.mxu1 }
 0x643   : > { %v7442_v36 = vpack.i.b16 %v7425_v42, %v7417_v56  ;;  %v7445_v62 = vshrl.u32 %v7425_v42, 16  ;;  %v7424_v22 = vpack.c.bf16 %v7356_v55, %v7353_v53 }
 0x645   : > { %v7446_v2 = vpack.i.b16 %v7445_v62, %v7444_v32  ;;  %v7594_v16 = vcombine.high %v7442_v36, %v17174_v35  ;;  %v7601_v21 = vrot.slane %v7442_v36, %v13356_v8  ;;  %v7434_v26 = vpack.i.b16 %v7424_v22, %v7416_v54 }
 0x646   : > { %v7437_v10 = vshrl.u32 %v7424_v22, 16 }
 0x647   : > { %v7608_v6 = vrot.slane %v7594_v16, %v13356_v8  ;;  %v7609_v19 = vcombine.high %v7601_v21, %v17175_v9  ;;  %v7643_v52 = vcombine.high %v7446_v2, %v17174_v35  ;;  %v7616_v30 = vrot.slane %v7601_v21, %v13359_v13  ;;  %v12192_v21 = vld [vmem:[%s12830_s17] sm:$0xff]  }
 0x648   : > { %v7650_v61 = vrot.slane %v7446_v2, %v13356_v8  ;;  %v7496_v39 = vcombine.high %v7434_v26, %v17174_v35  ;;  %v7503_v49 = vrot.slane %v7434_v26, %v13356_v8  ;;  %v7438_v20 = vpack.i.b16 %v7437_v10, %v7436_v18  ;;  %12057 = vmatprep.subr.bf16.mxu0 %v12192_v21 }
 0x649   : > { %v7623_v12 = vrot.slane %v7609_v19, %v13359_v13  ;;  %v7624_v24 = vcombine.high %v7608_v6, %v17175_v9  ;;  %v7657_v59 = vrot.slane %v7643_v52, %v13356_v8  ;;  %v7631_v4 = vrot.slane %v7608_v6, %v13359_v13  ;;  %12058 = vmatpush3.bf16.msra.mxu0 %v12192_v21 }
 0x64a   : > { %v7658_v28 = vcombine.high %v7650_v61, %v17175_v9  ;;  %v7510_v45 = vrot.slane %v7496_v39, %v13356_v8  ;;  %v7511_v14 = vcombine.high %v7503_v49, %v17175_v9  ;;  %v7665_v3 = vrot.slane %v7650_v61, %v13359_v13 }
 0x64b   : > { %v7638_v37 = vrot.slane %v7624_v24, %v13359_v13  ;;  %v7673_v38 = vcombine.high %v7657_v59, %v17175_v9  ;;  %v8378_v11 = vcombine.low %v7616_v30, %v7623_v12  ;;  %v7680_v40 = vrot.slane %v7657_v59, %v13359_v13 }
 0x64c   : > { %v7672_v0 = vrot.slane %v7658_v28, %v13359_v13  ;;  %v11513_v1 = vcombine.high %v7616_v30, %v7623_v12  ;;  %v7525_v7 = vrot.slane %v7511_v14, %v13359_v13  ;;  %v7526_v57 = vcombine.high %v7510_v45, %v17175_v9 }
 0x64d   : > { %v7687_v25 = vrot.slane %v7673_v38, %v13359_v13  ;;  %v8385_v34 = vrot.slane %v8378_v11, %v13356_v8  ;;  %v8394_v41 = vcombine.low %v7631_v4, %v7638_v37  ;;  %v11514_v44 = vcombine.high %v7631_v4, %v7638_v37 }
 0x64e   : > { %v8393_v23 = vrot.slane %v11513_v1, %v13356_v8  ;;  %v8427_v47 = vcombine.low %v7665_v3, %v7672_v0  ;;  %v11515_v17 = vcombine.high %v7665_v3, %v7672_v0  ;;  %v7518_v51 = vrot.slane %v7503_v49, %v13359_v13 }
 0x64f   : > { %v8401_v63 = vrot.slane %v8394_v41, %v13356_v8  ;;  %v8409_v58 = vrot.slane %v11514_v44, %v13356_v8  ;;  %v8443_v29 = vcombine.low %v7680_v40, %v7687_v25  ;;  %v11516_v43 = vcombine.high %v7680_v40, %v7687_v25 }
 0x650   : > { %v8434_v48 = vrot.slane %v8427_v47, %v13356_v8  ;;  %v8442_v27 = vrot.slane %v11515_v17, %v13356_v8  ;;  %v8410_v46 = vcombine.low %v8385_v34, %v8393_v23  ;;  %v7533_v53 = vrot.slane %v7510_v45, %v13359_v13 }
 0x651   : > { %v8418_v56 = vcombine.low %v8401_v63, %v8409_v58  ;;  %v7540_v15 = vrot.slane %v7526_v57, %v13359_v13  ;;  %v8450_v50 = vrot.slane %v8443_v29, %v13356_v8  ;;  %v7545_v60 = vcombine.high %v7438_v20, %v17174_v35 }
 0x652   : > { %v7552_v42 = vrot.slane %v7438_v20, %v13356_v8  ;;  %v8280_v32 = vcombine.low %v7518_v51, %v7525_v7  ;;  %v8458_v55 = vrot.slane %v11516_v43, %v13356_v8  ;;  %v11509_v54 = vcombine.high %v7518_v51, %v7525_v7 }
 0x653   : > { %v8296_v36 = vcombine.low %v7533_v53, %v7540_v15  ;;  %v11510_v62 = vcombine.high %v7533_v53, %v7540_v15  ;;  %v8459_v22 = vcombine.low %v8434_v48, %v8442_v27  ;;  %v7559_v31 = vrot.slane %v7545_v60, %v13356_v8 }
 0x654   : > { %v7560_v2 = vcombine.high %v7552_v42, %v17175_v9  ;;  %v8287_v16 = vrot.slane %v8280_v32, %v13356_v8  ;;  %v8295_v26 = vrot.slane %v11509_v54, %v13356_v8  ;;  %v8425_v6 = vrot.slane %v8418_v56, %v13359_v13 }
 0x655   : > { %v8303_v10 = vrot.slane %v8296_v36, %v13356_v8  ;;  %v8311_v18 = vrot.slane %v11510_v62, %v13356_v8  ;;  %v7567_v19 = vrot.slane %v7552_v42, %v13359_v13  ;;  %v7575_v33 = vcombine.high %v7559_v31, %v17175_v9 }
 0x656   : > { %v7574_v52 = vrot.slane %v7560_v2, %v13359_v13  ;;  %v7582_v30 = vrot.slane %v7559_v31, %v13359_v13  ;;  %v8417_v39 = vrot.slane %v8410_v46, %v13359_v13  ;;  %v8467_v49 = vcombine.low %v8450_v50, %v8458_v55 }
 0x657   : > { %v8320_v61 = vcombine.low %v8303_v10, %v8311_v18  ;;  %v7589_v12 = vrot.slane %v7575_v33, %v13359_v13  ;;  %v8312_v24 = vcombine.low %v8287_v16, %v8295_v26  ;;  %v8466_v14 = vrot.slane %v8459_v22, %v13359_v13 }
 0x658   : > { %v8329_v59 = vcombine.low %v7567_v19, %v7574_v52  ;;  %v11511_v20 = vcombine.high %v7567_v19, %v7574_v52  ;;  %v12033_v4 = vpop.f32.mrf.mxu1  ;;  %v15412_v45 = vcombine.low %v8417_v39, %v8425_v6  ;;  %v8474_v37 = vrot.slane %v8467_v49, %v13359_v13 }
 0x659   : > { %v12001_v28 = vpop.f32.mrf.mxu0  ;;  %v8327_v3 = vrot.slane %v8320_v61, %v13359_v13  ;;  %v8345_v5 = vcombine.low %v7582_v30, %v7589_v12  ;;  %v11512_v0 = vcombine.high %v7582_v30, %v7589_v12  ;;  %v8319_v23 = vrot.slane %v8312_v24, %v13359_v13 }
 0x65a   : > { %v8336_v38 = vrot.slane %v8329_v59, %v13356_v8  ;;  %v8344_v11 = vrot.slane %v11511_v20, %v13356_v8  ;;  %v7369_v40 = vpop.f32.mrf.mxu1  ;;  %v15419_v7 = vcombine.low %v8466_v14, %v8474_v37  ;;  %v9073_v17 = vshrl.u32 %v15412_v45, 16 }
 0x65b   : > { %v7272_v1 = vpop.f32.mrf.mxu0  ;;  %v8352_v25 = vrot.slane %v8345_v5, %v13356_v8  ;;  %v8360_v34 = vrot.slane %v11512_v0, %v13356_v8  ;;  %v15428_v48 = vcombine.low %v8319_v23, %v8327_v3 }
 0x65c   : > { %v8361_v41 = vcombine.low %v8336_v38, %v8344_v11  ;;  %v12034_v44 = vpop.f32.mrf.mxu1  ;;  %v9074_v57 = vshrl.u32 %v15419_v7, 16  ;;  %v9072_v58 = vpack.i.b16 %v15419_v7, %v15412_v45 }
 0x65d   : > { %v7427_v47 = vpack.c.bf16 %v12034_v44, %v12033_v4  ;;  %v12002_v63 = vpop.f32.mrf.mxu0  ;;  %v8369_v27 = vcombine.low %v8352_v25, %v8360_v34  ;;  %v9067_v31 = vshrl.u32 %v15428_v48, 16 }
 0x65e   : > { %v7419_v29 = vpack.c.bf16 %v12002_v63, %v12001_v28  ;;  %v7372_v43 = vpop.f32.mrf.mxu1  ;;  %v9075_v46 = vpack.i.b16 %v9074_v57, %v9073_v17  ;;  %v8368_v53 = vrot.slane %v8361_v41, %v13359_v13 }
 0x65f   : > { %v7461_v51 = vshrl.u32 %v7427_v47, 16  ;;  %v7426_v56 = vpack.c.bf16 %v7372_v43, %v7369_v40  ;;  %v7275_v15 = vpop.f32.mrf.mxu0  ;;  %v8376_v42 = vrot.slane %v8369_v27, %v13359_v13 }
 0x660   : > { %v7458_v50 = vpack.i.b16 %v7427_v47, %v7419_v29  ;;  %v7460_v60 = vshrl.u32 %v7419_v29, 16  ;;  %v7418_v32 = vpack.c.bf16 %v7275_v15, %v7272_v1  ;;  %9114 = vrot.lane.b32.xlu0 %v9075_v46, %s12682_s27 }
 0x661   : > { %v15435_v62 = vcombine.low %v8368_v53, %v8376_v42  ;;  %v7453_v22 = vshrl.u32 %v7426_v56, 16 }
 0x662   : > { %v7462_v55 = vpack.i.b16 %v7461_v51, %v7460_v60  ;;  %v7790_v54 = vcombine.high %v7458_v50, %v17174_v35  ;;  %v7797_v36 = vrot.slane %v7458_v50, %v13356_v8  ;;  %v7450_v2 = vpack.i.b16 %v7426_v56, %v7418_v32 }
 0x663   : > { %v7452_v10 = vshrl.u32 %v7418_v32, 16  ;;  %v9068_v52 = vshrl.u32 %v15435_v62, 16 }
 0x664   : > { %v7804_v16 = vrot.slane %v7790_v54, %v13356_v8  ;;  %v7805_v21 = vcombine.high %v7797_v36, %v17175_v9  ;;  %v7839_v26 = vcombine.high %v7462_v55, %v17174_v35  ;;  %v12005_v18 = vpop.f32.mrf.mxu0  ;;  %v7812_v6 = vrot.slane %v7797_v36, %v13359_v13 }
 0x665   : > { %v7846_v19 = vrot.slane %v7462_v55, %v13356_v8  ;;  %v7692_v33 = vcombine.high %v7450_v2, %v17174_v35  ;;  %v9069_v20 = vpack.i.b16 %v9068_v52, %v9067_v31  ;;  %v7699_v4 = vrot.slane %v7450_v2, %v13356_v8 }
 0x666   : > { %v7819_v30 = vrot.slane %v7805_v21, %v13359_v13  ;;  %v7820_v61 = vcombine.high %v7804_v16, %v17175_v9  ;;  %v7827_v39 = vrot.slane %v7804_v16, %v13359_v13  ;;  %v7853_v49 = vrot.slane %v7839_v26, %v13356_v8  ;;  %v7288_v12 = vpop.f32.mrf.mxu0 }
 0x667   : > { %v7854_v24 = vcombine.high %v7846_v19, %v17175_v9  ;;  %v7861_v59 = vrot.slane %v7846_v19, %v13359_v13  ;;  %9112 = vrot.lane.b32.xlu1 %v9069_v20, %s12682_s27  ;;  %v7706_v5 = vrot.slane %v7692_v33, %v13356_v8  ;;  %v7707_v0 = vcombine.high %v7699_v4, %v17175_v9 }
 0x668   : > { %v7834_v28 = vrot.slane %v7820_v61, %v13359_v13  ;;  %v7869_v14 = vcombine.high %v7853_v49, %v17175_v9  ;;  %v7876_v37 = vrot.slane %v7853_v49, %v13359_v13  ;;  %v8574_v3 = vcombine.low %v7812_v6, %v7819_v30  ;;  %v12006_v41 = vpop.f32.mrf.mxu0 }
 0x669   : > { %v7868_v38 = vrot.slane %v7854_v24, %v13359_v13  ;;  %v11521_v11 = vcombine.high %v7812_v6, %v7819_v30  ;;  %v7454_v17 = vpack.i.b16 %v7453_v22, %v7452_v10  ;;  %v7714_v56 = vrot.slane %v7699_v4, %v13359_v13 }
 0x66a   : > { %v7883_v40 = vrot.slane %v7869_v14, %v13359_v13  ;;  %v15461_v1 = vrot.slane %v8574_v3, %v13356_v8  ;;  %v8590_v25 = vcombine.low %v7827_v39, %v7834_v28  ;;  %v11522_v34 = vcombine.high %v7827_v39, %v7834_v28  ;;  %v7291_v55 = vpop.f32.mrf.mxu0 }
 0x66b   : > { %v15464_v44 = vrot.slane %v11521_v11, %v13356_v8  ;;  %v8623_v23 = vcombine.low %v7861_v59, %v7868_v38  ;;  %v11523_v47 = vcombine.high %v7861_v59, %v7868_v38  ;;  %v12037_v57 = vpop.f32.mrf.mxu1  ;;  %v7721_v53 = vrot.slane %v7707_v0, %v13359_v13 }
 0x66c   : > { %v15467_v63 = vrot.slane %v8590_v25, %v13356_v8  ;;  %v15470_v29 = vrot.slane %v11522_v34, %v13356_v8  ;;  %v8639_v43 = vcombine.low %v7876_v37, %v7883_v40  ;;  %v11524_v27 = vcombine.high %v7876_v37, %v7883_v40 }
 0x66d   : > { %v15473_v51 = vrot.slane %v8623_v23, %v13356_v8  ;;  %v15476_v46 = vrot.slane %v11523_v47, %v13356_v8  ;;  %v7385_v15 = vpop.f32.mrf.mxu1  ;;  %v8606_v50 = vcombine.low %v15461_v1, %v15464_v44  ;;  %v7722_v32 = vcombine.high %v7706_v5, %v17175_v9 }
 0x66e   : > { %v8614_v60 = vcombine.low %v15467_v63, %v15470_v29  ;;  %v15485_v42 = vrot.slane %v8639_v43, %v13356_v8  ;;  %v15489_v54 = vrot.slane %v11524_v27, %v13356_v8  ;;  %v7729_v36 = vrot.slane %v7706_v5, %v13359_v13 }
 0x66f   : > { %v7741_v22 = vcombine.high %v7454_v17, %v17174_v35  ;;  %v7748_v31 = vrot.slane %v7454_v17, %v13356_v8  ;;  %v12038_v2 = vpop.f32.mrf.mxu1  ;;  %v7736_v16 = vrot.slane %v7722_v32, %v13359_v13  ;;  %v8476_v21 = vcombine.low %v7714_v56, %v7721_v53 }
 0x670   : > { %v11517_v26 = vcombine.high %v7714_v56, %v7721_v53  ;;  %v7421_v10 = vpack.c.bf16 %v12006_v41, %v12005_v18  ;;  %v8655_v6 = vcombine.low %v15473_v51, %v15476_v46  ;;  %v7420_v33 = vpack.c.bf16 %v7291_v55, %v7288_v12 }
 0x671   : > { %v7755_v19 = vrot.slane %v7741_v22, %v13356_v8  ;;  %v7756_v52 = vcombine.high %v7748_v31, %v17175_v9  ;;  %v8483_v30 = vrot.slane %v8476_v21, %v13356_v8  ;;  %v8492_v39 = vcombine.low %v7729_v36, %v7736_v16  ;;  %v7388_v4 = vpop.f32.mrf.mxu1 }
 0x672   : > { %v8491_v61 = vrot.slane %v11517_v26, %v13356_v8  ;;  %v11518_v49 = vcombine.high %v7729_v36, %v7736_v16  ;;  %v7763_v24 = vrot.slane %v7748_v31, %v13359_v13  ;;  %v7476_v37 = vshrl.u32 %v7421_v10, 16 }
 0x673   : > { %v7770_v59 = vrot.slane %v7756_v52, %v13359_v13  ;;  %v7771_v18 = vcombine.high %v7755_v19, %v17175_v9  ;;  %v7778_v20 = vrot.slane %v7755_v19, %v13359_v13  ;;  %v15506_v28 = vrot.slane %v8492_v39, %v13356_v8 }
 0x674   : > { %v15509_v12 = vrot.slane %v11518_v49, %v13356_v8  ;;  %v8508_v14 = vcombine.low %v8483_v30, %v8491_v61  ;;  %v12009_v3 = vpop.f32.mrf.mxu0  ;;  %v7429_v0 = vpack.c.bf16 %v12038_v2, %v12037_v57  ;;  %v7468_v1 = vshrl.u32 %v7420_v33, 16 }
 0x675   : > { %v7785_v38 = vrot.slane %v7771_v18, %v13359_v13  ;;  %v8525_v11 = vcombine.low %v7763_v24, %v7770_v59  ;;  %v11519_v5 = vcombine.high %v7763_v24, %v7770_v59  ;;  %v7428_v25 = vpack.c.bf16 %v7388_v4, %v7385_v15 }
 0x676   : > { %v8516_v40 = vcombine.low %v15506_v28, %v15509_v12  ;;  %v7304_v34 = vpop.f32.mrf.mxu0  ;;  %v15515_v41 = vrot.slane %v8508_v14, %v13359_v13  ;;  %v7474_v43 = vpack.i.b16 %v7429_v0, %v7421_v10  ;;  %v7477_v27 = vshrl.u32 %v7429_v0, 16 }
 0x677   : > { %v15518_v44 = vrot.slane %v8525_v11, %v13356_v8  ;;  %v15521_v23 = vrot.slane %v11519_v5, %v13356_v8  ;;  %v8541_v47 = vcombine.low %v7778_v20, %v7785_v38  ;;  %v11520_v17 = vcombine.high %v7778_v20, %v7785_v38 }
 0x678   : > { %v7466_v57 = vpack.i.b16 %v7428_v25, %v7420_v33  ;;  %v7469_v56 = vshrl.u32 %v7428_v25, 16  ;;  %v12010_v53 = vpop.f32.mrf.mxu0  ;;  %v15532_v36 = vrot.slane %v8606_v50, %v13359_v13  ;;  %v7478_v31 = vpack.i.b16 %v7477_v27, %v7476_v37 }
 0x679   : > { %v15524_v32 = vrot.slane %v8541_v47, %v13356_v8  ;;  %v15527_v15 = vrot.slane %v11520_v17, %v13356_v8  ;;  %v15529_v55 = vpack.c.bf16 %v12010_v53, %v12009_v3  ;;  %v8557_v22 = vcombine.low %v15518_v44, %v15521_v23 }
 0x67a   : > { %v7986_v2 = vcombine.high %v7474_v43, %v17174_v35  ;;  %v7993_v16 = vrot.slane %v7474_v43, %v13356_v8  ;;  %v7307_v21 = vpop.f32.mrf.mxu0  ;;  %v7470_v26 = vpack.i.b16 %v7469_v56, %v7468_v1  ;;  %v7888_v10 = vcombine.high %v7466_v57, %v17174_v35 }
 0x67b   : > { %v7895_v19 = vrot.slane %v7466_v57, %v13356_v8  ;;  %v7492_v52 = vshrl.u32 %v15529_v55, 16  ;;  %v8035_v30 = vcombine.high %v7478_v31, %v17174_v35  ;;  %v15544_v61 = vpack.c.bf16 %v7307_v21, %v7304_v34  ;;  %v12041_v27 = vpop.f32.mrf.mxu1 }
 0x67c   : > { %v8000_v33 = vrot.slane %v7986_v2, %v13356_v8  ;;  %v8001_v50 = vcombine.high %v7993_v16, %v17175_v9  ;;  %v8008_v39 = vrot.slane %v7993_v16, %v13359_v13  ;;  %v8042_v49 = vrot.slane %v7478_v31, %v13356_v8 }
 0x67d   : > { %v7902_v24 = vrot.slane %v7888_v10, %v13356_v8  ;;  %v7903_v59 = vcombine.high %v7895_v19, %v17175_v9  ;;  %v8049_v4 = vrot.slane %v8035_v30, %v13356_v8  ;;  %v7910_v14 = vrot.slane %v7895_v19, %v13359_v13 }
 0x67e   : > { %v8015_v18 = vrot.slane %v8001_v50, %v13359_v13  ;;  %v8016_v20 = vcombine.high %v8000_v33, %v17175_v9  ;;  %v8023_v37 = vrot.slane %v8000_v33, %v13359_v13  ;;  %v8050_v3 = vcombine.high %v8042_v49, %v17175_v9 }
 0x67f   : > { %v8057_v38 = vrot.slane %v8042_v49, %v13359_v13  ;;  %v7918_v11 = vcombine.high %v7902_v24, %v17175_v9  ;;  %v8065_v0 = vcombine.high %v8049_v4, %v17175_v9  ;;  %v7917_v25 = vrot.slane %v7903_v59, %v13359_v13 }
 0x680   : > { %v8030_v5 = vrot.slane %v8016_v20, %v13359_v13  ;;  %v8770_v1 = vcombine.low %v8008_v39, %v8015_v18  ;;  %v8064_v34 = vrot.slane %v8050_v3, %v13359_v13  ;;  %v8072_v47 = vrot.slane %v8049_v4, %v13359_v13  ;;  %v7401_v20 = vpop.f32.mrf.mxu1 }
 0x681   : > { %v11529_v17 = vcombine.high %v8008_v39, %v8015_v18  ;;  %v7932_v43 = vrot.slane %v7918_v11, %v13359_v13  ;;  %v8079_v57 = vrot.slane %v8065_v0, %v13359_v13  ;;  %v7937_v10 = vcombine.high %v7470_v26, %v17174_v35 }
 0x682   : > { %v15566_v56 = vrot.slane %v8770_v1, %v13356_v8  ;;  %v8786_v53 = vcombine.low %v8023_v37, %v8030_v5  ;;  %v11530_v31 = vcombine.high %v8023_v37, %v8030_v5  ;;  %v8819_v16 = vcombine.low %v8057_v38, %v8064_v34 }
 0x683   : > { %v15569_v2 = vrot.slane %v11529_v17, %v13356_v8  ;;  %v11531_v21 = vcombine.high %v8057_v38, %v8064_v34  ;;  %v8835_v50 = vcombine.low %v8072_v47, %v8079_v57  ;;  %v11532_v30 = vcombine.high %v8072_v47, %v8079_v57 }
 0x684   : > { %v8793_v19 = vrot.slane %v8786_v53, %v13356_v8  ;;  %v8801_v33 = vrot.slane %v11530_v31, %v13356_v8  ;;  %v15575_v39 = vrot.slane %v8819_v16, %v13356_v8  ;;  %v7925_v59 = vrot.slane %v7902_v24, %v13359_v13  ;;  %v12042_v16 = vpop.f32.mrf.mxu1 }
 0x685   : > { %v15578_v49 = vrot.slane %v11531_v21, %v13356_v8  ;;  %v7944_v18 = vrot.slane %v7470_v26, %v13356_v8  ;;  %v8802_v4 = vcombine.low %v15566_v56, %v15569_v2  ;;  %v15585_v3 = vrot.slane %v8835_v50, %v13356_v8 }
 0x686   : > { %v8810_v37 = vcombine.low %v8793_v19, %v8801_v33  ;;  %v7951_v38 = vrot.slane %v7937_v10, %v13356_v8  ;;  %v15589_v11 = vrot.slane %v11532_v30, %v13356_v8  ;;  %v8672_v0 = vcombine.low %v7910_v14, %v7917_v25 }
 0x687   : > { %v8851_v5 = vcombine.low %v15575_v39, %v15578_v49  ;;  %v7952_v24 = vcombine.high %v7944_v18, %v17175_v9  ;;  %v7959_v26 = vrot.slane %v7944_v18, %v13359_v13  ;;  %v11525_v34 = vcombine.high %v7910_v14, %v7917_v25 }
 0x688   : > { %v7967_v1 = vcombine.high %v7951_v38, %v17175_v9  ;;  %v8688_v47 = vcombine.low %v7925_v59, %v7932_v43  ;;  %v7974_v57 = vrot.slane %v7951_v38, %v13359_v13  ;;  %v15599_v53 = vrot.slane %v8672_v0, %v13356_v8  ;;  %v7404_v0 = vpop.f32.mrf.mxu1 }
 0x689   : > { %v7966_v17 = vrot.slane %v7952_v24, %v13359_v13  ;;  %v11526_v31 = vcombine.high %v7925_v59, %v7932_v43  ;;  %v15603_v10 = vrot.slane %v11525_v34, %v13356_v8  ;;  %v8523_v14 = vrot.slane %v8516_v40, %v13359_v13 }
 0x68a   : > { %v7981_v21 = vrot.slane %v7967_v1, %v13359_v13  ;;  %v15606_v19 = vrot.slane %v8688_v47, %v13356_v8  ;;  %v7484_v43 = vshrl.u32 %v15544_v61, 16  ;;  %v8564_v38 = vrot.slane %v8557_v22, %v13359_v13 }
 0x68b   : > { %v15613_v25 = vrot.slane %v11526_v31, %v13356_v8  ;;  %v8721_v33 = vcombine.low %v7959_v26, %v7966_v17  ;;  %v11527_v50 = vcombine.high %v7959_v26, %v7966_v17  ;;  %v15617_v18 = vcombine.low %v15515_v41, %v8523_v14 }
 0x68c   : > { %v8737_v30 = vcombine.low %v7974_v57, %v7981_v21  ;;  %v11528_v59 = vcombine.high %v7974_v57, %v7981_v21  ;;  %v8704_v28 = vcombine.low %v15599_v53, %v15603_v10  ;;  %v8565_v24 = vcombine.low %v15524_v32, %v15527_v15 }
 0x68d   : > { %v15626_v12 = vrot.slane %v8721_v33, %v13356_v8  ;;  %v15629_v40 = vrot.slane %v11527_v50, %v13356_v8  ;;  %v8712_v41 = vcombine.low %v15606_v19, %v15613_v25  ;;  %v7431_v23 = vpack.c.bf16 %v12042_v16, %v12041_v27 }
 0x68e   : > { %v15636_v26 = vrot.slane %v8737_v30, %v13356_v8  ;;  %v15639_v44 = vrot.slane %v11528_v59, %v13356_v8  ;;  %v8572_v1 = vrot.slane %v8565_v24, %v13359_v13  ;;  %v9079_v34 = vshrl.u32 %v15617_v18, 16 }
 0x68f   : > { %v8753_v22 = vcombine.low %v15626_v12, %v15629_v40  ;;  %v8621_v32 = vrot.slane %v8614_v60, %v13359_v13  ;;  %v7490_v15 = vpack.i.b16 %v7431_v23, %v15529_v55  ;;  %v7493_v47 = vshrl.u32 %v7431_v23, 16 }
 0x690   : > { %v8663_v17 = vcombine.low %v15485_v42, %v15489_v54  ;;  %v7430_v57 = vpack.c.bf16 %v7404_v0, %v7401_v20  ;;  %v15652_v27 = vcombine.low %v8564_v38, %v8572_v1  ;;  %v8662_v16 = vrot.slane %v8655_v6, %v13359_v13 }
 0x691   : > { %v15655_v31 = vcombine.low %v15532_v36, %v8621_v32  ;;  %v8817_v63 = vrot.slane %v8810_v37, %v13359_v13  ;;  %v7494_v29 = vpack.i.b16 %v7493_v47, %v7492_v52  ;;  %v8182_v60 = vcombine.high %v7490_v15, %v17174_v35 }
 0x692   : > { %v8189_v42 = vrot.slane %v7490_v15, %v13356_v8  ;;  %v8670_v54 = vrot.slane %v8663_v17, %v13359_v13  ;;  %v9080_v20 = vshrl.u32 %v15652_v27, 16  ;;  %v7482_v21 = vpack.i.b16 %v7430_v57, %v15544_v61 }
 0x693   : > { %v9085_v36 = vshrl.u32 %v15655_v31, 16  ;;  %v7485_v14 = vshrl.u32 %v7430_v57, 16  ;;  %v8196_v51 = vrot.slane %v8182_v60, %v13356_v8  ;;  %v8231_v55 = vcombine.high %v7494_v29, %v17174_v35 }
 0x694   : > { %v8197_v46 = vcombine.high %v8189_v42, %v17175_v9  ;;  %v8204_v6 = vrot.slane %v8189_v42, %v13359_v13  ;;  %v9081_v52 = vpack.i.b16 %v9080_v20, %v9079_v34  ;;  %v8238_v37 = vrot.slane %v7494_v29, %v13356_v8 }
 0x695   : > { %v15675_v33 = vcombine.low %v8662_v16, %v8670_v54  ;;  %v7486_v50 = vpack.i.b16 %v7485_v14, %v7484_v43  ;;  %v8212_v59 = vcombine.high %v8196_v51, %v17175_v9  ;;  %v8219_v61 = vrot.slane %v8196_v51, %v13359_v13 }
 0x696   : > { %v8211_v30 = vrot.slane %v8197_v46, %v13359_v13  ;;  %v8245_v38 = vrot.slane %v8231_v55, %v13356_v8  ;;  %9116 = vrot.lane.b32.xlu1 %v9081_v52, %s12682_s27  ;;  %v8246_v24 = vcombine.high %v8238_v37, %v17175_v9  ;;  %v8253_v0 = vrot.slane %v8238_v37, %v13359_v13 }
 0x697   : > { %v9086_v23 = vshrl.u32 %v15675_v33, 16  ;;  %v8084_v1 = vcombine.high %v7482_v21, %v17174_v35  ;;  %v8226_v43 = vrot.slane %v8212_v59, %v13359_v13  ;;  %v8091_v16 = vrot.slane %v7482_v21, %v13356_v8 }
 0x698   : > { %v8261_v34 = vcombine.high %v8245_v38, %v17175_v9  ;;  %v8268_v32 = vrot.slane %v8245_v38, %v13359_v13  ;;  %v8966_v15 = vcombine.low %v8204_v6, %v8211_v30  ;;  %v8260_v47 = vrot.slane %v8246_v24, %v13359_v13 }
 0x699   : > { %v11537_v17 = vcombine.high %v8204_v6, %v8211_v30  ;;  %v9087_v57 = vpack.i.b16 %v9086_v23, %v9085_v36  ;;  %v8982_v42 = vcombine.low %v8219_v61, %v8226_v43  ;;  %v11538_v54 = vcombine.high %v8219_v61, %v8226_v43 }
 0x69a   : > { %v8275_v29 = vrot.slane %v8261_v34, %v13359_v13  ;;  %v15693_v60 = vrot.slane %v8966_v15, %v13356_v8  ;;  %v9015_v14 = vcombine.low %v8253_v0, %v8260_v47  ;;  %v11539_v51 = vcombine.high %v8253_v0, %v8260_v47 }
 0x69b   : > { %v15696_v20 = vrot.slane %v11537_v17, %v13356_v8  ;;  %9118 = vrot.lane.b32.xlu1 %v9087_v57, %s12682_s27  ;;  %v8098_v46 = vrot.slane %v8084_v1, %v13356_v8  ;;  %v8989_v36 = vrot.slane %v8982_v42, %v13356_v8  ;;  %v8997_v21 = vrot.slane %v11538_v54, %v13356_v8 }
 0x69c   : > { %v9031_v6 = vcombine.low %v8268_v32, %v8275_v29  ;;  %v11540_v55 = vcombine.high %v8268_v32, %v8275_v29  ;;  %v15703_v52 = vrot.slane %v9015_v14, %v13356_v8  ;;  %v15706_v37 = vrot.slane %v11539_v51, %v13356_v8 }
 0x69d   : > { %v8099_v30 = vcombine.high %v8091_v16, %v17175_v9  ;;  %v8809_v59 = vrot.slane %v8802_v4, %v13359_v13  ;;  %v8998_v61 = vcombine.low %v15693_v60, %v15696_v20  ;;  %v9006_v38 = vcombine.low %v8989_v36, %v8997_v21 }
 0x69e   : > { %v15716_v24 = vrot.slane %v9031_v6, %v13356_v8  ;;  %v9046_v0 = vrot.slane %v11540_v55, %v13356_v8  ;;  %v9047_v23 = vcombine.low %v15703_v52, %v15706_v37  ;;  %v8106_v1 = vrot.slane %v8091_v16, %v13359_v13 }
 0x69f   : > { %v8113_v43 = vrot.slane %v8099_v30, %v13359_v13  ;;  %v8114_v34 = vcombine.high %v8098_v46, %v17175_v9  ;;  %v8121_v56 = vrot.slane %v8098_v46, %v13359_v13  ;;  %v8133_v2 = vcombine.high %v7486_v50, %v17174_v35 }
 0x6a0   : > { %v8140_v4 = vrot.slane %v7486_v50, %v13356_v8  ;;  %v15727_v32 = vcombine.low %v8809_v59, %v8817_v63  ;;  %v8859_v57 = vcombine.low %v15585_v3, %v15589_v11  ;;  %v8858_v35 = vrot.slane %v8851_v5, %v13359_v13 }
 0x6a1   : > { %v8128_v15 = vrot.slane %v8114_v34, %v13359_v13  ;;  %v8868_v47 = vcombine.low %v8106_v1, %v8113_v43  ;;  %v11533_v17 = vcombine.high %v8106_v1, %v8113_v43  ;;  %v8147_v16 = vrot.slane %v8133_v2, %v13356_v8 }
 0x6a2   : > { %v8148_v29 = vcombine.high %v8140_v4, %v17175_v9  ;;  %v8155_v60 = vrot.slane %v8140_v4, %v13359_v13  ;;  %v8866_v11 = vrot.slane %v8859_v57, %v13359_v13  ;;  %v9097_v14 = vshrl.u32 %v15727_v32, 16 }
 0x6a3   : > { %v8875_v63 = vrot.slane %v8868_v47, %v13356_v8  ;;  %v8883_v50 = vrot.slane %v11533_v17, %v13356_v8  ;;  %v8884_v42 = vcombine.low %v8121_v56, %v8128_v15  ;;  %v11534_v54 = vcombine.high %v8121_v56, %v8128_v15 }
 0x6a4   : > { %v8162_v20 = vrot.slane %v8148_v29, %v13359_v13  ;;  %v8163_v3 = vcombine.high %v8147_v16, %v17175_v9  ;;  %v8170_v51 = vrot.slane %v8147_v16, %v13359_v13  ;;  %v15749_v6 = vcombine.low %v8858_v35, %v8866_v11 }
 0x6a5   : > { %v8891_v46 = vrot.slane %v8884_v42, %v13356_v8  ;;  %v8899_v39 = vrot.slane %v11534_v54, %v13356_v8  ;;  %v8900_v49 = vcombine.low %v8875_v63, %v8883_v50  ;;  %v8711_v52 = vrot.slane %v8704_v28, %v13359_v13 }
 0x6a6   : > { %v8177_v5 = vrot.slane %v8163_v3, %v13359_v13  ;;  %v8917_v36 = vcombine.low %v8155_v60, %v8162_v20  ;;  %v11535_v21 = vcombine.high %v8155_v60, %v8162_v20  ;;  %v8719_v37 = vrot.slane %v8712_v41, %v13359_v13 }
 0x6a7   : > { %v8908_v55 = vcombine.low %v8891_v46, %v8899_v39  ;;  %v8761_v30 = vcombine.low %v15636_v26, %v15639_v44  ;;  %v9098_v56 = vshrl.u32 %v15749_v6, 16  ;;  %v8760_v53 = vrot.slane %v8753_v22, %v13359_v13 }
 0x6a8   : > { %v8924_v59 = vrot.slane %v8917_v36, %v13356_v8  ;;  %v8932_v1 = vrot.slane %v11535_v21, %v13356_v8  ;;  %v8933_v43 = vcombine.low %v8170_v51, %v8177_v5  ;;  %v11536_v34 = vcombine.high %v8170_v51, %v8177_v5 }
 0x6a9   : > { %v8720_v2 = vcombine.low %v8711_v52, %v8719_v37  ;;  %v8768_v10 = vrot.slane %v8761_v30, %v13359_v13  ;;  %v9013_v41 = vrot.slane %v9006_v38, %v13359_v13  ;;  %v9099_v26 = vpack.i.b16 %v9098_v56, %v9097_v14  ;;  %v15809_v52 = vld [vmem:[%s17176_s23] ss:$0 sm:$0xff] }
 0x6aa   : > { %v8940_v19 = vrot.slane %v8933_v43, %v13356_v8  ;;  %v8948_v25 = vrot.slane %v11536_v34, %v13356_v8  ;;  %v8949_v28 = vcombine.low %v8924_v59, %v8932_v1  ;;  %v9005_v4 = vrot.slane %v8998_v61, %v13359_v13  ;;  %v12593_v1 = vld [vmem:[#allocation2 + $0x30] sm:$0xff] }
 0x6ab   : > { %v8769_v44 = vcombine.low %v8760_v53, %v8768_v10  ;;  %v9091_v15 = vshrl.u32 %v8720_v2, 16  ;;  %v9055_v47 = vcombine.low %v15716_v24, %v9046_v0  ;;  %v8907_v17 = vrot.slane %v8900_v49, %v13359_v13  ;;  %9122 = vrot.lane.b32.xlu1 %v9099_v26, %s12682_s27  ;;  %v12594_v53 = vld [vmem:[#allocation2] sm:$0xff] }
 0x6ac   : > { %v8915_v12 = vrot.slane %v8908_v55, %v13359_v13  ;;  %v9014_v22 = vcombine.low %v9005_v4, %v9013_v41  ;;  %v9054_v8 = vrot.slane %v9047_v23, %v13359_v13  ;;  %v8957_v57 = vcombine.low %v8940_v19, %v8948_v25  ;;  %v12595_v25 = vld [vmem:[#allocation2 + $0x58] sm:$0xff] }
 0x6ad   : > { %v9092_v40 = vshrl.u32 %v8769_v44, 16  ;;  %v9062_v38 = vrot.slane %v9055_v47, %v13359_v13  ;;  %v8956_v29 = vrot.slane %v8949_v28, %v13359_v13  ;;  %v9078_v61 = vpack.i.b16 %v15652_v27, %v15617_v18 }
 0x6ae   : > { %v8916_v16 = vcombine.low %v8907_v17, %v8915_v12  ;;  %v8964_v0 = vrot.slane %v8957_v57, %v13359_v13  ;;  %v9084_v60 = vpack.i.b16 %v15675_v33, %v15655_v31  ;;  %v9090_v35 = vpack.i.b16 %v8769_v44, %v8720_v2  ;;  %v12596_v44 = vld [vmem:[#allocation2 + $0x18] sm:$0xff] }
 0x6af   : > { %v9093_v24 = vpack.i.b16 %v9092_v40, %v9091_v15  ;;  %v9063_v63 = vcombine.low %v9054_v8, %v9062_v38  ;;  %v9096_v23 = vpack.i.b16 %v15749_v6, %v15727_v32  ;;  %v9109_v42 = vshrl.u32 %v9014_v22, 16  ;;  %v12193_v17 = vld [vmem:[%s12854_s19 + $0xe0] ss:$16 sps:$4 sm:$0xff]   ;;  %v12195_v12 = vld [vmem:[%s12854_s19 + $0xe4] ss:$16 sps:$4 sm:$0xff]  }
 0x6b0   : > { %v8965_v50 = vcombine.low %v8956_v29, %v8964_v0  ;;  %v9103_v3 = vshrl.u32 %v8916_v16, 16  ;;  %v9066_v31 = vpack.i.b16 %v15435_v62, %v15428_v48  ;;  %v12196_v40 = vld [vmem:[%s12854_s19 + $0xe8] ss:$16 sps:$4 sm:$0xff]   ;;  %9836 = vmatprep.subr.bf16.mxu1 %v12195_v12  ;;  %v12199_v8 = vld [vmem:[%s12854_s19 + $0xc0] ss:$16 sps:$4 sm:$0xff]  }
 0x6b1   : > { %9120 = vrot.lane.b32.xlu0 %v9093_v24, %s12682_s27  ;;  %v9110_v54 = vshrl.u32 %v9063_v63, 16  ;;  %v9108_v20 = vpack.i.b16 %v9063_v63, %v9014_v22  ;;  %v12198_v22 = vld [vmem:[%s12854_s19 + $0xec] ss:$16 sps:$4 sm:$0xff]   ;;  %9837 = vmatpush1.bf16.msra.mxu1 %v12193_v17  ;;  %v12201_v57 = vld [vmem:[%s12854_s19 + $0xc4] ss:$16 sps:$4 sm:$0xff]  }
 0x6b2   : > { %v9104_v11 = vshrl.u32 %v8965_v50, 16  ;;  %v9102_v18 = vpack.i.b16 %v8965_v50, %v8916_v16  ;;  %9949 = vmatprep.subr.bf16.mxu0 %v12198_v22  ;;  %v12202_v38 = vld [vmem:[%s12854_s19 + $0xc8] ss:$16 sps:$4 sm:$0xff]   ;;  %v12204_v16 = vld [vmem:[%s12854_s19 + $0xcc] ss:$16 sps:$4 sm:$0xff]   ;;  %9838 = vmatprep.subr.bf16.mxu1 %v12201_v57 }
 0x6b3   : > { %v9111_v27 = vpack.i.b16 %v9110_v54, %v9109_v42  ;;  %v12205_v29 = vld [vmem:[%s12854_s19 + $0xa0] ss:$16 sps:$4 sm:$0xff]   ;;  %v12208_v24 = vld [vmem:[%s12854_s19 + $0xa8] ss:$16 sps:$4 sm:$0xff]   ;;  %v12210_v0 = vld [vmem:[%s12854_s19 + $0xac] ss:$16 sps:$4 sm:$0xff]  }
 0x6b4   : > { %v9105_v14 = vpack.i.b16 %v9104_v11, %v9103_v3  ;;  %v12214_v63 = vld [vmem:[%s12854_s19 + $0x88] ss:$16 sps:$4 sm:$0xff]   ;;  %v12219_v50 = vld [vmem:[%s12854_s19 + $0x64] ss:$16 sps:$4 sm:$0xff]   ;;  %v12222_v42 = vld [vmem:[%s12854_s19 + $0x6c] ss:$16 sps:$4 sm:$0xff]  }
 0x6b5   : > { %9126 = vrot.lane.b32.xlu1 %v9111_v27, %s12682_s27  ;;  %9839 = vmatpush1.bf16.msra.mxu1 %v12199_v8  ;;  %v12217_v54 = vld [vmem:[%s12854_s19 + $0x60] ss:$16 sps:$4 sm:$0xff]   ;;  %v12225_v3 = vld [vmem:[%s12854_s19 + $0x44] ss:$16 sps:$4 sm:$0xff]   ;;  %v12228_v11 = vld [vmem:[%s12854_s19 + $0x4c] ss:$16 sps:$4 sm:$0xff]  }
 0x6b6   : > { %9124 = vrot.lane.b32.xlu0 %v9105_v14, %s12682_s27  ;;  %v12226_v14 = vld [vmem:[%s12854_s19 + $0x48] ss:$16 sps:$4 sm:$0xff]  }
 0x6b7   : > { %v12602_v8 = vld [vmem:[#allocation2 + $0x20] sm:$0xff] }
 0x6d2   : > { %v9115_v13 = vpop.permute.xlu0 %9114 }
 0x6d3   : > { %v9134_v51 = vsel %vm6627_vm0, %v9072_v58, %v9115_v13  ;;  %v12231_v13 = vld [vmem:[%s12854_s19 + $0x24] ss:$16 sps:$4 sm:$0xff]  }
 0x6d9   : > { %v9113_v33 = vpop.permute.xlu1 %9112 }
 0x6da   : > { %v9130_v32 = vsel %vm6627_vm0, %v9066_v31, %v9113_v33  ;;  %v12234_v31 = vld [vmem:[%s12854_s19 + $0x2c] ss:$16 sps:$4 sm:$0xff]  }
 0x6db   : > { %12059 = vmatprep.mubr.bf16.mxu0 %v9130_v32 }
 0x6dc   : > { %12060 = vmatmul.mubr.bf16.vlgmr.msra.gmra.mxu0 %v9134_v51  ;;  %v12229_v51 = vld [vmem:[%s12854_s19 + $0x20] ss:$16 sps:$4 sm:$0xff]  }
 0x6dd   : > { %9950 = vmatpush1.bf16.msra.mxu0 %v12196_v40 }
 0x6de   : > { %9951 = vmatprep.subr.bf16.mxu0 %v12204_v16 }
 0x6e1   : > { %9952 = vmatpush1.bf16.msra.mxu0 %v12202_v38 }
 0x6e2   : > { %9953 = vmatprep.subr.bf16.mxu0 %v12210_v0 }
 0x6e5   : > { %9954 = vmatpush1.bf16.msra.mxu0 %v12208_v24 }
 0x708   : > { %v9117_v46 = vpop.permute.xlu1 %9116 }
 0x709   : > { %v9138_v39 = vsel %vm6627_vm0, %v9078_v61, %v9117_v46  ;;  %v12207_v61 = vld [vmem:[%s12854_s19 + $0xa4] ss:$16 sps:$4 sm:$0xff]  }
 0x70a   : > { %12063 = vmatprep.mubr.bf16.mxu0 %v9138_v39  ;;  %9840 = vmatprep.subr.bf16.mxu1 %v12207_v61  ;;  %v12232_v39 = vld [vmem:[%s12854_s19 + $0x28] ss:$16 sps:$4 sm:$0xff]  }
 0x70b   : > { %9841 = vmatpush1.bf16.msra.mxu1 %v12205_v29  ;;  %v12603_v61 = vld [vmem:[#allocation2 + $0x10] sm:$0xff] }
 0x70d   : > { %v9119_v49 = vpop.permute.xlu1 %9118 }
 0x70e   : > { %v9142_v5 = vsel %vm6627_vm0, %v9084_v60, %v9119_v49  ;;  %v12211_v60 = vld [vmem:[%s12854_s19 + $0x80] ss:$16 sps:$4 sm:$0xff]   ;;  %v12597_v49 = vld [vmem:[#allocation2 + $0x50] sm:$0xff] }
 0x70f   : > { %12064 = vmatmul.mubr.bf16.gmra.mxu0 %v9142_v5 }
 0x71d   : > { %v9123_v48 = vpop.permute.xlu1 %9122 }
 0x71e   : > { %v9150_v45 = vsel %vm6627_vm0, %v9096_v23, %v9123_v48  ;;  %v12216_v23 = vld [vmem:[%s12854_s19 + $0x8c] ss:$16 sps:$4 sm:$0xff]  }
 0x71f   : > { %9955 = vmatprep.subr.bf16.mxu0 %v12216_v23  ;;  %v12604_v23 = vld [vmem:[#allocation2 + $0x38] sm:$0xff] }
 0x720   : > { %9956 = vmatpush1.bf16.msra.mxu0 %v12214_v63 }
 0x721   : > { %9957 = vmatprep.subr.bf16.mxu0 %v12222_v42 }
 0x723   : > { %v9121_v62 = vpop.permute.xlu0 %9120 }
 0x724   : > { %v9146_v36 = vsel %vm6627_vm0, %v9090_v35, %v9121_v62  ;;  %v12213_v35 = vld [vmem:[%s12854_s19 + $0x84] ss:$16 sps:$4 sm:$0xff]  }
 0x725   : > { %12067 = vmatprep.mubr.bf16.mxu0 %v9146_v36  ;;  %9842 = vmatprep.subr.bf16.mxu1 %v12213_v35 }
 0x726   : > { %12068 = vmatmul.mubr.bf16.gmra.mxu0 %v9150_v45  ;;  %9843 = vmatpush1.bf16.msra.mxu1 %v12211_v60  ;;  %v12598_v45 = vld [vmem:[#allocation2 + $0x68] sm:$0xff] }
 0x727   : > { %v9127_v58 = vpop.permute.xlu1 %9126  ;;  %9844 = vmatprep.subr.bf16.mxu1 %v12219_v50 }
 0x728   : > { %v9125_v7 = vpop.permute.xlu0 %9124  ;;  %v9158_v6 = vsel %vm6627_vm0, %v9108_v20, %v9127_v58  ;;  %v12220_v20 = vld [vmem:[%s12854_s19 + $0x68] ss:$16 sps:$4 sm:$0xff]  }
 0x729   : > { %v9154_v21 = vsel %vm6627_vm0, %v9102_v18, %v9125_v7  ;;  %v12223_v18 = vld [vmem:[%s12854_s19 + $0x40] ss:$16 sps:$4 sm:$0xff]   ;;  %9958 = vmatpush1.bf16.msra.mxu0 %v12220_v20 }
 0x72a   : > { %12071 = vmatprep.mubr.bf16.mxu0 %v9154_v21  ;;  %9845 = vmatpush1.bf16.msra.mxu1 %v12217_v54  ;;  %v12599_v21 = vld [vmem:[#allocation2 + $0x8] sm:$0xff]  ;;  %v12605_v54 = vld [vmem:[#allocation2 + $0x60] sm:$0xff] }
 0x72b   : > { %9846 = vmatprep.subr.bf16.mxu1 %v12225_v3  ;;  %9959 = vmatprep.subr.bf16.mxu0 %v12228_v11 }
 0x72d   : > { %9960 = vmatpush1.bf16.msra.mxu0 %v12226_v14 }
 0x72e   : > { %12072 = vmatmul.mubr.bf16.gmra.mxu0 %v9158_v6  ;;  %9847 = vmatpush1.bf16.msra.mxu1 %v12223_v18  ;;  %v12606_v18 = vld [vmem:[#allocation2 + $0x70] sm:$0xff] }
 0x72f   : > { %9981 = vmatprep.mubr.bf16.mxu0 %v17175_v9  ;;  %9848 = vmatprep.subr.bf16.mxu1 %v12231_v13 }
 0x730   : > { %9961 = vmatprep.subr.bf16.mxu0 %v12234_v31  ;;  %v12607_v31 = vld [vmem:[#allocation2 + $0x78] sm:$0xff] }
 0x731   : > { %9962 = vmatpush1.bf16.msra.mxu0 %v12232_v39 }
 0x732   : > { %9849 = vmatpush1.bf16.msra.mxu1 %v12229_v51 }
 0x79c   : > { %v12061_v55 = vpop.f32.mrf.mxu0 }
 0x79d   : > { %v9274_v2 = vadd.f32 %v12061_v55, %v15809_v52 }
 0x79e   : > { %v9265_v37 = vpop.f32.mrf.mxu0 }
 0x79f   : > { %v9266_v30 = vadd.f32 %v15809_v52, %v9265_v37  ;;  %v15822_v28 = vadd.f32 %v12595_v25, %v9274_v2  ;;  %v12238_v2 = vld [vmem:[%s12854_s19 + $0x8] ss:$16 sps:$4 sm:$0xff]  }
 0x7a0   : > { %v12062_v59 = vpop.f32.mrf.mxu0 }
 0x7a1   : > { %v15812_v43 = vadd.f32 %v12593_v1, %v9266_v30  ;;  %v9277_v41 = vadd.f32 %v12062_v59, %v15809_v52  ;;  %v9396_v15 = vmul.f32 %v15822_v28, %v15822_v28  ;;  %v12600_v30 = vld [vmem:[#allocation2 + $0x48] sm:$0xff] }
 0x7a2   : > { %v9268_v34 = vpop.f32.mrf.mxu0 }
 0x7a3   : > { %v9269_v56 = vadd.f32 %v15809_v52, %v9268_v34  ;;  %9346 = vadd.xlane.f32.xlu0 %v15812_v43  ;;  %v9394_v19 = vmul.f32 %v15812_v43, %v15812_v43  ;;  %v15828_v4 = vadd.f32 %v12596_v44, %v9277_v41  ;;  %v12235_v34 = vld [vmem:[%s12854_s19] ss:$16 sps:$4 sm:$0xff]  }
 0x7a5   : > { %v15817_v10 = vadd.f32 %v12594_v53, %v9269_v56  ;;  %v9397_v47 = vmul.f32 %v15828_v4, %v15828_v4  ;;  %v12237_v56 = vld [vmem:[%s12854_s19 + $0x4] ss:$16 sps:$4 sm:$0xff]   ;;  %v12240_v53 = vld [vmem:[%s12854_s19 + $0xc] ss:$16 sps:$4 sm:$0xff]  }
 0x7a6   : > { %9850 = vmatprep.subr.bf16.mxu1 %v12237_v56  ;;  %9963 = vmatprep.subr.bf16.mxu0 %v12240_v53 }
 0x7a7   : > { %9348 = vadd.xlane.f32.xlu1 %v15817_v10  ;;  %9410 = vadd.xlane.f32.xlu0 %v9394_v19  ;;  %v9395_v26 = vmul.f32 %v15817_v10, %v15817_v10 }
 0x7a8   : > { %9851 = vmatpush1.bf16.msra.mxu1 %v12235_v34  ;;  %9964 = vmatpush1.bf16.msra.mxu0 %v12238_v2 }
 0x7ab   : > { %9350 = vadd.xlane.f32.xlu1 %v15822_v28  ;;  %9412 = vadd.xlane.f32.xlu0 %v9395_v26 }
 0x7af   : > { %9414 = vadd.xlane.f32.xlu1 %v9396_v15  ;;  %9352 = vadd.xlane.f32.xlu0 %v15828_v4  ;;  %v12601_v15 = vld [vmem:[#allocation2 + $0x40] sm:$0xff] }
 0x7b3   : > { %9416 = vadd.xlane.f32.xlu0 %v9397_v47 }
 0x7cf   : > { %v12065_v27 = vpop.f32.mrf.mxu0 }
 0x7d0   : > { %v9290_v36 = vadd.f32 %v12065_v27, %v15809_v52 }
 0x7d1   : > { %v9281_v33 = vpop.f32.mrf.mxu0 }
 0x7d2   : > { %v9282_v32 = vadd.f32 %v15809_v52, %v9281_v33  ;;  %v15874_v6 = vadd.f32 %v12599_v21, %v9290_v36 }
 0x7d3   : > { %v12066_v46 = vpop.f32.mrf.mxu0 }
 0x7d4   : > { %v15864_v5 = vadd.f32 %v12597_v49, %v9282_v32  ;;  %v9293_v55 = vadd.f32 %v12066_v46, %v15809_v52  ;;  %v9400_v1 = vmul.f32 %v15874_v6, %v15874_v6  ;;  %v12608_v46 = vld [vmem:[#allocation2 + $0x28] sm:$0xff] }
 0x7d5   : > { %v9284_v48 = vpop.f32.mrf.mxu0 }
 0x7d6   : > { %v9285_v62 = vadd.f32 %v15809_v52, %v9284_v48  ;;  %9354 = vadd.xlane.f32.xlu1 %v15864_v5  ;;  %v9398_v58 = vmul.f32 %v15864_v5, %v15864_v5  ;;  %v15880_v59 = vadd.f32 %v12600_v30, %v9293_v55 }
 0x7d8   : > { %v15869_v7 = vadd.f32 %v12598_v45, %v9285_v62  ;;  %v9401_v19 = vmul.f32 %v15880_v59, %v15880_v59 }
 0x7da   : > { %9356 = vadd.xlane.f32.xlu0 %v15869_v7  ;;  %9418 = vadd.xlane.f32.xlu1 %v9398_v58  ;;  %v9399_v37 = vmul.f32 %v15869_v7, %v15869_v7 }
 0x7de   : > { %9420 = vadd.xlane.f32.xlu0 %v9399_v37  ;;  %9358 = vadd.xlane.f32.xlu1 %v15874_v6 }
 0x7e2   : > { %9360 = vadd.xlane.f32.xlu0 %v15880_v59  ;;  %9422 = vadd.xlane.f32.xlu1 %v9400_v1 }
 0x7e6   : > { %v12069_v25 = vpop.f32.mrf.mxu0  ;;  %9424 = vadd.xlane.f32.xlu0 %v9401_v19 }
 0x7e7   : > { %v9306_v22 = vadd.f32 %v12069_v25, %v15809_v52 }
 0x7e8   : > { %v9297_v41 = vpop.f32.mrf.mxu0 }
 0x7e9   : > { %v9298_v26 = vadd.f32 %v15809_v52, %v9297_v41  ;;  %v15902_v24 = vadd.f32 %v12603_v61, %v9306_v22 }
 0x7ea   : > { %v12070_v44 = vpop.f32.mrf.mxu0 }
 0x7eb   : > { %v15892_v47 = vadd.f32 %v12601_v15, %v9298_v26  ;;  %v9309_v0 = vadd.f32 %v12070_v44, %v15809_v52  ;;  %v9404_v42 = vmul.f32 %v15902_v24, %v15902_v24 }
 0x7ec   : > { %v9300_v17 = vpop.f32.mrf.mxu0 }
 0x7ed   : > { %v9301_v12 = vadd.f32 %v15809_v52, %v9300_v17  ;;  %9362 = vadd.xlane.f32.xlu1 %v15892_v47  ;;  %v9402_v38 = vmul.f32 %v15892_v47, %v15892_v47  ;;  %v15909_v50 = vadd.f32 %v12604_v23, %v9309_v0 }
 0x7ee   : > { %v12073_v40 = vpop.f32.mrf.mxu0 }
 0x7ef   : > { %v15897_v57 = vadd.f32 %v12602_v8, %v9301_v12  ;;  %v9405_v11 = vmul.f32 %v15909_v50, %v15909_v50  ;;  %v9322_v14 = vadd.f32 %v12073_v40, %v15809_v52 }
 0x7f0   : > { %v9313_v16 = vpop.f32.mrf.mxu0 }
 0x7f1   : > { %9364 = vadd.xlane.f32.xlu0 %v15897_v57  ;;  %9426 = vadd.xlane.f32.xlu1 %v9402_v38  ;;  %v9403_v60 = vmul.f32 %v15897_v57, %v15897_v57  ;;  %v9314_v35 = vadd.f32 %v15809_v52, %v9313_v16  ;;  %v15926_v33 = vadd.f32 %v12607_v31, %v9322_v14 }
 0x7f2   : > { %v12074_v29 = vpop.f32.mrf.mxu0 }
 0x7f3   : > { %v15913_v20 = vadd.f32 %v12605_v54, %v9314_v35  ;;  %17177 = vst [vmem:[#allocation18_spill] sm:$0xff] %v15926_v33  ;;  %v9325_v32 = vadd.f32 %v12074_v29, %v15809_v52  ;;  %v9408_v49 = vmul.f32 %v15926_v33, %v15926_v33  ;;  %v15945_v54 = vld [vmem:[%s17179_s18] ss:$0 sm:$0xff] }
 0x7f4   : > { %v9316_v63 = vpop.f32.mrf.mxu0 }
 0x7f5   : > { %9428 = vadd.xlane.f32.xlu0 %v9403_v60  ;;  %9366 = vadd.xlane.f32.xlu1 %v15902_v24  ;;  %v9317_v3 = vadd.f32 %v15809_v52, %v9316_v63  ;;  %v9406_v13 = vmul.f32 %v15913_v20, %v15913_v20  ;;  %v15932_v39 = vadd.f32 %v12608_v46, %v9325_v32 }
 0x7f7   : > { %v15919_v27 = vadd.f32 %v12606_v18, %v9317_v3  ;;  %17178 = vst [vmem:[#allocation25_spill] sm:$0xff] %v15932_v39  ;;  %v9409_v48 = vmul.f32 %v15932_v39, %v15932_v39 }
 0x7f9   : > { %9368 = vadd.xlane.f32.xlu0 %v15909_v50  ;;  %9430 = vadd.xlane.f32.xlu1 %v9404_v42  ;;  %v9407_v51 = vmul.f32 %v15919_v27, %v15919_v27 }
 0x7fd   : > { %9432 = vadd.xlane.f32.xlu0 %v9405_v11  ;;  %9370 = vadd.xlane.f32.xlu1 %v15913_v20 }
 0x801   : > { %9372 = vadd.xlane.f32.xlu0 %v15919_v27  ;;  %9434 = vadd.xlane.f32.xlu1 %v9406_v13  ;;  %v15954_v13 = vld [vmem:[%s17180_s30] ss:$0 sm:$0xff] }
 0x805   : > { %9436 = vadd.xlane.f32.xlu0 %v9407_v51  ;;  %9374 = vadd.xlane.f32.xlu1 %v15926_v33 }
 0x809   : > { %9376 = vadd.xlane.f32.xlu0 %v15932_v39  ;;  %9438 = vadd.xlane.f32.xlu1 %v9408_v49 }
 0x80d   : > { %9440 = vadd.xlane.f32.xlu0 %v9409_v48 }
 0x82c   : > { %v9347_v52 = vpop.xlane.xlu0 %9346 }
 0x82d   : > { %v9378_v62 = vmul.f32 0.0078125, %v9347_v52 }
 0x82f   : > { %v9458_v58 = vmul.f32 %v9378_v62, %v9378_v62  ;;  %v9506_v63 = vsub.f32 %v15812_v43, %v9378_v62 }
 0x830   : > { %v9411_v36 = vpop.xlane.xlu0 %9410  ;;  %v9349_v45 = vpop.xlane.xlu1 %9348 }
 0x831   : > { %v9442_v21 = vmul.f32 0.0078125, %v9411_v36  ;;  %v9379_v55 = vmul.f32 0.0078125, %v9349_v45 }
 0x833   : > { %v9474_v37 = vsub.f32 %v9442_v21, %v9458_v58  ;;  %v9459_v56 = vmul.f32 %v9379_v55, %v9379_v55  ;;  %v9507_v3 = vsub.f32 %v15817_v10, %v9379_v55 }
 0x834   : > { %v9413_v30 = vpop.xlane.xlu0 %9412  ;;  %v9351_v1 = vpop.xlane.xlu1 %9350 }
 0x835   : > { %v9490_v34 = vmax.f32 %v9474_v37, 0.0  ;;  %v9443_v2 = vmul.f32 0.0078125, %v9413_v30  ;;  %v9380_v53 = vmul.f32 0.0078125, %v9351_v1 }
 0x837   : > { %v9522_v19 = vadd.f32 1e-05, %v9490_v34  ;;  %v9475_v25 = vsub.f32 %v9443_v2, %v9459_v56  ;;  %v9460_v41 = vmul.f32 %v9380_v53, %v9380_v53  ;;  %v9508_v31 = vsub.f32 %v15822_v28, %v9380_v53 }
 0x838   : > { %v9353_v26 = vpop.xlane.xlu0 %9352  ;;  %v9415_v44 = vpop.xlane.xlu1 %9414 }
 0x839   : > { %12433 = vrsqrt.f32 %v9522_v19  ;;  %v9491_v15 = vmax.f32 %v9475_v25, 0.0  ;;  %v9381_v17 = vmul.f32 0.0078125, %v9353_v26  ;;  %v9444_v12 = vmul.f32 0.0078125, %v9415_v44 }
 0x83b   : > { %v9523_v40 = vadd.f32 1e-05, %v9491_v15  ;;  %v9476_v22 = vsub.f32 %v9444_v12, %v9460_v41  ;;  %v9461_v38 = vmul.f32 %v9381_v17, %v9381_v17  ;;  %v9509_v52 = vsub.f32 %v15828_v4, %v9381_v17 }
 0x83c   : > { %v9417_v8 = vpop.xlane.xlu0 %9416 }
 0x83d   : > { %12435 = vrsqrt.f32 %v9523_v40  ;;  %v9492_v16 = vmax.f32 %v9476_v22, 0.0  ;;  %v9445_v29 = vmul.f32 0.0078125, %v9417_v8 }
 0x83f   : > { %v9524_v61 = vadd.f32 1e-05, %v9492_v16  ;;  %v9477_v0 = vsub.f32 %v9445_v29, %v9461_v38 }
 0x841   : > { %12437 = vrsqrt.f32 %v9524_v61  ;;  %v9493_v60 = vmax.f32 %v9477_v0, 0.0 }
 0x843   : > { %v9525_v35 = vadd.f32 1e-05, %v9493_v60 }
 0x845   : > { %12439 = vrsqrt.f32 %v9525_v35 }
 0x846   : > { %v12434_v23 = vpop.eup %12433 }
 0x847   : > { %v9554_v42 = vmul.f32 %v12434_v23, %v9506_v63 }
 0x849   : > { %v9576_v14 = vmul.f32 %v15945_v54, %v9554_v42 }
 0x84a   : > { %v12436_v11 = vpop.eup %12435 }
 0x84b   : > { %v9555_v18 = vmul.f32 %v12436_v11, %v9507_v3  ;;  %v9598_v46 = vadd.f32 %v15954_v13, %v9576_v14 }
 0x84d   : > { %v9577_v32 = vmul.f32 %v15945_v54, %v9555_v18 }
 0x84e   : > { %v12438_v51 = vpop.eup %12437 }
 0x84f   : > { %v9599_v49 = vadd.f32 %v15954_v13, %v9577_v32  ;;  %v9556_v48 = vmul.f32 %v12438_v51, %v9508_v31 }
 0x851   : > { %v9614_v62 = vpack.c.bf16 %v9599_v49, %v9598_v46  ;;  %v9578_v58 = vmul.f32 %v15945_v54, %v9556_v48 }
 0x852   : > { %v12440_v36 = vpop.eup %12439 }
 0x853   : > { %9869 = vmatmul.mubr.bf16.vlgmr.msra.gmra.mxu1 %v9614_v62  ;;  %9982 = vmatmul.mubr.bf16.vlgmr.msra.gmra.mxu0 %v9614_v62  ;;  %v9557_v45 = vmul.f32 %v12440_v36, %v9509_v52  ;;  %v9600_v55 = vadd.f32 %v15954_v13, %v9578_v58 }
 0x854   : > { %9878 = vmatprep.mubr.bf16.mxu1 %v17175_v9  ;;  %9991 = vmatprep.mubr.bf16.mxu0 %v17175_v9 }
 0x855   : > { %v9579_v21 = vmul.f32 %v15945_v54, %v9557_v45 }
 0x857   : > { %v9601_v37 = vadd.f32 %v15954_v13, %v9579_v21 }
 0x859   : > { %v9615_v30 = vpack.c.bf16 %v9601_v37, %v9600_v55 }
 0x85b   : > { %9879 = vmatmul.mubr.bf16.gmra.mxu1 %v9615_v30  ;;  %9992 = vmatmul.mubr.bf16.gmra.mxu0 %v9615_v30 }
 0x85c   : > { %9888 = vmatprep.mubr.bf16.mxu1 %v17175_v9  ;;  %10001 = vmatprep.mubr.bf16.mxu0 %v17175_v9 }
 0x85f   : > { %v9355_v1 = vpop.xlane.xlu1 %9354 }
 0x860   : > { %v9382_v34 = vmul.f32 0.0078125, %v9355_v1 }
 0x862   : > { %v9462_v53 = vmul.f32 %v9382_v34, %v9382_v34  ;;  %v9510_v49 = vsub.f32 %v15864_v5, %v9382_v34 }
 0x863   : > { %v9357_v56 = vpop.xlane.xlu0 %9356  ;;  %v9419_v2 = vpop.xlane.xlu1 %9418 }
 0x864   : > { %v9383_v19 = vmul.f32 0.0078125, %v9357_v56  ;;  %v9446_v25 = vmul.f32 0.0078125, %v9419_v2 }
 0x866   : > { %v9478_v41 = vsub.f32 %v9446_v25, %v9462_v53  ;;  %v9463_v15 = vmul.f32 %v9383_v19, %v9383_v19  ;;  %v9511_v55 = vsub.f32 %v15869_v7, %v9383_v19 }
 0x867   : > { %v9421_v26 = vpop.xlane.xlu0 %9420  ;;  %v9359_v44 = vpop.xlane.xlu1 %9358 }
 0x868   : > { %v9494_v17 = vmax.f32 %v9478_v41, 0.0  ;;  %v9447_v12 = vmul.f32 0.0078125, %v9421_v26  ;;  %v9384_v40 = vmul.f32 0.0078125, %v9359_v44 }
 0x86a   : > { %v9526_v22 = vadd.f32 1e-05, %v9494_v17  ;;  %v9479_v8 = vsub.f32 %v9447_v12, %v9463_v15  ;;  %v9464_v38 = vmul.f32 %v9384_v40, %v9384_v40  ;;  %v9512_v44 = vsub.f32 %v15874_v6, %v9384_v40 }
 0x86b   : > { %v9361_v16 = vpop.xlane.xlu0 %9360  ;;  %v9423_v29 = vpop.xlane.xlu1 %9422 }
 0x86c   : > { %12441 = vrsqrt.f32 %v9526_v22  ;;  %v9495_v61 = vmax.f32 %v9479_v8, 0.0  ;;  %v9385_v0 = vmul.f32 0.0078125, %v9361_v16  ;;  %v9448_v60 = vmul.f32 0.0078125, %v9423_v29 }
 0x86e   : > { %v9527_v35 = vadd.f32 1e-05, %v9495_v61  ;;  %v9480_v63 = vsub.f32 %v9448_v60, %v9464_v38  ;;  %v9465_v42 = vmul.f32 %v9385_v0, %v9385_v0 }
 0x86f   : > { %v9425_v23 = vpop.xlane.xlu0 %9424 }
 0x870   : > { %12443 = vrsqrt.f32 %v9527_v35  ;;  %v9496_v3 = vmax.f32 %v9480_v63, 0.0  ;;  %v9449_v11 = vmul.f32 0.0078125, %v9425_v23  ;;  %v9513_v63 = vsub.f32 %v15880_v59, %v9385_v0 }
 0x872   : > { %v9528_v18 = vadd.f32 1e-05, %v9496_v3  ;;  %v9481_v14 = vsub.f32 %v9449_v11, %v9465_v42 }
 0x874   : > { %12445 = vrsqrt.f32 %v9528_v18  ;;  %v9497_v31 = vmax.f32 %v9481_v14, 0.0 }
 0x876   : > { %v9529_v32 = vadd.f32 1e-05, %v9497_v31  ;;  %v9363_v51 = vpop.xlane.xlu1 %9362 }
 0x877   : > { %v15969_v46 = vmul.f32 0.0078125, %v9363_v51 }
 0x878   : > { %12447 = vrsqrt.f32 %v9529_v32 }
 0x879   : > { %v12442_v48 = vpop.eup %12441  ;;  %v9466_v45 = vmul.f32 %v15969_v46, %v15969_v46 }
 0x87a   : > { %v9365_v52 = vpop.xlane.xlu0 %9364  ;;  %v9427_v62 = vpop.xlane.xlu1 %9426  ;;  %v9558_v36 = vmul.f32 %v12442_v48, %v9510_v49 }
 0x87b   : > { %v15974_v58 = vmul.f32 0.0078125, %v9365_v52  ;;  %v9450_v21 = vmul.f32 0.0078125, %v9427_v62 }
 0x87c   : > { %v9580_v34 = vmul.f32 %v15945_v54, %v9558_v36 }
 0x87d   : > { %v12444_v37 = vpop.eup %12443  ;;  %v9482_v30 = vsub.f32 %v9450_v21, %v9466_v45  ;;  %v9467_v53 = vmul.f32 %v15974_v58, %v15974_v58 }
 0x87e   : > { %v9429_v1 = vpop.xlane.xlu0 %9428  ;;  %v9367_v56 = vpop.xlane.xlu1 %9366  ;;  %v9559_v2 = vmul.f32 %v12444_v37, %v9511_v55  ;;  %v9602_v16 = vadd.f32 %v15954_v13, %v9580_v34 }
 0x87f   : > { %v9498_v25 = vmax.f32 %v9482_v30, 0.0  ;;  %v9451_v41 = vmul.f32 0.0078125, %v9429_v1  ;;  %v15980_v26 = vmul.f32 0.0078125, %v9367_v56 }
 0x880   : > { %v9581_v15 = vmul.f32 %v15945_v54, %v9559_v2 }
 0x881   : > { %v12446_v17 = vpop.eup %12445  ;;  %v9530_v19 = vadd.f32 1e-05, %v9498_v25  ;;  %v9483_v12 = vsub.f32 %v9451_v41, %v9467_v53  ;;  %v9468_v22 = vmul.f32 %v15980_v26, %v15980_v26 }
 0x882   : > { %v9369_v8 = vpop.xlane.xlu0 %9368  ;;  %v9431_v38 = vpop.xlane.xlu1 %9430  ;;  %v9603_v29 = vadd.f32 %v15954_v13, %v9581_v15  ;;  %v9560_v61 = vmul.f32 %v12446_v17, %v9512_v44 }
 0x883   : > { %12449 = vrsqrt.f32 %v9530_v19  ;;  %v9499_v60 = vmax.f32 %v9483_v12, 0.0  ;;  %v15988_v35 = vmul.f32 0.0078125, %v9369_v8  ;;  %v9452_v40 = vmul.f32 0.0078125, %v9431_v38 }
 0x884   : > { %v9616_v23 = vpack.c.bf16 %v9603_v29, %v9602_v16  ;;  %v9582_v51 = vmul.f32 %v15945_v54, %v9560_v61  ;;  %v9514_v8 = vsub.f32 %v15892_v47, %v15969_v46  ;;  %v9516_v46 = vsub.f32 %v15902_v24, %v15980_v26 }
 0x885   : > { %v12448_v42 = vpop.eup %12447  ;;  %v9531_v3 = vadd.f32 1e-05, %v9499_v60  ;;  %v9484_v11 = vsub.f32 %v9452_v40, %v9468_v22  ;;  %v9469_v18 = vmul.f32 %v15988_v35, %v15988_v35  ;;  %v9517_v26 = vsub.f32 %v15909_v50, %v15988_v35 }
 0x886   : > { %v9433_v14 = vpop.xlane.xlu0 %9432  ;;  %v9371_v31 = vpop.xlane.xlu1 %9370  ;;  %9889 = vmatmul.mubr.bf16.gmra.mxu1 %v9616_v23  ;;  %10002 = vmatmul.mubr.bf16.gmra.mxu0 %v9616_v23  ;;  %v9561_v32 = vmul.f32 %v12448_v42, %v9513_v63  ;;  %v9604_v37 = vadd.f32 %v15954_v13, %v9582_v51 }
 0x887   : > { %12451 = vrsqrt.f32 %v9531_v3  ;;  %v9500_v49 = vmax.f32 %v9484_v11, 0.0  ;;  %v9453_v48 = vmul.f32 0.0078125, %v9433_v14  ;;  %v15994_v52 = vmul.f32 0.0078125, %v9371_v31  ;;  %9898 = vmatprep.mubr.bf16.mxu1 %v17175_v9  ;;  %10011 = vmatprep.mubr.bf16.mxu0 %v17175_v9 }
 0x888   : > { %v9583_v0 = vmul.f32 %v15945_v54, %v9561_v32  ;;  %v9515_v11 = vsub.f32 %v15897_v57, %v15974_v58 }
 0x889   : > { %v9532_v62 = vadd.f32 1e-05, %v9500_v49  ;;  %v9485_v36 = vsub.f32 %v9453_v48, %v9469_v18  ;;  %v9470_v45 = vmul.f32 %v15994_v52, %v15994_v52 }
 0x88a   : > { %v9373_v21 = vpop.xlane.xlu0 %9372  ;;  %v9435_v55 = vpop.xlane.xlu1 %9434  ;;  %v9605_v30 = vadd.f32 %v15954_v13, %v9583_v0 }
 0x88b   : > { %12453 = vrsqrt.f32 %v9532_v62  ;;  %v9501_v1 = vmax.f32 %v9485_v36, 0.0  ;;  %v16003_v56 = vmul.f32 0.0078125, %v9373_v21  ;;  %v9454_v2 = vmul.f32 0.0078125, %v9435_v55 }
 0x88c   : > { %v9617_v34 = vpack.c.bf16 %v9605_v30, %v9604_v37 }
 0x88d   : > { %v9533_v53 = vadd.f32 1e-05, %v9501_v1  ;;  %v9486_v25 = vsub.f32 %v9454_v2, %v9470_v45  ;;  %v9471_v41 = vmul.f32 %v16003_v56, %v16003_v56 }
 0x88e   : > { %v9437_v44 = vpop.xlane.xlu0 %9436  ;;  %v9375_v15 = vpop.xlane.xlu1 %9374  ;;  %9899 = vmatmul.mubr.bf16.gmra.mxu1 %v9617_v34  ;;  %10012 = vmatmul.mubr.bf16.gmra.mxu0 %v9617_v34 }
 0x88f   : > { %12455 = vrsqrt.f32 %v9533_v53  ;;  %v9502_v17 = vmax.f32 %v9486_v25, 0.0  ;;  %v9455_v19 = vmul.f32 0.0078125, %v9437_v44  ;;  %v16007_v12 = vmul.f32 0.0078125, %v9375_v15  ;;  %9908 = vmatprep.mubr.bf16.mxu1 %v17175_v9  ;;  %10021 = vmatprep.mubr.bf16.mxu0 %v17175_v9 }
 0x890   : > { %v12450_v22 = vpop.eup %12449 }
 0x891   : > { %v9534_v38 = vadd.f32 1e-05, %v9502_v17  ;;  %v9487_v16 = vsub.f32 %v9455_v19, %v9471_v41  ;;  %v9472_v29 = vmul.f32 %v16007_v12, %v16007_v12  ;;  %v9562_v40 = vmul.f32 %v12450_v22, %v9514_v8 }
 0x892   : > { %v9377_v61 = vpop.xlane.xlu0 %9376  ;;  %v9439_v60 = vpop.xlane.xlu1 %9438  ;;  %v9518_v41 = vsub.f32 %v15913_v20, %v15994_v52  ;;  %v9519_v22 = vsub.f32 %v15919_v27, %v16003_v56 }
 0x893   : > { %12457 = vrsqrt.f32 %v9534_v38  ;;  %v9503_v63 = vmax.f32 %v9487_v16, 0.0  ;;  %v9393_v23 = vmul.f32 0.0078125, %v9377_v61  ;;  %v9456_v42 = vmul.f32 0.0078125, %v9439_v60 }
 0x894   : > { %v12452_v3 = vpop.eup %12451  ;;  %v9584_v51 = vmul.f32 %v15945_v54, %v9562_v40 }
 0x895   : > { %v9535_v18 = vadd.f32 1e-05, %v9503_v63  ;;  %v9488_v14 = vsub.f32 %v9456_v42, %v9472_v29  ;;  %v9563_v32 = vmul.f32 %v12452_v3, %v9515_v11  ;;  %v9473_v49 = vmul.f32 %v9393_v23, %v9393_v23 }
 0x896   : > { %v9441_v31 = vpop.xlane.xlu0 %9440  ;;  %v9606_v58 = vadd.f32 %v15954_v13, %v9584_v51  ;;  %v9520_v29 = vsub.f32 %v15926_v33, %v16007_v12  ;;  %v9521_v42 = vsub.f32 %v15932_v39, %v9393_v23  ;;  %v12242_v51 = vld [vmem:[%s12864_s2 + $0x38] sm:$0xff]  }
 0x897   : > { %12459 = vrsqrt.f32 %v9535_v18  ;;  %v9504_v48 = vmax.f32 %v9488_v14, 0.0  ;;  %v9457_v0 = vmul.f32 0.0078125, %v9441_v31  ;;  %v9585_v36 = vmul.f32 %v15945_v54, %v9563_v32  ;;  %v12241_v32 = vld [vmem:[%s12864_s2 + $0x78] sm:$0xff]  }
 0x898   : > { %v12454_v62 = vpop.eup %12453  ;;  %11755 = vmatprep.subr.bf16.mxu1 %v12241_v32 }
 0x899   : > { %v9536_v45 = vadd.f32 1e-05, %v9504_v48  ;;  %v9489_v21 = vsub.f32 %v9457_v0, %v9473_v49  ;;  %v9564_v55 = vmul.f32 %v12454_v62, %v9516_v46  ;;  %v9607_v37 = vadd.f32 %v15954_v13, %v9585_v36  ;;  %11756 = vmatpush3.bf16.msra.mxu1 %v12242_v51  ;;  %v12243_v49 = vld [vmem:[%s12864_s2 + $0x70] sm:$0xff]   ;;  %v12246_v48 = vld [vmem:[%s12864_s2 + $0xf8] sm:$0xff]   ;;  %v12247_v62 = vld [vmem:[%s12864_s2 + $0x28] sm:$0xff]  }
 0x89a   : > { %v16057_v0 = vld [vmem:[%s12864_s2 + $0xb8] sm:$0xff]   ;;  %11757 = vmatprep.subr.bf16.mxu1 %v12243_v49  ;;  %11819 = vmatprep.subr.bf16.mxu0 %v12246_v48  ;;  %v16065_v36 = vld [vmem:[%s12864_s2 + $0xb0] sm:$0xff]  }
 0x89b   : > { %12461 = vrsqrt.f32 %v9536_v45  ;;  %v9505_v30 = vmax.f32 %v9489_v21, 0.0  ;;  %v9618_v2 = vpack.c.bf16 %v9607_v37, %v9606_v58  ;;  %v9586_v25 = vmul.f32 %v15945_v54, %v9564_v55  ;;  %11820 = vmatpush3.bf16.msra.mxu0 %v16057_v0  ;;  %v12251_v45 = vld [vmem:[%s12864_s2 + $0x60] sm:$0xff]   ;;  %v16070_v21 = vld [vmem:[%s12864_s2 + $0xe8] sm:$0xff]  }
 0x89c   : > { %v12456_v1 = vpop.eup %12455  ;;  %v12253_v55 = vld [vmem:[%s12864_s2 + $0x20] sm:$0xff]   ;;  %v16075_v58 = vld [vmem:[%s12864_s2 + $0xa8] sm:$0xff]  }
 0x89d   : > { %v9537_v34 = vadd.f32 1e-05, %v9505_v30  ;;  %v9565_v53 = vmul.f32 %v12456_v1, %v9517_v26  ;;  %9909 = vmatmul.mubr.bf16.gmra.mxu1 %v9618_v2  ;;  %10022 = vmatmul.mubr.bf16.gmra.mxu0 %v9618_v2  ;;  %v9608_v15 = vadd.f32 %v15954_v13, %v9586_v25  ;;  %v16079_v37 = vld [vmem:[%s12864_s2 + $0xe0] sm:$0xff]   ;;  %v12257_v30 = vld [vmem:[%s12864_s2 + $0x58] sm:$0xff]   ;;  %v16097_v25 = vld [vmem:[%s12864_s2 + $0xd0] sm:$0xff]  }
 0x89e   : > { %9918 = vmatprep.mubr.bf16.mxu1 %v17175_v9  ;;  %10031 = vmatprep.mubr.bf16.mxu0 %v17175_v9  ;;  %v16083_v26 = vld [vmem:[%s12864_s2 + $0xa0] sm:$0xff]   ;;  %v16089_v1 = vld [vmem:[%s12864_s2 + $0xd8] sm:$0xff]  }
 0x89f   : > { %12463 = vrsqrt.f32 %v9537_v34  ;;  %v9587_v35 = vmul.f32 %v15945_v54, %v9565_v53  ;;  %v12259_v2 = vld [vmem:[%s12864_s2 + $0x18] sm:$0xff]   ;;  %v12261_v53 = vld [vmem:[%s12864_s2 + $0x50] sm:$0xff]  }
 0x8a0   : > { %v12458_v44 = vpop.eup %12457  ;;  %v16093_v34 = vld [vmem:[%s12864_s2 + $0x98] sm:$0xff]  }
 0x8a1   : > { %v9609_v17 = vadd.f32 %v15954_v13, %v9587_v35  ;;  %v9566_v19 = vmul.f32 %v12458_v44, %v9518_v41  ;;  %v12263_v41 = vld [vmem:[%s12864_s2 + $0x10] sm:$0xff]   ;;  %v12265_v44 = vld [vmem:[%s12864_s2 + $0x48] sm:$0xff]  }
 0x8a2   : > { %v16103_v35 = vld [vmem:[%s12864_s2 + $0x90] sm:$0xff]  }
 0x8a3   : > { %v9619_v8 = vpack.c.bf16 %v9609_v17, %v9608_v15  ;;  %v9588_v52 = vmul.f32 %v15945_v54, %v9566_v19  ;;  %v16109_v15 = vld [vmem:[%s12864_s2 + $0xc8] sm:$0xff]  }
 0x8a4   : > { %v12460_v38 = vpop.eup %12459  ;;  %v12267_v17 = vld [vmem:[%s12864_s2 + $0x8] sm:$0xff]  }
 0x8a5   : > { %v9567_v16 = vmul.f32 %v12460_v38, %v9519_v22  ;;  %9919 = vmatmul.mubr.bf16.gmra.mxu1 %v9619_v8  ;;  %10032 = vmatmul.mubr.bf16.gmra.mxu0 %v9619_v8  ;;  %v9610_v40 = vadd.f32 %v15954_v13, %v9588_v52  ;;  %v16113_v19 = vld [vmem:[%s12864_s2 + $0x88] sm:$0xff]   ;;  %v12269_v22 = vld [vmem:[%s12864_s2 + $0x40] sm:$0xff]  }
 0x8a6   : > { %9928 = vmatprep.mubr.bf16.mxu1 %v17175_v9  ;;  %10041 = vmatprep.mubr.bf16.mxu0 %v17175_v9  ;;  %v16117_v8 = vld [vmem:[%s12864_s2 + $0xc0] sm:$0xff]  }
 0x8a7   : > { %v9589_v61 = vmul.f32 %v15945_v54, %v9567_v16  ;;  %v12271_v38 = vld [vmem:[%s12864_s2] sm:$0xff]  }
 0x8a8   : > { %v12462_v60 = vpop.eup %12461  ;;  %v16123_v16 = vld [vmem:[%s12864_s2 + $0x80] sm:$0xff]  }
 0x8a9   : > { %v9611_v56 = vadd.f32 %v15954_v13, %v9589_v61  ;;  %v9568_v63 = vmul.f32 %v12462_v60, %v9520_v29  ;;  %v9654_v52 = vld [vmem:[%s12859_s24] sm:$0xf]  ;;  %v17181_v29 = vld [vmem:[#allocation9_spill] sm:$0xff] }
 0x8aa   : > { %v9670_v61 = vsub.s32 3, %v17181_v29 }
 0x8ab   : > { %v9620_v3 = vpack.c.bf16 %v9611_v56, %v9610_v40  ;;  %v9590_v12 = vmul.f32 %v15945_v54, %v9568_v63  ;;  %v17182_v56 = vsub.s32 0, %v17181_v29 }
 0x8ac   : > { %v12464_v11 = vpop.eup %12463 }
 0x8ad   : > { %v9569_v18 = vmul.f32 %v12464_v11, %v9521_v42  ;;  %9929 = vmatmul.mubr.bf16.gmra.mxu1 %v9620_v3  ;;  %10042 = vmatmul.mubr.bf16.gmra.mxu0 %v9620_v3  ;;  %v9612_v23 = vadd.f32 %v15954_v13, %v9590_v12  ;;  %v16131_v63 = vrot.slane %v9654_v52, %v17182_v56  ;;  %v17183_v42 = vsub.s32 2, %v17181_v29 }
 0x8ae   : > { %9938 = vmatprep.mubr.bf16.mxu1 %v17175_v9  ;;  %10051 = vmatprep.mubr.bf16.mxu0 %v17175_v9  ;;  %v12244_v9 = vld [vmem:[%s12864_s2 + $0x30] sm:$0xff]   ;;  %v17184_v11 = vsub.s32 1, %v17181_v29 }
 0x8af   : > { %v9591_v14 = vmul.f32 %v15945_v54, %v9569_v18  ;;  %v12245_v54 = vld [vmem:[%s12864_s2 + $0x68] sm:$0xff]   ;;  %11758 = vmatpush3.bf16.msra.mxu1 %v12244_v9  ;;  %v16135_v3 = vrot.slane %v9654_v52, %v17183_v42 }
 0x8b0   : > { %11759 = vmatprep.subr.bf16.mxu1 %v12245_v54  ;;  %v16139_v18 = vrot.slane %v9654_v52, %v17184_v11 }
 0x8b1   : > { %v9613_v46 = vadd.f32 %v15954_v13, %v9591_v14  ;;  %v16060_v13 = vld [vmem:[%s12864_s2 + $0xf0] sm:$0xff]   ;;  %v16141_v14 = vrot.slane %v9654_v52, %v9670_v61 }
 0x8b2   : > { %11821 = vmatprep.subr.bf16.mxu0 %v16060_v13 }
 0x8b3   : > { %v9621_v31 = vpack.c.bf16 %v9613_v46, %v9612_v23  ;;  %11760 = vmatpush3.bf16.msra.mxu1 %v12247_v62  ;;  %11822 = vmatpush3.bf16.msra.mxu0 %v16065_v36 }
 0x8b4   : > { %11761 = vmatprep.subr.bf16.mxu1 %v12251_v45  ;;  %11823 = vmatprep.subr.bf16.mxu0 %v16070_v21 }
 0x8b5   : > { %9939 = vmatmul.mubr.bf16.gmra.mxu1 %v9621_v31  ;;  %10052 = vmatmul.mubr.bf16.gmra.mxu0 %v9621_v31 }
 0x8b7   : > { %11762 = vmatpush3.bf16.msra.mxu1 %v12253_v55  ;;  %11824 = vmatpush3.bf16.msra.mxu0 %v16075_v58 }
 0x8b8   : > { %11825 = vmatprep.subr.bf16.mxu0 %v16079_v37  ;;  %11763 = vmatprep.subr.bf16.mxu1 %v12257_v30 }
 0x8bb   : > { %11826 = vmatpush3.bf16.msra.mxu0 %v16083_v26  ;;  %11764 = vmatpush3.bf16.msra.mxu1 %v12259_v2 }
 0x8bc   : > { %11827 = vmatprep.subr.bf16.mxu0 %v16089_v1  ;;  %11765 = vmatprep.subr.bf16.mxu1 %v12261_v53 }
 0x8bf   : > { %11828 = vmatpush3.bf16.msra.mxu0 %v16093_v34  ;;  %11766 = vmatpush3.bf16.msra.mxu1 %v12263_v41 }
 0x8c0   : > { %11829 = vmatprep.subr.bf16.mxu0 %v16097_v25  ;;  %11767 = vmatprep.subr.bf16.mxu1 %v12265_v44 }
 0x8c3   : > { %11830 = vmatpush3.bf16.msra.mxu0 %v16103_v35  ;;  %11768 = vmatpush3.bf16.msra.mxu1 %v12267_v17 }
 0x8c4   : > { %11831 = vmatprep.subr.bf16.mxu0 %v16109_v15  ;;  %11769 = vmatprep.subr.bf16.mxu1 %v12269_v22 }
 0x8c7   : > { %11832 = vmatpush3.bf16.msra.mxu0 %v16113_v19  ;;  %11770 = vmatpush3.bf16.msra.mxu1 %v12271_v38 }
 0x8c8   : > { %11833 = vmatprep.subr.bf16.mxu0 %v16117_v8  ;;  %12075 = vmatprep.subr.bf16.mxu1 %v12246_v48 }
 0x8cb   : > { %11834 = vmatpush3.bf16.msra.mxu0 %v16123_v16 }
 0x913   : > { %v9870_v60 = vpop.f32.mrf.mxu1  ;;  %v9983_v40 = vpop.f32.mrf.mxu0 }
 0x914   : > { %v9871_v32 = vadd.f32 %v9870_v60, %v16131_v63  ;;  %v9984_v51 = vadd.f32 %v9983_v40, %v16135_v3 }
 0x915   : > { %v9872_v12 = vpop.f32.mrf.mxu1  ;;  %v9985_v23 = vpop.f32.mrf.mxu0 }
 0x916   : > { %v9873_v54 = vadd.f32 %v9872_v12, %v16139_v18  ;;  %v9986_v48 = vadd.f32 %v9985_v23, %v16141_v14 }
 0x917   : > { %v9874_v46 = vpop.f32.mrf.mxu1  ;;  %v9987_v31 = vpop.f32.mrf.mxu0 }
 0x918   : > { %v9875_v49 = vadd.f32 %v9874_v46, %v16131_v63  ;;  %v9988_v9 = vadd.f32 %v9987_v31, %v16135_v3 }
 0x919   : > { %v9876_v62 = vpop.f32.mrf.mxu1  ;;  %v9989_v45 = vpop.f32.mrf.mxu0 }
 0x91a   : > { %v16149_v55 = vpack.c.bf16 %v9875_v49, %v9871_v32  ;;  %v16151_v30 = vpack.c.bf16 %v9988_v9, %v9984_v51  ;;  %v9877_v2 = vadd.f32 %v9876_v62, %v16139_v18  ;;  %v9990_v53 = vadd.f32 %v9989_v45, %v16141_v14 }
 0x91b   : > { %v9880_v41 = vpop.f32.mrf.mxu1  ;;  %v9993_v44 = vpop.f32.mrf.mxu0 }
 0x91c   : > { %v11584_v17 = vmul.bf16 3218784218, %v16149_v55  ;;  %v11586_v22 = vmul.bf16 3218784218, %v16151_v30  ;;  %v16157_v38 = vpack.c.bf16 %v9877_v2, %v9873_v54  ;;  %v16159_v52 = vpack.c.bf16 %v9990_v53, %v9986_v48 }
 0x91d   : > { %v9882_v29 = vpop.f32.mrf.mxu1  ;;  %v9995_v61 = vpop.f32.mrf.mxu0  ;;  %v9881_v11 = vadd.f32 %v9880_v41, %v16131_v63  ;;  %v9994_v12 = vadd.f32 %v9993_v44, %v16135_v3 }
 0x91e   : > { %v10159_v60 = vmul.bf16 1069105081, %v11584_v17  ;;  %v10165_v40 = vmul.bf16 1069105081, %v11586_v22  ;;  %v11585_v56 = vmul.bf16 3218784218, %v16157_v38  ;;  %v9883_v9 = vadd.f32 %v9882_v29, %v16139_v18 }
 0x91f   : > { %v11587_v42 = vmul.bf16 3218784218, %v16159_v52  ;;  %v9884_v23 = vpop.f32.mrf.mxu1  ;;  %v9997_v46 = vpop.f32.mrf.mxu0  ;;  %v9996_v53 = vadd.f32 %v9995_v61, %v16141_v14 }
 0x920   : > { %12465 = vpow.bf16 %v10159_v60  ;;  %v10162_v31 = vmul.bf16 1069105081, %v11585_v56  ;;  %v9885_v32 = vadd.f32 %v9884_v23, %v16131_v63  ;;  %v9998_v51 = vadd.f32 %v9997_v46, %v16135_v3 }
 0x921   : > { %12467 = vpow.bf16 %v10165_v40  ;;  %v10168_v49 = vmul.bf16 1069105081, %v11587_v42  ;;  %v9886_v54 = vpop.f32.mrf.mxu1  ;;  %v9999_v48 = vpop.f32.mrf.mxu0 }
 0x922   : > { %12469 = vpow.bf16 %v10162_v31  ;;  %v16168_v62 = vpack.c.bf16 %v9885_v32, %v9881_v11  ;;  %v16170_v45 = vpack.c.bf16 %v9998_v51, %v9994_v12  ;;  %v9887_v2 = vadd.f32 %v9886_v54, %v16139_v18 }
 0x923   : > { %12471 = vpow.bf16 %v10168_v49  ;;  %v10000_v41 = vadd.f32 %v9999_v48, %v16141_v14 }
 0x924   : > { %v11588_v44 = vmul.bf16 3218784218, %v16168_v62  ;;  %v11590_v17 = vmul.bf16 3218784218, %v16170_v45  ;;  %v16177_v22 = vpack.c.bf16 %v9887_v2, %v9883_v9 }
 0x925   : > { %v16179_v29 = vpack.c.bf16 %v10000_v41, %v9996_v53 }
 0x926   : > { %v10171_v60 = vmul.bf16 1069105081, %v11588_v44  ;;  %v10177_v40 = vmul.bf16 1069105081, %v11590_v17  ;;  %v11589_v56 = vmul.bf16 3218784218, %v16177_v22 }
 0x927   : > { %v11591_v42 = vmul.bf16 3218784218, %v16179_v29 }
 0x928   : > { %12473 = vpow.bf16 %v10171_v60  ;;  %v10174_v11 = vmul.bf16 1069105081, %v11589_v56 }
 0x929   : > { %12475 = vpow.bf16 %v10177_v40  ;;  %v10180_v61 = vmul.bf16 1069105081, %v11591_v42 }
 0x92a   : > { %12477 = vpow.bf16 %v10174_v11 }
 0x92b   : > { %12479 = vpow.bf16 %v10180_v61 }
 0x92e   : > { %v12466_v12 = vpop.eup %12465 }
 0x92f   : > { %v12468_v23 = vpop.eup %12467  ;;  %v10254_v46 = vadd.bf16 1065369472, %v12466_v12 }
 0x930   : > { %v12470_v31 = vpop.eup %12469  ;;  %v10256_v32 = vadd.bf16 1065369472, %v12468_v23 }
 0x931   : > { %v12472_v51 = vpop.eup %12471  ;;  %12481 = vrcp.bf16 %v10254_v46  ;;  %v10255_v49 = vadd.bf16 1065369472, %v12470_v31 }
 0x932   : > { %12483 = vrcp.bf16 %v10256_v32  ;;  %v10257_v9 = vadd.bf16 1065369472, %v12472_v51 }
 0x933   : > { %12485 = vrcp.bf16 %v10255_v49 }
 0x934   : > { %12487 = vrcp.bf16 %v10257_v9 }
 0x936   : > { %v12474_v54 = vpop.eup %12473 }
 0x937   : > { %v12476_v48 = vpop.eup %12475  ;;  %v10258_v2 = vadd.bf16 1065369472, %v12474_v54 }
 0x938   : > { %v12478_v53 = vpop.eup %12477  ;;  %v10260_v41 = vadd.bf16 1065369472, %v12476_v48 }
 0x939   : > { %v12480_v44 = vpop.eup %12479  ;;  %v10259_v17 = vadd.bf16 1065369472, %v12478_v53  ;;  %12489 = vrcp.bf16 %v10258_v2 }
 0x93a   : > { %12491 = vrcp.bf16 %v10260_v41  ;;  %v10261_v60 = vadd.bf16 1065369472, %v12480_v44 }
 0x93b   : > { %12493 = vrcp.bf16 %v10259_v17 }
 0x93c   : > { %12495 = vrcp.bf16 %v10261_v60 }
 0x93f   : > { %v12482_v40 = vpop.eup %12481 }
 0x940   : > { %v12484_v56 = vpop.eup %12483  ;;  %v10287_v11 = vmul.bf16 1065369472, %v12482_v40 }
 0x941   : > { %v12486_v42 = vpop.eup %12485  ;;  %v10291_v12 = vmul.bf16 1065369472, %v12484_v56 }
 0x942   : > { %v12488_v61 = vpop.eup %12487  ;;  %v10289_v23 = vmul.bf16 1065369472, %v12486_v42  ;;  %v10350_v49 = vmul.bf16 %v10287_v11, %v16149_v55 }
 0x943   : > { %v10293_v46 = vmul.bf16 1065369472, %v12488_v61  ;;  %v10352_v54 = vmul.bf16 %v10291_v12, %v16151_v30 }
 0x944   : > { %v10351_v51 = vmul.bf16 %v10289_v23, %v16157_v38 }
 0x945   : > { %v10353_v9 = vmul.bf16 %v10293_v46, %v16159_v52 }
 0x946   : > { %v9890_v31 = vpop.f32.mrf.mxu1  ;;  %v10003_v32 = vpop.f32.mrf.mxu0  ;;  %10677 = vmatprep.mubr.bf16.mxu1 %v10351_v51 }
 0x947   : > { %v12490_v53 = vpop.eup %12489  ;;  %10774 = vmatprep.mubr.bf16.mxu0 %v10353_v9  ;;  %10678 = vmatmul.mubr.bf16.vlgmr.msra.gmra.mxu1 %v10350_v49  ;;  %v9891_v44 = vadd.f32 %v9890_v31, %v16131_v63  ;;  %v10004_v55 = vadd.f32 %v10003_v32, %v16135_v3 }
 0x948   : > { %v9892_v48 = vpop.f32.mrf.mxu1  ;;  %v10005_v2 = vpop.f32.mrf.mxu0  ;;  %10775 = vmatmul.mubr.bf16.vlgmr.msra.gmra.mxu0 %v10352_v54  ;;  %12083 = vmatpush3.bf16.msra.mxu1 %v16057_v0  ;;  %v10295_v40 = vmul.bf16 1065369472, %v12490_v53 }
 0x949   : > { %v12492_v41 = vpop.eup %12491  ;;  %12076 = vmatprep.subr.bf16.mxu1 %v16060_v13  ;;  %v9893_v42 = vadd.f32 %v9892_v48, %v16139_v18  ;;  %v10006_v32 = vadd.f32 %v10005_v2, %v16141_v14 }
 0x94a   : > { %v9894_v17 = vpop.f32.mrf.mxu1  ;;  %v10007_v60 = vpop.f32.mrf.mxu0  ;;  %v10299_v23 = vmul.bf16 1065369472, %v12492_v41 }
 0x94b   : > { %v12494_v38 = vpop.eup %12493  ;;  %v9895_v52 = vadd.f32 %v9894_v17, %v16131_v63  ;;  %v10008_v30 = vadd.f32 %v10007_v60, %v16135_v3 }
 0x94c   : > { %v12496_v56 = vpop.eup %12495  ;;  %v9896_v11 = vpop.f32.mrf.mxu1  ;;  %v10297_v12 = vmul.bf16 1065369472, %v12494_v38  ;;  %12084 = vmatpush3.bf16.msra.mxu1 %v16065_v36  ;;  %v10356_v38 = vmul.bf16 %v10299_v23, %v16170_v45 }
 0x94d   : > { %v10009_v61 = vpop.f32.mrf.mxu0  ;;  %v16194_v46 = vpack.c.bf16 %v9895_v52, %v9891_v44  ;;  %v16196_v0 = vpack.c.bf16 %v10008_v30, %v10004_v55  ;;  %v9897_v31 = vadd.f32 %v9896_v11, %v16139_v18  ;;  %v10301_v54 = vmul.bf16 1065369472, %v12496_v56  ;;  %12077 = vmatprep.subr.bf16.mxu1 %v16070_v21 }
 0x94e   : > { %v10010_v51 = vadd.f32 %v10009_v61, %v16141_v14  ;;  %v9900_v49 = vpop.f32.mrf.mxu1  ;;  %v10355_v13 = vmul.bf16 %v10297_v12, %v16177_v22  ;;  %v10354_v44 = vmul.bf16 %v10295_v40, %v16168_v62 }
 0x94f   : > { %v10013_v9 = vpop.f32.mrf.mxu0  ;;  %v11592_v48 = vmul.bf16 3218784218, %v16194_v46  ;;  %v11594_v53 = vmul.bf16 3218784218, %v16196_v0  ;;  %v16205_v41 = vpack.c.bf16 %v9897_v31, %v9893_v42  ;;  %v10357_v22 = vmul.bf16 %v10301_v54, %v16179_v29 }
 0x950   : > { %v16209_v2 = vpack.c.bf16 %v10010_v51, %v10006_v32  ;;  %v9902_v17 = vpop.f32.mrf.mxu1  ;;  %10685 = vmatprep.mubr.bf16.mxu1 %v10355_v13  ;;  %12085 = vmatpush3.bf16.msra.mxu1 %v16075_v58  ;;  %v10014_v40 = vadd.f32 %v10013_v9, %v16135_v3 }
 0x951   : > { %v10015_v60 = vpop.f32.mrf.mxu0  ;;  %v10183_v36 = vmul.bf16 1069105081, %v11592_v48  ;;  %v10189_v55 = vmul.bf16 1069105081, %v11594_v53  ;;  %v11593_v52 = vmul.bf16 3218784218, %v16205_v41  ;;  %10686 = vmatmul.mubr.bf16.gmra.mxu1 %v10354_v44  ;;  %10782 = vmatprep.mubr.bf16.mxu0 %v10357_v22  ;;  %v9903_v61 = vadd.f32 %v9902_v17, %v16139_v18 }
 0x952   : > { %v11595_v30 = vmul.bf16 3218784218, %v16209_v2  ;;  %v9904_v56 = vpop.f32.mrf.mxu1  ;;  %10783 = vmatmul.mubr.bf16.gmra.mxu0 %v10356_v38  ;;  %12078 = vmatprep.subr.bf16.mxu1 %v16079_v37  ;;  %v10016_v23 = vadd.f32 %v10015_v60, %v16141_v14  ;;  %v9901_v48 = vadd.f32 %v9900_v49, %v16131_v63 }
 0x953   : > { %v10017_v62 = vpop.f32.mrf.mxu0  ;;  %12497 = vpow.bf16 %v10183_v36  ;;  %v10186_v21 = vmul.bf16 1069105081, %v11593_v52  ;;  %v9905_v51 = vadd.f32 %v9904_v56, %v16131_v63 }
 0x954   : > { %v10018_v29 = vadd.f32 %v10017_v62, %v16135_v3  ;;  %12499 = vpow.bf16 %v10189_v55  ;;  %v10192_v45 = vmul.bf16 1069105081, %v11595_v30  ;;  %v9906_v42 = vpop.f32.mrf.mxu1  ;;  %12086 = vmatpush3.bf16.msra.mxu1 %v16083_v26 }
 0x955   : > { %v10019_v11 = vpop.f32.mrf.mxu0  ;;  %12501 = vpow.bf16 %v10186_v21  ;;  %v9907_v58 = vadd.f32 %v9906_v42, %v16139_v18  ;;  %12079 = vmatprep.subr.bf16.mxu1 %v16089_v1  ;;  %v16238_v44 = vpack.c.bf16 %v9905_v51, %v9901_v48 }
 0x956   : > { %v16220_v12 = vpack.c.bf16 %v10018_v29, %v10014_v40  ;;  %12503 = vpow.bf16 %v10192_v45  ;;  %v10020_v31 = vadd.f32 %v10019_v11, %v16141_v14 }
 0x957   : > { %v16227_v32 = vpack.c.bf16 %v9907_v58, %v9903_v61  ;;  %v11596_v49 = vmul.bf16 3218784218, %v16238_v44 }
 0x958   : > { %v11598_v37 = vmul.bf16 3218784218, %v16220_v12  ;;  %v16231_v9 = vpack.c.bf16 %v10020_v31, %v10016_v23  ;;  %12087 = vmatpush3.bf16.msra.mxu1 %v16093_v34 }
 0x959   : > { %v11597_v54 = vmul.bf16 3218784218, %v16227_v32  ;;  %12080 = vmatprep.subr.bf16.mxu1 %v16097_v25  ;;  %v10195_v29 = vmul.bf16 1069105081, %v11596_v49 }
 0x95a   : > { %v10201_v13 = vmul.bf16 1069105081, %v11598_v37  ;;  %v11599_v53 = vmul.bf16 3218784218, %v16231_v9 }
 0x95b   : > { %v10198_v26 = vmul.bf16 1069105081, %v11597_v54 }
 0x95c   : > { %12505 = vpow.bf16 %v10201_v13  ;;  %v10204_v1 = vmul.bf16 1069105081, %v11599_v53  ;;  %12088 = vmatpush3.bf16.msra.mxu1 %v16103_v35 }
 0x95d   : > { %12507 = vpow.bf16 %v10198_v26  ;;  %v9910_v17 = vpop.f32.mrf.mxu1  ;;  %v10023_v60 = vpop.f32.mrf.mxu0  ;;  %12081 = vmatprep.subr.bf16.mxu1 %v16109_v15 }
 0x95e   : > { %12509 = vpow.bf16 %v10204_v1  ;;  %v9911_v56 = vadd.f32 %v9910_v17, %v16131_v63  ;;  %v10024_v62 = vadd.f32 %v10023_v60, %v16135_v3 }
 0x95f   : > { %v9912_v22 = vpop.f32.mrf.mxu1  ;;  %v10025_v38 = vpop.f32.mrf.mxu0 }
 0x960   : > { %12089 = vmatpush3.bf16.msra.mxu1 %v16113_v19  ;;  %v9913_v45 = vadd.f32 %v9912_v22, %v16139_v18  ;;  %v10026_v61 = vadd.f32 %v10025_v38, %v16141_v14 }
 0x961   : > { %v12498_v34 = vpop.eup %12497  ;;  %v9914_v25 = vpop.f32.mrf.mxu1  ;;  %12082 = vmatprep.subr.bf16.mxu1 %v16117_v8 }
 0x962   : > { %v12500_v36 = vpop.eup %12499  ;;  %v10262_v55 = vadd.bf16 1065369472, %v12498_v34  ;;  %v10027_v52 = vpop.f32.mrf.mxu0  ;;  %v9915_v35 = vadd.f32 %v9914_v25, %v16131_v63 }
 0x963   : > { %v12502_v30 = vpop.eup %12501  ;;  %v10028_v15 = vadd.f32 %v10027_v52, %v16135_v3  ;;  %v9916_v42 = vpop.f32.mrf.mxu1  ;;  %v10264_v19 = vadd.bf16 1065369472, %v12500_v36 }
 0x964   : > { %v12504_v21 = vpop.eup %12503  ;;  %v10263_v40 = vadd.bf16 1065369472, %v12502_v30  ;;  %v10029_v11 = vpop.f32.mrf.mxu0  ;;  %12511 = vrcp.bf16 %v10262_v55  ;;  %v16251_v58 = vpack.c.bf16 %v9915_v35, %v9911_v56  ;;  %v9917_v37 = vadd.f32 %v9916_v42, %v16139_v18  ;;  %12090 = vmatpush3.bf16.msra.mxu1 %v16123_v16 }
 0x965   : > { %v16253_v23 = vpack.c.bf16 %v10028_v15, %v10024_v62  ;;  %v10265_v31 = vadd.bf16 1065369472, %v12504_v21  ;;  %v10030_v8 = vadd.f32 %v10029_v11, %v16141_v14  ;;  %v9920_v51 = vpop.f32.mrf.mxu1 }
 0x966   : > { %v10033_v13 = vpop.f32.mrf.mxu0  ;;  %12513 = vrcp.bf16 %v10263_v40  ;;  %v11600_v54 = vmul.bf16 3218784218, %v16251_v58  ;;  %v16260_v53 = vpack.c.bf16 %v9917_v37, %v9913_v45  ;;  %v9921_v38 = vadd.f32 %v9920_v51, %v16131_v63 }
 0x967   : > { %v11602_v48 = vmul.bf16 3218784218, %v16253_v23  ;;  %12515 = vpow.bf16 %v10195_v29  ;;  %v16262_v26 = vpack.c.bf16 %v10030_v8, %v10026_v61  ;;  %v9922_v1 = vpop.f32.mrf.mxu1  ;;  %v10034_v16 = vadd.f32 %v10033_v13, %v16135_v3 }
 0x968   : > { %v10035_v17 = vpop.f32.mrf.mxu0  ;;  %12517 = vrcp.bf16 %v10264_v19  ;;  %v10207_v60 = vmul.bf16 1069105081, %v11600_v54  ;;  %v11601_v22 = vmul.bf16 3218784218, %v16260_v53  ;;  %v9923_v21 = vadd.f32 %v9922_v1, %v16139_v18 }
 0x969   : > { %v9924_v34 = vpop.f32.mrf.mxu1  ;;  %12519 = vrcp.bf16 %v10265_v31  ;;  %v10213_v25 = vmul.bf16 1069105081, %v11602_v48  ;;  %v11603_v52 = vmul.bf16 3218784218, %v16262_v26  ;;  %v10036_v40 = vadd.f32 %v10035_v17, %v16141_v14 }
 0x96a   : > { %v12506_v49 = vpop.eup %12505  ;;  %v10037_v36 = vpop.f32.mrf.mxu0  ;;  %v9925_v30 = vadd.f32 %v9924_v34, %v16131_v63  ;;  %v10210_v15 = vmul.bf16 1069105081, %v11601_v22  ;;  %12521 = vpow.bf16 %v10207_v60 }
 0x96b   : > { %v12508_v55 = vpop.eup %12507  ;;  %v10038_v56 = vadd.f32 %v10037_v36, %v16135_v3  ;;  %v9926_v29 = vpop.f32.mrf.mxu1  ;;  %v10268_v42 = vadd.bf16 1065369472, %v12506_v49  ;;  %v10216_v13 = vmul.bf16 1069105081, %v11603_v52 }
 0x96c   : > { %v12510_v62 = vpop.eup %12509  ;;  %v10267_v35 = vadd.bf16 1065369472, %v12508_v55  ;;  %v10039_v45 = vpop.f32.mrf.mxu0  ;;  %v16272_v11 = vpack.c.bf16 %v9925_v30, %v9921_v38  ;;  %12523 = vpow.bf16 %v10210_v15  ;;  %v9927_v31 = vadd.f32 %v9926_v29, %v16139_v18 }
 0x96d   : > { %v16274_v19 = vpack.c.bf16 %v10038_v56, %v10034_v16  ;;  %v10269_v61 = vadd.bf16 1065369472, %v12510_v62  ;;  %v10040_v37 = vadd.f32 %v10039_v45, %v16141_v14  ;;  %v9930_v8 = vpop.f32.mrf.mxu1  ;;  %12525 = vpow.bf16 %v10213_v25 }
 0x96e   : > { %v16278_v51 = vpop.f32.mrf.mxu0  ;;  %v11604_v54 = vmul.bf16 3218784218, %v16272_v11  ;;  %v16282_v1 = vpack.c.bf16 %v9927_v31, %v9923_v21  ;;  %12527 = vrcp.bf16 %v10267_v35  ;;  %v9931_v52 = vadd.f32 %v9930_v8, %v16131_v63 }
 0x96f   : > { %v11606_v48 = vmul.bf16 3218784218, %v16274_v19  ;;  %v16284_v17 = vpack.c.bf16 %v10040_v37, %v10036_v40  ;;  %v9932_v60 = vpop.f32.mrf.mxu1  ;;  %12529 = vrcp.bf16 %v10268_v42 }
 0x970   : > { %v10045_v49 = vpop.f32.mrf.mxu0  ;;  %v11605_v16 = vmul.bf16 3218784218, %v16282_v1  ;;  %12531 = vrcp.bf16 %v10269_v61  ;;  %v10219_v25 = vmul.bf16 1069105081, %v11604_v54  ;;  %v9933_v35 = vadd.f32 %v9932_v60, %v16139_v18 }
 0x971   : > { %v10225_v22 = vmul.bf16 1069105081, %v11606_v48  ;;  %v11607_v34 = vmul.bf16 3218784218, %v16284_v17  ;;  %v9934_v36 = vpop.f32.mrf.mxu1  ;;  %12533 = vpow.bf16 %v10216_v13  ;;  %v10046_v48 = vadd.f32 %v10045_v49, %v16141_v14 }
 0x972   : > { %v12512_v38 = vpop.eup %12511  ;;  %v10047_v55 = vpop.f32.mrf.mxu0  ;;  %v9935_v30 = vadd.f32 %v9934_v36, %v16131_v63  ;;  %v10222_v62 = vmul.bf16 1069105081, %v11605_v16 }
 0x973   : > { %v10228_v15 = vmul.bf16 1069105081, %v11607_v34  ;;  %v9936_v21 = vpop.f32.mrf.mxu1  ;;  %v10303_v29 = vmul.bf16 1065369472, %v12512_v38  ;;  %12535 = vpow.bf16 %v10225_v22 }
 0x974   : > { %v12514_v56 = vpop.eup %12513  ;;  %v10049_v40 = vpop.f32.mrf.mxu0  ;;  %v16291_v45 = vpack.c.bf16 %v9935_v30, %v9931_v52  ;;  %v9937_v42 = vadd.f32 %v9936_v21, %v16139_v18  ;;  %12537 = vpow.bf16 %v10222_v62 }
 0x975   : > { %v10050_v61 = vadd.f32 %v10049_v40, %v16141_v14  ;;  %v12516_v31 = vpop.eup %12515  ;;  %v9940_v37 = vpop.f32.mrf.mxu1  ;;  %v10305_v13 = vmul.bf16 1065369472, %v12514_v56  ;;  %12539 = vpow.bf16 %v10228_v15  ;;  %v10358_v56 = vmul.bf16 %v10303_v29, %v16194_v46 }
 0x976   : > { %v16295_v8 = vpop.f32.mrf.mxu0  ;;  %v12518_v54 = vpop.eup %12517  ;;  %v11608_v60 = vmul.bf16 3218784218, %v16291_v45  ;;  %v16299_v38 = vpack.c.bf16 %v9937_v42, %v9933_v35  ;;  %12541 = vpow.bf16 %v10219_v25  ;;  %v9941_v25 = vadd.f32 %v9940_v37, %v16131_v63 }
 0x977   : > { %v12520_v22 = vpop.eup %12519  ;;  %v9942_v16 = vpop.f32.mrf.mxu1  ;;  %v10359_v36 = vmul.bf16 %v10305_v13, %v16205_v41  ;;  %v16303_v30 = vpack.c.bf16 %v10050_v61, %v10046_v48  ;;  %v10307_v62 = vmul.bf16 1065369472, %v12518_v54  ;;  %v10266_v13 = vadd.bf16 1065369472, %v12516_v31 }
 0x978   : > { %v10055_v34 = vpop.f32.mrf.mxu0  ;;  %v11609_v52 = vmul.bf16 3218784218, %v16299_v38  ;;  %v16308_v49 = vpop.eup %12521  ;;  %v10231_v35 = vmul.bf16 1069105081, %v11608_v60  ;;  %v10309_v48 = vmul.bf16 1065369472, %v12520_v22  ;;  %v9943_v29 = vadd.f32 %v9942_v16, %v16139_v18 }
 0x979   : > { %v9944_v15 = vpop.f32.mrf.mxu1  ;;  %10693 = vmatprep.mubr.bf16.mxu1 %v10359_v36  ;;  %v11611_v46 = vmul.bf16 3218784218, %v16303_v30  ;;  %v10048_v37 = vadd.f32 %v10047_v55, %v16135_v3  ;;  %v10360_v31 = vmul.bf16 %v10307_v62, %v16196_v0  ;;  %v10044_v0 = vadd.f32 %v16278_v51, %v16135_v3 }
 0x97a   : > { %v16306_v21 = vpop.f32.mrf.mxu0  ;;  %v10234_v40 = vmul.bf16 1069105081, %v11609_v52  ;;  %v9945_v42 = vadd.f32 %v9944_v15, %v16131_v63  ;;  %10694 = vmatmul.mubr.bf16.gmra.mxu1 %v10358_v56  ;;  %v12524_v41 = vpop.eup %12523 }
 0x97b   : > { %v9946_v61 = vpop.f32.mrf.mxu1  ;;  %v12526_v39 = vpop.eup %12525  ;;  %v10271_v52 = vadd.bf16 1065369472, %v12524_v41  ;;  %v10240_v41 = vmul.bf16 1069105081, %v11611_v46 }
 0x97c   : > { %v16314_v54 = vpack.c.bf16 %v9945_v42, %v9941_v25  ;;  %v9947_v36 = vadd.f32 %v9946_v61, %v16139_v18  ;;  %v12528_v60 = vpop.eup %12527  ;;  %12543 = vpow.bf16 %v10234_v40  ;;  %v10059_v63 = vpop.f32.mrf.mxu0  ;;  %v10272_v16 = vadd.bf16 1065369472, %v12526_v39 }
 0x97d   : > { %v12530_v56 = vpop.eup %12529  ;;  %12545 = vpow.bf16 %v10231_v35  ;;  %v10361_v25 = vmul.bf16 %v10309_v48, %v16209_v2  ;;  %v10313_v42 = vmul.bf16 1065369472, %v12528_v60  ;;  %v10060_v40 = vadd.f32 %v10059_v63, %v16141_v14 }
 0x97e   : > { %v11612_v22 = vmul.bf16 3218784218, %v16314_v54  ;;  %v16320_v15 = vpack.c.bf16 %v9947_v36, %v9943_v29  ;;  %v12532_v33 = vpop.eup %12531  ;;  %12547 = vrcp.bf16 %v10266_v13  ;;  %v10056_v39 = vadd.f32 %v10055_v34, %v16141_v14 }
 0x97f   : > { %v12534_v18 = vpop.eup %12533  ;;  %v10317_v61 = vmul.bf16 1065369472, %v12532_v33  ;;  %10790 = vmatprep.mubr.bf16.mxu0 %v10361_v25  ;;  %v10363_v62 = vmul.bf16 %v10313_v42, %v16227_v32  ;;  %12549 = vrcp.bf16 %v10271_v52  ;;  %v16329_v29 = vpack.c.bf16 %v10048_v37, %v10044_v0 }
 0x980   : > { %v11613_v55 = vmul.bf16 3218784218, %v16320_v15  ;;  %v10243_v2 = vmul.bf16 1069105081, %v11612_v22  ;;  %10791 = vmatmul.mubr.bf16.gmra.mxu0 %v10360_v31  ;;  %12551 = vrcp.bf16 %v10272_v16  ;;  %v10273_v46 = vadd.bf16 1065369472, %v12534_v18 }
 0x981   : > { %v12536_v35 = vpop.eup %12535  ;;  %10701 = vmatprep.mubr.bf16.mxu1 %v10363_v62  ;;  %v10365_v33 = vmul.bf16 %v10317_v61, %v16231_v9  ;;  %v10315_v51 = vmul.bf16 1065369472, %v12530_v56  ;;  %v10270_v60 = vadd.bf16 1065369472, %v16308_v49  ;;  %12553 = vpow.bf16 %v10240_v41 }
 0x982   : > { %v10246_v48 = vmul.bf16 1069105081, %v11613_v55  ;;  %v12538_v13 = vpop.eup %12537  ;;  %v16333_v32 = vpack.c.bf16 %v10060_v40, %v10056_v39  ;;  %v10276_v63 = vadd.bf16 1065369472, %v12536_v35  ;;  %v11610_v37 = vmul.bf16 3218784218, %v16329_v29 }
 0x983   : > { %v12540_v36 = vpop.eup %12539  ;;  %v10275_v14 = vadd.bf16 1065369472, %v12538_v13  ;;  %10798 = vmatprep.mubr.bf16.mxu0 %v10365_v33  ;;  %v10058_v31 = vadd.f32 %v16306_v21, %v16135_v3  ;;  %v10364_v9 = vmul.bf16 %v10315_v51, %v16220_v12  ;;  %v10054_v22 = vadd.f32 %v16295_v8, %v16135_v3 }
 0x984   : > { %v12542_v52 = vpop.eup %12541  ;;  %12555 = vpow.bf16 %v10246_v48  ;;  %v10277_v34 = vadd.bf16 1065369472, %v12540_v36  ;;  %v11615_v49 = vmul.bf16 3218784218, %v16333_v32  ;;  %v10237_v25 = vmul.bf16 1069105081, %v11610_v37 }
 0x985   : > { %12557 = vpow.bf16 %v10243_v2  ;;  %v10274_v56 = vadd.bf16 1065369472, %v12542_v52  ;;  %v16342_v42 = vpack.c.bf16 %v10058_v31, %v10054_v22 }
 0x986   : > { %12559 = vrcp.bf16 %v10273_v46  ;;  %v10252_v41 = vmul.bf16 1069105081, %v11615_v49 }
 0x987   : > { %12561 = vrcp.bf16 %v10270_v60  ;;  %v11614_v61 = vmul.bf16 3218784218, %v16342_v42 }
 0x988   : > { %12563 = vrcp.bf16 %v10275_v14  ;;  %10799 = vmatmul.mubr.bf16.gmra.mxu0 %v10364_v9 }
 0x989   : > { %12565 = vrcp.bf16 %v10277_v34  ;;  %v10249_v48 = vmul.bf16 1069105081, %v11614_v61 }
 0x98a   : > { %v12544_v16 = vpop.eup %12543  ;;  %12567 = vrcp.bf16 %v10276_v63 }
 0x98b   : > { %v12546_v18 = vpop.eup %12545  ;;  %v10279_v21 = vadd.bf16 1065369472, %v12544_v16  ;;  %12569 = vrcp.bf16 %v10274_v56 }
 0x98c   : > { %v12548_v12 = vpop.eup %12547  ;;  %v10278_v3 = vadd.bf16 1065369472, %v12546_v18 }
 0x98d   : > { %v10311_v55 = vmul.bf16 1065369472, %v12548_v12  ;;  %12571 = vrcp.bf16 %v10279_v21  ;;  %v12550_v40 = vpop.eup %12549 }
 0x98e   : > { %12573 = vpow.bf16 %v10237_v25  ;;  %v10321_v0 = vmul.bf16 1065369472, %v12550_v40  ;;  %v12552_v62 = vpop.eup %12551 }
 0x98f   : > { %12575 = vpow.bf16 %v10252_v41  ;;  %v10362_v8 = vmul.bf16 %v10311_v55, %v16238_v44  ;;  %v12554_v35 = vpop.eup %12553  ;;  %v10323_v36 = vmul.bf16 1065369472, %v12552_v62 }
 0x990   : > { %v10367_v39 = vmul.bf16 %v10321_v0, %v16260_v53  ;;  %12577 = vrcp.bf16 %v10278_v3  ;;  %v10281_v9 = vadd.bf16 1065369472, %v12554_v35 }
 0x991   : > { %10702 = vmatmul.mubr.bf16.gmra.mxu1 %v10362_v8  ;;  %v10368_v31 = vmul.bf16 %v10323_v36, %v16253_v23 }
 0x992   : > { %v12556_v2 = vpop.eup %12555  ;;  %10709 = vmatprep.mubr.bf16.mxu1 %v10367_v39 }
 0x993   : > { %v12558_v13 = vpop.eup %12557  ;;  %v10283_v46 = vadd.bf16 1065369472, %v12556_v2 }
 0x994   : > { %v12560_v33 = vpop.eup %12559  ;;  %v10282_v34 = vadd.bf16 1065369472, %v12558_v13 }
 0x995   : > { %v12562_v51 = vpop.eup %12561  ;;  %v10325_v60 = vmul.bf16 1065369472, %v12560_v33  ;;  %12579 = vrcp.bf16 %v10283_v46 }
 0x996   : > { %v12564_v52 = vpop.eup %12563  ;;  %12581 = vpow.bf16 %v10249_v48  ;;  %v10319_v44 = vmul.bf16 1065369472, %v12562_v51 }
 0x997   : > { %v12566_v14 = vpop.eup %12565  ;;  %v10369_v63 = vmul.bf16 %v10325_v60, %v16262_v26  ;;  %v10329_v37 = vmul.bf16 1065369472, %v12564_v52  ;;  %12583 = vrcp.bf16 %v10282_v34 }
 0x998   : > { %v12568_v53 = vpop.eup %12567  ;;  %v10366_v56 = vmul.bf16 %v10319_v44, %v16251_v58  ;;  %v10333_v49 = vmul.bf16 1065369472, %v12566_v14  ;;  %12585 = vrcp.bf16 %v10281_v9 }
 0x999   : > { %v12570_v22 = vpop.eup %12569  ;;  %10806 = vmatprep.mubr.bf16.mxu0 %v10369_v63  ;;  %v10371_v16 = vmul.bf16 %v10329_v37, %v16282_v1  ;;  %v10331_v21 = vmul.bf16 1065369472, %v12568_v53 }
 0x99a   : > { %10710 = vmatmul.mubr.bf16.gmra.mxu1 %v10366_v56  ;;  %10807 = vmatmul.mubr.bf16.gmra.mxu0 %v10368_v31  ;;  %v10373_v25 = vmul.bf16 %v10333_v49, %v16284_v17  ;;  %v10327_v41 = vmul.bf16 1065369472, %v12570_v22 }
 0x99b   : > { %v12572_v18 = vpop.eup %12571  ;;  %10717 = vmatprep.mubr.bf16.mxu1 %v10371_v16  ;;  %v10372_v40 = vmul.bf16 %v10331_v21, %v16274_v19 }
 0x99c   : > { %v12574_v26 = vpop.eup %12573  ;;  %10814 = vmatprep.mubr.bf16.mxu0 %v10373_v25  ;;  %v10337_v23 = vmul.bf16 1065369472, %v12572_v18  ;;  %v10370_v61 = vmul.bf16 %v10327_v41, %v16272_v11 }
 0x99d   : > { %v12576_v12 = vpop.eup %12575  ;;  %v10280_v58 = vadd.bf16 1065369472, %v12574_v26 }
 0x99e   : > { %v10375_v55 = vmul.bf16 %v10337_v23, %v16299_v38  ;;  %v10285_v1 = vadd.bf16 1065369472, %v12576_v12  ;;  %v12578_v3 = vpop.eup %12577 }
 0x99f   : > { %12587 = vrcp.bf16 %v10280_v58  ;;  %v10335_v0 = vmul.bf16 1065369472, %v12578_v3 }
 0x9a0   : > { %12589 = vrcp.bf16 %v10285_v1 }
 0x9a1   : > { %v10374_v38 = vmul.bf16 %v10335_v0, %v16291_v45 }
 0x9a2   : > { %10718 = vmatmul.mubr.bf16.gmra.mxu1 %v10370_v61  ;;  %10815 = vmatmul.mubr.bf16.gmra.mxu0 %v10372_v40 }
 0x9a3   : > { %v12580_v17 = vpop.eup %12579  ;;  %10725 = vmatprep.mubr.bf16.mxu1 %v10375_v55 }
 0x9a4   : > { %v12582_v8 = vpop.eup %12581  ;;  %v10345_v62 = vmul.bf16 1065369472, %v12580_v17 }
 0x9a5   : > { %v10284_v35 = vadd.bf16 1065369472, %v12582_v8  ;;  %v12584_v2 = vpop.eup %12583 }
 0x9a6   : > { %v10379_v39 = vmul.bf16 %v10345_v62, %v16320_v15  ;;  %v12586_v19 = vpop.eup %12585  ;;  %v10343_v11 = vmul.bf16 1065369472, %v12584_v2 }
 0x9a7   : > { %12591 = vrcp.bf16 %v10284_v35  ;;  %v10341_v48 = vmul.bf16 1065369472, %v12586_v19 }
 0x9a8   : > { %v10378_v13 = vmul.bf16 %v10343_v11, %v16314_v54 }
 0x9a9   : > { %v10377_v33 = vmul.bf16 %v10341_v48, %v16303_v30  ;;  %v16367_v30 = vld [vmem:[%s726_s25] ss:$0 sm:$0xff] }
 0x9aa   : > { %10726 = vmatmul.mubr.bf16.gmra.mxu1 %v10374_v38 }
 0x9ab   : > { %10733 = vmatprep.mubr.bf16.mxu1 %v10379_v39 }
 0x9ad   : > { %v12588_v46 = vpop.eup %12587 }
 0x9ae   : > { %v12590_v36 = vpop.eup %12589  ;;  %v10339_v51 = vmul.bf16 1065369472, %v12588_v46 }
 0x9af   : > { %v10349_v15 = vmul.bf16 1065369472, %v12590_v36 }
 0x9b0   : > { %v10376_v45 = vmul.bf16 %v10339_v51, %v16329_v29 }
 0x9b1   : > { %v10381_v52 = vmul.bf16 %v10349_v15, %v16333_v32 }
 0x9b2   : > { %10734 = vmatmul.mubr.bf16.gmra.mxu1 %v10378_v13 }
 0x9b3   : > { %10822 = vmatprep.mubr.bf16.mxu1 %v10377_v33 }
 0x9b5   : > { %v12592_v60 = vpop.eup %12591 }
 0x9b6   : > { %v10347_v44 = vmul.bf16 1065369472, %v12592_v60 }
 0x9b8   : > { %v10380_v14 = vmul.bf16 %v10347_v44, %v16342_v42 }
 0x9ba   : > { %10823 = vmatmul.mubr.bf16.vlgmr.msra.gmra.mxu1 %v10376_v45 }
 0x9bb   : > { %10830 = vmatprep.mubr.bf16.mxu1 %v10381_v52 }
 0x9c2   : > { %10831 = vmatmul.mubr.bf16.gmra.mxu1 %v10380_v14 }
 0xa07   : > { %v11771_v54 = vpop.f32.mrf.mxu1 }
 0xa08   : > { %v11835_v34 = vpop.f32.mrf.mxu0 }
 0xa09   : > { %v11772_v63 = vpop.f32.mrf.mxu1 }
 0xa0a   : > { %v11773_v37 = vadd.f32 %v11772_v63, %v11771_v54  ;;  %v11836_v29 = vpop.f32.mrf.mxu0 }
 0xa0b   : > { %v11774_v53 = vpop.f32.mrf.mxu1  ;;  %v11837_v31 = vadd.f32 %v11836_v29, %v11835_v34 }
 0xa0c   : > { %v10680_v32 = vadd.f32 %v11773_v37, %v16367_v30  ;;  %v11838_v9 = vpop.f32.mrf.mxu0 }
 0xa0d   : > { %v11775_v56 = vpop.f32.mrf.mxu1 }
 0xa0e   : > { %v10777_v49 = vadd.f32 %v11837_v31, %v10680_v32  ;;  %v11776_v42 = vadd.f32 %v11775_v56, %v11774_v53  ;;  %v11839_v22 = vpop.f32.mrf.mxu0 }
 0xa0f   : > { %v11840_v26 = vadd.f32 %v11839_v22, %v11838_v9 }
 0xa10   : > { %v16371_v25 = vadd.f32 %v10777_v49, %v15812_v43  ;;  %v10683_v18 = vadd.f32 %v11776_v42, %v16367_v30 }
 0xa11   : > { %v11777_v16 = vpop.f32.mrf.mxu1 }
 0xa12   : > { %v11841_v21 = vpop.f32.mrf.mxu0  ;;  %10855 = vst [vmem:[#allocation2 + $0x30] sm:$0xff] %v16371_v25  ;;  %v10780_v23 = vadd.f32 %v11840_v26, %v10683_v18 }
 0xa13   : > { %v11778_v41 = vpop.f32.mrf.mxu1 }
 0xa14   : > { %v11779_v12 = vadd.f32 %v11778_v41, %v11777_v16  ;;  %v11842_v58 = vpop.f32.mrf.mxu0  ;;  %v16376_v40 = vadd.f32 %v10780_v23, %v15817_v10 }
 0xa15   : > { %v11780_v55 = vpop.f32.mrf.mxu1  ;;  %v11843_v61 = vadd.f32 %v11842_v58, %v11841_v21 }
 0xa16   : > { %v10688_v1 = vadd.f32 %v11779_v12, %v16367_v30  ;;  %v11844_v3 = vpop.f32.mrf.mxu0  ;;  %10856 = vst [vmem:[#allocation2] sm:$0xff] %v16376_v40 }
 0xa17   : > { %v11781_v43 = vpop.f32.mrf.mxu1 }
 0xa18   : > { %v10785_v17 = vadd.f32 %v11843_v61, %v10688_v1  ;;  %v11782_v8 = vadd.f32 %v11781_v43, %v11780_v55  ;;  %v11845_v0 = vpop.f32.mrf.mxu0 }
 0xa19   : > { %v11846_v39 = vadd.f32 %v11845_v0, %v11844_v3 }
 0xa1a   : > { %v16381_v62 = vadd.f32 %v10785_v17, %v15822_v28  ;;  %v10691_v35 = vadd.f32 %v11782_v8, %v16367_v30 }
 0xa1c   : > { %10857 = vst [vmem:[#allocation2 + $0x58] sm:$0xff] %v16381_v62  ;;  %v10788_v10 = vadd.f32 %v11846_v39, %v10691_v35 }
 0xa1e   : > { %v16386_v38 = vadd.f32 %v10788_v10, %v15828_v4 }
 0xa20   : > { %10858 = vst [vmem:[#allocation2 + $0x18] sm:$0xff] %v16386_v38 }
 0xa3a   : > { %v11783_v2 = vpop.f32.mrf.mxu1 }
 0xa3c   : > { %v11784_v19 = vpop.f32.mrf.mxu1 }
 0xa3d   : > { %v11785_v48 = vadd.f32 %v11784_v19, %v11783_v2 }
 0xa3e   : > { %v11786_v11 = vpop.f32.mrf.mxu1 }
 0xa3f   : > { %v10696_v28 = vadd.f32 %v11785_v48, %v16367_v30 }
 0xa40   : > { %v11787_v13 = vpop.f32.mrf.mxu1  ;;  %v11847_v46 = vpop.f32.mrf.mxu0 }
 0xa41   : > { %v11788_v33 = vadd.f32 %v11787_v13, %v11786_v11 }
 0xa42   : > { %v11848_v36 = vpop.f32.mrf.mxu0 }
 0xa43   : > { %v11849_v51 = vadd.f32 %v11848_v36, %v11847_v46  ;;  %v10699_v60 = vadd.f32 %v11788_v33, %v16367_v30 }
 0xa44   : > { %v11850_v15 = vpop.f32.mrf.mxu0 }
 0xa45   : > { %v10793_v45 = vadd.f32 %v11849_v51, %v10696_v28 }
 0xa46   : > { %v11851_v52 = vpop.f32.mrf.mxu0 }
 0xa47   : > { %v16392_v4 = vadd.f32 %v10793_v45, %v15864_v5  ;;  %v11852_v44 = vadd.f32 %v11851_v52, %v11850_v15 }
 0xa48   : > { %v11853_v54 = vpop.f32.mrf.mxu0 }
 0xa49   : > { %10859 = vst [vmem:[#allocation2 + $0x50] sm:$0xff] %v16392_v4  ;;  %v10796_v14 = vadd.f32 %v11852_v44, %v10699_v60 }
 0xa4a   : > { %v11854_v63 = vpop.f32.mrf.mxu0 }
 0xa4b   : > { %v16396_v34 = vadd.f32 %v10796_v14, %v15869_v7  ;;  %v11855_v5 = vadd.f32 %v11854_v63, %v11853_v54 }
 0xa4c   : > { %v11856_v29 = vpop.f32.mrf.mxu0 }
 0xa4d   : > { %10860 = vst [vmem:[#allocation2 + $0x68] sm:$0xff] %v16396_v34 }
 0xa4e   : > { %v11857_v56 = vpop.f32.mrf.mxu0 }
 0xa4f   : > { %v11858_v18 = vadd.f32 %v11857_v56, %v11856_v29 }
 0xa51   : > { %v11789_v37 = vpop.f32.mrf.mxu1 }
 0xa53   : > { %v11790_v53 = vpop.f32.mrf.mxu1 }
 0xa54   : > { %v11791_v32 = vadd.f32 %v11790_v53, %v11789_v37 }
 0xa55   : > { %v11792_v31 = vpop.f32.mrf.mxu1 }
 0xa56   : > { %v10704_v9 = vadd.f32 %v11791_v32, %v16367_v30 }
 0xa57   : > { %v11793_v49 = vpop.f32.mrf.mxu1 }
 0xa58   : > { %v10801_v42 = vadd.f32 %v11855_v5, %v10704_v9  ;;  %v11794_v22 = vadd.f32 %v11793_v49, %v11792_v31 }
 0xa5a   : > { %v16401_v16 = vadd.f32 %v10801_v42, %v15874_v6  ;;  %v10707_v7 = vadd.f32 %v11794_v22, %v16367_v30  ;;  %v11795_v26 = vpop.f32.mrf.mxu1  ;;  %v11859_v21 = vpop.f32.mrf.mxu0 }
 0xa5c   : > { %10861 = vst [vmem:[#allocation2 + $0x8] sm:$0xff] %v16401_v16  ;;  %v10804_v41 = vadd.f32 %v11858_v18, %v10707_v7  ;;  %v11796_v23 = vpop.f32.mrf.mxu1  ;;  %v11860_v12 = vpop.f32.mrf.mxu0 }
 0xa5d   : > { %v11797_v58 = vadd.f32 %v11796_v23, %v11795_v26  ;;  %v11861_v6 = vadd.f32 %v11860_v12, %v11859_v21 }
 0xa5e   : > { %v16406_v55 = vadd.f32 %v10804_v41, %v15880_v59  ;;  %v11798_v1 = vpop.f32.mrf.mxu1  ;;  %v11862_v61 = vpop.f32.mrf.mxu0 }
 0xa5f   : > { %v10712_v3 = vadd.f32 %v11797_v58, %v16367_v30 }
 0xa60   : > { %10862 = vst [vmem:[#allocation2 + $0x48] sm:$0xff] %v16406_v55  ;;  %v11799_v43 = vpop.f32.mrf.mxu1  ;;  %v11863_v17 = vpop.f32.mrf.mxu0 }
 0xa61   : > { %v10809_v8 = vadd.f32 %v11861_v6, %v10712_v3  ;;  %v11800_v0 = vadd.f32 %v11799_v43, %v11798_v1  ;;  %v11864_v59 = vadd.f32 %v11863_v17, %v11862_v61 }
 0xa62   : > { %v11801_v35 = vpop.f32.mrf.mxu1  ;;  %v11865_v39 = vpop.f32.mrf.mxu0 }
 0xa63   : > { %v16411_v10 = vadd.f32 %v10809_v8, %v15892_v47  ;;  %v10715_v2 = vadd.f32 %v11800_v0, %v16367_v30 }
 0xa64   : > { %v11802_v19 = vpop.f32.mrf.mxu1  ;;  %v11866_v11 = vpop.f32.mrf.mxu0 }
 0xa65   : > { %10863 = vst [vmem:[#allocation2 + $0x40] sm:$0xff] %v16411_v10  ;;  %v10812_v48 = vadd.f32 %v11864_v59, %v10715_v2  ;;  %v11803_v13 = vadd.f32 %v11802_v19, %v11801_v35  ;;  %v11867_v51 = vadd.f32 %v11866_v11, %v11865_v39  ;;  %v17185_v39 = vld [vmem:[#allocation18_spill] sm:$0xff]  ;;  %v17186_v11 = vld [vmem:[#allocation25_spill] sm:$0xff] }
 0xa66   : > { %v11804_v46 = vpop.f32.mrf.mxu1  ;;  %v11868_v28 = vpop.f32.mrf.mxu0 }
 0xa67   : > { %v16416_v33 = vadd.f32 %v10812_v48, %v15897_v57  ;;  %v10720_v36 = vadd.f32 %v11803_v13, %v16367_v30 }
 0xa68   : > { %v11805_v15 = vpop.f32.mrf.mxu1  ;;  %v11869_v47 = vpop.f32.mrf.mxu0 }
 0xa69   : > { %10864 = vst [vmem:[#allocation2 + $0x20] sm:$0xff] %v16416_v33  ;;  %v10817_v45 = vadd.f32 %v11867_v51, %v10720_v36  ;;  %v11806_v60 = vadd.f32 %v11805_v15, %v11804_v46  ;;  %v11870_v54 = vadd.f32 %v11869_v47, %v11868_v28 }
 0xa6a   : > { %v11807_v52 = vpop.f32.mrf.mxu1 }
 0xa6b   : > { %v16421_v44 = vadd.f32 %v10817_v45, %v15902_v24  ;;  %v10723_v14 = vadd.f32 %v11806_v60, %v16367_v30 }
 0xa6c   : > { %v11808_v63 = vpop.f32.mrf.mxu1 }
 0xa6d   : > { %10865 = vst [vmem:[#allocation2 + $0x10] sm:$0xff] %v16421_v44  ;;  %v10820_v57 = vadd.f32 %v11870_v54, %v10723_v14  ;;  %v11809_v24 = vadd.f32 %v11808_v63, %v11807_v52 }
 0xa6e   : > { %v11810_v37 = vpop.f32.mrf.mxu1 }
 0xa6f   : > { %v16426_v29 = vadd.f32 %v10820_v57, %v15909_v50  ;;  %v10728_v42 = vadd.f32 %v11809_v24, %v16367_v30 }
 0xa70   : > { %v11811_v53 = vpop.f32.mrf.mxu1 }
 0xa71   : > { %10866 = vst [vmem:[#allocation2 + $0x38] sm:$0xff] %v16426_v29  ;;  %v11812_v22 = vadd.f32 %v11811_v53, %v11810_v37 }
 0xa72   : > { %v11813_v32 = vpop.f32.mrf.mxu1 }
 0xa73   : > { %v10731_v50 = vadd.f32 %v11812_v22, %v16367_v30 }
 0xa74   : > { %v11814_v31 = vpop.f32.mrf.mxu1 }
 0xa75   : > { %v11815_v41 = vadd.f32 %v11814_v31, %v11813_v32 }
 0xa76   : > { %v11816_v9 = vpop.f32.mrf.mxu1 }
 0xa77   : > { %v10736_v3 = vadd.f32 %v11815_v41, %v16367_v30 }
 0xa78   : > { %v11817_v5 = vpop.f32.mrf.mxu1 }
 0xa79   : > { %v11818_v6 = vadd.f32 %v11817_v5, %v11816_v9 }
 0xa7a   : > { %v11871_v56 = vpop.f32.mrf.mxu1 }
 0xa7c   : > { %v11872_v49 = vpop.f32.mrf.mxu1 }
 0xa7d   : > { %v11873_v7 = vadd.f32 %v11872_v49, %v11871_v56 }
 0xa7e   : > { %v11874_v18 = vpop.f32.mrf.mxu1 }
 0xa7f   : > { %v10825_v26 = vadd.f32 %v11873_v7, %v10728_v42 }
 0xa80   : > { %v11875_v21 = vpop.f32.mrf.mxu1 }
 0xa81   : > { %v16432_v23 = vadd.f32 %v10825_v26, %v15913_v20  ;;  %v11876_v12 = vadd.f32 %v11875_v21, %v11874_v18  ;;  %v10739_v20 = vadd.f32 %v11818_v6, %v16367_v30 }
 0xa82   : > { %v11877_v58 = vpop.f32.mrf.mxu1 }
 0xa83   : > { %10867 = vst [vmem:[#allocation2 + $0x60] sm:$0xff] %v16432_v23  ;;  %v10828_v1 = vadd.f32 %v11876_v12, %v10731_v50 }
 0xa84   : > { %v11878_v61 = vpop.f32.mrf.mxu1 }
 0xa85   : > { %v16437_v43 = vadd.f32 %v10828_v1, %v15919_v27  ;;  %v11879_v17 = vadd.f32 %v11878_v61, %v11877_v58 }
 0xa86   : > { %v11880_v8 = vpop.f32.mrf.mxu1 }
 0xa87   : > { %10868 = vst [vmem:[#allocation2 + $0x70] sm:$0xff] %v16437_v43  ;;  %v10833_v0 = vadd.f32 %v11879_v17, %v10736_v3 }
 0xa88   : > { %v11881_v35 = vpop.f32.mrf.mxu1 }
 0xa89   : > { %v16442_v2 = vadd.f32 %v10833_v0, %v17185_v39  ;;  %v11882_v59 = vadd.f32 %v11881_v35, %v11880_v8 }
 0xa8b   : > { %10869 = vst [vmem:[#allocation2 + $0x78] sm:$0xff] %v16442_v2  ;;  %v10836_v19 = vadd.f32 %v11882_v59, %v10739_v20  ;;  %10874 = sbr.rel (%p11649_p8) target bundleno = 2932 (0xb74), region = 92 }
 0xa8d   : > { %v16446_v48 = vadd.f32 %v10836_v19, %v17186_v11 }
 0xa8f   : > { %10870 = vst [vmem:[#allocation2 + $0x28] sm:$0xff] %v16446_v48 }
 0xa90   : > { %10881 = vadd.xlane.f32.xlu1 %v16381_v62  ;;  %10877 = vadd.xlane.f32.xlu0 %v16371_v25  ;;  %v10926_v27 = vmul.f32 %v16376_v40, %v16376_v40  ;;  %v10925_v30 = vmul.f32 %v16371_v25, %v16371_v25  ;;  %v10928_v13 = vmul.f32 %v16386_v38, %v16386_v38 }
 0xa91   : > { %v10927_v46 = vmul.f32 %v16381_v62, %v16381_v62  ;;  %v10930_v28 = vmul.f32 %v16396_v34, %v16396_v34  ;;  %v10929_v36 = vmul.f32 %v16392_v4, %v16392_v4  ;;  %v10932_v51 = vmul.f32 %v16406_v55, %v16406_v55 }
 0xa92   : > { %v10931_v15 = vmul.f32 %v16401_v16, %v16401_v16  ;;  %v10934_v47 = vmul.f32 %v16416_v33, %v16416_v33  ;;  %v10933_v45 = vmul.f32 %v16411_v10, %v16411_v10  ;;  %v10936_v60 = vmul.f32 %v16426_v29, %v16426_v29 }
 0xa93   : > { %v10935_v52 = vmul.f32 %v16421_v44, %v16421_v44  ;;  %v10938_v14 = vmul.f32 %v16437_v43, %v16437_v43  ;;  %v10937_v54 = vmul.f32 %v16432_v23, %v16432_v23  ;;  %v10940_v63 = vmul.f32 %v16446_v48, %v16446_v48 }
 0xa94   : > { %10883 = vadd.xlane.f32.xlu1 %v16386_v38  ;;  %10879 = vadd.xlane.f32.xlu0 %v16376_v40  ;;  %v10939_v57 = vmul.f32 %v16442_v2, %v16442_v2 }
 0xa98   : > { %10887 = vadd.xlane.f32.xlu1 %v16396_v34  ;;  %10885 = vadd.xlane.f32.xlu0 %v16392_v4 }
 0xa9c   : > { %10891 = vadd.xlane.f32.xlu1 %v16406_v55  ;;  %10889 = vadd.xlane.f32.xlu0 %v16401_v16 }
 0xaa0   : > { %10895 = vadd.xlane.f32.xlu1 %v16416_v33  ;;  %10893 = vadd.xlane.f32.xlu0 %v16411_v10 }
 0xaa4   : > { %10899 = vadd.xlane.f32.xlu1 %v16426_v29  ;;  %10897 = vadd.xlane.f32.xlu0 %v16421_v44 }
 0xaa8   : > { %10903 = vadd.xlane.f32.xlu1 %v16437_v43  ;;  %10901 = vadd.xlane.f32.xlu0 %v16432_v23 }
 0xaac   : > { %10907 = vadd.xlane.f32.xlu1 %v16446_v48  ;;  %10905 = vadd.xlane.f32.xlu0 %v16442_v2 }
 0xab0   : > { %10943 = vadd.xlane.f32.xlu1 %v10926_v27  ;;  %10941 = vadd.xlane.f32.xlu0 %v10925_v30 }
 0xab4   : > { %10947 = vadd.xlane.f32.xlu1 %v10928_v13  ;;  %10945 = vadd.xlane.f32.xlu0 %v10927_v46 }
 0xab8   : > { %10951 = vadd.xlane.f32.xlu1 %v10930_v28  ;;  %10949 = vadd.xlane.f32.xlu0 %v10929_v36 }
 0xabc   : > { %10955 = vadd.xlane.f32.xlu1 %v10932_v51  ;;  %10953 = vadd.xlane.f32.xlu0 %v10931_v15 }
 0xac0   : > { %10959 = vadd.xlane.f32.xlu1 %v10934_v47  ;;  %10957 = vadd.xlane.f32.xlu0 %v10933_v45 }
 0xac4   : > { %10963 = vadd.xlane.f32.xlu1 %v10936_v60  ;;  %10961 = vadd.xlane.f32.xlu0 %v10935_v52 }
 0xac8   : > { %10967 = vadd.xlane.f32.xlu1 %v10938_v14  ;;  %10965 = vadd.xlane.f32.xlu0 %v10937_v54 }
 0xacc   : > { %10971 = vadd.xlane.f32.xlu1 %v10940_v63  ;;  %10969 = vadd.xlane.f32.xlu0 %v10939_v57 }
 0xb19   : > { %v10882_v37 = vpop.xlane.xlu1 %10881  ;;  %v10878_v53 = vpop.xlane.xlu0 %10877 }
 0xb1a   : > { %v16510_v41 = vmul.f32 0.0078125, %v10878_v53  ;;  %v16514_v58 = vmul.f32 0.0078125, %v10882_v37 }
 0xb1c   : > { %v10989_v6 = vmul.f32 %v16510_v41, %v16510_v41  ;;  %v10991_v39 = vmul.f32 %v16514_v58, %v16514_v58  ;;  %v11039_v36 = vsub.f32 %v16381_v62, %v16514_v58  ;;  %v11037_v14 = vsub.f32 %v16371_v25, %v16510_v41 }
 0xb1d   : > { %v10884_v32 = vpop.xlane.xlu1 %10883  ;;  %v10880_v31 = vpop.xlane.xlu0 %10879 }
 0xb1e   : > { %v16512_v12 = vmul.f32 0.0078125, %v10880_v31  ;;  %v16516_v1 = vmul.f32 0.0078125, %v10884_v32 }
 0xb20   : > { %v10990_v17 = vmul.f32 %v16512_v12, %v16512_v12  ;;  %v10992_v59 = vmul.f32 %v16516_v1, %v16516_v1  ;;  %v11040_v54 = vsub.f32 %v16386_v38, %v16516_v1 }
 0xb21   : > { %v10888_v9 = vpop.xlane.xlu1 %10887  ;;  %v10886_v5 = vpop.xlane.xlu0 %10885 }
 0xb22   : > { %v16526_v19 = vmul.f32 0.0078125, %v10888_v9  ;;  %v16530_v51 = vmul.f32 0.0078125, %v10886_v5  ;;  %v11038_v5 = vsub.f32 %v16376_v40, %v16512_v12 }
 0xb24   : > { %v10994_v63 = vmul.f32 %v16526_v19, %v16526_v19 }
 0xb25   : > { %v10892_v24 = vpop.xlane.xlu1 %10891  ;;  %v10890_v56 = vpop.xlane.xlu0 %10889 }
 0xb26   : > { %v16532_v15 = vmul.f32 0.0078125, %v10892_v24  ;;  %v16540_v57 = vmul.f32 0.0078125, %v10890_v56  ;;  %v10993_v24 = vmul.f32 %v16530_v51, %v16530_v51 }
 0xb29   : > { %v10896_v49 = vpop.xlane.xlu1 %10895  ;;  %v10894_v42 = vpop.xlane.xlu0 %10893 }
 0xb2d   : > { %v16498_v22 = vpop.xlane.xlu1 %10899  ;;  %v16500_v7 = vpop.xlane.xlu0 %10897 }
 0xb31   : > { %v16502_v18 = vpop.xlane.xlu1 %10903  ;;  %v16504_v26 = vpop.xlane.xlu0 %10901 }
 0xb35   : > { %v16506_v21 = vpop.xlane.xlu1 %10907  ;;  %v16508_v50 = vpop.xlane.xlu0 %10905 }
 0xb39   : > { %v10944_v61 = vpop.xlane.xlu1 %10943  ;;  %v10942_v3 = vpop.xlane.xlu0 %10941 }
 0xb3a   : > { %v10974_v8 = vmul.f32 0.0078125, %v10944_v61  ;;  %v10973_v0 = vmul.f32 0.0078125, %v10942_v3  ;;  %v10996_v3 = vmul.f32 %v16532_v15, %v16532_v15 }
 0xb3c   : > { %v11006_v35 = vsub.f32 %v10974_v8, %v10990_v17  ;;  %v11005_v20 = vsub.f32 %v10973_v0, %v10989_v6  ;;  %v10995_v8 = vmul.f32 %v16540_v57, %v16540_v57  ;;  %v16550_v0 = vmul.f32 0.0078125, %v10896_v49 }
 0xb3d   : > { %v10948_v11 = vpop.xlane.xlu1 %10947  ;;  %v10946_v27 = vpop.xlane.xlu0 %10945  ;;  %v16559_v49 = vmul.f32 0.0078125, %v16498_v22 }
 0xb3e   : > { %v11022_v30 = vmax.f32 %v11006_v35, 0.0  ;;  %v11021_v13 = vmax.f32 %v11005_v20, 0.0  ;;  %v10976_v46 = vmul.f32 0.0078125, %v10948_v11  ;;  %v10975_v28 = vmul.f32 0.0078125, %v10946_v27 }
 0xb3f   : > { %v16552_v35 = vmul.f32 0.0078125, %v10894_v42  ;;  %v11042_v27 = vsub.f32 %v16396_v34, %v16526_v19 }
 0xb40   : > { %v11054_v47 = vadd.f32 1e-05, %v11022_v30  ;;  %v11053_v45 = vadd.f32 1e-05, %v11021_v13  ;;  %v11008_v60 = vsub.f32 %v10976_v46, %v10992_v59  ;;  %v11007_v52 = vsub.f32 %v10975_v28, %v10991_v39 }
 0xb41   : > { %v10952_v37 = vpop.xlane.xlu1 %10951  ;;  %v10950_v53 = vpop.xlane.xlu0 %10949  ;;  %v11041_v30 = vsub.f32 %v16392_v4, %v16530_v51 }
 0xb42   : > { %12609 = vrsqrt.f32 %v11054_v47  ;;  %v11024_v32 = vmax.f32 %v11008_v60, 0.0  ;;  %v11023_v31 = vmax.f32 %v11007_v52, 0.0  ;;  %v10978_v9 = vmul.f32 0.0078125, %v10952_v37 }
 0xb43   : > { %12611 = vrsqrt.f32 %v11053_v45  ;;  %v10977_v61 = vmul.f32 0.0078125, %v10950_v53  ;;  %v10998_v47 = vmul.f32 %v16550_v0, %v16550_v0  ;;  %v10997_v45 = vmul.f32 %v16552_v35, %v16552_v35 }
 0xb44   : > { %v11056_v6 = vadd.f32 1e-05, %v11024_v32  ;;  %v11055_v56 = vadd.f32 1e-05, %v11023_v31  ;;  %v11010_v17 = vsub.f32 %v10978_v9, %v10994_v63  ;;  %v16566_v60 = vmul.f32 0.0078125, %v16500_v7 }
 0xb45   : > { %v11009_v20 = vsub.f32 %v10977_v61, %v10993_v24  ;;  %v10956_v40 = vpop.xlane.xlu1 %10955  ;;  %v10954_v12 = vpop.xlane.xlu0 %10953  ;;  %v16569_v31 = vmul.f32 0.0078125, %v16502_v18  ;;  %v16572_v9 = vmul.f32 0.0078125, %v16504_v26  ;;  %v11000_v61 = vmul.f32 %v16559_v49, %v16559_v49 }
 0xb46   : > { %12613 = vrsqrt.f32 %v11056_v6  ;;  %v11026_v39 = vmax.f32 %v11010_v17, 0.0  ;;  %v10980_v59 = vmul.f32 0.0078125, %v10956_v40  ;;  %v10979_v11 = vmul.f32 0.0078125, %v10954_v12 }
 0xb47   : > { %12615 = vrsqrt.f32 %v11055_v56  ;;  %v11025_v13 = vmax.f32 %v11009_v20, 0.0  ;;  %v10999_v56 = vmul.f32 %v16566_v60, %v16566_v60  ;;  %v16579_v17 = vmul.f32 0.0078125, %v16506_v21  ;;  %v16591_v21 = vld [vmem:[%s17188_s15] ss:$0 sm:$0xff] }
 0xb48   : > { %v11058_v42 = vadd.f32 1e-05, %v11026_v39  ;;  %v11012_v46 = vsub.f32 %v10980_v59, %v10996_v3  ;;  %v11011_v28 = vsub.f32 %v10979_v11, %v10995_v8  ;;  %v16582_v18 = vmul.f32 0.0078125, %v16508_v50 }
 0xb49   : > { %v11057_v52 = vadd.f32 1e-05, %v11025_v13  ;;  %v10960_v63 = vpop.xlane.xlu1 %10959  ;;  %v10958_v37 = vpop.xlane.xlu0 %10957  ;;  %v11002_v11 = vmul.f32 %v16569_v31, %v16569_v31  ;;  %v11001_v13 = vmul.f32 %v16572_v9, %v16572_v9 }
 0xb4a   : > { %12617 = vrsqrt.f32 %v11058_v42  ;;  %v11028_v53 = vmax.f32 %v11012_v46, 0.0  ;;  %v11027_v32 = vmax.f32 %v11011_v28, 0.0  ;;  %v10982_v22 = vmul.f32 0.0078125, %v10960_v63 }
 0xb4b   : > { %12619 = vrsqrt.f32 %v11057_v52  ;;  %v10981_v24 = vmul.f32 0.0078125, %v10958_v37  ;;  %v11004_v52 = vmul.f32 %v16579_v17, %v16579_v17  ;;  %v11003_v63 = vmul.f32 %v16582_v18, %v16582_v18  ;;  %v16600_v37 = vld [vmem:[%s17189_s21] ss:$0 sm:$0xff] }
 0xb4c   : > { %v11060_v7 = vadd.f32 1e-05, %v11028_v53  ;;  %v11059_v3 = vadd.f32 1e-05, %v11027_v32  ;;  %v11014_v6 = vsub.f32 %v10982_v22, %v10998_v47 }
 0xb4d   : > { %v11013_v8 = vsub.f32 %v10981_v24, %v10997_v45  ;;  %v10964_v26 = vpop.xlane.xlu1 %10963  ;;  %v10962_v20 = vpop.xlane.xlu0 %10961 }
 0xb4e   : > { %12621 = vrsqrt.f32 %v11060_v7  ;;  %v11030_v40 = vmax.f32 %v11014_v6, 0.0  ;;  %v10984_v12 = vmul.f32 0.0078125, %v10964_v26  ;;  %v10983_v39 = vmul.f32 0.0078125, %v10962_v20 }
 0xb4f   : > { %v12610_v59 = vpop.eup %12609  ;;  %12623 = vrsqrt.f32 %v11059_v3  ;;  %v11029_v50 = vmax.f32 %v11013_v8, 0.0 }
 0xb50   : > { %v12612_v42 = vpop.eup %12611  ;;  %v11086_v46 = vmul.f32 %v12610_v59, %v11038_v5  ;;  %v11062_v28 = vadd.f32 1e-05, %v11030_v40  ;;  %v11016_v47 = vsub.f32 %v10984_v12, %v11000_v61  ;;  %v11015_v45 = vsub.f32 %v10983_v39, %v10999_v56 }
 0xb51   : > { %v11085_v53 = vmul.f32 %v12612_v42, %v11037_v14  ;;  %v11061_v32 = vadd.f32 1e-05, %v11029_v50  ;;  %v10968_v5 = vpop.xlane.xlu1 %10967  ;;  %v10966_v22 = vpop.xlane.xlu0 %10965 }
 0xb52   : > { %v11108_v24 = vmul.f32 %v16591_v21, %v11086_v46  ;;  %12625 = vrsqrt.f32 %v11062_v28  ;;  %v11032_v61 = vmax.f32 %v11016_v47, 0.0  ;;  %v11031_v7 = vmax.f32 %v11015_v45, 0.0 }
 0xb53   : > { %v12614_v3 = vpop.eup %12613  ;;  %v11107_v6 = vmul.f32 %v16591_v21, %v11085_v53  ;;  %12627 = vrsqrt.f32 %v11061_v32  ;;  %v10986_v56 = vmul.f32 0.0078125, %v10968_v5  ;;  %v10985_v8 = vmul.f32 0.0078125, %v10966_v22 }
 0xb54   : > { %v12616_v26 = vpop.eup %12615  ;;  %v11130_v20 = vadd.f32 %v16600_v37, %v11108_v24  ;;  %v11088_v25 = vmul.f32 %v12614_v3, %v11040_v54  ;;  %v11064_v41 = vadd.f32 1e-05, %v11032_v61  ;;  %v11063_v14 = vadd.f32 1e-05, %v11031_v7 }
 0xb55   : > { %v11129_v40 = vadd.f32 %v16600_v37, %v11107_v6  ;;  %v11087_v12 = vmul.f32 %v12616_v26, %v11039_v36  ;;  %v11018_v39 = vsub.f32 %v10986_v56, %v11002_v11  ;;  %v11017_v59 = vsub.f32 %v10985_v8, %v11001_v13  ;;  %v10972_v50 = vpop.xlane.xlu1 %10971  ;;  %v10970_v42 = vpop.xlane.xlu0 %10969 }
 0xb56   : > { %11146 = vst [vmem:[%s12873_s6 + $0x8] sm:$0xff] %v11130_v20  ;;  %v11110_v46 = vmul.f32 %v16591_v21, %v11088_v25  ;;  %12629 = vrsqrt.f32 %v11064_v41  ;;  %v10988_v28 = vmul.f32 0.0078125, %v10972_v50  ;;  %v10987_v38 = vmul.f32 0.0078125, %v10970_v42 }
 0xb57   : > { %v12618_v1 = vpop.eup %12617  ;;  %11145 = vst [vmem:[%s12873_s6] sm:$0xff] %v11129_v40  ;;  %v11109_v54 = vmul.f32 %v16591_v21, %v11087_v12  ;;  %12631 = vrsqrt.f32 %v11063_v14  ;;  %v11034_v47 = vmax.f32 %v11018_v39, 0.0  ;;  %v11033_v45 = vmax.f32 %v11017_v59, 0.0 }
 0xb58   : > { %v12620_v62 = vpop.eup %12619  ;;  %v11132_v58 = vadd.f32 %v16600_v37, %v11110_v46  ;;  %v11090_v36 = vmul.f32 %v12618_v1, %v11042_v27  ;;  %v11020_v11 = vsub.f32 %v10988_v28, %v11004_v52  ;;  %v11019_v13 = vsub.f32 %v10987_v38, %v11003_v63 }
 0xb59   : > { %v11131_v53 = vadd.f32 %v16600_v37, %v11109_v54  ;;  %v11089_v32 = vmul.f32 %v12620_v62, %v11041_v30  ;;  %v11066_v5 = vadd.f32 1e-05, %v11034_v47  ;;  %v11065_v22 = vadd.f32 1e-05, %v11033_v45 }
 0xb5a   : > { %v11044_v24 = vsub.f32 %v16406_v55, %v16532_v15  ;;  %11148 = vst [vmem:[%s12873_s6 + $0x18] sm:$0xff] %v11132_v58  ;;  %v11112_v61 = vmul.f32 %v16591_v21, %v11090_v36  ;;  %v11036_v7 = vmax.f32 %v11020_v11, 0.0  ;;  %v11035_v34 = vmax.f32 %v11019_v13, 0.0 }
 0xb5b   : > { %v12622_v19 = vpop.eup %12621  ;;  %v11043_v27 = vsub.f32 %v16401_v16, %v16540_v57  ;;  %11147 = vst [vmem:[%s12873_s6 + $0x10] sm:$0xff] %v11131_v53  ;;  %v11111_v52 = vmul.f32 %v16591_v21, %v11089_v32  ;;  %12633 = vrsqrt.f32 %v11066_v5  ;;  %v11046_v6 = vsub.f32 %v16416_v33, %v16550_v0 }
 0xb5c   : > { %v12624_v4 = vpop.eup %12623  ;;  %v11134_v51 = vadd.f32 %v16600_v37, %v11112_v61  ;;  %v11092_v30 = vmul.f32 %v12622_v19, %v11044_v24  ;;  %12635 = vrsqrt.f32 %v11065_v22  ;;  %v11068_v55 = vadd.f32 1e-05, %v11036_v7 }
 0xb5d   : > { %v11133_v15 = vadd.f32 %v16600_v37, %v11111_v52  ;;  %v11091_v63 = vmul.f32 %v12624_v4, %v11043_v27  ;;  %v11067_v3 = vadd.f32 1e-05, %v11035_v34  ;;  %v11045_v56 = vsub.f32 %v16411_v10, %v16552_v35 }
 0xb5e   : > { %11150 = vst [vmem:[%s12873_s6 + $0x28] sm:$0xff] %v11134_v51  ;;  %v11114_v16 = vmul.f32 %v16591_v21, %v11092_v30  ;;  %12637 = vrsqrt.f32 %v11068_v55  ;;  %v11048_v41 = vsub.f32 %v16426_v29, %v16559_v49  ;;  %v11047_v35 = vsub.f32 %v16421_v44, %v16566_v60 }
 0xb5f   : > { %v12626_v57 = vpop.eup %12625  ;;  %11149 = vst [vmem:[%s12873_s6 + $0x20] sm:$0xff] %v11133_v15  ;;  %v11113_v8 = vmul.f32 %v16591_v21, %v11091_v63  ;;  %12639 = vrsqrt.f32 %v11067_v3  ;;  %v11050_v49 = vsub.f32 %v16437_v43, %v16569_v31  ;;  %v11049_v46 = vsub.f32 %v16432_v23, %v16572_v9 }
 0xb60   : > { %v12628_v26 = vpop.eup %12627  ;;  %v11136_v20 = vadd.f32 %v16600_v37, %v11114_v16  ;;  %v11094_v25 = vmul.f32 %v12626_v57, %v11046_v6  ;;  %v11052_v47 = vsub.f32 %v16446_v48, %v16579_v17  ;;  %v11051_v45 = vsub.f32 %v16442_v2, %v16582_v18 }
 0xb61   : > { %v11135_v33 = vadd.f32 %v16600_v37, %v11113_v8  ;;  %v11093_v0 = vmul.f32 %v12628_v26, %v11045_v56 }
 0xb62   : > { %11152 = vst [vmem:[%s12873_s6 + $0x38] sm:$0xff] %v11136_v20  ;;  %v11116_v14 = vmul.f32 %v16591_v21, %v11094_v25 }
 0xb63   : > { %v12630_v10 = vpop.eup %12629  ;;  %11151 = vst [vmem:[%s12873_s6 + $0x30] sm:$0xff] %v11135_v33  ;;  %v11115_v40 = vmul.f32 %v16591_v21, %v11093_v0 }
 0xb64   : > { %v12632_v12 = vpop.eup %12631  ;;  %v11138_v39 = vadd.f32 %v16600_v37, %v11116_v14  ;;  %v11096_v59 = vmul.f32 %v12630_v10, %v11048_v41 }
 0xb65   : > { %v11137_v50 = vadd.f32 %v16600_v37, %v11115_v40  ;;  %v11095_v42 = vmul.f32 %v12632_v12, %v11047_v35 }
 0xb66   : > { %11154 = vst [vmem:[%s12873_s6 + $0x48] sm:$0xff] %v11138_v39  ;;  %v11118_v29 = vmul.f32 %v16591_v21, %v11096_v59 }
 0xb67   : > { %11153 = vst [vmem:[%s12873_s6 + $0x40] sm:$0xff] %v11137_v50  ;;  %v11117_v44 = vmul.f32 %v16591_v21, %v11095_v42 }
 0xb68   : > { %v12634_v60 = vpop.eup %12633  ;;  %v11140_v28 = vadd.f32 %v16600_v37, %v11118_v29 }
 0xb69   : > { %v12636_v38 = vpop.eup %12635  ;;  %v11139_v1 = vadd.f32 %v16600_v37, %v11117_v44  ;;  %v11098_v54 = vmul.f32 %v12634_v60, %v11050_v49 }
 0xb6a   : > { %11156 = vst [vmem:[%s12873_s6 + $0x58] sm:$0xff] %v11140_v28  ;;  %v11097_v43 = vmul.f32 %v12636_v38, %v11049_v46 }
 0xb6b   : > { %v12638_v31 = vpop.eup %12637  ;;  %11155 = vst [vmem:[%s12873_s6 + $0x50] sm:$0xff] %v11139_v1  ;;  %v11120_v23 = vmul.f32 %v16591_v21, %v11098_v54 }
 0xb6c   : > { %v12640_v9 = vpop.eup %12639  ;;  %v11119_v62 = vmul.f32 %v16591_v21, %v11097_v43  ;;  %v11100_v58 = vmul.f32 %v12638_v31, %v11052_v47 }
 0xb6d   : > { %v11142_v36 = vadd.f32 %v16600_v37, %v11120_v23  ;;  %v11099_v11 = vmul.f32 %v12640_v9, %v11051_v45 }
 0xb6e   : > { %v11141_v48 = vadd.f32 %v16600_v37, %v11119_v62  ;;  %v11122_v17 = vmul.f32 %v16591_v21, %v11100_v58 }
 0xb6f   : > { %11158 = vst [vmem:[%s12873_s6 + $0x68] sm:$0xff] %v11142_v36  ;;  %v11121_v13 = vmul.f32 %v16591_v21, %v11099_v11 }
 0xb70   : > { %11157 = vst [vmem:[%s12873_s6 + $0x60] sm:$0xff] %v11141_v48  ;;  %v11144_v2 = vadd.f32 %v16600_v37, %v11122_v17 }
 0xb71   : > { %v11143_v18 = vadd.f32 %v16600_v37, %v11121_v13 }
 0xb72   : > { %11160 = vst [vmem:[%s12873_s6 + $0x78] sm:$0xff] %v11144_v2 }
 0xb73   : > { %11159 = vst [vmem:[%s12873_s6 + $0x70] sm:$0xff] %v11143_v18 }
 0xb74 PF: > { %s17190_s0 = sld [smem:[#allocation6_spill]] }
 0xb75   : > { %s17191_s21 = sld [smem:[#allocation4_spill]] }
 0xb76   : > { %s17192_s22 = sld [smem:[#allocation5_spill]] }
 0xb77   : > { %s17193_s23 = sld [smem:[#allocation7_spill]] }
 0xb78   : > { %s17194_s24 = sld [smem:[#allocation8_spill]] }
 0xb7a   : > { %s26_s25 = sadd.s32 1, %s17190_s0  }
 0xb7b   : > { %p23_p9 = scmp.ge.s32.totalorder %s26_s25, 6  }
 0xb7d   :  { %25 = sbr.rel (!%p23_p9) target bundleno = 9 (0x9), region = 158 }

</bundles_post_ra>
